<compile_context>
chip_gen: v7x
topology: tpu7x:2x2x1
jax: 0.10.0
libtpu: 0.0.40
codegen_flags: <defaults>
</compile_context>

<pallas_src>
import math

import numpy as np

import jax
import jax.numpy as jnp
from jax import lax
from jax.experimental import pallas as pl
from jax.experimental.pallas import tpu as pltpu

# Full-precision matmuls so the Pallas kernel and the pure-JAX reference agree.
jax.config.update("jax_default_matmul_precision", "highest")

# ----------------------------------------------------------------------------
# Model hyperparameters (small, consistent with a d_model/nhead decoder layer)
# ----------------------------------------------------------------------------
B, L, S, E, H, FF = 2, 8, 16, 32, 4, 64
HD = E // H
NUM_LAYERS = 2
EPS = 1e-5
NEG = -1e9
SCALE = 1.0 / math.sqrt(HD)

T = L * B        # 16 target tokens, l-major: row i <-> (l=i//B, b=i%B)
TM = S * B       # 32 memory tokens, s-major: row j <-> (s=j//B, b=j%B)
KW = H * TM      # 128 lane width of the packed small-vector / constant slabs
VROWS = 16       # per-layer rows in the vec slab (13 used + 3 pad, 8-aligned)


# ----------------------------------------------------------------------------
# Compile-time (numpy) constants: head-block masks and batch-block biases
# ----------------------------------------------------------------------------
def _np_head_mask(tk):
    """(H*tk, E) block-diagonal head selector: 1 iff row//tk == col//HD."""
    r = np.arange(H * tk)[:, None] // tk
    c = np.arange(E)[None, :] // HD
    return (r == c).astype(np.float32)


def _np_batch_bias(tk):
    """(T, H*tk) additive bias: 0 where query batch == key batch, else -1e9."""
    r = np.arange(T)[:, None] % B
    c = np.arange(H * tk)[None, :] % B
    return np.where(r == c, 0.0, NEG).astype(np.float32)


HM_S = _np_head_mask(T)                   # (H*T,  E)
HM_X = _np_head_mask(TM)                  # (H*TM, E)
HMT_S = np.ascontiguousarray(HM_S.T)      # (E, H*T)   pre-transposed
HMT_X = np.ascontiguousarray(HM_X.T)      # (E, H*TM)  pre-transposed
BIAS_SELF = _np_batch_bias(T)             # (T, H*T)
BATCH_BIAS_X = _np_batch_bias(TM)         # (T, H*TM)  batch part of cross bias

# Row offsets of each constant inside the single packed constant slab.
C_HMT_X, C_HMT_S, C_BIAS_S, C_HM_X, C_HM_S, CROWS = 0, 32, 64, 80, 208, 272


def _build_const_slab():
    slab = np.zeros((CROWS, KW), np.float32)
    slab[C_HMT_X:C_HMT_X + E, :] = HMT_X
    slab[C_HMT_S:C_HMT_S + E, :H * T] = HMT_S
    slab[C_BIAS_S:C_BIAS_S + T, :H * T] = BIAS_SELF
    slab[C_HM_X:C_HM_X + H * TM, :E] = HM_X
    slab[C_HM_S:C_HM_S + H * T, :E] = HM_S
    return slab


CONST_SLAB = _build_const_slab()          # (272, 128) f32, ~136 KB


# ----------------------------------------------------------------------------
# Shared math
# ----------------------------------------------------------------------------
def _layernorm(x, g, b):
    mu = jnp.mean(x, axis=-1, keepdims=True)
    var = jnp.mean(jnp.square(x - mu), axis=-1, keepdims=True)
    return (x - mu) * lax.rsqrt(var + EPS) * g + b


def _attend(q, k, v, wo, bo, hmask, hmaskT, bias):
    """Multi-head attention for ALL batches & heads with 3 wide MXU matmuls.

    q: (T, E), k/v: (Tk, E).  Score column m <-> (head = m//Tk, token = m%Tk).
    The block-diagonal key matrix is built PRE-TRANSPOSED (E, H*Tk) so the
    score matmul runs in native (M,K)x(K,N) orientation (only a small (Tk,E)
    transpose, not an implicit transpose of the H-times-tiled matrix).
    `bias` carries the batch-block mask and (for cross-attn) key validity.
    """
    kbT = jnp.tile(k.T, (1, H)) * hmaskT        # (E, H*Tk) block-diag keys^T
    vb = jnp.tile(v, (H, 1)) * hmask            # (H*Tk, E) block-diag values
    s = jnp.dot(q, kbT, preferred_element_type=jnp.float32) * SCALE + bias
    s = s - jnp.max(s, axis=-1, keepdims=True)  # row max >= every segment max
    p = jnp.exp(s)                              # masked / wrong-batch cols -> 0
    num = jnp.dot(p, vb, preferred_element_type=jnp.float32)      # (T, E)
    den = jnp.dot(p, hmask, preferred_element_type=jnp.float32)   # per-head sums
    den = jnp.maximum(den, 1e-30)               # guard fully-masked rows (no NaN)
    ctx = num * pl.reciprocal(den, approx=False)
    return jnp.dot(ctx, wo, preferred_element_type=jnp.float32) + bo


# ----------------------------------------------------------------------------
# Pallas kernel: all layers, full batch, single invocation (no grid)
# ----------------------------------------------------------------------------
# vec slab per-layer row layout (width KW = 128, zero padded):
#   0: bqkv_self(3E) 1: bo_self(E) 2: bq_cross(E) 3: bkv_cross(2E) 4: bo_cross(E)
#   5: b1(FF) 6: b2(E) 7..12: g1,be1,g2,be2,g3,be3(E) 13..15: pad
#   16..16+T-1 (layer 0): hoisted cross-attn additive bias (batch + key mask)
def _cyctr_kernel(x_ref, win_ref, wout_ref, vec_ref, const_ref, out_ref):
    x = x_ref[0:T, :]             # (T, E)   target tokens (l-major)
    mem = x_ref[T:T + TM, :]      # (TM, E)  memory tokens (s-major)

    # Hoisted constants / biases: loaded once, reused by every layer.
    hmT_x = const_ref[C_HMT_X:C_HMT_X + E, :]
    hmT_s = const_ref[C_HMT_S:C_HMT_S + E, 0:H * T]
    bias_self = const_ref[C_BIAS_S:C_BIAS_S + T, 0:H * T]
    hm_x = const_ref[C_HM_X:C_HM_X + H * TM, 0:E]
    hm_s = const_ref[C_HM_S:C_HM_S + H * T, 0:E]
    bias_cross = vec_ref[0][VROWS:VROWS + T, :]        # (T, H*TM)

    for li in range(NUM_LAYERS):      # static unroll: all layers in one launch
        w_in = win_ref[li]            # (E, 8E)  [Wqkv_s | Wq_c | Wkv_c | W1]
        w_out = wout_ref[li]          # (4E, E)  [Wo_s ; Wo_c ; W2]
        vv = vec_ref[li]              # (VROWS+T, KW) packed bias / LN rows

        # --- self-attention (fused QKV projection) + residual + LN ---
        qkv = jnp.dot(x, w_in[:, 0:3 * E],
                      preferred_element_type=jnp.float32) + vv[0:1, 0:3 * E]
        sa = _attend(qkv[:, 0:E], qkv[:, E:2 * E], qkv[:, 2 * E:3 * E],
                     w_out[0:E, :], vv[1:2, 0:E], hm_s, hmT_s, bias_self)
        x = _layernorm(x + sa, vv[7:8, 0:E], vv[8:9, 0:E])

        # --- cross-attention (fused KV projection, key-validity masked) ---
        q = jnp.dot(x, w_in[:, 3 * E:4 * E],
                    preferred_element_type=jnp.float32) + vv[2:3, 0:E]
        kv = jnp.dot(mem, w_in[:, 4 * E:6 * E],
                     preferred_element_type=jnp.float32) + vv[3:4, 0:2 * E]
        ca = _attend(q, kv[:, 0:E], kv[:, E:2 * E],
                     w_out[E:2 * E, :], vv[4:5, 0:E], hm_x, hmT_x, bias_cross)
        x = _layernorm(x + ca, vv[9:10, 0:E], vv[10:11, 0:E])

        # --- feed-forward + residual + LN ---
        h1 = jnp.maximum(
            jnp.dot(x, w_in[:, 6 * E:8 * E],
                    preferred_element_type=jnp.float32) + vv[5:6, 0:FF], 0.0)
        ff = jnp.dot(h1, w_out[2 * E:4 * E, :],
                     preferred_element_type=jnp.float32) + vv[6:7, 0:E]
        x = _layernorm(x + ff, vv[11:12, 0:E], vv[12:13, 0:E])

    out_ref[...] = x


# ----------------------------------------------------------------------------
# Host-side packing (done once) + thin wrapper around the single pallas_call
# ----------------------------------------------------------------------------
def pack_params(raw):
    """Pack raw per-layer parameters into 3 contiguous kernel slabs."""
    aw, ab, w1, b1, w2, b2, ln = raw
    # Weights applied to token activations ("input side"): (NL, E, 8E).
    w_in = jnp.concatenate([aw[:, 0], aw[:, 1], aw[:, 2],   # self QKV (fused)
                            aw[:, 4],                        # cross Q
                            aw[:, 5], aw[:, 6],              # cross KV (fused)
                            w1], axis=2)
    # Weights applied on the "output side": (NL, 4E, E).
    w_out = jnp.concatenate([aw[:, 3], aw[:, 7], w2], axis=1)

    def row(v):                     # (NL, w) -> (NL, 1, KW) zero-padded row
        return jnp.pad(v, ((0, 0), (0, KW - v.shape[-1])))[:, None, :]

    rows = [row(jnp.concatenate([ab[:, 0], ab[:, 1], ab[:, 2]], axis=-1)),  # 0
            row(ab[:, 3]),                                                  # 1
            row(ab[:, 4]),                                                  # 2
            row(jnp.concatenate([ab[:, 5], ab[:, 6]], axis=-1)),            # 3
            row(ab[:, 7]),                                                  # 4
            row(b1),                                                        # 5
            row(b2)]                                                        # 6
    rows += [row(ln[:, i]) for i in range(6)]                               # 7..12
    vec = jnp.concatenate(rows, axis=1)                                     # (NL,13,KW)
    vec = jnp.pad(vec, ((0, 0), (0, VROWS - vec.shape[1]), (0, 0)))         # (NL,16,KW)
    return (w_in, w_out, vec)


def cyctr_forward(tgt, memory, mask, kparams):
    """tgt: (L, B, E), memory: (S, B, E), mask: (B, S) with 1 = valid key."""
    w_in, w_out, vec = kparams
    # Activations cross the boundary as ONE slab via free row-major reshapes.
    x_all = jnp.concatenate([tgt.reshape(T, E), memory.reshape(TM, E)], axis=0)
    # Hoisted cross-attention additive bias (key validity + batch block),
    # appended to the packed vector slab (rows 16..31 of every layer).
    key_bias = jnp.where(mask.T.reshape(1, TM) > 0.5, 0.0, NEG).astype(jnp.float32)
    cross_bias = jnp.asarray(BATCH_BIAS_X) + jnp.tile(key_bias, (1, H))   # (T, H*TM)
    vec_full = jnp.concatenate(
        [vec, jnp.broadcast_to(cross_bias[None], (NUM_LAYERS, T, KW))], axis=1)

    out = pl.pallas_call(
        _cyctr_kernel,
        out_shape=jax.ShapeDtypeStruct((T, E), jnp.float32),
        in_specs=[pl.BlockSpec(memory_space=pltpu.MemorySpace.VMEM)] * 5,
        out_specs=pl.BlockSpec(memory_space=pltpu.MemorySpace.VMEM),
    )(x_all, w_in, w_out, vec_full, jnp.asarray(CONST_SLAB))
    return out.reshape(L, B, E)     # free reshape back to (L, B, E)


# ----------------------------------------------------------------------------
# Pure-JAX reference (straightforward per-batch, per-head implementation)
# ----------------------------------------------------------------------------
def _ref_mha(q_in, kv_in, wq, bq, wk, bk, wv, bv, wo, bo, add_mask):
    q = q_in @ wq + bq
    k = kv_in @ wk + bk
    v = kv_in @ wv + bv
    outs = []
    for h in range(H):
        sl = slice(h * HD, (h + 1) * HD)
        s = (q[:, sl] @ k[:, sl].T) * SCALE
        if add_mask is not None:
            s = s + add_mask
        s = s - jnp.max(s, axis=-1, keepdims=True)
        p = jnp.exp(s)
        p = p / jnp.sum(p, axis=-1, keepdims=True)
        outs.append(p @ v[:, sl])
    return jnp.concatenate(outs, axis=-1) @ wo + bo


def _ref_layer(x, mem_b, add_b, aw, ab, w1, b1, w2, b2, ln):
    sa = _ref_mha(x, x, aw[0], ab[0], aw[1], ab[1], aw[2], ab[2], aw[3], ab[3], None)
    x = _layernorm(x + sa, ln[0], ln[1])
    ca = _ref_mha(x, mem_b, aw[4], ab[4], aw[5], ab[5], aw[6], ab[6], aw[7], ab[7], add_b)
    x = _layernorm(x + ca, ln[2], ln[3])
    h1 = jnp.maximum(x @ w1 + b1, 0.0)
    x = _layernorm(x + h1 @ w2 + b2, ln[4], ln[5])
    return x


def cyctr_reference(tgt, memory, mask, raw):
    aw, ab, w1, b1, w2, b2, ln = raw
    cols = []
    for b in range(B):
        x = tgt[:, b, :]
        mem_b = memory[:, b, :]
        add_b = jnp.where(mask[b] > 0.5, 0.0, NEG)[None, :]
        for li in range(NUM_LAYERS):
            x = _ref_layer(x, mem_b, add_b, aw[li], ab[li], w1[li], b1[li],
                           w2[li], b2[li], ln[li])
        cols.append(x)
    return jnp.stack(cols, axis=1)   # (L, B, E)


# ----------------------------------------------------------------------------
# Deterministic parameter init (raw, per-layer form used by the reference)
# ----------------------------------------------------------------------------
def make_raw_params(key):
    ks = jax.random.split(key, 6)

    def rnd(k, shape):
        return jax.random.normal(k, shape, jnp.float32) * 0.1

    aw = rnd(ks[0], (NUM_LAYERS, 8, E, E))  # [sa_q,sa_k,sa_v,sa_o,ca_q,ca_k,ca_v,ca_o]
    ab = rnd(ks[1], (NUM_LAYERS, 8, E))
    w1 = rnd(ks[2], (NUM_LAYERS, E, FF))
    b1 = rnd(ks[3], (NUM_LAYERS, FF))
    w2 = rnd(ks[4], (NUM_LAYERS, FF, E))
    b2 = rnd(ks[5], (NUM_LAYERS, E))
    ones = jnp.ones((NUM_LAYERS, 1, E), jnp.float32)
    zeros = jnp.zeros((NUM_LAYERS, 1, E), jnp.float32)
    # ln rows: [g1, be1, g2, be2, g3, be3]
    ln = jnp.concatenate([ones, zeros, ones, zeros, ones, zeros], axis=1)
    return (aw, ab, w1, b1, w2, b2, ln)


if __name__ == "__main__":
    key = jax.random.PRNGKey(0)
    k_tgt, k_mem, k_mask, k_par = jax.random.split(key, 4)

    tgt = jax.random.normal(k_tgt, (L, B, E), jnp.float32)      # (L, B, E)
    memory = jax.random.normal(k_mem, (S, B, E), jnp.float32)   # (S, B, E)
    mask = (jax.random.uniform(k_mask, (B, S)) > 0.3).astype(jnp.float32)
    mask = mask.at[:, 0].set(1.0)  # at least one valid key per batch row

    raw = make_raw_params(k_par)
    kparams = pack_params(raw)

    fwd = jax.jit(cyctr_forward)
    out = jax.block_until_ready(fwd(tgt, memory, mask, kparams))

    ref = cyctr_reference(tgt, memory, mask, raw)
    assert out.shape == (L, B, E)
    err = float(jnp.max(jnp.abs(out - ref)))
    assert jnp.allclose(out, ref, atol=2e-4, rtol=2e-4), err

    print("KERNEL_OK")
</pallas_src>

<mosaic_0001>
module attributes {stable_mosaic.version = 11 : i64} {
  func.func @_cyctr_kernel(%arg0: memref<48x32xf32, #tpu.memory_space<vmem>>, %arg1: memref<2x32x256xf32, #tpu.memory_space<vmem>>, %arg2: memref<2x128x32xf32, #tpu.memory_space<vmem>>, %arg3: memref<2x32x128xf32, #tpu.memory_space<vmem>>, %arg4: memref<272x128xf32, #tpu.memory_space<vmem>>, %arg5: memref<16x32xf32, #tpu.memory_space<vmem>>) attributes {dimension_semantics = [], scalar_prefetch = 0 : i64, scratch_operands = 0 : i64, tpu.core_type = #tpu.core_type<tc>} {
    %c0 = arith.constant 0 : index
    %c0_0 = arith.constant 0 : index
    %0 = vector.load %arg0[%c0, %c0_0] : memref<48x32xf32, #tpu.memory_space<vmem>>, vector<16x32xf32>
    %c16 = arith.constant 16 : index
    %c0_1 = arith.constant 0 : index
    %1 = vector.load %arg0[%c16, %c0_1] : memref<48x32xf32, #tpu.memory_space<vmem>>, vector<32x32xf32>
    %c0_2 = arith.constant 0 : index
    %c0_3 = arith.constant 0 : index
    %2 = vector.load %arg4[%c0_2, %c0_3] : memref<272x128xf32, #tpu.memory_space<vmem>>, vector<32x128xf32>
    %c32 = arith.constant 32 : index
    %c0_4 = arith.constant 0 : index
    %3 = vector.load %arg4[%c32, %c0_4] : memref<272x128xf32, #tpu.memory_space<vmem>>, vector<32x64xf32>
    %c64 = arith.constant 64 : index
    %c0_5 = arith.constant 0 : index
    %4 = vector.load %arg4[%c64, %c0_5] : memref<272x128xf32, #tpu.memory_space<vmem>>, vector<16x64xf32>
    %c80 = arith.constant 80 : index
    %c0_6 = arith.constant 0 : index
    %5 = vector.load %arg4[%c80, %c0_6] : memref<272x128xf32, #tpu.memory_space<vmem>>, vector<128x32xf32>
    %c208 = arith.constant 208 : index
    %c0_7 = arith.constant 0 : index
    %6 = vector.load %arg4[%c208, %c0_7] : memref<272x128xf32, #tpu.memory_space<vmem>>, vector<64x32xf32>
    %c0_8 = arith.constant 0 : index
    %c0_9 = arith.constant 0 : index
    %c0_10 = arith.constant 0 : index
    %7 = vector.load %arg3[%c0_8, %c0_9, %c0_10] : memref<2x32x128xf32, #tpu.memory_space<vmem>>, vector<1x32x128xf32>
    %8 = vector.shape_cast %7 : vector<1x32x128xf32> to vector<32x128xf32>
    %9 = vector.extract_strided_slice %8 {offsets = [16, 0], sizes = [16, 128], strides = [1, 1]} : vector<32x128xf32> to vector<16x128xf32>
    %c0_11 = arith.constant 0 : index
    %c0_12 = arith.constant 0 : index
    %c0_13 = arith.constant 0 : index
    %10 = vector.load %arg1[%c0_11, %c0_12, %c0_13] : memref<2x32x256xf32, #tpu.memory_space<vmem>>, vector<1x32x256xf32>
    %11 = vector.shape_cast %10 : vector<1x32x256xf32> to vector<32x256xf32>
    %c0_14 = arith.constant 0 : index
    %c0_15 = arith.constant 0 : index
    %c0_16 = arith.constant 0 : index
    %12 = vector.load %arg2[%c0_14, %c0_15, %c0_16] : memref<2x128x32xf32, #tpu.memory_space<vmem>>, vector<1x128x32xf32>
    %13 = vector.shape_cast %12 : vector<1x128x32xf32> to vector<128x32xf32>
    %c0_17 = arith.constant 0 : index
    %c0_18 = arith.constant 0 : index
    %c0_19 = arith.constant 0 : index
    %14 = vector.load %arg3[%c0_17, %c0_18, %c0_19] : memref<2x32x128xf32, #tpu.memory_space<vmem>>, vector<1x32x128xf32>
    %15 = vector.shape_cast %14 : vector<1x32x128xf32> to vector<32x128xf32>
    %16 = vector.extract_strided_slice %11 {offsets = [0, 0], sizes = [32, 96], strides = [1, 1]} : vector<32x256xf32> to vector<32x96xf32>
    %cst = arith.constant dense<0.000000e+00> : vector<16x96xf32>
    %17 = tpu.matmul %0, %16, %cst {dimension_numbers = #tpu.dot_dimension_numbers<[1], [0], [0], [1], [0, 0, 1, 1], [], []>, precision = #tpu.contract_precision<fp32>} : vector<16x32xf32>, vector<32x96xf32>, vector<16x96xf32> -> vector<16x96xf32>
    %18 = vector.extract_strided_slice %15 {offsets = [0, 0], sizes = [1, 96], strides = [1, 1]} : vector<32x128xf32> to vector<1x96xf32>
    %19 = vector.broadcast %18 : vector<1x96xf32> to vector<16x96xf32>
    %20 = arith.addf %17, %19 : vector<16x96xf32>
    %21 = vector.extract_strided_slice %20 {offsets = [0, 0], sizes = [16, 32], strides = [1, 1]} : vector<16x96xf32> to vector<16x32xf32>
    %22 = vector.extract_strided_slice %20 {offsets = [0, 32], sizes = [16, 32], strides = [1, 1]} : vector<16x96xf32> to vector<16x32xf32>
    %23 = vector.extract_strided_slice %20 {offsets = [0, 64], sizes = [16, 32], strides = [1, 1]} : vector<16x96xf32> to vector<16x32xf32>
    %24 = vector.extract_strided_slice %13 {offsets = [0, 0], sizes = [32, 32], strides = [1, 1]} : vector<128x32xf32> to vector<32x32xf32>
    %25 = vector.extract_strided_slice %15 {offsets = [1, 0], sizes = [1, 32], strides = [1, 1]} : vector<32x128xf32> to vector<1x32xf32>
    %26 = tpu.transpose %22, [1, 0] : vector<16x32xf32> -> vector<32x16xf32>
    %27 = tpu.concatenate %26, %26, %26, %26 in 1 : vector<32x16xf32>, vector<32x16xf32>, vector<32x16xf32>, vector<32x16xf32> -> vector<32x64xf32>
    %28 = arith.mulf %27, %3 : vector<32x64xf32>
    %29 = tpu.concatenate %23, %23, %23, %23 in 0 : vector<16x32xf32>, vector<16x32xf32>, vector<16x32xf32>, vector<16x32xf32> -> vector<64x32xf32>
    %30 = arith.mulf %29, %6 : vector<64x32xf32>
    %cst_20 = arith.constant dense<0.000000e+00> : vector<16x64xf32>
    %31 = tpu.matmul %21, %28, %cst_20 {dimension_numbers = #tpu.dot_dimension_numbers<[1], [0], [0], [1], [0, 0, 1, 1], [], []>, precision = #tpu.contract_precision<fp32>} : vector<16x32xf32>, vector<32x64xf32>, vector<16x64xf32> -> vector<16x64xf32>
    %cst_21 = arith.constant 0.353553385 : f32
    %32 = vector.broadcast %cst_21 : f32 to vector<16x64xf32>
    %33 = arith.mulf %31, %32 : vector<16x64xf32>
    %34 = arith.addf %33, %4 : vector<16x64xf32>
    %cst_22 = arith.constant dense<0xFF800000> : vector<16xf32>
    %35 = vector.multi_reduction <maximumf>, %34, %cst_22 [1] : vector<16x64xf32> to vector<16xf32>
    %36 = vector.shape_cast %35 : vector<16xf32> to vector<16x1xf32>
    %37 = vector.broadcast %36 : vector<16x1xf32> to vector<16x64xf32>
    %38 = arith.subf %34, %37 : vector<16x64xf32>
    %39 = math.exp %38 : vector<16x64xf32>
    %cst_23 = arith.constant dense<0.000000e+00> : vector<16x32xf32>
    %40 = tpu.matmul %39, %30, %cst_23 {dimension_numbers = #tpu.dot_dimension_numbers<[1], [0], [0], [1], [0, 0, 1, 1], [], []>, precision = #tpu.contract_precision<fp32>} : vector<16x64xf32>, vector<64x32xf32>, vector<16x32xf32> -> vector<16x32xf32>
    %cst_24 = arith.constant dense<0.000000e+00> : vector<16x32xf32>
    %41 = tpu.matmul %39, %6, %cst_24 {dimension_numbers = #tpu.dot_dimension_numbers<[1], [0], [0], [1], [0, 0, 1, 1], [], []>, precision = #tpu.contract_precision<fp32>} : vector<16x64xf32>, vector<64x32xf32>, vector<16x32xf32> -> vector<16x32xf32>
    %cst_25 = arith.constant 1.000000e-30 : f32
    %42 = vector.broadcast %cst_25 : f32 to vector<16x32xf32>
    %43 = arith.maximumf %41, %42 : vector<16x32xf32>
    %44 = tpu.reciprocal %43 : vector<16x32xf32> -> vector<16x32xf32>
    %45 = arith.mulf %40, %44 : vector<16x32xf32>
    %cst_26 = arith.constant dense<0.000000e+00> : vector<16x32xf32>
    %46 = tpu.matmul %45, %24, %cst_26 {dimension_numbers = #tpu.dot_dimension_numbers<[1], [0], [0], [1], [0, 0, 1, 1], [], []>, precision = #tpu.contract_precision<fp32>} : vector<16x32xf32>, vector<32x32xf32>, vector<16x32xf32> -> vector<16x32xf32>
    %47 = vector.broadcast %25 : vector<1x32xf32> to vector<16x32xf32>
    %48 = arith.addf %46, %47 : vector<16x32xf32>
    %49 = arith.addf %0, %48 : vector<16x32xf32>
    %50 = vector.extract_strided_slice %15 {offsets = [7, 0], sizes = [1, 32], strides = [1, 1]} : vector<32x128xf32> to vector<1x32xf32>
    %51 = vector.extract_strided_slice %15 {offsets = [8, 0], sizes = [1, 32], strides = [1, 1]} : vector<32x128xf32> to vector<1x32xf32>
    %cst_27 = arith.constant dense<0.000000e+00> : vector<16xf32>
    %52 = vector.multi_reduction <add>, %49, %cst_27 [1] : vector<16x32xf32> to vector<16xf32>
    %53 = vector.shape_cast %52 : vector<16xf32> to vector<16x1xf32>
    %cst_28 = arith.constant 3.200000e+01 : f32
    %54 = vector.broadcast %cst_28 : f32 to vector<16x1xf32>
    %55 = arith.divf %53, %54 : vector<16x1xf32>
    %56 = vector.broadcast %55 : vector<16x1xf32> to vector<16x32xf32>
    %57 = arith.subf %49, %56 : vector<16x32xf32>
    %58 = arith.mulf %57, %57 : vector<16x32xf32>
    %cst_29 = arith.constant dense<0.000000e+00> : vector<16xf32>
    %59 = vector.multi_reduction <add>, %58, %cst_29 [1] : vector<16x32xf32> to vector<16xf32>
    %60 = vector.shape_cast %59 : vector<16xf32> to vector<16x1xf32>
    %cst_30 = arith.constant 3.200000e+01 : f32
    %61 = vector.broadcast %cst_30 : f32 to vector<16x1xf32>
    %62 = arith.divf %60, %61 : vector<16x1xf32>
    %63 = vector.broadcast %55 : vector<16x1xf32> to vector<16x32xf32>
    %64 = arith.subf %49, %63 : vector<16x32xf32>
    %cst_31 = arith.constant 9.99999974E-6 : f32
    %65 = vector.broadcast %cst_31 : f32 to vector<16x1xf32>
    %66 = arith.addf %62, %65 : vector<16x1xf32>
    %67 = math.rsqrt %66 : vector<16x1xf32>
    %68 = vector.broadcast %67 : vector<16x1xf32> to vector<16x32xf32>
    %69 = arith.mulf %64, %68 : vector<16x32xf32>
    %70 = vector.broadcast %50 : vector<1x32xf32> to vector<16x32xf32>
    %71 = arith.mulf %69, %70 : vector<16x32xf32>
    %72 = vector.broadcast %51 : vector<1x32xf32> to vector<16x32xf32>
    %73 = arith.addf %71, %72 : vector<16x32xf32>
    %74 = vector.extract_strided_slice %11 {offsets = [0, 96], sizes = [32, 32], strides = [1, 1]} : vector<32x256xf32> to vector<32x32xf32>
    %cst_32 = arith.constant dense<0.000000e+00> : vector<16x32xf32>
    %75 = tpu.matmul %73, %74, %cst_32 {dimension_numbers = #tpu.dot_dimension_numbers<[1], [0], [0], [1], [0, 0, 1, 1], [], []>, precision = #tpu.contract_precision<fp32>} : vector<16x32xf32>, vector<32x32xf32>, vector<16x32xf32> -> vector<16x32xf32>
    %76 = vector.extract_strided_slice %15 {offsets = [2, 0], sizes = [1, 32], strides = [1, 1]} : vector<32x128xf32> to vector<1x32xf32>
    %77 = vector.broadcast %76 : vector<1x32xf32> to vector<16x32xf32>
    %78 = arith.addf %75, %77 : vector<16x32xf32>
    %79 = vector.extract_strided_slice %11 {offsets = [0, 128], sizes = [32, 64], strides = [1, 1]} : vector<32x256xf32> to vector<32x64xf32>
    %cst_33 = arith.constant dense<0.000000e+00> : vector<32x64xf32>
    %80 = tpu.matmul %1, %79, %cst_33 {dimension_numbers = #tpu.dot_dimension_numbers<[1], [0], [0], [1], [0, 0, 1, 1], [], []>, precision = #tpu.contract_precision<fp32>} : vector<32x32xf32>, vector<32x64xf32>, vector<32x64xf32> -> vector<32x64xf32>
    %81 = vector.extract_strided_slice %15 {offsets = [3, 0], sizes = [1, 64], strides = [1, 1]} : vector<32x128xf32> to vector<1x64xf32>
    %82 = vector.broadcast %81 : vector<1x64xf32> to vector<32x64xf32>
    %83 = arith.addf %80, %82 : vector<32x64xf32>
    %84 = vector.extract_strided_slice %83 {offsets = [0, 0], sizes = [32, 32], strides = [1, 1]} : vector<32x64xf32> to vector<32x32xf32>
    %85 = vector.extract_strided_slice %83 {offsets = [0, 32], sizes = [32, 32], strides = [1, 1]} : vector<32x64xf32> to vector<32x32xf32>
    %86 = vector.extract_strided_slice %13 {offsets = [32, 0], sizes = [32, 32], strides = [1, 1]} : vector<128x32xf32> to vector<32x32xf32>
    %87 = vector.extract_strided_slice %15 {offsets = [4, 0], sizes = [1, 32], strides = [1, 1]} : vector<32x128xf32> to vector<1x32xf32>
    %88 = tpu.transpose %84, [1, 0] : vector<32x32xf32> -> vector<32x32xf32>
    %89 = tpu.concatenate %88, %88, %88, %88 in 1 : vector<32x32xf32>, vector<32x32xf32>, vector<32x32xf32>, vector<32x32xf32> -> vector<32x128xf32>
    %90 = arith.mulf %89, %2 : vector<32x128xf32>
    %91 = tpu.concatenate %85, %85, %85, %85 in 0 : vector<32x32xf32>, vector<32x32xf32>, vector<32x32xf32>, vector<32x32xf32> -> vector<128x32xf32>
    %92 = arith.mulf %91, %5 : vector<128x32xf32>
    %cst_34 = arith.constant dense<0.000000e+00> : vector<16x128xf32>
    %93 = tpu.matmul %78, %90, %cst_34 {dimension_numbers = #tpu.dot_dimension_numbers<[1], [0], [0], [1], [0, 0, 1, 1], [], []>, precision = #tpu.contract_precision<fp32>} : vector<16x32xf32>, vector<32x128xf32>, vector<16x128xf32> -> vector<16x128xf32>
    %cst_35 = arith.constant 0.353553385 : f32
    %94 = vector.broadcast %cst_35 : f32 to vector<16x128xf32>
    %95 = arith.mulf %93, %94 : vector<16x128xf32>
    %96 = arith.addf %95, %9 : vector<16x128xf32>
    %cst_36 = arith.constant dense<0xFF800000> : vector<16xf32>
    %97 = vector.multi_reduction <maximumf>, %96, %cst_36 [1] : vector<16x128xf32> to vector<16xf32>
    %98 = vector.shape_cast %97 : vector<16xf32> to vector<16x1xf32>
    %99 = vector.broadcast %98 : vector<16x1xf32> to vector<16x128xf32>
    %100 = arith.subf %96, %99 : vector<16x128xf32>
    %101 = math.exp %100 : vector<16x128xf32>
    %cst_37 = arith.constant dense<0.000000e+00> : vector<16x32xf32>
    %102 = tpu.matmul %101, %92, %cst_37 {dimension_numbers = #tpu.dot_dimension_numbers<[1], [0], [0], [1], [0, 0, 1, 1], [], []>, precision = #tpu.contract_precision<fp32>} : vector<16x128xf32>, vector<128x32xf32>, vector<16x32xf32> -> vector<16x32xf32>
    %cst_38 = arith.constant dense<0.000000e+00> : vector<16x32xf32>
    %103 = tpu.matmul %101, %5, %cst_38 {dimension_numbers = #tpu.dot_dimension_numbers<[1], [0], [0], [1], [0, 0, 1, 1], [], []>, precision = #tpu.contract_precision<fp32>} : vector<16x128xf32>, vector<128x32xf32>, vector<16x32xf32> -> vector<16x32xf32>
    %cst_39 = arith.constant 1.000000e-30 : f32
    %104 = vector.broadcast %cst_39 : f32 to vector<16x32xf32>
    %105 = arith.maximumf %103, %104 : vector<16x32xf32>
    %106 = tpu.reciprocal %105 : vector<16x32xf32> -> vector<16x32xf32>
    %107 = arith.mulf %102, %106 : vector<16x32xf32>
    %cst_40 = arith.constant dense<0.000000e+00> : vector<16x32xf32>
    %108 = tpu.matmul %107, %86, %cst_40 {dimension_numbers = #tpu.dot_dimension_numbers<[1], [0], [0], [1], [0, 0, 1, 1], [], []>, precision = #tpu.contract_precision<fp32>} : vector<16x32xf32>, vector<32x32xf32>, vector<16x32xf32> -> vector<16x32xf32>
    %109 = vector.broadcast %87 : vector<1x32xf32> to vector<16x32xf32>
    %110 = arith.addf %108, %109 : vector<16x32xf32>
    %111 = arith.addf %73, %110 : vector<16x32xf32>
    %112 = vector.extract_strided_slice %15 {offsets = [9, 0], sizes = [1, 32], strides = [1, 1]} : vector<32x128xf32> to vector<1x32xf32>
    %113 = vector.extract_strided_slice %15 {offsets = [10, 0], sizes = [1, 32], strides = [1, 1]} : vector<32x128xf32> to vector<1x32xf32>
    %cst_41 = arith.constant dense<0.000000e+00> : vector<16xf32>
    %114 = vector.multi_reduction <add>, %111, %cst_41 [1] : vector<16x32xf32> to vector<16xf32>
    %115 = vector.shape_cast %114 : vector<16xf32> to vector<16x1xf32>
    %cst_42 = arith.constant 3.200000e+01 : f32
    %116 = vector.broadcast %cst_42 : f32 to vector<16x1xf32>
    %117 = arith.divf %115, %116 : vector<16x1xf32>
    %118 = vector.broadcast %117 : vector<16x1xf32> to vector<16x32xf32>
    %119 = arith.subf %111, %118 : vector<16x32xf32>
    %120 = arith.mulf %119, %119 : vector<16x32xf32>
    %cst_43 = arith.constant dense<0.000000e+00> : vector<16xf32>
    %121 = vector.multi_reduction <add>, %120, %cst_43 [1] : vector<16x32xf32> to vector<16xf32>
    %122 = vector.shape_cast %121 : vector<16xf32> to vector<16x1xf32>
    %cst_44 = arith.constant 3.200000e+01 : f32
    %123 = vector.broadcast %cst_44 : f32 to vector<16x1xf32>
    %124 = arith.divf %122, %123 : vector<16x1xf32>
    %125 = vector.broadcast %117 : vector<16x1xf32> to vector<16x32xf32>
    %126 = arith.subf %111, %125 : vector<16x32xf32>
    %cst_45 = arith.constant 9.99999974E-6 : f32
    %127 = vector.broadcast %cst_45 : f32 to vector<16x1xf32>
    %128 = arith.addf %124, %127 : vector<16x1xf32>
    %129 = math.rsqrt %128 : vector<16x1xf32>
    %130 = vector.broadcast %129 : vector<16x1xf32> to vector<16x32xf32>
    %131 = arith.mulf %126, %130 : vector<16x32xf32>
    %132 = vector.broadcast %112 : vector<1x32xf32> to vector<16x32xf32>
    %133 = arith.mulf %131, %132 : vector<16x32xf32>
    %134 = vector.broadcast %113 : vector<1x32xf32> to vector<16x32xf32>
    %135 = arith.addf %133, %134 : vector<16x32xf32>
    %136 = vector.extract_strided_slice %11 {offsets = [0, 192], sizes = [32, 64], strides = [1, 1]} : vector<32x256xf32> to vector<32x64xf32>
    %cst_46 = arith.constant dense<0.000000e+00> : vector<16x64xf32>
    %137 = tpu.matmul %135, %136, %cst_46 {dimension_numbers = #tpu.dot_dimension_numbers<[1], [0], [0], [1], [0, 0, 1, 1], [], []>, precision = #tpu.contract_precision<fp32>} : vector<16x32xf32>, vector<32x64xf32>, vector<16x64xf32> -> vector<16x64xf32>
    %138 = vector.extract_strided_slice %15 {offsets = [5, 0], sizes = [1, 64], strides = [1, 1]} : vector<32x128xf32> to vector<1x64xf32>
    %139 = vector.broadcast %138 : vector<1x64xf32> to vector<16x64xf32>
    %140 = arith.addf %137, %139 : vector<16x64xf32>
    %cst_47 = arith.constant 0.000000e+00 : f32
    %141 = vector.broadcast %cst_47 : f32 to vector<16x64xf32>
    %142 = arith.maximumf %140, %141 : vector<16x64xf32>
    %143 = vector.extract_strided_slice %13 {offsets = [64, 0], sizes = [64, 32], strides = [1, 1]} : vector<128x32xf32> to vector<64x32xf32>
    %cst_48 = arith.constant dense<0.000000e+00> : vector<16x32xf32>
    %144 = tpu.matmul %142, %143, %cst_48 {dimension_numbers = #tpu.dot_dimension_numbers<[1], [0], [0], [1], [0, 0, 1, 1], [], []>, precision = #tpu.contract_precision<fp32>} : vector<16x64xf32>, vector<64x32xf32>, vector<16x32xf32> -> vector<16x32xf32>
    %145 = vector.extract_strided_slice %15 {offsets = [6, 0], sizes = [1, 32], strides = [1, 1]} : vector<32x128xf32> to vector<1x32xf32>
    %146 = vector.broadcast %145 : vector<1x32xf32> to vector<16x32xf32>
    %147 = arith.addf %144, %146 : vector<16x32xf32>
    %148 = arith.addf %135, %147 : vector<16x32xf32>
    %149 = vector.extract_strided_slice %15 {offsets = [11, 0], sizes = [1, 32], strides = [1, 1]} : vector<32x128xf32> to vector<1x32xf32>
    %150 = vector.extract_strided_slice %15 {offsets = [12, 0], sizes = [1, 32], strides = [1, 1]} : vector<32x128xf32> to vector<1x32xf32>
    %cst_49 = arith.constant dense<0.000000e+00> : vector<16xf32>
    %151 = vector.multi_reduction <add>, %148, %cst_49 [1] : vector<16x32xf32> to vector<16xf32>
    %152 = vector.shape_cast %151 : vector<16xf32> to vector<16x1xf32>
    %cst_50 = arith.constant 3.200000e+01 : f32
    %153 = vector.broadcast %cst_50 : f32 to vector<16x1xf32>
    %154 = arith.divf %152, %153 : vector<16x1xf32>
    %155 = vector.broadcast %154 : vector<16x1xf32> to vector<16x32xf32>
    %156 = arith.subf %148, %155 : vector<16x32xf32>
    %157 = arith.mulf %156, %156 : vector<16x32xf32>
    %cst_51 = arith.constant dense<0.000000e+00> : vector<16xf32>
    %158 = vector.multi_reduction <add>, %157, %cst_51 [1] : vector<16x32xf32> to vector<16xf32>
    %159 = vector.shape_cast %158 : vector<16xf32> to vector<16x1xf32>
    %cst_52 = arith.constant 3.200000e+01 : f32
    %160 = vector.broadcast %cst_52 : f32 to vector<16x1xf32>
    %161 = arith.divf %159, %160 : vector<16x1xf32>
    %162 = vector.broadcast %154 : vector<16x1xf32> to vector<16x32xf32>
    %163 = arith.subf %148, %162 : vector<16x32xf32>
    %cst_53 = arith.constant 9.99999974E-6 : f32
    %164 = vector.broadcast %cst_53 : f32 to vector<16x1xf32>
    %165 = arith.addf %161, %164 : vector<16x1xf32>
    %166 = math.rsqrt %165 : vector<16x1xf32>
    %167 = vector.broadcast %166 : vector<16x1xf32> to vector<16x32xf32>
    %168 = arith.mulf %163, %167 : vector<16x32xf32>
    %169 = vector.broadcast %149 : vector<1x32xf32> to vector<16x32xf32>
    %170 = arith.mulf %168, %169 : vector<16x32xf32>
    %171 = vector.broadcast %150 : vector<1x32xf32> to vector<16x32xf32>
    %172 = arith.addf %170, %171 : vector<16x32xf32>
    %c1 = arith.constant 1 : index
    %c0_54 = arith.constant 0 : index
    %c0_55 = arith.constant 0 : index
    %173 = vector.load %arg1[%c1, %c0_54, %c0_55] : memref<2x32x256xf32, #tpu.memory_space<vmem>>, vector<1x32x256xf32>
    %174 = vector.shape_cast %173 : vector<1x32x256xf32> to vector<32x256xf32>
    %c1_56 = arith.constant 1 : index
    %c0_57 = arith.constant 0 : index
    %c0_58 = arith.constant 0 : index
    %175 = vector.load %arg2[%c1_56, %c0_57, %c0_58] : memref<2x128x32xf32, #tpu.memory_space<vmem>>, vector<1x128x32xf32>
    %176 = vector.shape_cast %175 : vector<1x128x32xf32> to vector<128x32xf32>
    %c1_59 = arith.constant 1 : index
    %c0_60 = arith.constant 0 : index
    %c0_61 = arith.constant 0 : index
    %177 = vector.load %arg3[%c1_59, %c0_60, %c0_61] : memref<2x32x128xf32, #tpu.memory_space<vmem>>, vector<1x32x128xf32>
    %178 = vector.shape_cast %177 : vector<1x32x128xf32> to vector<32x128xf32>
    %179 = vector.extract_strided_slice %174 {offsets = [0, 0], sizes = [32, 96], strides = [1, 1]} : vector<32x256xf32> to vector<32x96xf32>
    %cst_62 = arith.constant dense<0.000000e+00> : vector<16x96xf32>
    %180 = tpu.matmul %172, %179, %cst_62 {dimension_numbers = #tpu.dot_dimension_numbers<[1], [0], [0], [1], [0, 0, 1, 1], [], []>, precision = #tpu.contract_precision<fp32>} : vector<16x32xf32>, vector<32x96xf32>, vector<16x96xf32> -> vector<16x96xf32>
    %181 = vector.extract_strided_slice %178 {offsets = [0, 0], sizes = [1, 96], strides = [1, 1]} : vector<32x128xf32> to vector<1x96xf32>
    %182 = vector.broadcast %181 : vector<1x96xf32> to vector<16x96xf32>
    %183 = arith.addf %180, %182 : vector<16x96xf32>
    %184 = vector.extract_strided_slice %183 {offsets = [0, 0], sizes = [16, 32], strides = [1, 1]} : vector<16x96xf32> to vector<16x32xf32>
    %185 = vector.extract_strided_slice %183 {offsets = [0, 32], sizes = [16, 32], strides = [1, 1]} : vector<16x96xf32> to vector<16x32xf32>
    %186 = vector.extract_strided_slice %183 {offsets = [0, 64], sizes = [16, 32], strides = [1, 1]} : vector<16x96xf32> to vector<16x32xf32>
    %187 = vector.extract_strided_slice %176 {offsets = [0, 0], sizes = [32, 32], strides = [1, 1]} : vector<128x32xf32> to vector<32x32xf32>
    %188 = vector.extract_strided_slice %178 {offsets = [1, 0], sizes = [1, 32], strides = [1, 1]} : vector<32x128xf32> to vector<1x32xf32>
    %189 = tpu.transpose %185, [1, 0] : vector<16x32xf32> -> vector<32x16xf32>
    %190 = tpu.concatenate %189, %189, %189, %189 in 1 : vector<32x16xf32>, vector<32x16xf32>, vector<32x16xf32>, vector<32x16xf32> -> vector<32x64xf32>
    %191 = arith.mulf %190, %3 : vector<32x64xf32>
    %192 = tpu.concatenate %186, %186, %186, %186 in 0 : vector<16x32xf32>, vector<16x32xf32>, vector<16x32xf32>, vector<16x32xf32> -> vector<64x32xf32>
    %193 = arith.mulf %192, %6 : vector<64x32xf32>
    %cst_63 = arith.constant dense<0.000000e+00> : vector<16x64xf32>
    %194 = tpu.matmul %184, %191, %cst_63 {dimension_numbers = #tpu.dot_dimension_numbers<[1], [0], [0], [1], [0, 0, 1, 1], [], []>, precision = #tpu.contract_precision<fp32>} : vector<16x32xf32>, vector<32x64xf32>, vector<16x64xf32> -> vector<16x64xf32>
    %cst_64 = arith.constant 0.353553385 : f32
    %195 = vector.broadcast %cst_64 : f32 to vector<16x64xf32>
    %196 = arith.mulf %194, %195 : vector<16x64xf32>
    %197 = arith.addf %196, %4 : vector<16x64xf32>
    %cst_65 = arith.constant dense<0xFF800000> : vector<16xf32>
    %198 = vector.multi_reduction <maximumf>, %197, %cst_65 [1] : vector<16x64xf32> to vector<16xf32>
    %199 = vector.shape_cast %198 : vector<16xf32> to vector<16x1xf32>
    %200 = vector.broadcast %199 : vector<16x1xf32> to vector<16x64xf32>
    %201 = arith.subf %197, %200 : vector<16x64xf32>
    %202 = math.exp %201 : vector<16x64xf32>
    %cst_66 = arith.constant dense<0.000000e+00> : vector<16x32xf32>
    %203 = tpu.matmul %202, %193, %cst_66 {dimension_numbers = #tpu.dot_dimension_numbers<[1], [0], [0], [1], [0, 0, 1, 1], [], []>, precision = #tpu.contract_precision<fp32>} : vector<16x64xf32>, vector<64x32xf32>, vector<16x32xf32> -> vector<16x32xf32>
    %cst_67 = arith.constant dense<0.000000e+00> : vector<16x32xf32>
    %204 = tpu.matmul %202, %6, %cst_67 {dimension_numbers = #tpu.dot_dimension_numbers<[1], [0], [0], [1], [0, 0, 1, 1], [], []>, precision = #tpu.contract_precision<fp32>} : vector<16x64xf32>, vector<64x32xf32>, vector<16x32xf32> -> vector<16x32xf32>
    %cst_68 = arith.constant 1.000000e-30 : f32
    %205 = vector.broadcast %cst_68 : f32 to vector<16x32xf32>
    %206 = arith.maximumf %204, %205 : vector<16x32xf32>
    %207 = tpu.reciprocal %206 : vector<16x32xf32> -> vector<16x32xf32>
    %208 = arith.mulf %203, %207 : vector<16x32xf32>
    %cst_69 = arith.constant dense<0.000000e+00> : vector<16x32xf32>
    %209 = tpu.matmul %208, %187, %cst_69 {dimension_numbers = #tpu.dot_dimension_numbers<[1], [0], [0], [1], [0, 0, 1, 1], [], []>, precision = #tpu.contract_precision<fp32>} : vector<16x32xf32>, vector<32x32xf32>, vector<16x32xf32> -> vector<16x32xf32>
    %210 = vector.broadcast %188 : vector<1x32xf32> to vector<16x32xf32>
    %211 = arith.addf %209, %210 : vector<16x32xf32>
    %212 = arith.addf %172, %211 : vector<16x32xf32>
    %213 = vector.extract_strided_slice %178 {offsets = [7, 0], sizes = [1, 32], strides = [1, 1]} : vector<32x128xf32> to vector<1x32xf32>
    %214 = vector.extract_strided_slice %178 {offsets = [8, 0], sizes = [1, 32], strides = [1, 1]} : vector<32x128xf32> to vector<1x32xf32>
    %cst_70 = arith.constant dense<0.000000e+00> : vector<16xf32>
    %215 = vector.multi_reduction <add>, %212, %cst_70 [1] : vector<16x32xf32> to vector<16xf32>
    %216 = vector.shape_cast %215 : vector<16xf32> to vector<16x1xf32>
    %cst_71 = arith.constant 3.200000e+01 : f32
    %217 = vector.broadcast %cst_71 : f32 to vector<16x1xf32>
    %218 = arith.divf %216, %217 : vector<16x1xf32>
    %219 = vector.broadcast %218 : vector<16x1xf32> to vector<16x32xf32>
    %220 = arith.subf %212, %219 : vector<16x32xf32>
    %221 = arith.mulf %220, %220 : vector<16x32xf32>
    %cst_72 = arith.constant dense<0.000000e+00> : vector<16xf32>
    %222 = vector.multi_reduction <add>, %221, %cst_72 [1] : vector<16x32xf32> to vector<16xf32>
    %223 = vector.shape_cast %222 : vector<16xf32> to vector<16x1xf32>
    %cst_73 = arith.constant 3.200000e+01 : f32
    %224 = vector.broadcast %cst_73 : f32 to vector<16x1xf32>
    %225 = arith.divf %223, %224 : vector<16x1xf32>
    %226 = vector.broadcast %218 : vector<16x1xf32> to vector<16x32xf32>
    %227 = arith.subf %212, %226 : vector<16x32xf32>
    %cst_74 = arith.constant 9.99999974E-6 : f32
    %228 = vector.broadcast %cst_74 : f32 to vector<16x1xf32>
    %229 = arith.addf %225, %228 : vector<16x1xf32>
    %230 = math.rsqrt %229 : vector<16x1xf32>
    %231 = vector.broadcast %230 : vector<16x1xf32> to vector<16x32xf32>
    %232 = arith.mulf %227, %231 : vector<16x32xf32>
    %233 = vector.broadcast %213 : vector<1x32xf32> to vector<16x32xf32>
    %234 = arith.mulf %232, %233 : vector<16x32xf32>
    %235 = vector.broadcast %214 : vector<1x32xf32> to vector<16x32xf32>
    %236 = arith.addf %234, %235 : vector<16x32xf32>
    %237 = vector.extract_strided_slice %174 {offsets = [0, 96], sizes = [32, 32], strides = [1, 1]} : vector<32x256xf32> to vector<32x32xf32>
    %cst_75 = arith.constant dense<0.000000e+00> : vector<16x32xf32>
    %238 = tpu.matmul %236, %237, %cst_75 {dimension_numbers = #tpu.dot_dimension_numbers<[1], [0], [0], [1], [0, 0, 1, 1], [], []>, precision = #tpu.contract_precision<fp32>} : vector<16x32xf32>, vector<32x32xf32>, vector<16x32xf32> -> vector<16x32xf32>
    %239 = vector.extract_strided_slice %178 {offsets = [2, 0], sizes = [1, 32], strides = [1, 1]} : vector<32x128xf32> to vector<1x32xf32>
    %240 = vector.broadcast %239 : vector<1x32xf32> to vector<16x32xf32>
    %241 = arith.addf %238, %240 : vector<16x32xf32>
    %242 = vector.extract_strided_slice %174 {offsets = [0, 128], sizes = [32, 64], strides = [1, 1]} : vector<32x256xf32> to vector<32x64xf32>
    %cst_76 = arith.constant dense<0.000000e+00> : vector<32x64xf32>
    %243 = tpu.matmul %1, %242, %cst_76 {dimension_numbers = #tpu.dot_dimension_numbers<[1], [0], [0], [1], [0, 0, 1, 1], [], []>, precision = #tpu.contract_precision<fp32>} : vector<32x32xf32>, vector<32x64xf32>, vector<32x64xf32> -> vector<32x64xf32>
    %244 = vector.extract_strided_slice %178 {offsets = [3, 0], sizes = [1, 64], strides = [1, 1]} : vector<32x128xf32> to vector<1x64xf32>
    %245 = vector.broadcast %244 : vector<1x64xf32> to vector<32x64xf32>
    %246 = arith.addf %243, %245 : vector<32x64xf32>
    %247 = vector.extract_strided_slice %246 {offsets = [0, 0], sizes = [32, 32], strides = [1, 1]} : vector<32x64xf32> to vector<32x32xf32>
    %248 = vector.extract_strided_slice %246 {offsets = [0, 32], sizes = [32, 32], strides = [1, 1]} : vector<32x64xf32> to vector<32x32xf32>
    %249 = vector.extract_strided_slice %176 {offsets = [32, 0], sizes = [32, 32], strides = [1, 1]} : vector<128x32xf32> to vector<32x32xf32>
    %250 = vector.extract_strided_slice %178 {offsets = [4, 0], sizes = [1, 32], strides = [1, 1]} : vector<32x128xf32> to vector<1x32xf32>
    %251 = tpu.transpose %247, [1, 0] : vector<32x32xf32> -> vector<32x32xf32>
    %252 = tpu.concatenate %251, %251, %251, %251 in 1 : vector<32x32xf32>, vector<32x32xf32>, vector<32x32xf32>, vector<32x32xf32> -> vector<32x128xf32>
    %253 = arith.mulf %252, %2 : vector<32x128xf32>
    %254 = tpu.concatenate %248, %248, %248, %248 in 0 : vector<32x32xf32>, vector<32x32xf32>, vector<32x32xf32>, vector<32x32xf32> -> vector<128x32xf32>
    %255 = arith.mulf %254, %5 : vector<128x32xf32>
    %cst_77 = arith.constant dense<0.000000e+00> : vector<16x128xf32>
    %256 = tpu.matmul %241, %253, %cst_77 {dimension_numbers = #tpu.dot_dimension_numbers<[1], [0], [0], [1], [0, 0, 1, 1], [], []>, precision = #tpu.contract_precision<fp32>} : vector<16x32xf32>, vector<32x128xf32>, vector<16x128xf32> -> vector<16x128xf32>
    %cst_78 = arith.constant 0.353553385 : f32
    %257 = vector.broadcast %cst_78 : f32 to vector<16x128xf32>
    %258 = arith.mulf %256, %257 : vector<16x128xf32>
    %259 = arith.addf %258, %9 : vector<16x128xf32>
    %cst_79 = arith.constant dense<0xFF800000> : vector<16xf32>
    %260 = vector.multi_reduction <maximumf>, %259, %cst_79 [1] : vector<16x128xf32> to vector<16xf32>
    %261 = vector.shape_cast %260 : vector<16xf32> to vector<16x1xf32>
    %262 = vector.broadcast %261 : vector<16x1xf32> to vector<16x128xf32>
    %263 = arith.subf %259, %262 : vector<16x128xf32>
    %264 = math.exp %263 : vector<16x128xf32>
    %cst_80 = arith.constant dense<0.000000e+00> : vector<16x32xf32>
    %265 = tpu.matmul %264, %255, %cst_80 {dimension_numbers = #tpu.dot_dimension_numbers<[1], [0], [0], [1], [0, 0, 1, 1], [], []>, precision = #tpu.contract_precision<fp32>} : vector<16x128xf32>, vector<128x32xf32>, vector<16x32xf32> -> vector<16x32xf32>
    %cst_81 = arith.constant dense<0.000000e+00> : vector<16x32xf32>
    %266 = tpu.matmul %264, %5, %cst_81 {dimension_numbers = #tpu.dot_dimension_numbers<[1], [0], [0], [1], [0, 0, 1, 1], [], []>, precision = #tpu.contract_precision<fp32>} : vector<16x128xf32>, vector<128x32xf32>, vector<16x32xf32> -> vector<16x32xf32>
    %cst_82 = arith.constant 1.000000e-30 : f32
    %267 = vector.broadcast %cst_82 : f32 to vector<16x32xf32>
    %268 = arith.maximumf %266, %267 : vector<16x32xf32>
    %269 = tpu.reciprocal %268 : vector<16x32xf32> -> vector<16x32xf32>
    %270 = arith.mulf %265, %269 : vector<16x32xf32>
    %cst_83 = arith.constant dense<0.000000e+00> : vector<16x32xf32>
    %271 = tpu.matmul %270, %249, %cst_83 {dimension_numbers = #tpu.dot_dimension_numbers<[1], [0], [0], [1], [0, 0, 1, 1], [], []>, precision = #tpu.contract_precision<fp32>} : vector<16x32xf32>, vector<32x32xf32>, vector<16x32xf32> -> vector<16x32xf32>
    %272 = vector.broadcast %250 : vector<1x32xf32> to vector<16x32xf32>
    %273 = arith.addf %271, %272 : vector<16x32xf32>
    %274 = arith.addf %236, %273 : vector<16x32xf32>
    %275 = vector.extract_strided_slice %178 {offsets = [9, 0], sizes = [1, 32], strides = [1, 1]} : vector<32x128xf32> to vector<1x32xf32>
    %276 = vector.extract_strided_slice %178 {offsets = [10, 0], sizes = [1, 32], strides = [1, 1]} : vector<32x128xf32> to vector<1x32xf32>
    %cst_84 = arith.constant dense<0.000000e+00> : vector<16xf32>
    %277 = vector.multi_reduction <add>, %274, %cst_84 [1] : vector<16x32xf32> to vector<16xf32>
    %278 = vector.shape_cast %277 : vector<16xf32> to vector<16x1xf32>
    %cst_85 = arith.constant 3.200000e+01 : f32
    %279 = vector.broadcast %cst_85 : f32 to vector<16x1xf32>
    %280 = arith.divf %278, %279 : vector<16x1xf32>
    %281 = vector.broadcast %280 : vector<16x1xf32> to vector<16x32xf32>
    %282 = arith.subf %274, %281 : vector<16x32xf32>
    %283 = arith.mulf %282, %282 : vector<16x32xf32>
    %cst_86 = arith.constant dense<0.000000e+00> : vector<16xf32>
    %284 = vector.multi_reduction <add>, %283, %cst_86 [1] : vector<16x32xf32> to vector<16xf32>
    %285 = vector.shape_cast %284 : vector<16xf32> to vector<16x1xf32>
    %cst_87 = arith.constant 3.200000e+01 : f32
    %286 = vector.broadcast %cst_87 : f32 to vector<16x1xf32>
    %287 = arith.divf %285, %286 : vector<16x1xf32>
    %288 = vector.broadcast %280 : vector<16x1xf32> to vector<16x32xf32>
    %289 = arith.subf %274, %288 : vector<16x32xf32>
    %cst_88 = arith.constant 9.99999974E-6 : f32
    %290 = vector.broadcast %cst_88 : f32 to vector<16x1xf32>
    %291 = arith.addf %287, %290 : vector<16x1xf32>
    %292 = math.rsqrt %291 : vector<16x1xf32>
    %293 = vector.broadcast %292 : vector<16x1xf32> to vector<16x32xf32>
    %294 = arith.mulf %289, %293 : vector<16x32xf32>
    %295 = vector.broadcast %275 : vector<1x32xf32> to vector<16x32xf32>
    %296 = arith.mulf %294, %295 : vector<16x32xf32>
    %297 = vector.broadcast %276 : vector<1x32xf32> to vector<16x32xf32>
    %298 = arith.addf %296, %297 : vector<16x32xf32>
    %299 = vector.extract_strided_slice %174 {offsets = [0, 192], sizes = [32, 64], strides = [1, 1]} : vector<32x256xf32> to vector<32x64xf32>
    %cst_89 = arith.constant dense<0.000000e+00> : vector<16x64xf32>
    %300 = tpu.matmul %298, %299, %cst_89 {dimension_numbers = #tpu.dot_dimension_numbers<[1], [0], [0], [1], [0, 0, 1, 1], [], []>, precision = #tpu.contract_precision<fp32>} : vector<16x32xf32>, vector<32x64xf32>, vector<16x64xf32> -> vector<16x64xf32>
    %301 = vector.extract_strided_slice %178 {offsets = [5, 0], sizes = [1, 64], strides = [1, 1]} : vector<32x128xf32> to vector<1x64xf32>
    %302 = vector.broadcast %301 : vector<1x64xf32> to vector<16x64xf32>
    %303 = arith.addf %300, %302 : vector<16x64xf32>
    %cst_90 = arith.constant 0.000000e+00 : f32
    %304 = vector.broadcast %cst_90 : f32 to vector<16x64xf32>
    %305 = arith.maximumf %303, %304 : vector<16x64xf32>
    %306 = vector.extract_strided_slice %176 {offsets = [64, 0], sizes = [64, 32], strides = [1, 1]} : vector<128x32xf32> to vector<64x32xf32>
    %cst_91 = arith.constant dense<0.000000e+00> : vector<16x32xf32>
    %307 = tpu.matmul %305, %306, %cst_91 {dimension_numbers = #tpu.dot_dimension_numbers<[1], [0], [0], [1], [0, 0, 1, 1], [], []>, precision = #tpu.contract_precision<fp32>} : vector<16x64xf32>, vector<64x32xf32>, vector<16x32xf32> -> vector<16x32xf32>
    %308 = vector.extract_strided_slice %178 {offsets = [6, 0], sizes = [1, 32], strides = [1, 1]} : vector<32x128xf32> to vector<1x32xf32>
    %309 = vector.broadcast %308 : vector<1x32xf32> to vector<16x32xf32>
    %310 = arith.addf %307, %309 : vector<16x32xf32>
    %311 = arith.addf %298, %310 : vector<16x32xf32>
    %312 = vector.extract_strided_slice %178 {offsets = [11, 0], sizes = [1, 32], strides = [1, 1]} : vector<32x128xf32> to vector<1x32xf32>
    %313 = vector.extract_strided_slice %178 {offsets = [12, 0], sizes = [1, 32], strides = [1, 1]} : vector<32x128xf32> to vector<1x32xf32>
    %cst_92 = arith.constant dense<0.000000e+00> : vector<16xf32>
    %314 = vector.multi_reduction <add>, %311, %cst_92 [1] : vector<16x32xf32> to vector<16xf32>
    %315 = vector.shape_cast %314 : vector<16xf32> to vector<16x1xf32>
    %cst_93 = arith.constant 3.200000e+01 : f32
    %316 = vector.broadcast %cst_93 : f32 to vector<16x1xf32>
    %317 = arith.divf %315, %316 : vector<16x1xf32>
    %318 = vector.broadcast %317 : vector<16x1xf32> to vector<16x32xf32>
    %319 = arith.subf %311, %318 : vector<16x32xf32>
    %320 = arith.mulf %319, %319 : vector<16x32xf32>
    %cst_94 = arith.constant dense<0.000000e+00> : vector<16xf32>
    %321 = vector.multi_reduction <add>, %320, %cst_94 [1] : vector<16x32xf32> to vector<16xf32>
    %322 = vector.shape_cast %321 : vector<16xf32> to vector<16x1xf32>
    %cst_95 = arith.constant 3.200000e+01 : f32
    %323 = vector.broadcast %cst_95 : f32 to vector<16x1xf32>
    %324 = arith.divf %322, %323 : vector<16x1xf32>
    %325 = vector.broadcast %317 : vector<16x1xf32> to vector<16x32xf32>
    %326 = arith.subf %311, %325 : vector<16x32xf32>
    %cst_96 = arith.constant 9.99999974E-6 : f32
    %327 = vector.broadcast %cst_96 : f32 to vector<16x1xf32>
    %328 = arith.addf %324, %327 : vector<16x1xf32>
    %329 = math.rsqrt %328 : vector<16x1xf32>
    %330 = vector.broadcast %329 : vector<16x1xf32> to vector<16x32xf32>
    %331 = arith.mulf %326, %330 : vector<16x32xf32>
    %332 = vector.broadcast %312 : vector<1x32xf32> to vector<16x32xf32>
    %333 = arith.mulf %331, %332 : vector<16x32xf32>
    %334 = vector.broadcast %313 : vector<1x32xf32> to vector<16x32xf32>
    %335 = arith.addf %333, %334 : vector<16x32xf32>
    %c0_97 = arith.constant 0 : index
    %c0_98 = arith.constant 0 : index
    %336 = vector.load %arg5[%c0_97, %c0_98] : memref<16x32xf32, #tpu.memory_space<vmem>>, vector<16x32xf32>
    tpu.vector_store %arg5[%c0_97, %c0_98], %335 {strides = array<i32>} : memref<16x32xf32, #tpu.memory_space<vmem>>, vector<16x32xf32>,
    return
  }
}

</mosaic_0001>

<bundles_post_ra>
// kernel: cyctr_forward.1
= control target key start
LH: loop header
LB: loop body
LE: loop exit
PB: predicated region body
PF: predicated region fallthrough
CT: control target
= control target key end

     0   :  { %vm93_vm0 = vcmask 261120   ;;  %s25951_s0 = inlined_call_operand.vmem [shape: f32[48,32], index: 0, kind: input, shape index: {}]   ;;  %s25952_s1 = inlined_call_operand.vmem [shape: f32[2,32,256], index: 1, kind: input, shape index: {}]   ;;  %s25953_s2 = inlined_call_operand.vmem [shape: f32[2,128,32], index: 2, kind: input, shape index: {}]   ;;  %s25954_s3 = inlined_call_operand.vmem [shape: f32[2,32,128], index: 3, kind: input, shape index: {}]   ;;  %s25955_s4 = inlined_call_operand.vmem [shape: f32[272,128], index: 4, kind: input, shape index: {}]   ;;  %s25956_s5 = inlined_call_operand.hbm [shape: f32[16,32], index: 5, kind: output, shape index: {}]  }
   0x1   :  { %v65_v0 = vld [vmem:[%s25952_s1] sm:$0xff]  ;;  %v67_v1 = vld [vmem:[%s25952_s1 + $0x10] sm:$0xff]  ;;  %v22_v8 = vld [vmem:[%s25951_s0 + $0x8] sm:$0xff] }
   0x2   :  { %v69_v2 = vld [vmem:[%s25952_s1 + $0x20] sm:$0xff]  ;;  %v101_v3 = vand.u32 4294901760, %v65_v0  ;;  %v104_v4 = vand.u32 4294901760, %v67_v1  ;;  %v71_v5 = vld [vmem:[%s25952_s1 + $0x30] sm:$0xff]  ;;  %v98_v11 = vsel %vm93_vm0, %v22_v8, 0 }
   0x3   :  { %v107_v6 = vand.u32 4294901760, %v69_v2  ;;  %v21_v7 = vld [vmem:[%s25951_s0] sm:$0xff]  ;;  %v110_v9 = vand.u32 4294901760, %v71_v5  ;;  %v22893_v14 = vand.u32 4294901760, %v98_v11 }
   0x4   :  { %v95_v10 = vsel %vm93_vm0, %v21_v7, 0  ;;  %v22889_v12 = vpack.c.bf16 %v104_v4, %v101_v3  ;;  %v191_v15 = vsub.f32 %v65_v0, %v101_v3 }
   0x5   :  { %v22891_v13 = vand.u32 4294901760, %v95_v10 }
   0x6   :  { %10 = vsyncpa [#allocation3], 0  ;;  %v22895_v16 = vpack.c.bf16 %v110_v9, %v107_v6  ;;  %v198_v17 = vsub.f32 %v67_v1, %v104_v4  ;;  %v205_v18 = vsub.f32 %v69_v2, %v107_v6  ;;  %v212_v19 = vsub.f32 %v71_v5, %v110_v9  ;;  %20281 = vmatprep.subr.bf16.mxu0 %v22889_v12  ;;  %v61_v49 = vld [vmem:[%s25954_s3] sm:$0xff]  ;;  %s22831_s7 = smov 96   ;;  %s22832_s8 = smov 16   ;;  %v22959_v3 = vld [vmem:[%s25955_s4 + $0xd8] sm:$0xff] }
   0x7   :  { %v170_v20 = vsub.f32 %v95_v10, %v22891_v13  ;;  %v180_v21 = vsub.f32 %v98_v11, %v22893_v14  ;;  %v192_v22 = vand.u32 4294901760, %v191_v15  ;;  %20283 = vmatpush3.bf16.msra.mxu0 %v22889_v12  ;;  %v89_v46 = vlaneseq  ;;  %s22833_s9 = smov 32   ;;  %s22834_s10 = smov 48   ;;  %v22967_v4 = vld [vmem:[%s25955_s4 + $0xe8] sm:$0xff]  ;;  %v22976_v5 = vld [vmem:[%s25955_s4 + $0xf8] sm:$0xff]  ;;  %v22998_v7 = vld [vmem:[%s25955_s4 + $0xd0] sm:$0xff] }
   0x8   :  { %v199_v23 = vand.u32 4294901760, %v198_v17  ;;  %v206_v24 = vand.u32 4294901760, %v205_v18  ;;  %v213_v25 = vand.u32 4294901760, %v212_v19  ;;  %20285 = vmatprep.subr.bf16.mxu0 %v22895_v16  ;;  %v20296_v42 = vpack.c.bf16 %v198_v17, %v191_v15  ;;  %s22835_s13 = smov 64   ;;  %v22985_v6 = vld [vmem:[%s25955_s4 + $0x108] sm:$0xff]  ;;  %v23005_v8 = vld [vmem:[%s25955_s4 + $0xe0] sm:$0xff] }
   0x9   :  { %v171_v26 = vand.u32 4294901760, %v170_v20  ;;  %v181_v27 = vand.u32 4294901760, %v180_v21  ;;  %v193_v28 = vsub.f32 %v191_v15, %v192_v22  ;;  %v20300_v43 = vpack.c.bf16 %v212_v19, %v205_v18  ;;  %v23012_v9 = vld [vmem:[%s25955_s4 + $0xf0] sm:$0xff]  ;;  %v23019_v10 = vld [vmem:[%s25955_s4 + $0x100] sm:$0xff] }
   0xa   :  { %v200_v29 = vsub.f32 %v198_v17, %v199_v23  ;;  %v207_v30 = vsub.f32 %v205_v18, %v206_v24  ;;  %v214_v31 = vsub.f32 %v212_v19, %v213_v25  ;;  %v20312_v44 = vpack.c.bf16 %v199_v23, %v192_v22  ;;  %v31_v19 = vld [vmem:[%s25955_s4 + $0x20] sm:$0xff]  ;;  %v32_v22 = vld [vmem:[%s25955_s4 + $0x28] sm:$0xff] }
   0xb   :  { %v172_v32 = vsub.f32 %v170_v20, %v171_v26  ;;  %v182_v33 = vsub.f32 %v180_v21, %v181_v27  ;;  %v194_v34 = vand.u32 4294901760, %v193_v28  ;;  %20287 = vmatpush3.bf16.msra.mxu0 %v22895_v16  ;;  %v20316_v45 = vpack.c.bf16 %v213_v25, %v206_v24 }
   0xc   :  { %v201_v35 = vand.u32 4294901760, %v200_v29  ;;  %v208_v36 = vand.u32 4294901760, %v207_v30  ;;  %v215_v37 = vand.u32 4294901760, %v214_v31  ;;  %v22917_v47 = vshrl.u32 %v89_v46, 7 }
   0xd   :  { %v173_v38 = vand.u32 4294901760, %v172_v32  ;;  %v183_v39 = vand.u32 4294901760, %v182_v33  ;;  %vm708_vm1 = vcmask 130048   ;;  %vm717_vm2 = vcmask 392192  }
   0xe   :  { %v20288_v40 = vpack.c.bf16 %v201_v35, %v194_v34  ;;  %v20292_v41 = vpack.c.bf16 %v215_v37, %v208_v36  ;;  %26124 = vst [vmem:[#allocation5_spill] sm:$0xff] %v22917_v47  ;;  %v22920_v48 = vsub.s32 0, %v22917_v47  ;;  %vm1302_vm3 = vcmask 523264  }
   0xf   :  { %17672 = vmatprep.mubr.f32.mxu0 %v173_v38  ;;  %vm4362_vm4 = vcmask 785408  }
  0x10   :  { %17673 = vmatmul.mubr.f32.vlgmr.msra.gmra.mrb[0].mxu0 %v183_v39  ;;  %20289 = vmatprep.subr.bf16.mxu0 %v20288_v40  ;;  %26125 = vst [vmem:[#allocation6_spill] sm:$0xff] %v22920_v48  ;;  %v92_v50 = vrot.slane %v61_v49, %v22920_v48 }
  0x11   :  { %20291 = vmatpush3.bf16.msra.mxu0 %v20288_v40  ;;  %17683 = vmatprep.mubr.f32.mxu0 %v22891_v13 }
  0x12   :  { %20293 = vmatprep.subr.bf16.mxu0 %v20292_v41 }
  0x15   :  { %20295 = vmatpush3.bf16.msra.mxu0 %v20292_v41 }
  0x16   :  { %20297 = vmatprep.subr.bf16.mxu0 %v20296_v42 }
  0x18   :  { %17684 = vmatmul.mubr.f32.vlgmr.msra.gmra.mrb[0].mxu0 %v22893_v14 }
  0x19   :  { %20299 = vmatpush3.bf16.msra.mxu0 %v20296_v42  ;;  %17694 = vmatprep.mubr.f32.mxu0 %v170_v20 }
  0x1a   :  { %20301 = vmatprep.subr.bf16.mxu0 %v20300_v43 }
  0x1d   :  { %20303 = vmatpush3.bf16.msra.mxu0 %v20300_v43  ;;  %v34_v43 = vld [vmem:[%s25955_s4 + $0x38] sm:$0xff] }
  0x1e   :  { %20305 = vmatprep.subr.bf16.mxu0 %v22889_v12 }
  0x20   :  { %17695 = vmatmul.mubr.f32.vlgmr.msra.gmra.mrb[0].mxu0 %v180_v21 }
  0x21   :  { %20307 = vmatpush3.bf16.msra.mxu0 %v22889_v12  ;;  %17705 = vmatprep.mubr.f32.mxu0 %v171_v26 }
  0x22   :  { %20309 = vmatprep.subr.bf16.mxu0 %v22895_v16 }
  0x25   :  { %20311 = vmatpush3.bf16.msra.mxu0 %v22895_v16 }
  0x26   :  { %20313 = vmatprep.subr.bf16.mxu0 %v20312_v44 }
  0x28   :  { %17706 = vmatmul.mubr.f32.vlgmr.msra.gmra.mrb[0].mxu0 %v181_v27 }
  0x29   :  { %20315 = vmatpush3.bf16.msra.mxu0 %v20312_v44  ;;  %17716 = vmatprep.mubr.f32.mxu0 %v22891_v13 }
  0x2a   :  { %20317 = vmatprep.subr.bf16.mxu0 %v20316_v45 }
  0x2d   :  { %20319 = vmatpush3.bf16.msra.mxu0 %v20316_v45 }
  0x2e   :  { %20321 = vmatprep.subr.bf16.mxu0 %v22889_v12 }
  0x30   :  { %17717 = vmatmul.mubr.f32.vlgmr.msra.gmra.mrb[0].mxu0 %v22893_v14 }
  0x31   :  { %20323 = vmatpush3.bf16.msra.mxu0 %v22889_v12  ;;  %17727 = vmatprep.mubr.f32.mxu0 %v22891_v13 }
  0x32   :  { %20325 = vmatprep.subr.bf16.mxu0 %v22895_v16 }
  0x35   :  { %20327 = vmatpush3.bf16.msra.mxu0 %v22895_v16 }
  0x38   :  { %17728 = vmatmul.mubr.f32.vlgmr.msra.gmra.mrb[0].mxu0 %v22893_v14 }
 0x10b   :  { %v17729_v51 = vpop.f32.mrb[0].mxu0 }
 0x10c   :  { %v618_v52 = vpop.f32.mrb[1].mxu0  ;;  %v22934_v56 = vadd.f32 %v17729_v51, %v92_v50 }
 0x10d   :  { %v22926_v53 = vadd.f32 %v618_v52, %v92_v50 }
 0x10e   :  { %v768_v37 = vsel %vm93_vm0, %v22934_v56, 0 }
 0x10f   :  { %630 = vrot.lane.b32.xlu0 %v22926_v53, %s22831_s7  ;;  %v766_v54 = vsel %vm93_vm0, %v22926_v53, 0  ;;  %v23055_v41 = vand.u32 4294901760, %v768_v37 }
 0x110   :  { %v22932_v55 = vand.u32 4294901760, %v766_v54 }
 0x111   :  { %v850_v51 = vsub.f32 %v768_v37, %v23055_v41 }
 0x112   :  { %v22937_v57 = vsub.f32 %v766_v54, %v22932_v55 }
 0x113   :  { %632 = vrot.lane.b32.xlu0 %v22934_v56, %s22831_s7 }
 0x114   :  { %v841_v58 = vand.u32 4294901760, %v22937_v57 }
 0x116   :  { %v842_v59 = vsub.f32 %v22937_v57, %v841_v58 }
 0x118   :  { %v843_v60 = vand.u32 4294901760, %v842_v59  ;;  %v33_v59 = vld [vmem:[%s25955_s4 + $0x30] sm:$0xff] }
 0x11a   :  { %17738 = vmatprep.mubr.f32.mxu1 %v843_v60 }
 0x181   :  { %v631_v61 = vpop.permute.xlu0 %630 }
 0x182   :  { %636 = vxpose.xlu1.b32.start [1/2] (short) (narrow) %v631_v61, 32 }
 0x185   :  { %v633_v62 = vpop.permute.xlu0 %632 }
 0x186   :  { %637 = vxpose.xlu1.b32.end [2/2] (short) (narrow) %v633_v62, 32 }
 0x202   :  { %v652_v63 = vpop.trf.xlu1 }
 0x203   :  { %672 = vrot.lane.b32.xlu0 %v652_v63, %s22832_s8 }
 0x206   :  { %v653_v0 = vpop.trf.xlu1 }
 0x207   :  { %684 = vrot.lane.b32.xlu0 %v652_v63, %s22833_s9  ;;  %674 = vrot.lane.b32.xlu1 %v653_v0, %s22832_s8 }
 0x20a   :  { %v22948_v1 = vpop.trf.xlu1 }
 0x20b   :  { %696 = vrot.lane.b32.xlu0 %v652_v63, %s22834_s10 }
 0x20e   :  { %v22951_v2 = vpop.trf.xlu1 }
 0x20f   :  { %686 = vrot.lane.b32.xlu0 %v653_v0, %s22833_s9  ;;  %702 = vrot.lane.b32.xlu1 %v22951_v2, %s22834_s10 }
 0x213   :  { %698 = vrot.lane.b32.xlu0 %v653_v0, %s22834_s10  ;;  %736 = vrot.lane.b32.xlu1 %v22959_v3, %s22835_s13 }
 0x217   :  { %676 = vrot.lane.b32.xlu0 %v22948_v1, %s22832_s8  ;;  %740 = vrot.lane.b32.xlu1 %v22967_v4, %s22835_s13 }
 0x21b   :  { %688 = vrot.lane.b32.xlu0 %v22948_v1, %s22833_s9  ;;  %744 = vrot.lane.b32.xlu1 %v22976_v5, %s22835_s13 }
 0x21f   :  { %748 = vrot.lane.b32.xlu1 %v22985_v6, %s22835_s13  ;;  %678 = vrot.lane.b32.xlu0 %v22951_v2, %s22832_s8 }
 0x223   :  { %690 = vrot.lane.b32.xlu0 %v22951_v2, %s22833_s9 }
 0x227   :  { %700 = vrot.lane.b32.xlu0 %v22948_v1, %s22834_s10 }
 0x22b   :  { %734 = vrot.lane.b32.xlu0 %v22998_v7, %s22835_s13 }
 0x22f   :  { %738 = vrot.lane.b32.xlu0 %v23005_v8, %s22835_s13 }
 0x233   :  { %742 = vrot.lane.b32.xlu0 %v23012_v9, %s22835_s13 }
 0x237   :  { %746 = vrot.lane.b32.xlu0 %v23019_v10, %s22835_s13 }
 0x275   :  { %v673_v11 = vpop.permute.xlu0 %672 }
 0x276   :  { %v709_v15 = vsel %vm708_vm1, %v652_v63, %v673_v11 }
 0x279   :  { %v685_v12 = vpop.permute.xlu0 %684  ;;  %v675_v13 = vpop.permute.xlu1 %674 }
 0x27a   :  { %v713_v16 = vsel %vm93_vm0, %v709_v15, %v685_v12  ;;  %v710_v21 = vsel %vm708_vm1, %v653_v0, %v675_v13  ;;  %v851_v12 = vand.u32 4294901760, %v850_v51 }
 0x27d   :  { %v697_v14 = vpop.permute.xlu0 %696 }
 0x27e   :  { %v718_v20 = vsel %vm717_vm2, %v713_v16, %v697_v14 }
 0x27f   :  { %v722_v23 = vmul.f32 %v718_v20, %v31_v19 }
 0x281   :  { %v687_v17 = vpop.permute.xlu0 %686  ;;  %v703_v18 = vpop.permute.xlu1 %702  ;;  %v771_v30 = vand.u32 4294901760, %v722_v23 }
 0x282   :  { %v714_v24 = vsel %vm93_vm0, %v710_v21, %v687_v17  ;;  %v852_v21 = vsub.f32 %v850_v51, %v851_v12 }
 0x283   :  { %v23053_v40 = vsub.f32 %v722_v23, %v771_v30 }
 0x285   :  { %v699_v25 = vpop.permute.xlu0 %698  ;;  %v23034_v26 = vpop.permute.xlu1 %736  ;;  %v862_v50 = vand.u32 4294901760, %v23053_v40 }
 0x286   :  { %26126 = vst [vmem:[#allocation7_spill] sm:$0xff] %v23034_v26  ;;  %v719_v27 = vsel %vm717_vm2, %v714_v24, %v699_v25  ;;  %v759_v28 = vmul.f32 %v22934_v56, %v23034_v26 }
 0x287   :  { %v723_v29 = vmul.f32 %v719_v27, %v32_v22  ;;  %v863_v11 = vsub.f32 %v23053_v40, %v862_v50 }
 0x288   :  { %1325 = vrot.lane.b32.xlu1 %v759_v28, %s22835_s13  ;;  %v853_v28 = vand.u32 4294901760, %v852_v21 }
 0x289   :  { %v774_v31 = vand.u32 4294901760, %v723_v29  ;;  %v677_v32 = vpop.permute.xlu0 %676  ;;  %v23040_v33 = vpop.permute.xlu1 %740  ;;  %v864_v20 = vand.u32 4294901760, %v863_v11 }
 0x28a   :  { %26127 = vst [vmem:[#allocation8_spill] sm:$0xff] %v23040_v33  ;;  %v761_v34 = vmul.f32 %v22934_v56, %v23040_v33  ;;  %v711_v52 = vsel %vm708_vm1, %v22948_v1, %v677_v32 }
 0x28b   :  { %v23044_v35 = vpack.c.bf16 %v774_v31, %v771_v30  ;;  %v23051_v38 = vsub.f32 %v723_v29, %v774_v31 }
 0x28c   :  { %1329 = vrot.lane.b32.xlu1 %v761_v34, %s22835_s13 }
 0x28d   :  { %v689_v36 = vpop.permute.xlu0 %688  ;;  %20329 = vmatprep.subr.bf16.mxu1 %v23044_v35  ;;  %v869_v45 = vand.u32 4294901760, %v23051_v38  ;;  %v20344_v34 = vpack.c.bf16 %v23051_v38, %v23053_v40 }
 0x28e   :  { %20331 = vmatpush3.bf16.msra.mxu1 %v23044_v35  ;;  %v715_v60 = vsel %vm93_vm0, %v711_v52, %v689_v36 }
 0x28f   :  { %v870_v62 = vsub.f32 %v23051_v38, %v869_v45  ;;  %v20360_v37 = vpack.c.bf16 %v869_v45, %v862_v50 }
 0x291   :  { %v679_v39 = vpop.permute.xlu0 %678  ;;  %v871_v15 = vand.u32 4294901760, %v870_v62 }
 0x292   :  { %v712_v42 = vsel %vm708_vm1, %v22951_v2, %v679_v39 }
 0x293   :  { %v20336_v23 = vpack.c.bf16 %v871_v15, %v864_v20 }
 0x295   :  { %v691_v44 = vpop.permute.xlu0 %690 }
 0x296   :  { %v716_v46 = vsel %vm93_vm0, %v712_v42, %v691_v44 }
 0x297   :  { %v721_v49 = vsel %vm717_vm2, %v716_v46, %v703_v18 }
 0x298   :  { %v725_v54 = vmul.f32 %v721_v49, %v34_v43 }
 0x299   :  { %v701_v61 = vpop.permute.xlu0 %700 }
 0x29a   :  { %v780_v63 = vand.u32 4294901760, %v725_v54  ;;  %v720_v0 = vsel %vm717_vm2, %v715_v60, %v701_v61 }
 0x29b   :  { %v724_v2 = vmul.f32 %v720_v0, %v33_v59 }
 0x29c   :  { %v882_v13 = vsub.f32 %v725_v54, %v780_v63 }
 0x29d   :  { %v777_v14 = vand.u32 4294901760, %v724_v2  ;;  %v23076_v1 = vpop.permute.xlu0 %734 }
 0x29e   :  { %26128 = vst [vmem:[#allocation9_spill] sm:$0xff] %v23076_v1  ;;  %v758_v16 = vmul.f32 %v22926_v53, %v23076_v1  ;;  %v883_v17 = vand.u32 4294901760, %v882_v13 }
 0x29f   :  { %v20332_v18 = vpack.c.bf16 %v780_v63, %v777_v14  ;;  %v875_v19 = vsub.f32 %v724_v2, %v777_v14 }
 0x2a0   :  { %1323 = vrot.lane.b32.xlu0 %v758_v16, %s22835_s13  ;;  %v884_v25 = vsub.f32 %v882_v13, %v883_v17 }
 0x2a1   :  { %v23081_v22 = vpop.permute.xlu0 %738  ;;  %20333 = vmatprep.subr.bf16.mxu1 %v20332_v18  ;;  %v876_v24 = vand.u32 4294901760, %v875_v19  ;;  %v20348_v36 = vpack.c.bf16 %v882_v13, %v875_v19 }
 0x2a2   :  { %26129 = vst [vmem:[#allocation10_spill] sm:$0xff] %v23081_v22  ;;  %v760_v27 = vmul.f32 %v22926_v53, %v23081_v22  ;;  %20335 = vmatpush3.bf16.msra.mxu1 %v20332_v18  ;;  %v885_v31 = vand.u32 4294901760, %v884_v25  ;;  %v36_v25 = vld [vmem:[%s25955_s4 + $0x48] sm:$0xff] }
 0x2a3   :  { %20337 = vmatprep.subr.bf16.mxu1 %v20336_v23  ;;  %v877_v29 = vsub.f32 %v875_v19, %v876_v24  ;;  %v20364_v38 = vpack.c.bf16 %v883_v17, %v876_v24 }
 0x2a4   :  { %1327 = vrot.lane.b32.xlu0 %v760_v27, %s22835_s13 }
 0x2a5   :  { %17739 = vmatmul.mubr.f32.vlgmr.msra.gmra.mrb[0].mxu1 %v853_v28  ;;  %v878_v30 = vand.u32 4294901760, %v877_v29  ;;  %v23105_v40 = vpop.permute.xlu0 %742  ;;  %v35_v29 = vld [vmem:[%s25955_s4 + $0x40] sm:$0xff] }
 0x2a6   :  { %20339 = vmatpush3.bf16.msra.mxu1 %v20336_v23  ;;  %17749 = vmatprep.mubr.f32.mxu1 %v22932_v55  ;;  %26132 = vst [vmem:[#allocation13_spill] sm:$0xff] %v23105_v40 }
 0x2a7   :  { %v20340_v32 = vpack.c.bf16 %v885_v31, %v878_v30 }
 0x2a9   :  { %20341 = vmatprep.subr.bf16.mxu1 %v20340_v32  ;;  %v23107_v44 = vpop.permute.xlu0 %746 }
 0x2aa   :  { %20343 = vmatpush3.bf16.msra.mxu1 %v20340_v32  ;;  %26133 = vst [vmem:[#allocation14_spill] sm:$0xff] %v23107_v44 }
 0x2ab   :  { %20345 = vmatprep.subr.bf16.mxu1 %v20344_v34 }
 0x2ad   :  { %17750 = vmatmul.mubr.f32.vlgmr.msra.gmra.mrb[0].mxu1 %v23055_v41 }
 0x2ae   :  { %20347 = vmatpush3.bf16.msra.mxu1 %v20344_v34  ;;  %17760 = vmatprep.mubr.f32.mxu1 %v22937_v57  ;;  %v23101_v57 = vpop.permute.xlu1 %744 }
 0x2af   :  { %20349 = vmatprep.subr.bf16.mxu1 %v20348_v36  ;;  %26130 = vst [vmem:[#allocation11_spill] sm:$0xff] %v23101_v57 }
 0x2b2   :  { %20351 = vmatpush3.bf16.msra.mxu1 %v20348_v36 }
 0x2b3   :  { %20353 = vmatprep.subr.bf16.mxu1 %v23044_v35 }
 0x2b5   :  { %17761 = vmatmul.mubr.f32.vlgmr.msra.gmra.mrb[0].mxu1 %v850_v51 }
 0x2b6   :  { %20355 = vmatpush3.bf16.msra.mxu1 %v23044_v35  ;;  %17771 = vmatprep.mubr.f32.mxu1 %v841_v58  ;;  %v23103_v58 = vpop.permute.xlu1 %748 }
 0x2b7   :  { %20357 = vmatprep.subr.bf16.mxu1 %v20332_v18  ;;  %26131 = vst [vmem:[#allocation12_spill] sm:$0xff] %v23103_v58 }
 0x2ba   :  { %20359 = vmatpush3.bf16.msra.mxu1 %v20332_v18 }
 0x2bb   :  { %20361 = vmatprep.subr.bf16.mxu1 %v20360_v37 }
 0x2bd   :  { %17772 = vmatmul.mubr.f32.vlgmr.msra.gmra.mrb[0].mxu1 %v851_v12 }
 0x2be   :  { %20363 = vmatpush3.bf16.msra.mxu1 %v20360_v37  ;;  %17782 = vmatprep.mubr.f32.mxu1 %v22932_v55  ;;  %v763_v37 = vmul.f32 %v22934_v56, %v23101_v57 }
 0x2bf   :  { %20365 = vmatprep.subr.bf16.mxu1 %v20364_v38 }
 0x2c2   :  { %20367 = vmatpush3.bf16.msra.mxu1 %v20364_v38  ;;  %v765_v38 = vmul.f32 %v22934_v56, %v23103_v58 }
 0x2c3   :  { %20369 = vmatprep.subr.bf16.mxu1 %v23044_v35 }
 0x2c5   :  { %17783 = vmatmul.mubr.f32.vlgmr.msra.gmra.mrb[0].mxu1 %v23055_v41 }
 0x2c6   :  { %20371 = vmatpush3.bf16.msra.mxu1 %v23044_v35  ;;  %17793 = vmatprep.mubr.f32.mxu1 %v22932_v55 }
 0x2c7   :  { %20373 = vmatprep.subr.bf16.mxu1 %v20332_v18 }
 0x2ca   :  { %20375 = vmatpush3.bf16.msra.mxu1 %v20332_v18 }
 0x2cd   :  { %17794 = vmatmul.mubr.f32.vlgmr.msra.gmra.mrb[0].mxu1 %v23055_v41 }
 0x2fa   :  { %v1326_v39 = vpop.permute.xlu1 %1325 }
 0x2fb   :  { %v1357_v42 = vand.u32 4294901760, %v1326_v39 }
 0x2fd   :  { %v1455_v45 = vsub.f32 %v1326_v39, %v1357_v42  ;;  %v762_v39 = vmul.f32 %v22926_v53, %v23105_v40 }
 0x2fe   :  { %v1330_v43 = vpop.permute.xlu1 %1329 }
 0x2ff   :  { %v1363_v46 = vand.u32 4294901760, %v1330_v43  ;;  %v1456_v35 = vand.u32 4294901760, %v1455_v45 }
 0x301   :  { %v1469_v55 = vsub.f32 %v1330_v43, %v1363_v46  ;;  %v1457_v52 = vsub.f32 %v1455_v45, %v1456_v35 }
 0x303   :  { %v1470_v59 = vand.u32 4294901760, %v1469_v55  ;;  %v1458_v12 = vand.u32 4294901760, %v1457_v52 }
 0x305   :  { %v1471_v13 = vsub.f32 %v1469_v55, %v1470_v59 }
 0x307   :  { %v1472_v21 = vand.u32 4294901760, %v1471_v13 }
 0x312   :  { %v1324_v49 = vpop.permute.xlu0 %1323 }
 0x313   :  { %v1354_v50 = vand.u32 4294901760, %v1324_v49 }
 0x315   :  { %v23109_v51 = vpack.c.bf16 %v1357_v42, %v1354_v50  ;;  %v1448_v41 = vsub.f32 %v1324_v49, %v1354_v50  ;;  %v764_v42 = vmul.f32 %v22926_v53, %v23107_v44  ;;  %v1934_v53 = vand.u32 4294901760, %v22998_v7 }
 0x316   :  { %v1328_v54 = vpop.permute.xlu0 %1327 }
 0x317   :  { %v1449_v60 = vand.u32 4294901760, %v1448_v41  ;;  %v1360_v61 = vand.u32 4294901760, %v1328_v54  ;;  %20377 = vmatprep.subr.bf16.mxu1 %v23109_v51  ;;  %v23112_v62 = vpack.c.bf16 %v1455_v45, %v1448_v41 }
 0x318   :  { %20379 = vmatpush3.bf16.msra.mxu1 %v23109_v51 }
 0x319   :  { %v23115_v63 = vpack.c.bf16 %v1363_v46, %v1360_v61  ;;  %v1462_v0 = vsub.f32 %v1328_v54, %v1360_v61  ;;  %v1450_v2 = vsub.f32 %v1448_v41, %v1449_v60  ;;  %v23117_v11 = vpack.c.bf16 %v1456_v35, %v1449_v60 }
 0x31b   :  { %v1463_v14 = vand.u32 4294901760, %v1462_v0  ;;  %20381 = vmatprep.subr.bf16.mxu1 %v23115_v63  ;;  %v1451_v15 = vand.u32 4294901760, %v1450_v2  ;;  %v23120_v16 = vpack.c.bf16 %v1469_v55, %v1462_v0 }
 0x31c   :  { %20383 = vmatpush3.bf16.msra.mxu1 %v23115_v63 }
 0x31d   :  { %v20392_v17 = vpack.c.bf16 %v1458_v12, %v1451_v15  ;;  %v1464_v18 = vsub.f32 %v1462_v0, %v1463_v14  ;;  %v23123_v19 = vpack.c.bf16 %v1470_v59, %v1463_v14  ;;  %v1937_v59 = vand.u32 4294901760, %v22959_v3 }
 0x31f   :  { %20393 = vmatprep.subr.bf16.mxu0 %v20392_v17  ;;  %v1465_v20 = vand.u32 4294901760, %v1464_v18 }
 0x320   :  { %20395 = vmatpush3.bf16.msra.mxu0 %v20392_v17 }
 0x321   :  { %v20396_v23 = vpack.c.bf16 %v1472_v21, %v1465_v20  ;;  %v23162_v20 = vpack.c.bf16 %v1937_v59, %v1934_v53 }
 0x323   :  { %20397 = vmatprep.subr.bf16.mxu0 %v20396_v23  ;;  %26134 = vst [vmem:[#allocation15_spill] sm:$0xff] %v23162_v20 }
 0x324   :  { %20399 = vmatpush3.bf16.msra.mxu0 %v20396_v23 }
 0x3a0   :  { %v17795_v24 = vpop.f32.mrb[0].mxu1 }
 0x3a1   :  { %v1299_v27 = vmul.f32 0.35355338, %v17795_v24  ;;  %v1288_v28 = vpop.f32.mrb[1].mxu1 }
 0x3a2   :  { %v1298_v30 = vmul.f32 0.35355338, %v1288_v28 }
 0x3a3   :  { %v1301_v31 = vadd.f32 %v1299_v27, %v36_v25 }
 0x3a4   :  { %v1300_v32 = vadd.f32 %v1298_v30, %v35_v29 }
 0x3a5   :  { %v1306_v34 = vsel %vm1302_vm3, %v1301_v31, -inf }
 0x3a6   :  { %1307 = vmax.xlane.f32.xlu1 %v1306_v34  ;;  %v1303_v36 = vsel %vm1302_vm3, %v1300_v32, -inf }
 0x3a7   :  { %1304 = vmax.xlane.f32.xlu0 %v1303_v36 }
 0x3b7   :  { %1333 = vrot.lane.b32.xlu1 %v763_v37, %s22835_s13 }
 0x3bb   :  { %1337 = vrot.lane.b32.xlu1 %v765_v38, %s22835_s13 }
 0x3bd   :  { %1331 = vrot.lane.b32.xlu0 %v762_v39, %s22835_s13 }
 0x3c1   :  { %1335 = vrot.lane.b32.xlu0 %v764_v42, %s22835_s13 }
 0x433   :  { %v1308_v43 = vpop.xlane.xlu1 %1307 }
 0x434   :  { %v1310_v45 = vsub.f32 %v1301_v31, %v1308_v43  ;;  %v1305_v46 = vpop.xlane.xlu0 %1304 }
 0x435   :  { %v1309_v35 = vsub.f32 %v1300_v32, %v1305_v46 }
 0x436   :  { %v1313_v49 = vmul.f32 1.442695, %v1310_v45 }
 0x437   :  { %v1311_v55 = vmul.f32 1.442695, %v1309_v35  ;;  %v1334_v50 = vpop.permute.xlu1 %1333 }
 0x438   :  { %22713 = vpow2.f32 %v1313_v49  ;;  %v1369_v56 = vand.u32 4294901760, %v1334_v50  ;;  %v1332_v41 = vpop.permute.xlu0 %1331 }
 0x439   :  { %22715 = vpow2.f32 %v1311_v55  ;;  %v1366_v52 = vand.u32 4294901760, %v1332_v41 }
 0x43a   :  { %v23145_v54 = vsub.f32 %v1334_v50, %v1369_v56 }
 0x43b   :  { %v23149_v60 = vpack.c.bf16 %v1369_v56, %v1366_v52  ;;  %v23151_v61 = vsub.f32 %v1332_v41, %v1366_v52  ;;  %v1338_v0 = vpop.permute.xlu1 %1337  ;;  %v1943_v56 = vand.u32 4294901760, %v22967_v4  ;;  %v1940_v41 = vand.u32 4294901760, %v23005_v8 }
 0x43c   :  { %v1484_v2 = vand.u32 4294901760, %v23145_v54  ;;  %v1375_v12 = vand.u32 4294901760, %v1338_v0  ;;  %v1336_v13 = vpop.permute.xlu0 %1335 }
 0x43d   :  { %v1477_v14 = vand.u32 4294901760, %v23151_v61  ;;  %v1372_v15 = vand.u32 4294901760, %v1336_v13  ;;  %20385 = vmatprep.subr.bf16.mxu1 %v23149_v60 }
 0x43e   :  { %v23156_v17 = vsub.f32 %v1338_v0, %v1375_v12  ;;  %20387 = vmatpush3.bf16.msra.mxu1 %v23149_v60  ;;  %v1485_v18 = vsub.f32 %v23145_v54, %v1484_v2  ;;  %v23206_v0 = vsub.f32 %v22959_v3, %v1937_v59  ;;  %v23222_v3 = vsub.f32 %v23005_v8, %v1940_v41 }
 0x43f   :  { %v23164_v21 = vpack.c.bf16 %v1375_v12, %v1372_v15  ;;  %v23166_v23 = vsub.f32 %v1336_v13, %v1372_v15  ;;  %v1478_v24 = vsub.f32 %v23151_v61, %v1477_v14  ;;  %v23209_v12 = vsub.f32 %v22998_v7, %v1934_v53 }
 0x440   :  { %v1498_v25 = vand.u32 4294901760, %v23156_v17  ;;  %v1486_v27 = vand.u32 4294901760, %v1485_v18  ;;  %v23215_v15 = vsub.f32 %v22967_v4, %v1943_v56  ;;  %v1949_v18 = vand.u32 4294901760, %v22976_v5 }
 0x441   :  { %v1491_v28 = vand.u32 4294901760, %v23166_v23  ;;  %20389 = vmatprep.subr.bf16.mxu1 %v23164_v21  ;;  %v1479_v29 = vand.u32 4294901760, %v1478_v24  ;;  %v1946_v7 = vand.u32 4294901760, %v23012_v9  ;;  %v2036_v4 = vand.u32 4294901760, %v23206_v0 }
 0x442   :  { %v22714_v30 = vpop.eup %22713  ;;  %20391 = vmatpush3.bf16.msra.mxu1 %v23164_v21  ;;  %v1499_v31 = vsub.f32 %v23156_v17, %v1498_v25  ;;  %v2029_v53 = vand.u32 4294901760, %v23209_v12  ;;  %v23232_v8 = vsub.f32 %v22976_v5, %v1949_v18 }
 0x443   :  { %v22716_v32 = vpop.eup %22715  ;;  %v1351_v34 = vsel %vm1302_vm3, %v22714_v30, 0  ;;  %v20400_v36 = vpack.c.bf16 %v1486_v27, %v1479_v29  ;;  %v1492_v37 = vsub.f32 %v23166_v23, %v1491_v28  ;;  %20473 = vmatprep.subr.bf16.mxu1 %v23162_v20  ;;  %v23219_v27 = vpack.c.bf16 %v1943_v56, %v1940_v41 }
 0x444   :  { %v23183_v38 = vand.u32 4294901760, %v1351_v34  ;;  %v1348_v39 = vsel %vm1302_vm3, %v22716_v32, 0  ;;  %v1500_v42 = vand.u32 4294901760, %v1499_v31  ;;  %v2050_v29 = vand.u32 4294901760, %v23215_v15 }
 0x445   :  { %v23186_v43 = vand.u32 4294901760, %v1348_v39  ;;  %20401 = vmatprep.subr.bf16.mxu0 %v20400_v36  ;;  %v1493_v45 = vand.u32 4294901760, %v1492_v37  ;;  %26135 = vst [vmem:[#allocation16_spill] sm:$0xff] %v23219_v27  ;;  %v1955_v30 = vand.u32 4294901760, %v22985_v6  ;;  %v2043_v31 = vand.u32 4294901760, %v23222_v3 }
 0x446   :  { %v23189_v46 = vsub.f32 %v1351_v34, %v23183_v38  ;;  %20403 = vmatpush3.bf16.msra.mxu0 %v20400_v36  ;;  %v23239_v32 = vpack.c.bf16 %v1949_v18, %v1946_v7  ;;  %v23242_v34 = vsub.f32 %v23012_v9, %v1946_v7  ;;  %v1952_v36 = vand.u32 4294901760, %v23019_v10 }
 0x447   :  { %17831 = vmatprep.mubr.f32.mxu0 %v23186_v43  ;;  %v20404_v35 = vpack.c.bf16 %v1500_v42, %v1493_v45  ;;  %v23193_v49 = vsub.f32 %v1348_v39, %v23186_v43  ;;  %v2037_v5 = vsub.f32 %v23206_v0, %v2036_v4  ;;  %v2030_v37 = vsub.f32 %v23209_v12, %v2029_v53 }
 0x448   :  { %v23196_v55 = vand.u32 4294901760, %v23189_v46  ;;  %26136 = vst [vmem:[#allocation17_spill] sm:$0xff] %v23239_v32  ;;  %v2051_v9 = vsub.f32 %v23215_v15, %v2050_v29  ;;  %v2064_v39 = vand.u32 4294901760, %v23232_v8  ;;  %v23258_v42 = vsub.f32 %v22985_v6, %v1955_v30 }
 0x449   :  { %20405 = vmatprep.subr.bf16.mxu0 %v20404_v35  ;;  %v23199_v50 = vand.u32 4294901760, %v23193_v49  ;;  %v2044_v45 = vsub.f32 %v23222_v3, %v2043_v31  ;;  %v23267_v56 = vpack.c.bf16 %v1955_v30, %v1952_v36  ;;  %v23270_v41 = vsub.f32 %v23019_v10, %v1952_v36 }
 0x44a   :  { %20407 = vmatpush3.bf16.msra.mxu0 %v20404_v35  ;;  %v1439_v52 = vsub.f32 %v23189_v46, %v23196_v55  ;;  %v2057_v35 = vand.u32 4294901760, %v23242_v34  ;;  %v2038_v6 = vand.u32 4294901760, %v2037_v5  ;;  %v2078_v18 = vand.u32 4294901760, %v23258_v42 }
 0x44b   :  { %20409 = vmatprep.subr.bf16.mxu0 %v23112_v62  ;;  %v1429_v13 = vsub.f32 %v23193_v49, %v23199_v50  ;;  %26137 = vst [vmem:[#allocation18_spill] sm:$0xff] %v23267_v56  ;;  %v2045_v7 = vand.u32 4294901760, %v2044_v45  ;;  %v2071_v30 = vand.u32 4294901760, %v23270_v41 }
 0x44c   :  { %v1440_v59 = vand.u32 4294901760, %v1439_v52  ;;  %v2031_v52 = vand.u32 4294901760, %v2030_v37  ;;  %v2058_v10 = vsub.f32 %v23242_v34, %v2057_v35  ;;  %v2079_v36 = vsub.f32 %v23258_v42, %v2078_v18 }
 0x44d   :  { %17832 = vmatmul.mubr.f32.vlgmr.msra.gmra.mrb[2].mxu0 %v23183_v38  ;;  %v1430_v24 = vand.u32 4294901760, %v1429_v13  ;;  %v2052_v13 = vand.u32 4294901760, %v2051_v9  ;;  %v2072_v9 = vsub.f32 %v23270_v41, %v2071_v30 }
 0x44e   :  { %20411 = vmatpush3.bf16.msra.mxu0 %v23112_v62  ;;  %17850 = vmatprep.mubr.f32.mxu0 %v23193_v49  ;;  %v20416_v62 = vpack.c.bf16 %v23145_v54, %v23151_v61  ;;  %v2059_v37 = vand.u32 4294901760, %v2058_v10  ;;  %v2080_v45 = vand.u32 4294901760, %v2079_v36  ;;  %v23399_v54 = vpack.c.bf16 %v2064_v39, %v2057_v35  ;;  %v73_v61 = vld [vmem:[%s25953_s2] sm:$0xff] }
 0x44f   :  { %17812 = vmatprep.mubr.f32.mxu1 %v1430_v24  ;;  %20413 = vmatprep.subr.bf16.mxu0 %v23120_v16 }
 0x450   :  { %17813 = vmatmul.mubr.f32.vlgmr.msra.gmra.mrb[2].mxu1 %v1440_v59  ;;  %26148 = vst [vmem:[#allocation29_spill] sm:$0xff] %v23399_v54 }
 0x451   :  { %20475 = vmatpush3.bf16.msra.mxu1 %v23162_v20  ;;  %17926 = vmatprep.mubr.f32.mxu1 %v1430_v24  ;;  %v2065_v24 = vsub.f32 %v23232_v8, %v2064_v39 }
 0x452   :  { %20415 = vmatpush3.bf16.msra.mxu0 %v23120_v16  ;;  %20477 = vmatprep.subr.bf16.mxu1 %v23219_v27  ;;  %v20420_v16 = vpack.c.bf16 %v23156_v17, %v23166_v23  ;;  %v2530_v17 = vand.u32 4294901760, %v73_v61  ;;  %v76_v23 = vld [vmem:[%s25953_s2 + $0x18] sm:$0xff] }
 0x453   :  { %20417 = vmatprep.subr.bf16.mxu0 %v20416_v62  ;;  %v2066_v5 = vand.u32 4294901760, %v2065_v24  ;;  %v23327_v24 = vpack.c.bf16 %v23215_v15, %v23222_v3 }
 0x455   :  { %20479 = vmatpush3.bf16.msra.mxu1 %v23219_v27  ;;  %26143 = vst [vmem:[#allocation24_spill] sm:$0xff] %v23327_v24 }
 0x456   :  { %20419 = vmatpush3.bf16.msra.mxu0 %v20416_v62  ;;  %20481 = vmatprep.subr.bf16.mxu1 %v23239_v32  ;;  %v23284_v62 = vpack.c.bf16 %v2038_v6, %v2031_v52  ;;  %v2073_v6 = vand.u32 4294901760, %v2072_v9  ;;  %v23304_v52 = vpack.c.bf16 %v2066_v5, %v2059_v37 }
 0x457   :  { %20421 = vmatprep.subr.bf16.mxu0 %v20420_v16 }
 0x458   :  { %26138 = vst [vmem:[#allocation19_spill] sm:$0xff] %v23284_v62  ;;  %26140 = vst [vmem:[#allocation21_spill] sm:$0xff] %v23304_v52 }
 0x459   :  { %20483 = vmatpush3.bf16.msra.mxu1 %v23239_v32 }
 0x45a   :  { %20423 = vmatpush3.bf16.msra.mxu0 %v20420_v16  ;;  %20485 = vmatprep.subr.bf16.mxu1 %v23267_v56  ;;  %v23296_v16 = vpack.c.bf16 %v2052_v13, %v2045_v7  ;;  %v23319_v13 = vpack.c.bf16 %v23206_v0, %v23209_v12  ;;  %v23342_v7 = vpack.c.bf16 %v23232_v8, %v23242_v34 }
 0x45b   :  { %20425 = vmatprep.subr.bf16.mxu0 %v23109_v51 }
 0x45c   :  { %26139 = vst [vmem:[#allocation20_spill] sm:$0xff] %v23296_v16  ;;  %26142 = vst [vmem:[#allocation23_spill] sm:$0xff] %v23319_v13 }
 0x45d   :  { %20487 = vmatpush3.bf16.msra.mxu1 %v23267_v56  ;;  %17851 = vmatmul.mubr.f32.vlgmr.msra.gmra.mrb[2].mxu0 %v23189_v46  ;;  %26144 = vst [vmem:[#allocation25_spill] sm:$0xff] %v23342_v7 }
 0x45e   :  { %20427 = vmatpush3.bf16.msra.mxu0 %v23109_v51  ;;  %17869 = vmatprep.mubr.f32.mxu0 %v23199_v50 }
 0x45f   :  { %20429 = vmatprep.subr.bf16.mxu0 %v23115_v63  ;;  %20489 = vmatprep.subr.bf16.mxu1 %v23284_v62 }
 0x460   :  { %17927 = vmatmul.mubr.f32.vlgmr.msra.gmra.mrb[4].mxu1 %v1440_v59  ;;  %v23310_v59 = vpack.c.bf16 %v2080_v45, %v2073_v6 }
 0x461   :  { %20491 = vmatpush3.bf16.msra.mxu1 %v23284_v62  ;;  %17945 = vmatprep.mubr.f32.mxu1 %v23186_v43 }
 0x462   :  { %20431 = vmatpush3.bf16.msra.mxu0 %v23115_v63  ;;  %20493 = vmatprep.subr.bf16.mxu1 %v23296_v16  ;;  %26141 = vst [vmem:[#allocation22_spill] sm:$0xff] %v23310_v59 }
 0x463   :  { %20433 = vmatprep.subr.bf16.mxu0 %v23149_v60 }
 0x465   :  { %20495 = vmatpush3.bf16.msra.mxu1 %v23296_v16 }
 0x466   :  { %20435 = vmatpush3.bf16.msra.mxu0 %v23149_v60  ;;  %20497 = vmatprep.subr.bf16.mxu1 %v23304_v52 }
 0x467   :  { %20437 = vmatprep.subr.bf16.mxu0 %v23164_v21 }
 0x469   :  { %20499 = vmatpush3.bf16.msra.mxu1 %v23304_v52 }
 0x46a   :  { %20439 = vmatpush3.bf16.msra.mxu0 %v23164_v21  ;;  %20501 = vmatprep.subr.bf16.mxu1 %v23310_v59 }
 0x46b   :  { %20441 = vmatprep.subr.bf16.mxu0 %v23117_v11 }
 0x46d   :  { %20503 = vmatpush3.bf16.msra.mxu1 %v23310_v59  ;;  %17870 = vmatmul.mubr.f32.vlgmr.msra.gmra.mrb[2].mxu0 %v23196_v55 }
 0x46e   :  { %20443 = vmatpush3.bf16.msra.mxu0 %v23117_v11  ;;  %17888 = vmatprep.mubr.f32.mxu0 %v23186_v43  ;;  %v20448_v11 = vpack.c.bf16 %v1484_v2, %v1477_v14  ;;  %v74_v2 = vld [vmem:[%s25953_s2 + $0x8] sm:$0xff]  ;;  %v75_v14 = vld [vmem:[%s25953_s2 + $0x10] sm:$0xff] }
 0x46f   :  { %20445 = vmatprep.subr.bf16.mxu0 %v23123_v19  ;;  %20505 = vmatprep.subr.bf16.mxu1 %v23319_v13 }
 0x470   :  { %17946 = vmatmul.mubr.f32.vlgmr.msra.gmra.mrb[4].mxu1 %v23183_v38 }
 0x471   :  { %20507 = vmatpush3.bf16.msra.mxu1 %v23319_v13  ;;  %17964 = vmatprep.mubr.f32.mxu1 %v23193_v49  ;;  %v20452_v49 = vpack.c.bf16 %v1498_v25, %v1491_v28  ;;  %v2536_v25 = vand.u32 4294901760, %v75_v14  ;;  %v2539_v28 = vand.u32 4294901760, %v76_v23 }
 0x472   :  { %20447 = vmatpush3.bf16.msra.mxu0 %v23123_v19  ;;  %20509 = vmatprep.subr.bf16.mxu1 %v23327_v24  ;;  %v23352_v19 = vpack.c.bf16 %v23258_v42, %v23270_v41 }
 0x473   :  { %20449 = vmatprep.subr.bf16.mxu0 %v20448_v11  ;;  %v2634_v3 = vsub.f32 %v75_v14, %v2536_v25 }
 0x474   :  { %26145 = vst [vmem:[#allocation26_spill] sm:$0xff] %v23352_v19 }
 0x475   :  { %20511 = vmatpush3.bf16.msra.mxu1 %v23327_v24  ;;  %v2635_v8 = vand.u32 4294901760, %v2634_v3 }
 0x476   :  { %20451 = vmatpush3.bf16.msra.mxu0 %v20448_v11  ;;  %20513 = vmatprep.subr.bf16.mxu1 %v23342_v7 }
 0x477   :  { %20453 = vmatprep.subr.bf16.mxu0 %v20452_v49  ;;  %v2636_v39 = vsub.f32 %v2634_v3, %v2635_v8 }
 0x479   :  { %20515 = vmatpush3.bf16.msra.mxu1 %v23342_v7  ;;  %v2637_v35 = vand.u32 4294901760, %v2636_v39  ;;  %v23_v39 = vld [vmem:[%s25951_s0 + $0x10] sm:$0xff] }
 0x47a   :  { %20455 = vmatpush3.bf16.msra.mxu0 %v20452_v49  ;;  %20517 = vmatprep.subr.bf16.mxu1 %v23352_v19 }
 0x47b   :  { %20457 = vmatprep.subr.bf16.mxu0 %v23109_v51 }
 0x47d   :  { %20519 = vmatpush3.bf16.msra.mxu1 %v23352_v19  ;;  %17889 = vmatmul.mubr.f32.vlgmr.msra.gmra.mrb[2].mxu0 %v23183_v38 }
 0x47e   :  { %20459 = vmatpush3.bf16.msra.mxu0 %v23109_v51  ;;  %17907 = vmatprep.mubr.f32.mxu0 %v23186_v43  ;;  %v23380_v51 = vpack.c.bf16 %v2036_v4, %v2029_v53  ;;  %v2641_v4 = vsub.f32 %v76_v23, %v2539_v28 }
 0x47f   :  { %20461 = vmatprep.subr.bf16.mxu0 %v23115_v63  ;;  %20521 = vmatprep.subr.bf16.mxu1 %v23162_v20 }
 0x480   :  { %17965 = vmatmul.mubr.f32.vlgmr.msra.gmra.mrb[4].mxu1 %v23189_v46  ;;  %26146 = vst [vmem:[#allocation27_spill] sm:$0xff] %v23380_v51  ;;  %v2620_v46 = vsub.f32 %v73_v61, %v2530_v17  ;;  %v20588_v5 = vpack.c.bf16 %v2641_v4, %v2634_v3 }
 0x481   :  { %20523 = vmatpush3.bf16.msra.mxu1 %v23162_v20  ;;  %17983 = vmatprep.mubr.f32.mxu1 %v23199_v50 }
 0x482   :  { %20463 = vmatpush3.bf16.msra.mxu0 %v23115_v63  ;;  %20525 = vmatprep.subr.bf16.mxu1 %v23219_v27  ;;  %v23389_v63 = vpack.c.bf16 %v2050_v29, %v2043_v31  ;;  %v2621_v50 = vand.u32 4294901760, %v2620_v46  ;;  %v2642_v31 = vand.u32 4294901760, %v2641_v4 }
 0x483   :  { %20465 = vmatprep.subr.bf16.mxu0 %v23149_v60 }
 0x484   :  { %26147 = vst [vmem:[#allocation28_spill] sm:$0xff] %v23389_v63  ;;  %v2622_v12 = vsub.f32 %v2620_v46, %v2621_v50  ;;  %v2643_v42 = vsub.f32 %v2641_v4, %v2642_v31  ;;  %v23443_v9 = vpack.c.bf16 %v2642_v31, %v2635_v8 }
 0x485   :  { %20527 = vmatpush3.bf16.msra.mxu1 %v23219_v27 }
 0x486   :  { %20467 = vmatpush3.bf16.msra.mxu0 %v23149_v60  ;;  %20529 = vmatprep.subr.bf16.mxu1 %v23239_v32  ;;  %v23407_v60 = vpack.c.bf16 %v2078_v18, %v2071_v30  ;;  %v2623_v53 = vand.u32 4294901760, %v2622_v12  ;;  %v2644_v41 = vand.u32 4294901760, %v2643_v42  ;;  %v66_v42 = vld [vmem:[%s25952_s1 + $0x8] sm:$0xff] }
 0x487   :  { %20469 = vmatprep.subr.bf16.mxu0 %v23164_v21 }
 0x488   :  { %26149 = vst [vmem:[#allocation30_spill] sm:$0xff] %v23407_v60  ;;  %v20580_v18 = vpack.c.bf16 %v2644_v41, %v2637_v35  ;;  %v68_v35 = vld [vmem:[%s25952_s1 + $0x18] sm:$0xff] }
 0x489   :  { %20531 = vmatpush3.bf16.msra.mxu1 %v23239_v32 }
 0x48a   :  { %20471 = vmatpush3.bf16.msra.mxu0 %v23164_v21  ;;  %20533 = vmatprep.subr.bf16.mxu1 %v23267_v56  ;;  %v2533_v21 = vand.u32 4294901760, %v74_v2 }
 0x48d   :  { %20535 = vmatpush3.bf16.msra.mxu1 %v23267_v56  ;;  %17908 = vmatmul.mubr.f32.vlgmr.msra.gmra.mrb[2].mxu0 %v23183_v38 }
 0x48e   :  { %20537 = vmatprep.subr.bf16.mxu1 %v23380_v51 }
 0x490   :  { %17984 = vmatmul.mubr.f32.vlgmr.msra.gmra.mrb[4].mxu1 %v23196_v55  ;;  %v2627_v55 = vsub.f32 %v74_v2, %v2533_v21 }
 0x491   :  { %20539 = vmatpush3.bf16.msra.mxu1 %v23380_v51  ;;  %18002 = vmatprep.mubr.f32.mxu1 %v23186_v43 }
 0x492   :  { %20541 = vmatprep.subr.bf16.mxu1 %v23389_v63  ;;  %v2628_v0 = vand.u32 4294901760, %v2627_v55  ;;  %v20584_v36 = vpack.c.bf16 %v2627_v55, %v2620_v46 }
 0x494   :  { %v2629_v15 = vsub.f32 %v2627_v55, %v2628_v0  ;;  %v20600_v37 = vpack.c.bf16 %v2628_v0, %v2621_v50 }
 0x495   :  { %20543 = vmatpush3.bf16.msra.mxu1 %v23389_v63  ;;  %v28_v63 = vld [vmem:[%s25955_s4 + $0x8] sm:$0xff] }
 0x496   :  { %20545 = vmatprep.subr.bf16.mxu1 %v23399_v54  ;;  %v2630_v29 = vand.u32 4294901760, %v2629_v15 }
 0x498   :  { %v20576_v34 = vpack.c.bf16 %v2630_v29, %v2623_v53 }
 0x499   :  { %20547 = vmatpush3.bf16.msra.mxu1 %v23399_v54 }
 0x49a   :  { %20549 = vmatprep.subr.bf16.mxu1 %v23407_v60 }
 0x49d   :  { %20551 = vmatpush3.bf16.msra.mxu1 %v23407_v60 }
 0x49e   :  { %20553 = vmatprep.subr.bf16.mxu1 %v23162_v20 }
 0x4a0   :  { %18003 = vmatmul.mubr.f32.vlgmr.msra.gmra.mrb[4].mxu1 %v23183_v38 }
 0x4a1   :  { %20555 = vmatpush3.bf16.msra.mxu1 %v23162_v20  ;;  %18021 = vmatprep.mubr.f32.mxu1 %v23186_v43  ;;  %v23437_v43 = vpack.c.bf16 %v2539_v28, %v2536_v25 }
 0x4a2   :  { %20557 = vmatprep.subr.bf16.mxu1 %v23219_v27 }
 0x4a5   :  { %20559 = vmatpush3.bf16.msra.mxu1 %v23219_v27 }
 0x4a6   :  { %20561 = vmatprep.subr.bf16.mxu1 %v23239_v32 }
 0x4a9   :  { %20563 = vmatpush3.bf16.msra.mxu1 %v23239_v32 }
 0x4aa   :  { %20565 = vmatprep.subr.bf16.mxu1 %v23267_v56 }
 0x4ad   :  { %20567 = vmatpush3.bf16.msra.mxu1 %v23267_v56 }
 0x4b0   :  { %18022 = vmatmul.mubr.f32.vlgmr.msra.gmra.mrb[4].mxu1 %v23183_v38  ;;  %v23435_v38 = vpack.c.bf16 %v2533_v21, %v2530_v17 }
 0x4b2   :  { %20569 = vmatprep.subr.bf16.mxu0 %v23435_v38 }
 0x4b3   :  { %20571 = vmatpush3.bf16.msra.mxu0 %v23435_v38 }
 0x4b4   :  { %20573 = vmatprep.subr.bf16.mxu0 %v23437_v43 }
 0x4b7   :  { %20575 = vmatpush3.bf16.msra.mxu0 %v23437_v43 }
 0x4b8   :  { %20577 = vmatprep.subr.bf16.mxu0 %v20576_v34 }
 0x523   :  { %v17814_v10 = vpop.f32.mrb[2].mxu1 }
 0x524   :  { %v1432_v30 = vpop.f32.mrb[3].mxu1 }
 0x560   :  { %v17909_v45 = vpop.f32.mrb[2].mxu0 }
 0x561   :  { %v22394_v6 = vadd.f32 %v17909_v45, %v17814_v10  ;;  %v1923_v11 = vpop.f32.mrb[3].mxu0  ;;  %v3672_v10 = vand.u32 4294901760, %v68_v35  ;;  %v25_v45 = vld [vmem:[%s25951_s0 + $0x20] sm:$0xff] }
 0x562   :  { %v22395_v49 = vadd.f32 %v1923_v11, %v1432_v30  ;;  %v70_v30 = vld [vmem:[%s25952_s1 + $0x28] sm:$0xff] }
 0x583   :  { %v18023_v61 = vpop.f32.mrb[4].mxu1 }
 0x584   :  { %v2514_v2 = vmax.f32 %v18023_v61, 1e-30  ;;  %v2503_v14 = vpop.f32.mrb[5].mxu1 }
 0x585   :  { %v2513_v17 = vmax.f32 %v2503_v14, 1e-30  ;;  %v23491_v14 = vsub.f32 %v68_v35, %v3672_v10 }
 0x586   :  { %22717 = vrcp.f32 %v2514_v2 }
 0x587   :  { %22719 = vrcp.f32 %v2513_v17  ;;  %v3663_v17 = vsel %vm93_vm0, %v25_v45, 0 }
 0x590   :  { %v22718_v21 = vpop.eup %22717 }
 0x591   :  { %v22720_v23 = vpop.eup %22719  ;;  %v2518_v25 = vmul.f32 %v22718_v21, %v22394_v6  ;;  %v3675_v6 = vand.u32 4294901760, %v70_v30 }
 0x592   :  { %v2517_v28 = vmul.f32 %v22720_v23, %v22395_v49 }
 0x593   :  { %v2527_v46 = vsel %vm93_vm0, %v2518_v25, 0  ;;  %v23503_v25 = vand.u32 4294901760, %v3663_v17 }
 0x594   :  { %v2524_v55 = vsel %vm93_vm0, %v2517_v28, 0  ;;  %v23447_v50 = vand.u32 4294901760, %v2527_v46 }
 0x595   :  { %v23449_v0 = vand.u32 4294901760, %v2524_v55  ;;  %26154 = vst [vmem:[#allocation35_spill] sm:$0xff] %v23503_v25 }
 0x596   :  { %v2609_v12 = vsub.f32 %v2527_v46, %v23447_v50 }
 0x597   :  { %v2599_v15 = vsub.f32 %v2524_v55, %v23449_v0  ;;  %v3787_v55 = vand.u32 4294901760, %v23491_v14 }
 0x598   :  { %v2610_v3 = vand.u32 4294901760, %v2609_v12 }
 0x599   :  { %v2600_v4 = vand.u32 4294901760, %v2599_v15 }
 0x59a   :  { %v2611_v53 = vsub.f32 %v2609_v12, %v2610_v3 }
 0x59b   :  { %v2601_v29 = vsub.f32 %v2599_v15, %v2600_v4 }
 0x59c   :  { %v2612_v31 = vand.u32 4294901760, %v2611_v53 }
 0x59d   :  { %v2602_v8 = vand.u32 4294901760, %v2601_v29  ;;  %v23526_v29 = vsub.f32 %v3663_v17, %v23503_v25 }
 0x59f   :  { %18032 = vmatprep.mubr.f32.mxu0 %v2602_v8  ;;  %26157 = vst [vmem:[#allocation38_spill] sm:$0xff] %v23526_v29 }
 0x5a0   :  { %18033 = vmatmul.mubr.f32.vlgmr.msra.gmra.mrb[4].mxu0 %v2612_v31 }
 0x5a1   :  { %20579 = vmatpush3.bf16.msra.mxu0 %v20576_v34  ;;  %18043 = vmatprep.mubr.f32.mxu0 %v23449_v0  ;;  %v3657_v34 = vsel %vm93_vm0, %v23_v39, 0 }
 0x5a2   :  { %20581 = vmatprep.subr.bf16.mxu0 %v20580_v18  ;;  %v23469_v41 = vand.u32 4294901760, %v3657_v34 }
 0x5a4   :  { %26150 = vst [vmem:[#allocation31_spill] sm:$0xff] %v23469_v41  ;;  %v23485_v11 = vsub.f32 %v3657_v34, %v23469_v41 }
 0x5a5   :  { %20583 = vmatpush3.bf16.msra.mxu0 %v20580_v18  ;;  %v3669_v18 = vand.u32 4294901760, %v66_v42 }
 0x5a6   :  { %20585 = vmatprep.subr.bf16.mxu0 %v20584_v36  ;;  %26151 = vst [vmem:[#allocation32_spill] sm:$0xff] %v23485_v11  ;;  %v23501_v23 = vand.u32 4294901760, %v23485_v11 }
 0x5a7   :  { %v23489_v2 = vsub.f32 %v66_v42, %v3669_v18 }
 0x5a8   :  { %18044 = vmatmul.mubr.f32.vlgmr.msra.gmra.mrb[4].mxu0 %v23447_v50  ;;  %26153 = vst [vmem:[#allocation34_spill] sm:$0xff] %v23501_v23  ;;  %v3740_v53 = vsub.f32 %v23485_v11, %v23501_v23 }
 0x5a9   :  { %20587 = vmatpush3.bf16.msra.mxu0 %v20584_v36  ;;  %18054 = vmatprep.mubr.f32.mxu0 %v2599_v15  ;;  %v24_v36 = vld [vmem:[%s25951_s0 + $0x18] sm:$0xff]  ;;  %v3780_v46 = vand.u32 4294901760, %v23489_v2 }
 0x5aa   :  { %20589 = vmatprep.subr.bf16.mxu0 %v20588_v5  ;;  %v3660_v49 = vsel %vm93_vm0, %v24_v36, 0  ;;  %v23546_v35 = vand.u32 4294901760, %v3740_v53 }
 0x5ab   :  { %v23497_v21 = vand.u32 4294901760, %v3660_v49  ;;  %v3781_v8 = vsub.f32 %v23489_v2, %v3780_v46 }
 0x5ac   :  { %26160 = vst [vmem:[#allocation41_spill] sm:$0xff] %v23546_v35 }
 0x5ad   :  { %20591 = vmatpush3.bf16.msra.mxu0 %v20588_v5  ;;  %v72_v5 = vld [vmem:[%s25952_s1 + $0x38] sm:$0xff]  ;;  %26152 = vst [vmem:[#allocation33_spill] sm:$0xff] %v23497_v21 }
 0x5ae   :  { %20593 = vmatprep.subr.bf16.mxu0 %v23435_v38  ;;  %v3678_v61 = vand.u32 4294901760, %v72_v5 }
 0x5b0   :  { %18055 = vmatmul.mubr.f32.vlgmr.msra.gmra.mrb[4].mxu0 %v2609_v12  ;;  %v23509_v12 = vsub.f32 %v70_v30, %v3675_v6  ;;  %v23511_v15 = vsub.f32 %v72_v5, %v3678_v61  ;;  %v23544_v42 = vpack.c.bf16 %v3678_v61, %v3675_v6 }
 0x5b1   :  { %20595 = vmatpush3.bf16.msra.mxu0 %v23435_v38  ;;  %18065 = vmatprep.mubr.f32.mxu0 %v2600_v4  ;;  %v23521_v4 = vpack.c.bf16 %v3672_v10, %v3669_v18  ;;  %v23549_v18 = vand.u32 4294901760, %v23526_v29  ;;  %v3782_v10 = vand.u32 4294901760, %v3781_v8 }
 0x5b2   :  { %20597 = vmatprep.subr.bf16.mxu0 %v23437_v43  ;;  %v3801_v31 = vand.u32 4294901760, %v23511_v15 }
 0x5b3   :  { %26161 = vst [vmem:[#allocation42_spill] sm:$0xff] %v23549_v18  ;;  %v3760_v6 = vsub.f32 %v23526_v29, %v23549_v18 }
 0x5b4   :  { %v3802_v5 = vsub.f32 %v23511_v15, %v3801_v31 }
 0x5b5   :  { %20599 = vmatpush3.bf16.msra.mxu0 %v23437_v43 }
 0x5b6   :  { %20601 = vmatprep.subr.bf16.mxu0 %v20600_v37  ;;  %v3803_v17 = vand.u32 4294901760, %v3802_v5 }
 0x5b8   :  { %18066 = vmatmul.mubr.f32.vlgmr.msra.gmra.mrb[4].mxu0 %v2610_v3 }
 0x5b9   :  { %20603 = vmatpush3.bf16.msra.mxu0 %v20600_v37  ;;  %18076 = vmatprep.mubr.f32.mxu0 %v23449_v0  ;;  %v26_v37 = vld [vmem:[%s25951_s0 + $0x28] sm:$0xff] }
 0x5ba   :  { %20605 = vmatprep.subr.bf16.mxu0 %v23443_v9  ;;  %v3666_v28 = vsel %vm93_vm0, %v26_v37, 0 }
 0x5bb   :  { %v23517_v3 = vand.u32 4294901760, %v3666_v28 }
 0x5bd   :  { %20607 = vmatpush3.bf16.msra.mxu0 %v23443_v9  ;;  %v23515_v9 = vsub.f32 %v3660_v49, %v23497_v21  ;;  %26156 = vst [vmem:[#allocation37_spill] sm:$0xff] %v23517_v3  ;;  %v23541_v34 = vsub.f32 %v3666_v28, %v23517_v3  ;;  %v23570_v28 = vand.u32 4294901760, %v3760_v6 }
 0x5be   :  { %20609 = vmatprep.subr.bf16.mxu0 %v23435_v38 }
 0x5bf   :  { %26155 = vst [vmem:[#allocation36_spill] sm:$0xff] %v23515_v9  ;;  %v23538_v39 = vand.u32 4294901760, %v23515_v9  ;;  %26159 = vst [vmem:[#allocation40_spill] sm:$0xff] %v23541_v34  ;;  %v23558_v45 = vand.u32 4294901760, %v23541_v34 }
 0x5c0   :  { %18077 = vmatmul.mubr.f32.vlgmr.msra.gmra.mrb[4].mxu0 %v23447_v50  ;;  %26164 = vst [vmem:[#allocation45_spill] sm:$0xff] %v23570_v28 }
 0x5c1   :  { %20611 = vmatpush3.bf16.msra.mxu0 %v23435_v38  ;;  %18087 = vmatprep.mubr.f32.mxu0 %v23449_v0  ;;  %v3788_v38 = vsub.f32 %v23491_v14, %v3787_v55  ;;  %v3794_v0 = vand.u32 4294901760, %v23509_v12  ;;  %26158 = vst [vmem:[#allocation39_spill] sm:$0xff] %v23538_v39  ;;  %26162 = vst [vmem:[#allocation43_spill] sm:$0xff] %v23558_v45 }
 0x5c2   :  { %20613 = vmatprep.subr.bf16.mxu0 %v23437_v43 }
 0x5c3   :  { %v3789_v30 = vand.u32 4294901760, %v3788_v38  ;;  %v3795_v36 = vsub.f32 %v23509_v12, %v3794_v0  ;;  %v20680_v38 = vpack.c.bf16 %v23491_v14, %v23489_v2  ;;  %v23614_v2 = vsub.s32 1, %v22917_v47  ;;  %v23619_v14 = vld [vmem:[%s25954_s3] sm:$0xff] }
 0x5c5   :  { %20615 = vmatpush3.bf16.msra.mxu0 %v23437_v43  ;;  %v3750_v43 = vsub.f32 %v23515_v9, %v23538_v39  ;;  %v20672_v49 = vpack.c.bf16 %v3789_v30, %v3782_v10  ;;  %v3796_v61 = vand.u32 4294901760, %v3795_v36  ;;  %v20684_v10 = vpack.c.bf16 %v23511_v15, %v23509_v12  ;;  %26166 = vst [vmem:[#allocation47_spill] sm:$0xff] %v23614_v2  ;;  %v22771_v36 = vld [vmem:[%s25951_s0] sm:$0xff] }
 0x5c6   :  { %20665 = vmatprep.subr.bf16.mxu0 %v23521_v4  ;;  %v20696_v12 = vpack.c.bf16 %v3787_v55, %v3780_v46  ;;  %v20700_v15 = vpack.c.bf16 %v3801_v31, %v3794_v0  ;;  %v2522_v46 = vrot.slane %v23619_v14, %v23614_v2 }
 0x5c7   :  { %v23565_v37 = vand.u32 4294901760, %v3750_v43  ;;  %v20676_v53 = vpack.c.bf16 %v3803_v17, %v3796_v61  ;;  %v22773_v61 = vld [vmem:[%s25952_s1 + $0x20] sm:$0xff]  ;;  %v22774_v17 = vld [vmem:[%s25952_s1 + $0x30] sm:$0xff] }
 0x5c8   :  { %18088 = vmatmul.mubr.f32.vlgmr.msra.gmra.mrb[4].mxu0 %v23447_v50  ;;  %v3770_v50 = vsub.f32 %v23541_v34, %v23558_v45 }
 0x5c9   :  { %20667 = vmatpush3.bf16.msra.mxu0 %v23521_v4  ;;  %18164 = vmatprep.mubr.f32.mxu0 %v23546_v35  ;;  %26163 = vst [vmem:[#allocation44_spill] sm:$0xff] %v23565_v37 }
 0x5ca   :  { %20669 = vmatprep.subr.bf16.mxu0 %v23544_v42  ;;  %v23573_v8 = vand.u32 4294901760, %v3770_v50 }
 0x5cc   :  { %26165 = vst [vmem:[#allocation46_spill] sm:$0xff] %v23573_v8 }
 0x5cd   :  { %20671 = vmatpush3.bf16.msra.mxu0 %v23544_v42 }
 0x5ce   :  { %20673 = vmatprep.subr.bf16.mxu0 %v20672_v49 }
 0x5d0   :  { %18165 = vmatmul.mubr.f32.vlgmr.msra.gmra.mrb[6].mxu0 %v23565_v37 }
 0x5d1   :  { %20675 = vmatpush3.bf16.msra.mxu0 %v20672_v49  ;;  %18167 = vmatprep.mubr.f32.mxu0 %v23570_v28  ;;  %v22772_v49 = vld [vmem:[%s25952_s1] sm:$0xff] }
 0x5d2   :  { %20677 = vmatprep.subr.bf16.mxu0 %v20676_v53 }
 0x5d4   :  { %18168 = vmatmul.mubr.f32.gmra.mrb[8].mxu0 %v23573_v8 }
 0x5d5   :  { %20679 = vmatpush3.bf16.msra.mxu0 %v20676_v53  ;;  %18178 = vmatprep.mubr.f32.mxu0 %v23469_v41 }
 0x5d6   :  { %20681 = vmatprep.subr.bf16.mxu0 %v20680_v38 }
 0x5d8   :  { %18179 = vmatmul.mubr.f32.vlgmr.msra.gmra.mrb[6].mxu0 %v23497_v21 }
 0x5d9   :  { %20683 = vmatpush3.bf16.msra.mxu0 %v20680_v38  ;;  %18181 = vmatprep.mubr.f32.mxu0 %v23503_v25 }
 0x5da   :  { %20685 = vmatprep.subr.bf16.mxu0 %v20684_v10 }
 0x5dc   :  { %18182 = vmatmul.mubr.f32.gmra.mrb[8].mxu0 %v23517_v3 }
 0x5dd   :  { %20687 = vmatpush3.bf16.msra.mxu0 %v20684_v10  ;;  %18192 = vmatprep.mubr.f32.mxu0 %v23485_v11 }
 0x5de   :  { %20689 = vmatprep.subr.bf16.mxu0 %v23521_v4 }
 0x5e0   :  { %18193 = vmatmul.mubr.f32.vlgmr.msra.gmra.mrb[6].mxu0 %v23515_v9 }
 0x5e1   :  { %20691 = vmatpush3.bf16.msra.mxu0 %v23521_v4  ;;  %18195 = vmatprep.mubr.f32.mxu0 %v23526_v29 }
 0x5e2   :  { %20693 = vmatprep.subr.bf16.mxu0 %v23544_v42 }
 0x5e4   :  { %18196 = vmatmul.mubr.f32.gmra.mrb[8].mxu0 %v23541_v34 }
 0x5e5   :  { %20695 = vmatpush3.bf16.msra.mxu0 %v23544_v42  ;;  %18206 = vmatprep.mubr.f32.mxu0 %v23501_v23  ;;  %v25968_v23 = vsub.s32 7, %v22917_v47 }
 0x5e6   :  { %20697 = vmatprep.subr.bf16.mxu0 %v20696_v12 }
 0x5e8   :  { %18207 = vmatmul.mubr.f32.vlgmr.msra.gmra.mrb[6].mxu0 %v23538_v39 }
 0x5e9   :  { %20699 = vmatpush3.bf16.msra.mxu0 %v20696_v12  ;;  %18209 = vmatprep.mubr.f32.mxu0 %v23549_v18 }
 0x5ea   :  { %20701 = vmatprep.subr.bf16.mxu0 %v20700_v15 }
 0x5ec   :  { %18210 = vmatmul.mubr.f32.gmra.mrb[8].mxu0 %v23558_v45 }
 0x5ed   :  { %20703 = vmatpush3.bf16.msra.mxu0 %v20700_v15  ;;  %18220 = vmatprep.mubr.f32.mxu0 %v23469_v41 }
 0x5ee   :  { %20705 = vmatprep.subr.bf16.mxu0 %v23521_v4 }
 0x5f0   :  { %18221 = vmatmul.mubr.f32.vlgmr.msra.gmra.mrb[6].mxu0 %v23497_v21 }
 0x5f1   :  { %20707 = vmatpush3.bf16.msra.mxu0 %v23521_v4  ;;  %18223 = vmatprep.mubr.f32.mxu0 %v23503_v25 }
 0x5f2   :  { %20709 = vmatprep.subr.bf16.mxu0 %v23544_v42 }
 0x5f4   :  { %18224 = vmatmul.mubr.f32.gmra.mrb[8].mxu0 %v23517_v3 }
 0x5f5   :  { %20711 = vmatpush3.bf16.msra.mxu0 %v23544_v42  ;;  %18234 = vmatprep.mubr.f32.mxu0 %v23469_v41  ;;  %v22770_v42 = vld [vmem:[%s25951_s0 + $0x8] sm:$0xff] }
 0x5f8   :  { %18235 = vmatmul.mubr.f32.vlgmr.msra.gmra.mrb[6].mxu0 %v23497_v21 }
 0x5f9   :  { %18237 = vmatprep.mubr.f32.mxu0 %v23503_v25 }
 0x5fc   :  { %18238 = vmatmul.mubr.f32.gmra.mrb[8].mxu0 %v23517_v3 }
 0x69b   :  { %v18089_v55 = vpop.f32.mrb[4].mxu0 }
 0x69c   :  { %v22396_v4 = vadd.f32 %v18089_v55, %v2522_v46  ;;  %v3047_v0 = vpop.f32.mrb[5].mxu0 }
 0x69d   :  { %v22397_v31 = vadd.f32 %v3047_v0, %v2522_v46 }
 0x69e   :  { %v3058_v30 = vadd.f32 %v22770_v42, %v22396_v4 }
 0x69f   :  { %v3057_v5 = vadd.f32 %v22771_v36, %v22397_v31 }
 0x6a0   :  { %v3062_v43 = vsel %vm93_vm0, %v3058_v30, 0.0 }
 0x6a1   :  { %3063 = vadd.xlane.f32.xlu1 %v3062_v43  ;;  %v3059_v6 = vsel %vm93_vm0, %v3057_v5, 0.0 }
 0x6a2   :  { %3060 = vadd.xlane.f32.xlu0 %v3059_v6  ;;  %v22775_v6 = vld [vmem:[%s25952_s1 + $0x10] sm:$0xff] }
 0x6b2   :  { %3106 = vrot.lane.b32.xlu1 %v22772_v49, %s22833_s9  ;;  %v23650_v49 = vsub.s32 3, %v22917_v47 }
 0x6b4   :  { %26167 = vst [vmem:[#allocation48_spill] sm:$0xff] %v23650_v49 }
 0x6b6   :  { %3110 = vrot.lane.b32.xlu1 %v22773_v61, %s22833_s9 }
 0x6ba   :  { %3112 = vrot.lane.b32.xlu1 %v22774_v17, %s22833_s9 }
 0x6cb   :  { %v18236_v50 = vpop.f32.mrb[6].mxu0 }
 0x6cc   :  { %v4260_v53 = vpop.f32.mrb[7].mxu0 }
 0x6cf   :  { %v18239_v38 = vpop.f32.mrb[8].mxu0 }
 0x6d0   :  { %v4272_v10 = vpop.f32.mrb[9].mxu0 }
 0x72e   :  { %v3064_v12 = vpop.xlane.xlu1 %3063 }
 0x72f   :  { %v3067_v15 = vmul.f32 0.03125, %v3064_v12  ;;  %v3061_v46 = vpop.xlane.xlu0 %3060 }
 0x730   :  { %v3066_v55 = vmul.f32 0.03125, %v3061_v46 }
 0x731   :  { %v3069_v4 = vsub.f32 %v3058_v30, %v3067_v15  ;;  %v3655_v30 = vrot.slane %v23619_v14, %v23650_v49 }
 0x732   :  { %v3068_v0 = vsub.f32 %v3057_v5, %v3066_v55  ;;  %v3107_v15 = vpop.permute.xlu1 %3106 }
 0x733   :  { %v3071_v36 = vmul.f32 %v3069_v4, %v3069_v4  ;;  %v23654_v5 = vadd.f32 %v4260_v53, %v3655_v30  ;;  %v23656_v61 = vadd.f32 %v18236_v50, %v3655_v30  ;;  %v23660_v17 = vadd.f32 %v4272_v10, %v3655_v30 }
 0x734   :  { %v3070_v31 = vmul.f32 %v3068_v0, %v3068_v0  ;;  %v23662_v12 = vadd.f32 %v18239_v38, %v3655_v30  ;;  %v3125_v46 = vand.u32 4294901760, %v3107_v15 }
 0x735   :  { %v3075_v43 = vsel %vm93_vm0, %v3071_v36, 0.0 }
 0x736   :  { %v3072_v42 = vsel %vm93_vm0, %v3070_v31, 0.0  ;;  %v3111_v31 = vpop.permute.xlu1 %3110  ;;  %v23666_v50 = vsub.f32 %v3107_v15, %v3125_v46 }
 0x737   :  { %3073 = vadd.xlane.f32.xlu0 %v3072_v42  ;;  %v3131_v45 = vand.u32 4294901760, %v3111_v31 }
 0x738   :  { %v25962_v38 = vand.u32 4294901760, %v23666_v50 }
 0x739   :  { %v3229_v21 = vsub.f32 %v3111_v31, %v3131_v45 }
 0x73b   :  { %3076 = vadd.xlane.f32.xlu0 %v3075_v43 }
 0x751   :  { %3108 = vrot.lane.b32.xlu0 %v22775_v6, %s22833_s9  ;;  %v3113_v6 = vpop.permute.xlu1 %3112 }
 0x752   :  { %v3134_v39 = vand.u32 4294901760, %v3113_v6 }
 0x754   :  { %v23674_v15 = vpack.c.bf16 %v3134_v39, %v3131_v45  ;;  %v3236_v41 = vsub.f32 %v3113_v6, %v3134_v39 }
 0x76f   :  { %4282 = vxpose.xlu0.b32.start [1/4] (short) (narrow) %v23654_v5, 32 }
 0x773   :  { %4283 = vxpose.xlu0.b32.cont [2/4] (short) (narrow) %v23656_v61, 32 }
 0x777   :  { %4284 = vxpose.xlu0.b32.cont [3/4] (short) (narrow) %v23660_v17, 32 }
 0x77b   :  { %4285 = vxpose.xlu0.b32.end [4/4] (short) (narrow) %v23662_v12, 32 }
 0x7c4   :  { %v3074_v55 = vpop.xlane.xlu0 %3073 }
 0x7c5   :  { %v3078_v53 = vmul.f32 0.03125, %v3074_v55 }
 0x7c7   :  { %v3080_v42 = vadd.f32 1e-05, %v3078_v53  ;;  %v3217_v53 = vsub.f32 %v23666_v50, %v25962_v38 }
 0x7c8   :  { %v3077_v36 = vpop.xlane.xlu0 %3076 }
 0x7c9   :  { %22721 = vrsqrt.f32 %v3080_v42  ;;  %v3079_v43 = vmul.f32 0.03125, %v3077_v36  ;;  %v62_v36 = vld [vmem:[%s25954_s3 + $0x8] sm:$0xff] }
 0x7ca   :  { %v3095_v38 = vrot.slane %v62_v36, %v22920_v48  ;;  %v3230_v36 = vand.u32 4294901760, %v3229_v21 }
 0x7cb   :  { %v3081_v10 = vadd.f32 1e-05, %v3079_v43  ;;  %v3218_v43 = vand.u32 4294901760, %v3217_v53 }
 0x7cc   :  { %v3109_v30 = vpop.permute.xlu0 %3108  ;;  %v3231_v45 = vsub.f32 %v3229_v21, %v3230_v36 }
 0x7cd   :  { %22723 = vrsqrt.f32 %v3081_v10  ;;  %v3128_v18 = vand.u32 4294901760, %v3109_v30 }
 0x7cf   :  { %v23670_v34 = vpack.c.bf16 %v3128_v18, %v3125_v46  ;;  %v23672_v55 = vsub.f32 %v3109_v30, %v3128_v18  ;;  %v3089_v46 = vrot.slane %v23619_v14, %v25968_v23 }
 0x7d1   :  { %v25976_v42 = vand.u32 4294901760, %v23672_v55  ;;  %20617 = vmatprep.subr.bf16.mxu1 %v23670_v34 }
 0x7d2   :  { %20619 = vmatpush3.bf16.msra.mxu1 %v23670_v34 }
 0x7d3   :  { %v22722_v18 = vpop.eup %22721  ;;  %20621 = vmatprep.subr.bf16.mxu1 %v23674_v15  ;;  %v3224_v10 = vsub.f32 %v23672_v55, %v25976_v42 }
 0x7d4   :  { %v3084_v30 = vmul.f32 %v22722_v18, %v3068_v0  ;;  %v3237_v18 = vand.u32 4294901760, %v3236_v41 }
 0x7d5   :  { %v3225_v29 = vand.u32 4294901760, %v3224_v10 }
 0x7d6   :  { %20623 = vmatpush3.bf16.msra.mxu1 %v23674_v15  ;;  %v3090_v9 = vmul.f32 %v3089_v46, %v3084_v30 }
 0x7d7   :  { %v22724_v11 = vpop.eup %22723  ;;  %v20624_v3 = vpack.c.bf16 %v3225_v29, %v3218_v43 }
 0x7d8   :  { %v3085_v23 = vmul.f32 %v22724_v11, %v3069_v4  ;;  %v23694_v25 = vadd.f32 %v3095_v38, %v3090_v9  ;;  %v3238_v4 = vsub.f32 %v3236_v41, %v3237_v18 }
 0x7d9   :  { %20625 = vmatprep.subr.bf16.mxu1 %v20624_v3 }
 0x7da   :  { %26168 = vst [vmem:[#allocation49_spill] sm:$0xff] %v23694_v25  ;;  %v3091_v53 = vmul.f32 %v3089_v46, %v3085_v23  ;;  %v3119_v8 = vsel %vm93_vm0, %v23694_v25, 0  ;;  %v3232_v46 = vand.u32 4294901760, %v3231_v45  ;;  %v3239_v43 = vand.u32 4294901760, %v3238_v4  ;;  %v23745_v4 = vld [vmem:[%s25955_s4 + $0xb0] sm:$0xff] }
 0x7db   :  { %v23698_v42 = vand.u32 4294901760, %v3119_v8 }
 0x7dc   :  { %v23700_v0 = vadd.f32 %v3095_v38, %v3091_v53  ;;  %v20632_v53 = vpack.c.bf16 %v23672_v55, %v23666_v50 }
 0x7dd   :  { %v3194_v10 = vsub.f32 %v3119_v8, %v23698_v42  ;;  %v20628_v8 = vpack.c.bf16 %v3239_v43, %v3232_v46  ;;  %v23847_v46 = vld [vmem:[%s25955_s4 + $0x98] sm:$0xff]  ;;  %v23854_v43 = vld [vmem:[%s25955_s4 + $0xa8] sm:$0xff] }
 0x7de   :  { %26169 = vst [vmem:[#allocation50_spill] sm:$0xff] %v23700_v0  ;;  %v3122_v11 = vsel %vm93_vm0, %v23700_v0, 0 }
 0x7df   :  { %v3195_v9 = vand.u32 4294901760, %v3194_v10  ;;  %v23705_v29 = vand.u32 4294901760, %v3122_v11 }
 0x7e1   :  { %v3196_v39 = vsub.f32 %v3194_v10, %v3195_v9  ;;  %v3204_v23 = vsub.f32 %v3122_v11, %v23705_v29 }
 0x7e3   :  { %v3197_v31 = vand.u32 4294901760, %v3196_v39  ;;  %v3205_v6 = vand.u32 4294901760, %v3204_v23  ;;  %v20636_v39 = vpack.c.bf16 %v3236_v41, %v3229_v21  ;;  %v23730_v41 = vld [vmem:[%s25955_s4 + $0xa0] sm:$0xff]  ;;  %v26170_v21 = vand.u32 4294901760, %v23666_v50 }
 0x7e4   :  { %v23755_v50 = vld [vmem:[%s25955_s4 + $0xc0] sm:$0xff]  ;;  %v5778_v25 = vand.u32 4294901760, %v23730_v41 }
 0x7e5   :  { %18098 = vmatprep.mubr.f32.mxu1 %v3197_v31  ;;  %v3206_v38 = vsub.f32 %v3204_v23, %v3205_v6  ;;  %v23826_v31 = vld [vmem:[%s25955_s4 + $0x80] sm:$0xff] }
 0x7e7   :  { %v3207_v30 = vand.u32 4294901760, %v3206_v38  ;;  %v23840_v38 = vld [vmem:[%s25955_s4 + $0x90] sm:$0xff] }
 0x7e9   :  { %18099 = vmatmul.mubr.f32.vlgmr.msra.gmra.mrb[6].mxu1 %v3207_v30  ;;  %v23861_v30 = vld [vmem:[%s25955_s4 + $0xb8] sm:$0xff] }
 0x7ea   :  { %20627 = vmatpush3.bf16.msra.mxu1 %v20624_v3  ;;  %18109 = vmatprep.mubr.f32.mxu1 %v23698_v42 }
 0x7eb   :  { %20629 = vmatprep.subr.bf16.mxu1 %v20628_v8 }
 0x7ee   :  { %20631 = vmatpush3.bf16.msra.mxu1 %v20628_v8  ;;  %v23868_v8 = vld [vmem:[%s25955_s4 + $0xc8] sm:$0xff] }
 0x7ef   :  { %20633 = vmatprep.subr.bf16.mxu1 %v20632_v53  ;;  %v23711_v11 = vpop.trf.xlu0 }
 0x7f0   :  { %4318 = vrot.lane.b32.xlu1 %v23711_v11, %s22833_s9 }
 0x7f1   :  { %18110 = vmatmul.mubr.f32.vlgmr.msra.gmra.mrb[6].mxu1 %v23705_v29 }
 0x7f2   :  { %20635 = vmatpush3.bf16.msra.mxu1 %v20632_v53  ;;  %18120 = vmatprep.mubr.f32.mxu1 %v3194_v10  ;;  %v26171_v10 = vand.u32 4294901760, %v23672_v55 }
 0x7f3   :  { %20637 = vmatprep.subr.bf16.mxu1 %v20636_v39  ;;  %v23716_v3 = vpop.trf.xlu0 }
 0x7f4   :  { %4320 = vrot.lane.b32.xlu1 %v23716_v3, %s22833_s9 }
 0x7f6   :  { %20639 = vmatpush3.bf16.msra.mxu1 %v20636_v39 }
 0x7f7   :  { %20641 = vmatprep.subr.bf16.mxu1 %v23670_v34  ;;  %v23721_v45 = vpop.trf.xlu0 }
 0x7f8   :  { %4330 = vrot.lane.b32.xlu1 %v23711_v11, %s22835_s13  ;;  %4346 = vrot.lane.b32.xlu0 %v23721_v45, %s22831_s7 }
 0x7f9   :  { %18121 = vmatmul.mubr.f32.vlgmr.msra.gmra.mrb[6].mxu1 %v3204_v23  ;;  %v20648_v23 = vpack.c.bf16 %v26171_v10, %v26170_v21 }
 0x7fa   :  { %20643 = vmatpush3.bf16.msra.mxu1 %v23670_v34  ;;  %18131 = vmatprep.mubr.f32.mxu1 %v3195_v9  ;;  %v20652_v9 = vpack.c.bf16 %v3237_v18, %v3230_v36  ;;  %v23805_v36 = vld [vmem:[%s25955_s4 + $0x68] sm:$0xff]  ;;  %v23812_v18 = vld [vmem:[%s25955_s4 + $0x70] sm:$0xff] }
 0x7fb   :  { %20645 = vmatprep.subr.bf16.mxu1 %v23674_v15  ;;  %v23766_v55 = vpop.trf.xlu0 }
 0x7fc   :  { %4332 = vrot.lane.b32.xlu1 %v23716_v3, %s22835_s13  ;;  %4407 = vrot.lane.b32.xlu0 %v23730_v41, %s22833_s9 }
 0x7fe   :  { %20647 = vmatpush3.bf16.msra.mxu1 %v23674_v15 }
 0x7ff   :  { %20649 = vmatprep.subr.bf16.mxu1 %v20648_v23 }
 0x800   :  { %4342 = vrot.lane.b32.xlu1 %v23711_v11, %s22831_s7  ;;  %4411 = vrot.lane.b32.xlu0 %v23745_v4, %s22833_s9 }
 0x801   :  { %18132 = vmatmul.mubr.f32.vlgmr.msra.gmra.mrb[6].mxu1 %v3205_v6  ;;  %v23833_v6 = vld [vmem:[%s25955_s4 + $0x88] sm:$0xff] }
 0x802   :  { %20651 = vmatpush3.bf16.msra.mxu1 %v20648_v23  ;;  %18142 = vmatprep.mubr.f32.mxu1 %v23698_v42 }
 0x803   :  { %20653 = vmatprep.subr.bf16.mxu1 %v20652_v9 }
 0x804   :  { %4344 = vrot.lane.b32.xlu1 %v23716_v3, %s22831_s7  ;;  %4415 = vrot.lane.b32.xlu0 %v23755_v50, %s22833_s9 }
 0x806   :  { %20655 = vmatpush3.bf16.msra.mxu1 %v20652_v9  ;;  %v27_v9 = vld [vmem:[%s25955_s4] sm:$0xff] }
 0x807   :  { %20657 = vmatprep.subr.bf16.mxu1 %v23670_v34 }
 0x808   :  { %4322 = vrot.lane.b32.xlu1 %v23721_v45, %s22833_s9 }
 0x809   :  { %18143 = vmatmul.mubr.f32.vlgmr.msra.gmra.mrb[6].mxu1 %v23705_v29 }
 0x80a   :  { %20659 = vmatpush3.bf16.msra.mxu1 %v23670_v34  ;;  %18153 = vmatprep.mubr.f32.mxu1 %v23698_v42  ;;  %v23784_v34 = vld [vmem:[%s25955_s4 + $0x50] sm:$0xff]  ;;  %v23798_v42 = vld [vmem:[%s25955_s4 + $0x60] sm:$0xff] }
 0x80b   :  { %20661 = vmatprep.subr.bf16.mxu1 %v23674_v15 }
 0x80c   :  { %4324 = vrot.lane.b32.xlu1 %v23766_v55, %s22833_s9 }
 0x80e   :  { %20663 = vmatpush3.bf16.msra.mxu1 %v23674_v15  ;;  %v23791_v15 = vld [vmem:[%s25955_s4 + $0x58] sm:$0xff] }
 0x810   :  { %4334 = vrot.lane.b32.xlu1 %v23721_v45, %s22835_s13 }
 0x811   :  { %18154 = vmatmul.mubr.f32.vlgmr.msra.gmra.mrb[6].mxu1 %v23705_v29  ;;  %v23819_v29 = vld [vmem:[%s25955_s4 + $0x78] sm:$0xff] }
 0x814   :  { %4336 = vrot.lane.b32.xlu1 %v23766_v55, %s22835_s13 }
 0x818   :  { %4348 = vrot.lane.b32.xlu1 %v23766_v55, %s22831_s7 }
 0x81c   :  { %4387 = vrot.lane.b32.xlu1 %v23784_v34, %s22833_s9 }
 0x820   :  { %4389 = vrot.lane.b32.xlu1 %v23791_v15, %s22833_s9 }
 0x824   :  { %4391 = vrot.lane.b32.xlu1 %v23798_v42, %s22833_s9 }
 0x828   :  { %4393 = vrot.lane.b32.xlu1 %v23805_v36, %s22833_s9 }
 0x82c   :  { %4395 = vrot.lane.b32.xlu1 %v23812_v18, %s22833_s9 }
 0x830   :  { %4397 = vrot.lane.b32.xlu1 %v23819_v29, %s22833_s9 }
 0x834   :  { %4399 = vrot.lane.b32.xlu1 %v23826_v31, %s22833_s9 }
 0x838   :  { %4401 = vrot.lane.b32.xlu1 %v23833_v6, %s22833_s9 }
 0x83c   :  { %4403 = vrot.lane.b32.xlu1 %v23840_v38, %s22833_s9 }
 0x840   :  { %4405 = vrot.lane.b32.xlu1 %v23847_v46, %s22833_s9 }
 0x844   :  { %4409 = vrot.lane.b32.xlu1 %v23854_v43, %s22833_s9 }
 0x848   :  { %4413 = vrot.lane.b32.xlu1 %v23861_v30, %s22833_s9 }
 0x84c   :  { %4417 = vrot.lane.b32.xlu1 %v23868_v8, %s22833_s9 }
 0x862   :  { %v4319_v53 = vpop.permute.xlu1 %4318 }
 0x863   :  { %v4354_v23 = vsel %vm93_vm0, %v23711_v11, %v4319_v53 }
 0x866   :  { %v4321_v39 = vpop.permute.xlu1 %4320 }
 0x867   :  { %v4355_v54 = vsel %vm93_vm0, %v23716_v3, %v4321_v39 }
 0x86a   :  { %v4331_v21 = vpop.permute.xlu1 %4330 }
 0x86b   :  { %v4358_v28 = vsel %vm1302_vm3, %v4354_v23, %v4331_v21 }
 0x86e   :  { %v4333_v10 = vpop.permute.xlu1 %4332 }
 0x86f   :  { %v4359_v51 = vsel %vm1302_vm3, %v4355_v54, %v4333_v10 }
 0x872   :  { %v4343_v37 = vpop.permute.xlu1 %4342 }
 0x873   :  { %v4363_v35 = vsel %vm4362_vm4, %v4358_v28, %v4343_v37 }
 0x874   :  { %v4367_v60 = vmul.f32 %v4363_v35, %v27_v9 }
 0x876   :  { %v4458_v11 = vand.u32 4294901760, %v4367_v60  ;;  %v4345_v53 = vpop.permute.xlu1 %4344 }
 0x877   :  { %v4364_v19 = vsel %vm4362_vm4, %v4359_v51, %v4345_v53  ;;  %v29_v51 = vld [vmem:[%s25955_s4 + $0x10] sm:$0xff] }
 0x878   :  { %v4368_v7 = vmul.f32 %v4364_v19, %v28_v63  ;;  %v4548_v24 = vsub.f32 %v4367_v60, %v4458_v11 }
 0x87a   :  { %v4461_v21 = vand.u32 4294901760, %v4368_v7  ;;  %v4323_v23 = vpop.permute.xlu1 %4322  ;;  %v4549_v28 = vand.u32 4294901760, %v4548_v24 }
 0x87b   :  { %v4356_v19 = vsel %vm93_vm0, %v23721_v45, %v4323_v23  ;;  %v30_v45 = vld [vmem:[%s25955_s4 + $0x18] sm:$0xff] }
 0x87c   :  { %v23886_v13 = vpack.c.bf16 %v4461_v21, %v4458_v11  ;;  %v4555_v35 = vsub.f32 %v4368_v7, %v4461_v21  ;;  %v4347_v7 = vpop.permute.xlu0 %4346 }
 0x87e   :  { %20713 = vmatprep.subr.bf16.mxu1 %v23886_v13  ;;  %v4325_v37 = vpop.permute.xlu1 %4324  ;;  %v4556_v3 = vand.u32 4294901760, %v4555_v35  ;;  %v23889_v39 = vpack.c.bf16 %v4555_v35, %v4548_v24 }
 0x87f   :  { %20715 = vmatpush3.bf16.msra.mxu1 %v23886_v13  ;;  %v4357_v21 = vsel %vm93_vm0, %v23766_v55, %v4325_v37 }
 0x880   :  { %v23892_v54 = vpack.c.bf16 %v4556_v3, %v4549_v28  ;;  %v4557_v16 = vsub.f32 %v4555_v35, %v4556_v3 }
 0x882   :  { %v4335_v63 = vpop.permute.xlu1 %4334 }
 0x883   :  { %v4360_v60 = vsel %vm1302_vm3, %v4356_v19, %v4335_v63  ;;  %v4550_v63 = vsub.f32 %v4548_v24, %v4549_v28 }
 0x884   :  { %v4365_v10 = vsel %vm4362_vm4, %v4360_v60, %v4347_v7  ;;  %v4558_v60 = vand.u32 4294901760, %v4557_v16 }
 0x885   :  { %v4369_v9 = vmul.f32 %v4365_v10, %v29_v51  ;;  %v4551_v26 = vand.u32 4294901760, %v4550_v63 }
 0x886   :  { %v4337_v11 = vpop.permute.xlu1 %4336 }
 0x887   :  { %v4464_v53 = vand.u32 4294901760, %v4369_v9  ;;  %v4361_v23 = vsel %vm1302_vm3, %v4357_v21, %v4337_v11 }
 0x889   :  { %v4562_v59 = vsub.f32 %v4369_v9, %v4464_v53 }
 0x88a   :  { %v4349_v52 = vpop.permute.xlu1 %4348 }
 0x88b   :  { %v4366_v58 = vsel %vm4362_vm4, %v4361_v23, %v4349_v52  ;;  %v4563_v10 = vand.u32 4294901760, %v4562_v59 }
 0x88c   :  { %v4370_v19 = vmul.f32 %v4366_v58, %v30_v45  ;;  %v23918_v58 = vpack.c.bf16 %v4558_v60, %v4551_v26 }
 0x88d   :  { %v4564_v52 = vsub.f32 %v4562_v59, %v4563_v10 }
 0x88e   :  { %v4467_v7 = vand.u32 4294901760, %v4370_v19  ;;  %v23908_v51 = vpop.permute.xlu1 %4387 }
 0x88f   :  { %26172 = vst [vmem:[#allocation51_spill] sm:$0xff] %v23908_v51  ;;  %v4435_v55 = vmul.f32 %v23654_v5, %v23908_v51  ;;  %v4565_v26 = vand.u32 4294901760, %v4564_v52 }
 0x890   :  { %v23912_v37 = vpack.c.bf16 %v4467_v7, %v4464_v53  ;;  %v4569_v9 = vsub.f32 %v4370_v19, %v4467_v7 }
 0x891   :  { %5015 = vrot.lane.b32.xlu0 %v4435_v55, %s22831_s7 }
 0x892   :  { %20717 = vmatprep.subr.bf16.mxu1 %v23912_v37  ;;  %v23916_v35 = vpop.permute.xlu1 %4389  ;;  %v4570_v24 = vand.u32 4294901760, %v4569_v9  ;;  %v23920_v28 = vpack.c.bf16 %v4569_v9, %v4562_v59 }
 0x893   :  { %26173 = vst [vmem:[#allocation52_spill] sm:$0xff] %v23916_v35  ;;  %v4436_v16 = vmul.f32 %v23656_v61, %v23916_v35  ;;  %20719 = vmatpush3.bf16.msra.mxu1 %v23912_v37 }
 0x894   :  { %20721 = vmatprep.subr.bf16.mxu1 %v23918_v58  ;;  %v4571_v3 = vsub.f32 %v4569_v9, %v4570_v24  ;;  %v23926_v11 = vpack.c.bf16 %v4570_v24, %v4563_v10 }
 0x895   :  { %5017 = vrot.lane.b32.xlu1 %v4436_v16, %s22831_s7  ;;  %v23959_v16 = vpop.permute.xlu0 %4407 }
 0x896   :  { %v23929_v53 = vpop.permute.xlu1 %4391  ;;  %v4572_v21 = vand.u32 4294901760, %v4571_v3  ;;  %26180 = vst [vmem:[#allocation59_spill] sm:$0xff] %v23959_v16 }
 0x897   :  { %26174 = vst [vmem:[#allocation53_spill] sm:$0xff] %v23929_v53  ;;  %v4437_v59 = vmul.f32 %v23660_v17, %v23929_v53 }
 0x898   :  { %v20724_v45 = vpack.c.bf16 %v4572_v21, %v4565_v26 }
 0x899   :  { %5019 = vrot.lane.b32.xlu0 %v4437_v59, %s22831_s7  ;;  %v4445_v59 = vmul.f32 %v23660_v17, %v23959_v16 }
 0x89a   :  { %v23934_v23 = vpop.permute.xlu1 %4393 }
 0x89b   :  { %26175 = vst [vmem:[#allocation54_spill] sm:$0xff] %v23934_v23  ;;  %v4438_v19 = vmul.f32 %v23662_v12, %v23934_v23 }
 0x89d   :  { %5021 = vrot.lane.b32.xlu1 %v4438_v19, %s22831_s7 }
 0x89e   :  { %v23939_v63 = vpop.permute.xlu1 %4395 }
 0x89f   :  { %26176 = vst [vmem:[#allocation55_spill] sm:$0xff] %v23939_v63  ;;  %v4439_v7 = vmul.f32 %v23654_v5, %v23939_v63 }
 0x8a1   :  { %5023 = vrot.lane.b32.xlu0 %v4439_v7, %s22831_s7  ;;  %v23972_v7 = vpop.permute.xlu0 %4411 }
 0x8a2   :  { %v23944_v60 = vpop.permute.xlu1 %4397  ;;  %26183 = vst [vmem:[#allocation62_spill] sm:$0xff] %v23972_v7 }
 0x8a3   :  { %26177 = vst [vmem:[#allocation56_spill] sm:$0xff] %v23944_v60  ;;  %v4440_v10 = vmul.f32 %v23656_v61, %v23944_v60 }
 0x8a5   :  { %5025 = vrot.lane.b32.xlu1 %v4440_v10, %s22831_s7 }
 0x8a6   :  { %v23949_v55 = vpop.permute.xlu1 %4399 }
 0x8a7   :  { %26178 = vst [vmem:[#allocation57_spill] sm:$0xff] %v23949_v55  ;;  %v4441_v9 = vmul.f32 %v23660_v17, %v23949_v55 }
 0x8a9   :  { %5027 = vrot.lane.b32.xlu0 %v4441_v9, %s22831_s7  ;;  %v4447_v9 = vmul.f32 %v23654_v5, %v23972_v7 }
 0x8aa   :  { %v23954_v52 = vpop.permute.xlu1 %4401 }
 0x8ab   :  { %26179 = vst [vmem:[#allocation58_spill] sm:$0xff] %v23954_v52  ;;  %v4442_v24 = vmul.f32 %v23662_v12, %v23954_v52 }
 0x8ad   :  { %5029 = vrot.lane.b32.xlu1 %v4442_v24, %s22831_s7 }
 0x8ae   :  { %v23961_v3 = vpop.permute.xlu1 %4403 }
 0x8af   :  { %26181 = vst [vmem:[#allocation60_spill] sm:$0xff] %v23961_v3  ;;  %v4443_v26 = vmul.f32 %v23654_v5, %v23961_v3 }
 0x8b1   :  { %5031 = vrot.lane.b32.xlu0 %v4443_v26, %s22831_s7 }
 0x8b2   :  { %v23966_v21 = vpop.permute.xlu1 %4405 }
 0x8b3   :  { %26182 = vst [vmem:[#allocation61_spill] sm:$0xff] %v23966_v21  ;;  %v4444_v19 = vmul.f32 %v23656_v61, %v23966_v21 }
 0x8b5   :  { %5035 = vrot.lane.b32.xlu0 %v4445_v59, %s22831_s7  ;;  %5033 = vrot.lane.b32.xlu1 %v4444_v19, %s22831_s7  ;;  %v23990_v59 = vsub.s32 2, %v22917_v47  ;;  %v26192_v47 = vand.u32 4294901760, %v23854_v43 }
 0x8b6   :  { %v23976_v10 = vpop.permute.xlu1 %4409 }
 0x8b7   :  { %26184 = vst [vmem:[#allocation63_spill] sm:$0xff] %v23976_v10  ;;  %v4446_v24 = vmul.f32 %v23662_v12, %v23976_v10  ;;  %26186 = vst [vmem:[#allocation65_spill] sm:$0xff] %v23990_v59  ;;  %v3101_v5 = vrot.slane %v23619_v14, %v23990_v59 }
 0x8b9   :  { %5039 = vrot.lane.b32.xlu0 %v4447_v9, %s22831_s7  ;;  %5037 = vrot.lane.b32.xlu1 %v4446_v24, %s22831_s7 }
 0x8ba   :  { %v23984_v26 = vpop.permute.xlu1 %4413 }
 0x8bb   :  { %26185 = vst [vmem:[#allocation64_spill] sm:$0xff] %v23984_v26  ;;  %v4448_v21 = vmul.f32 %v23656_v61, %v23984_v26 }
 0x8bd   :  { %5041 = vrot.lane.b32.xlu1 %v4448_v21, %s22831_s7 }
 0x8e4   :  { %v18155_v19 = vpop.f32.mrb[6].mxu1 }
 0x8e5   :  { %v22398_v7 = vadd.f32 %v18155_v19, %v3101_v5  ;;  %v3642_v10 = vpop.f32.mrb[7].mxu1 }
 0x8e6   :  { %v22399_v52 = vadd.f32 %v3642_v10, %v3101_v5 }
 0x8e7   :  { %v4455_v9 = vsel %vm93_vm0, %v22398_v7, 0 }
 0x8e8   :  { %v23995_v24 = vand.u32 4294901760, %v4455_v9  ;;  %v4452_v16 = vsel %vm93_vm0, %v22399_v52, 0  ;;  %v24008_v52 = vpop.permute.xlu0 %4415 }
 0x8e9   :  { %v23998_v3 = vand.u32 4294901760, %v4452_v16  ;;  %26187 = vst [vmem:[#allocation66_spill] sm:$0xff] %v24008_v52 }
 0x8ea   :  { %v4537_v61 = vsub.f32 %v4455_v9, %v23995_v24 }
 0x8eb   :  { %v4527_v21 = vsub.f32 %v4452_v16, %v23998_v3 }
 0x8ec   :  { %v4538_v26 = vand.u32 4294901760, %v4537_v61 }
 0x8ed   :  { %v4528_v60 = vand.u32 4294901760, %v4527_v21 }
 0x8ee   :  { %v4539_v23 = vsub.f32 %v4537_v61, %v4538_v26 }
 0x8ef   :  { %v4529_v14 = vsub.f32 %v4527_v21, %v4528_v60 }
 0x8f0   :  { %v4540_v19 = vand.u32 4294901760, %v4539_v23 }
 0x8f1   :  { %v4530_v53 = vand.u32 4294901760, %v4529_v14 }
 0x8f3   :  { %18248 = vmatprep.mubr.f32.mxu1 %v4530_v53 }
 0x8f4   :  { %18249 = vmatmul.mubr.f32.vlgmr.msra.gmra.mrb[8].mxu1 %v4540_v19 }
 0x8f5   :  { %20723 = vmatpush3.bf16.msra.mxu1 %v23918_v58  ;;  %18259 = vmatprep.mubr.f32.mxu1 %v23998_v3  ;;  %v24012_v58 = vpop.permute.xlu1 %4417 }
 0x8f6   :  { %20725 = vmatprep.subr.bf16.mxu1 %v20724_v45  ;;  %26188 = vst [vmem:[#allocation67_spill] sm:$0xff] %v24012_v58 }
 0x8f9   :  { %20727 = vmatpush3.bf16.msra.mxu1 %v20724_v45 }
 0x8fa   :  { %20729 = vmatprep.subr.bf16.mxu1 %v23889_v39 }
 0x8fc   :  { %18260 = vmatmul.mubr.f32.vlgmr.msra.gmra.mrb[8].mxu1 %v23995_v24 }
 0x8fd   :  { %20731 = vmatpush3.bf16.msra.mxu1 %v23889_v39  ;;  %18270 = vmatprep.mubr.f32.mxu1 %v4527_v21 }
 0x8fe   :  { %20733 = vmatprep.subr.bf16.mxu1 %v23920_v28 }
 0x901   :  { %20735 = vmatpush3.bf16.msra.mxu1 %v23920_v28 }
 0x902   :  { %20737 = vmatprep.subr.bf16.mxu1 %v23886_v13 }
 0x903   :  { %v5016_v53 = vpop.permute.xlu0 %5015 }
 0x904   :  { %v5064_v23 = vand.u32 4294901760, %v5016_v53  ;;  %18271 = vmatmul.mubr.f32.vlgmr.msra.gmra.mrb[8].mxu1 %v4537_v61 }
 0x905   :  { %20739 = vmatpush3.bf16.msra.mxu1 %v23886_v13  ;;  %18281 = vmatprep.mubr.f32.mxu1 %v4528_v60 }
 0x906   :  { %v5166_v45 = vsub.f32 %v5016_v53, %v5064_v23  ;;  %20741 = vmatprep.subr.bf16.mxu1 %v23912_v37 }
 0x907   :  { %v5018_v39 = vpop.permute.xlu1 %5017 }
 0x908   :  { %v5167_v16 = vand.u32 4294901760, %v5166_v45  ;;  %v5067_v7 = vand.u32 4294901760, %v5018_v39 }
 0x909   :  { %20743 = vmatpush3.bf16.msra.mxu1 %v23912_v37 }
 0x90a   :  { %v5173_v10 = vsub.f32 %v5018_v39, %v5067_v7  ;;  %20745 = vmatprep.subr.bf16.mxu1 %v23892_v54  ;;  %v5168_v21 = vsub.f32 %v5166_v45, %v5167_v16 }
 0x90b   :  { %v5020_v28 = vpop.permute.xlu0 %5019 }
 0x90c   :  { %v5174_v5 = vand.u32 4294901760, %v5173_v10  ;;  %v5070_v9 = vand.u32 4294901760, %v5020_v28  ;;  %18282 = vmatmul.mubr.f32.vlgmr.msra.gmra.mrb[8].mxu1 %v4538_v26  ;;  %v24018_v61 = vpack.c.bf16 %v5173_v10, %v5166_v45  ;;  %v5169_v55 = vand.u32 4294901760, %v5168_v21 }
 0x90d   :  { %20747 = vmatpush3.bf16.msra.mxu1 %v23892_v54  ;;  %18292 = vmatprep.mubr.f32.mxu1 %v23998_v3 }
 0x90e   :  { %v5175_v60 = vsub.f32 %v5173_v10, %v5174_v5  ;;  %v5180_v14 = vsub.f32 %v5020_v28, %v5070_v9  ;;  %20749 = vmatprep.subr.bf16.mxu1 %v23926_v11  ;;  %v24023_v19 = vpack.c.bf16 %v5174_v5, %v5167_v16 }
 0x90f   :  { %v5022_v53 = vpop.permute.xlu1 %5021 }
 0x910   :  { %v5181_v39 = vand.u32 4294901760, %v5180_v14  ;;  %v5073_v51 = vand.u32 4294901760, %v5022_v53  ;;  %v5176_v63 = vand.u32 4294901760, %v5175_v60 }
 0x911   :  { %20751 = vmatpush3.bf16.msra.mxu1 %v23926_v11 }
 0x912   :  { %v5187_v26 = vsub.f32 %v5022_v53, %v5073_v51  ;;  %20753 = vmatprep.subr.bf16.mxu1 %v23886_v13  ;;  %v20792_v45 = vpack.c.bf16 %v5176_v63, %v5169_v55  ;;  %v5182_v10 = vsub.f32 %v5180_v14, %v5181_v39  ;;  %v24035_v63 = vpack.c.bf16 %v5067_v7, %v5064_v23 }
 0x913   :  { %v5024_v54 = vpop.permute.xlu0 %5023 }
 0x914   :  { %v5188_v35 = vand.u32 4294901760, %v5187_v26  ;;  %v5076_v62 = vand.u32 4294901760, %v5024_v54  ;;  %18293 = vmatmul.mubr.f32.vlgmr.msra.gmra.mrb[8].mxu1 %v23995_v24  ;;  %20793 = vmatprep.subr.bf16.mxu0 %v20792_v45  ;;  %v24028_v16 = vpack.c.bf16 %v5187_v26, %v5180_v14  ;;  %v5183_v53 = vand.u32 4294901760, %v5182_v10 }
 0x915   :  { %20755 = vmatpush3.bf16.msra.mxu1 %v23886_v13  ;;  %18303 = vmatprep.mubr.f32.mxu1 %v23998_v3  ;;  %v24039_v3 = vpack.c.bf16 %v5073_v51, %v5070_v9 }
 0x916   :  { %v5189_v28 = vsub.f32 %v5187_v26, %v5188_v35  ;;  %v5194_v5 = vsub.f32 %v5024_v54, %v5076_v62  ;;  %20757 = vmatprep.subr.bf16.mxu1 %v23912_v37  ;;  %20795 = vmatpush3.bf16.msra.mxu0 %v20792_v45  ;;  %v24033_v11 = vpack.c.bf16 %v5188_v35, %v5181_v39 }
 0x917   :  { %v5026_v55 = vpop.permute.xlu1 %5025 }
 0x918   :  { %v5195_v21 = vand.u32 4294901760, %v5194_v5  ;;  %v5079_v60 = vand.u32 4294901760, %v5026_v55  ;;  %v5190_v56 = vand.u32 4294901760, %v5189_v28 }
 0x919   :  { %20759 = vmatpush3.bf16.msra.mxu1 %v23912_v37 }
 0x91a   :  { %v5201_v14 = vsub.f32 %v5026_v55, %v5079_v60  ;;  %20761 = vmatprep.subr.bf16.mxu1 %v24035_v63  ;;  %v20796_v13 = vpack.c.bf16 %v5190_v56, %v5183_v53  ;;  %v5196_v35 = vsub.f32 %v5194_v5, %v5195_v21  ;;  %v24048_v56 = vpack.c.bf16 %v5079_v60, %v5076_v62 }
 0x91b   :  { %v5028_v26 = vpop.permute.xlu0 %5027 }
 0x91c   :  { %v5202_v54 = vand.u32 4294901760, %v5201_v14  ;;  %v5082_v45 = vand.u32 4294901760, %v5028_v26  ;;  %18304 = vmatmul.mubr.f32.vlgmr.msra.gmra.mrb[8].mxu1 %v23995_v24  ;;  %20797 = vmatprep.subr.bf16.mxu0 %v20796_v13  ;;  %v24042_v23 = vpack.c.bf16 %v5201_v14, %v5194_v5  ;;  %v5197_v28 = vand.u32 4294901760, %v5196_v35 }
 0x91d   :  { %20763 = vmatpush3.bf16.msra.mxu1 %v24035_v63  ;;  %20799 = vmatpush3.bf16.msra.mxu0 %v20796_v13 }
 0x91e   :  { %v5203_v7 = vsub.f32 %v5201_v14, %v5202_v54  ;;  %v5208_v37 = vsub.f32 %v5028_v26, %v5082_v45  ;;  %20765 = vmatprep.subr.bf16.mxu1 %v24039_v3  ;;  %v24046_v39 = vpack.c.bf16 %v5202_v54, %v5195_v21 }
 0x91f   :  { %v5030_v51 = vpop.permute.xlu1 %5029 }
 0x920   :  { %v5209_v9 = vand.u32 4294901760, %v5208_v37  ;;  %v5085_v10 = vand.u32 4294901760, %v5030_v51  ;;  %v5204_v24 = vand.u32 4294901760, %v5203_v7 }
 0x921   :  { %20767 = vmatpush3.bf16.msra.mxu1 %v24039_v3 }
 0x922   :  { %v24051_v5 = vpack.c.bf16 %v5085_v10, %v5082_v45  ;;  %v5215_v55 = vsub.f32 %v5030_v51, %v5085_v10  ;;  %20769 = vmatprep.subr.bf16.mxu1 %v24048_v56  ;;  %v20800_v53 = vpack.c.bf16 %v5204_v24, %v5197_v28  ;;  %v5210_v13 = vsub.f32 %v5208_v37, %v5209_v9 }
 0x923   :  { %v5032_v14 = vpop.permute.xlu0 %5031 }
 0x924   :  { %v5216_v26 = vand.u32 4294901760, %v5215_v55  ;;  %v5088_v21 = vand.u32 4294901760, %v5032_v14  ;;  %20801 = vmatprep.subr.bf16.mxu0 %v20800_v53  ;;  %v24054_v62 = vpack.c.bf16 %v5215_v55, %v5208_v37  ;;  %v5211_v51 = vand.u32 4294901760, %v5210_v13 }
 0x925   :  { %20771 = vmatpush3.bf16.msra.mxu1 %v24048_v56  ;;  %20803 = vmatpush3.bf16.msra.mxu0 %v20800_v53 }
 0x926   :  { %v5217_v60 = vsub.f32 %v5215_v55, %v5216_v26  ;;  %v5222_v54 = vsub.f32 %v5032_v14, %v5088_v21  ;;  %20773 = vmatprep.subr.bf16.mxu1 %v24051_v5  ;;  %v24058_v45 = vpack.c.bf16 %v5216_v26, %v5209_v9 }
 0x927   :  { %v5036_v35 = vpop.permute.xlu0 %5035  ;;  %v5034_v7 = vpop.permute.xlu1 %5033 }
 0x928   :  { %v5223_v10 = vand.u32 4294901760, %v5222_v54  ;;  %v5094_v28 = vand.u32 4294901760, %v5036_v35  ;;  %v5091_v24 = vand.u32 4294901760, %v5034_v7  ;;  %v5218_v32 = vand.u32 4294901760, %v5217_v60 }
 0x929   :  { %20775 = vmatpush3.bf16.msra.mxu1 %v24051_v5 }
 0x92a   :  { %v5236_v37 = vsub.f32 %v5036_v35, %v5094_v28  ;;  %v24061_v27 = vpack.c.bf16 %v5091_v24, %v5088_v21  ;;  %v5229_v20 = vsub.f32 %v5034_v7, %v5091_v24  ;;  %v20804_v53 = vpack.c.bf16 %v5218_v32, %v5211_v51 }
 0x92b   :  { %v5040_v55 = vpop.permute.xlu0 %5039  ;;  %v5038_v14 = vpop.permute.xlu1 %5037  ;;  %v5224_v44 = vsub.f32 %v5222_v54, %v5223_v10 }
 0x92c   :  { %v5237_v57 = vand.u32 4294901760, %v5236_v37  ;;  %v5230_v9 = vand.u32 4294901760, %v5229_v20  ;;  %v5100_v26 = vand.u32 4294901760, %v5040_v55  ;;  %v5097_v40 = vand.u32 4294901760, %v5038_v14  ;;  %20777 = vmatprep.subr.bf16.mxu1 %v24061_v27  ;;  %20805 = vmatprep.subr.bf16.mxu0 %v20804_v53 }
 0x92d   :  { %20779 = vmatpush3.bf16.msra.mxu1 %v24061_v27  ;;  %20807 = vmatpush3.bf16.msra.mxu0 %v20804_v53  ;;  %v24065_v13 = vpack.c.bf16 %v5229_v20, %v5222_v54  ;;  %v5225_v51 = vand.u32 4294901760, %v5224_v44 }
 0x92e   :  { %v5231_v60 = vsub.f32 %v5229_v20, %v5230_v9  ;;  %v5250_v21 = vsub.f32 %v5040_v55, %v5100_v26  ;;  %v24067_v35 = vpack.c.bf16 %v5097_v40, %v5094_v28  ;;  %v5243_v32 = vsub.f32 %v5038_v14, %v5097_v40 }
 0x92f   :  { %v5042_v7 = vpop.permute.xlu1 %5041  ;;  %v5238_v24 = vsub.f32 %v5236_v37, %v5237_v57  ;;  %v24069_v33 = vpack.c.bf16 %v5230_v9, %v5223_v10 }
 0x930   :  { %v5251_v22 = vand.u32 4294901760, %v5250_v21  ;;  %v5244_v1 = vand.u32 4294901760, %v5243_v32  ;;  %v5103_v48 = vand.u32 4294901760, %v5042_v7  ;;  %20781 = vmatprep.subr.bf16.mxu1 %v24067_v35  ;;  %v5232_v49 = vand.u32 4294901760, %v5231_v60 }
 0x931   :  { %20783 = vmatpush3.bf16.msra.mxu1 %v24067_v35  ;;  %v24073_v54 = vpack.c.bf16 %v5243_v32, %v5236_v37  ;;  %v5239_v55 = vand.u32 4294901760, %v5238_v24 }
 0x932   :  { %v5245_v20 = vsub.f32 %v5243_v32, %v5244_v1  ;;  %v24075_v53 = vpack.c.bf16 %v5103_v48, %v5100_v26  ;;  %v5257_v28 = vsub.f32 %v5042_v7, %v5103_v48  ;;  %v20808_v40 = vpack.c.bf16 %v5232_v49, %v5225_v51  ;;  %v63_v51 = vld [vmem:[%s25954_s3 + $0x10] sm:$0xff] }
 0x933   :  { %v24077_v44 = vpack.c.bf16 %v5244_v1, %v5237_v57  ;;  %v5252_v9 = vsub.f32 %v5250_v21, %v5251_v22  ;;  %v64_v57 = vld [vmem:[%s25954_s3 + $0x18] sm:$0xff] }
 0x934   :  { %v5258_v10 = vand.u32 4294901760, %v5257_v28  ;;  %20785 = vmatprep.subr.bf16.mxu1 %v24075_v53  ;;  %20809 = vmatprep.subr.bf16.mxu0 %v20808_v40  ;;  %v5246_v14 = vand.u32 4294901760, %v5245_v20  ;;  %v24080_v59 = vpack.c.bf16 %v5257_v28, %v5250_v21 }
 0x935   :  { %20787 = vmatpush3.bf16.msra.mxu1 %v24075_v53  ;;  %20811 = vmatpush3.bf16.msra.mxu0 %v20808_v40  ;;  %v5253_v48 = vand.u32 4294901760, %v5252_v9  ;;  %v4449_v40 = vmul.f32 %v23660_v17, %v24008_v52  ;;  %v26191_v52 = vand.u32 4294901760, %v23791_v15 }
 0x936   :  { %v5259_v37 = vsub.f32 %v5257_v28, %v5258_v10  ;;  %v20812_v60 = vpack.c.bf16 %v5246_v14, %v5239_v55  ;;  %v24083_v26 = vpack.c.bf16 %v5258_v10, %v5251_v22  ;;  %v4450_v28 = vmul.f32 %v23662_v12, %v24012_v58 }
 0x937   :  { %v26190_v58 = vand.u32 4294901760, %v23784_v34  ;;  %v24181_v2 = vsub.f32 %v23791_v15, %v26191_v52 }
 0x938   :  { %20813 = vmatprep.subr.bf16.mxu0 %v20812_v60  ;;  %v5260_v49 = vand.u32 4294901760, %v5259_v37 }
 0x939   :  { %20815 = vmatpush3.bf16.msra.mxu0 %v20812_v60  ;;  %v26041_v60 = vand.u32 4294901760, %v23784_v34  ;;  %v26053_v52 = vand.u32 4294901760, %v24181_v2 }
 0x93a   :  { %v20816_v1 = vpack.c.bf16 %v5260_v49, %v5253_v48  ;;  %v26040_v48 = vand.u32 4294901760, %v23791_v15 }
 0x93c   :  { %20817 = vmatprep.subr.bf16.mxu0 %v20816_v1  ;;  %v24105_v17 = vpack.c.bf16 %v26040_v48, %v26041_v60  ;;  %v5769_v60 = vand.u32 4294901760, %v23833_v6 }
 0x93d   :  { %20819 = vmatpush3.bf16.msra.mxu0 %v20816_v1 }
 0x9ef   :  { %v18305_v21 = vpop.f32.mrb[8].mxu1 }
 0x9f0   :  { %v4986_v32 = vmul.f32 0.35355338, %v18305_v21  ;;  %v4975_v7 = vpop.f32.mrb[9].mxu1 }
 0x9f1   :  { %v4985_v22 = vmul.f32 0.35355338, %v4975_v7 }
 0x9f2   :  { %v4988_v24 = vadd.f32 %v4986_v32, %v64_v57 }
 0x9f3   :  { %v4987_v20 = vadd.f32 %v4985_v22, %v63_v51 }
 0x9f4   :  { %4991 = vmax.xlane.f32.xlu1 %v4988_v24 }
 0x9f5   :  { %4989 = vmax.xlane.f32.xlu0 %v4987_v20 }
 0xa05   :  { %5045 = vrot.lane.b32.xlu1 %v4450_v28, %s22831_s7 }
 0xa0b   :  { %5043 = vrot.lane.b32.xlu0 %v4449_v40, %s22831_s7 }
 0xa81   :  { %v4992_v55 = vpop.xlane.xlu1 %4991 }
 0xa82   :  { %v4994_v10 = vsub.f32 %v4988_v24, %v4992_v55  ;;  %v4990_v14 = vpop.xlane.xlu0 %4989 }
 0xa83   :  { %v4993_v9 = vsub.f32 %v4987_v20, %v4990_v14 }
 0xa84   :  { %v4997_v37 = vmul.f32 1.442695, %v4994_v10 }
 0xa85   :  { %v4995_v49 = vmul.f32 1.442695, %v4993_v9  ;;  %v5046_v1 = vpop.permute.xlu1 %5045 }
 0xa86   :  { %22725 = vpow2.f32 %v4997_v37  ;;  %v5109_v12 = vand.u32 4294901760, %v5046_v1  ;;  %v5044_v57 = vpop.permute.xlu0 %5043 }
 0xa87   :  { %22727 = vpow2.f32 %v4995_v49  ;;  %v5106_v21 = vand.u32 4294901760, %v5044_v57 }
 0xa88   :  { %v24099_v32 = vsub.f32 %v5046_v1, %v5109_v12 }
 0xa89   :  { %v24107_v7 = vpack.c.bf16 %v5109_v12, %v5106_v21  ;;  %v24109_v51 = vsub.f32 %v5044_v57, %v5106_v21 }
 0xa8a   :  { %v5272_v22 = vand.u32 4294901760, %v24099_v32 }
 0xa8b   :  { %v5265_v24 = vand.u32 4294901760, %v24109_v51  ;;  %20789 = vmatprep.subr.bf16.mxu1 %v24107_v7 }
 0xa8c   :  { %v5273_v20 = vsub.f32 %v24099_v32, %v5272_v22  ;;  %20791 = vmatpush3.bf16.msra.mxu1 %v24107_v7 }
 0xa8d   :  { %v5266_v28 = vsub.f32 %v24109_v51, %v5265_v24  ;;  %20953 = vmatprep.subr.bf16.mxu1 %v24105_v17  ;;  %v24118_v40 = vpack.c.bf16 %v5272_v22, %v5265_v24  ;;  %v5754_v24 = vand.u32 4294901760, %v23798_v42 }
 0xa8e   :  { %v5274_v55 = vand.u32 4294901760, %v5273_v20  ;;  %v5757_v20 = vand.u32 4294901760, %v23805_v36 }
 0xa8f   :  { %v5267_v10 = vand.u32 4294901760, %v5266_v28 }
 0xa90   :  { %v22726_v14 = vpop.eup %22725 }
 0xa91   :  { %v22728_v9 = vpop.eup %22727  ;;  %v24120_v37 = vand.u32 4294901760, %v22726_v14  ;;  %v20820_v49 = vpack.c.bf16 %v5274_v55, %v5267_v10 }
 0xa92   :  { %v24122_v1 = vand.u32 4294901760, %v22728_v9 }
 0xa93   :  { %v24125_v12 = vsub.f32 %v22726_v14, %v24120_v37  ;;  %20821 = vmatprep.subr.bf16.mxu0 %v20820_v49  ;;  %v24148_v14 = vpack.c.bf16 %v5757_v20, %v5754_v24 }
 0xa94   :  { %20823 = vmatpush3.bf16.msra.mxu0 %v20820_v49  ;;  %18373 = vmatprep.mubr.f32.mxu0 %v24122_v1  ;;  %v24129_v57 = vsub.f32 %v22728_v9, %v24122_v1  ;;  %v5760_v9 = vand.u32 4294901760, %v23812_v18  ;;  %v5763_v49 = vand.u32 4294901760, %v23819_v29 }
 0xa95   :  { %20825 = vmatprep.subr.bf16.mxu0 %v24018_v61  ;;  %v24133_v21 = vand.u32 4294901760, %v24125_v12 }
 0xa96   :  { %v24136_v22 = vand.u32 4294901760, %v24129_v57 }
 0xa97   :  { %18374 = vmatmul.mubr.f32.vlgmr.msra.gmra.mrb[10].mxu0 %v24120_v37  ;;  %v5157_v28 = vsub.f32 %v24125_v12, %v24133_v21 }
 0xa98   :  { %20827 = vmatpush3.bf16.msra.mxu0 %v24018_v61  ;;  %18408 = vmatprep.mubr.f32.mxu0 %v24129_v57  ;;  %v5147_v55 = vsub.f32 %v24129_v57, %v24136_v22  ;;  %v24158_v61 = vpack.c.bf16 %v5763_v49, %v5760_v9 }
 0xa99   :  { %20829 = vmatprep.subr.bf16.mxu0 %v24028_v16  ;;  %v24152_v48 = vand.u32 4294901760, %v5157_v28  ;;  %v5772_v28 = vand.u32 4294901760, %v23840_v38 }
 0xa9a   :  { %v5148_v10 = vand.u32 4294901760, %v5147_v55  ;;  %26189 = vst [vmem:[#allocation68_spill] sm:$0xff] %v24158_v61  ;;  %v5766_v55 = vand.u32 4294901760, %v23826_v31 }
 0xa9c   :  { %18338 = vmatprep.mubr.f32.mxu1 %v5148_v10  ;;  %20831 = vmatpush3.bf16.msra.mxu0 %v24028_v16  ;;  %v24166_v16 = vpack.c.bf16 %v5769_v60, %v5766_v55 }
 0xa9d   :  { %18339 = vmatmul.mubr.f32.vlgmr.msra.gmra.mrb[10].mxu1 %v24152_v48  ;;  %20833 = vmatprep.subr.bf16.mxu0 %v24042_v23 }
 0xa9e   :  { %20955 = vmatpush3.bf16.msra.mxu1 %v24105_v17  ;;  %18548 = vmatprep.mubr.f32.mxu1 %v5148_v10  ;;  %v5775_v10 = vand.u32 4294901760, %v23847_v46 }
 0xa9f   :  { %20957 = vmatprep.subr.bf16.mxu1 %v24148_v14 }
 0xaa0   :  { %20835 = vmatpush3.bf16.msra.mxu0 %v24042_v23  ;;  %v24176_v23 = vsub.f32 %v23784_v34, %v26190_v58  ;;  %v24185_v0 = vpack.c.bf16 %v5775_v10, %v5772_v28  ;;  %v24191_v34 = vsub.f32 %v23798_v42, %v5754_v24  ;;  %v24197_v58 = vsub.f32 %v23805_v36, %v5757_v20 }
 0xaa1   :  { %20837 = vmatprep.subr.bf16.mxu0 %v24054_v62  ;;  %v24219_v42 = vsub.f32 %v23812_v18, %v5760_v9 }
 0xaa2   :  { %20959 = vmatpush3.bf16.msra.mxu1 %v24148_v14  ;;  %v26052_v15 = vand.u32 4294901760, %v24176_v23  ;;  %v26194_v18 = vand.u32 4294901760, %v24191_v34 }
 0xaa3   :  { %20961 = vmatprep.subr.bf16.mxu1 %v24158_v61  ;;  %v26061_v20 = vand.u32 4294901760, %v24219_v42 }
 0xaa4   :  { %20839 = vmatpush3.bf16.msra.mxu0 %v24054_v62  ;;  %v26054_v62 = vand.u32 4294901760, %v23745_v4  ;;  %v5852_v36 = vsub.f32 %v24176_v23, %v26052_v15  ;;  %v5793_v15 = vand.u32 4294901760, %v23868_v8 }
 0xaa5   :  { %20841 = vmatprep.subr.bf16.mxu0 %v24065_v13 }
 0xaa6   :  { %20963 = vmatpush3.bf16.msra.mxu1 %v24158_v61  ;;  %v24203_v61 = vpack.c.bf16 %v26192_v47, %v5778_v25  ;;  %v5859_v47 = vsub.f32 %v24181_v2, %v26053_v52  ;;  %v20852_v52 = vpack.c.bf16 %v24099_v32, %v24109_v51  ;;  %v5853_v9 = vand.u32 4294901760, %v5852_v36 }
 0xaa7   :  { %20965 = vmatprep.subr.bf16.mxu1 %v24166_v16  ;;  %v24249_v51 = vsub.f32 %v23833_v6, %v5769_v60  ;;  %v24264_v6 = vsub.f32 %v23840_v38, %v5772_v28  ;;  %v24267_v60 = vsub.f32 %v23847_v46, %v5775_v10  ;;  %v24281_v38 = vsub.f32 %v23730_v41, %v5778_v25 }
 0xaa8   :  { %20843 = vmatpush3.bf16.msra.mxu0 %v24065_v13  ;;  %v26193_v13 = vand.u32 4294901760, %v23861_v30  ;;  %v26197_v25 = vand.u32 4294901760, %v23854_v43 }
 0xaa9   :  { %20845 = vmatprep.subr.bf16.mxu0 %v24073_v54  ;;  %v26060_v10 = vand.u32 4294901760, %v24264_v6 }
 0xaaa   :  { %20967 = vmatpush3.bf16.msra.mxu1 %v24166_v16  ;;  %v24229_v24 = vpack.c.bf16 %v26193_v13, %v26054_v62  ;;  %v24241_v13 = vsub.f32 %v23826_v31, %v5766_v55  ;;  %v26195_v62 = vand.u32 4294901760, %v24197_v58  ;;  %v5880_v55 = vsub.f32 %v24219_v42, %v26061_v20 }
 0xaab   :  { %20969 = vmatprep.subr.bf16.mxu1 %v24185_v0  ;;  %v24296_v41 = vsub.f32 %v23854_v43, %v26197_v25  ;;  %v24350_v20 = vsub.f32 %v23868_v8, %v5793_v15 }
 0xaac   :  { %20847 = vmatpush3.bf16.msra.mxu0 %v24073_v54  ;;  %v24223_v54 = vsub.f32 %v23819_v29, %v5763_v49  ;;  %v5866_v29 = vsub.f32 %v24191_v34, %v26194_v18  ;;  %v5860_v49 = vand.u32 4294901760, %v5859_v47  ;;  %v5873_v32 = vsub.f32 %v24197_v58, %v26195_v62 }
 0xaad   :  { %20849 = vmatprep.subr.bf16.mxu0 %v24080_v59  ;;  %v26196_v18 = vand.u32 4294901760, %v23755_v50  ;;  %v26055_v62 = vand.u32 4294901760, %v24241_v13  ;;  %v5881_v46 = vand.u32 4294901760, %v5880_v55 }
 0xaae   :  { %20971 = vmatpush3.bf16.msra.mxu1 %v24185_v0  ;;  %v5867_v31 = vand.u32 4294901760, %v5866_v29  ;;  %v5874_v47 = vand.u32 4294901760, %v5873_v32  ;;  %v26056_v29 = vand.u32 4294901760, %v24249_v51  ;;  %v26058_v32 = vand.u32 4294901760, %v24267_v60 }
 0xaaf   :  { %20973 = vmatprep.subr.bf16.mxu1 %v24203_v61  ;;  %v24255_v36 = vpack.c.bf16 %v5793_v15, %v26196_v18  ;;  %v24276_v18 = vpack.c.bf16 %v5860_v49, %v5853_v9  ;;  %v5894_v28 = vsub.f32 %v24241_v13, %v26055_v62  ;;  %v26059_v62 = vand.u32 4294901760, %v24281_v38 }
 0xab0   :  { %20851 = vmatpush3.bf16.msra.mxu0 %v24080_v59  ;;  %v26057_v59 = vand.u32 4294901760, %v24223_v54  ;;  %v5901_v49 = vsub.f32 %v24249_v51, %v26056_v29  ;;  %v24299_v55 = vpack.c.bf16 %v5874_v47, %v5867_v31  ;;  %v26198_v29 = vand.u32 4294901760, %v23745_v4 }
 0xab1   :  { %20853 = vmatprep.subr.bf16.mxu0 %v20852_v52  ;;  %v5895_v25 = vand.u32 4294901760, %v5894_v28  ;;  %v5908_v31 = vsub.f32 %v24264_v6, %v26060_v10  ;;  %v5915_v47 = vsub.f32 %v24267_v60, %v26058_v32  ;;  %v26199_v4 = vand.u32 4294901760, %v23861_v30  ;;  %v22777_v32 = vld [vmem:[%s25955_s4 + $0xc0] sm:$0xff] }
 0xab2   :  { %20975 = vmatpush3.bf16.msra.mxu1 %v24203_v61  ;;  %v5956_v15 = vand.u32 4294901760, %v24350_v20 }
 0xab3   :  { %20977 = vmatprep.subr.bf16.mxu1 %v24229_v24 }
 0xab4   :  { %20855 = vmatpush3.bf16.msra.mxu0 %v20852_v52  ;;  %v5887_v52 = vsub.f32 %v24223_v54, %v26057_v59  ;;  %v5928_v59 = vand.u32 4294901760, %v24296_v41 }
 0xab5   :  { %20857 = vmatprep.subr.bf16.mxu0 %v24035_v63 }
 0xab6   :  { %20979 = vmatpush3.bf16.msra.mxu1 %v24229_v24  ;;  %v5888_v9 = vand.u32 4294901760, %v5887_v52  ;;  %v22776_v52 = vld [vmem:[%s25955_s4 + $0xb0] sm:$0xff] }
 0xab7   :  { %18409 = vmatmul.mubr.f32.vlgmr.msra.gmra.mrb[10].mxu0 %v24125_v12  ;;  %20981 = vmatprep.subr.bf16.mxu1 %v24255_v36  ;;  %v24310_v43 = vsub.f32 %v22776_v52, %v26198_v29  ;;  %v24324_v29 = vsub.f32 %v23861_v30, %v26199_v4  ;;  %v5922_v52 = vsub.f32 %v24281_v38, %v26059_v62  ;;  %v26200_v30 = vand.u32 4294901760, %v23755_v50 }
 0xab8   :  { %20859 = vmatpush3.bf16.msra.mxu0 %v24035_v63  ;;  %18443 = vmatprep.mubr.f32.mxu0 %v24136_v22  ;;  %v24327_v28 = vpack.c.bf16 %v5888_v9, %v5881_v46  ;;  %v5909_v46 = vand.u32 4294901760, %v5908_v31  ;;  %v5916_v9 = vand.u32 4294901760, %v5915_v47  ;;  %v5929_v62 = vsub.f32 %v24296_v41, %v5928_v59 }
 0xab9   :  { %20861 = vmatprep.subr.bf16.mxu0 %v24039_v3  ;;  %v24340_v4 = vsub.f32 %v22777_v32, %v26200_v30  ;;  %v26062_v10 = vand.u32 4294901760, %v24324_v29  ;;  %v5923_v32 = vand.u32 4294901760, %v5922_v52 }
 0xaba   :  { %20983 = vmatpush3.bf16.msra.mxu1 %v24255_v36  ;;  %v5930_v30 = vand.u32 4294901760, %v5929_v62 }
 0xabb   :  { %20985 = vmatprep.subr.bf16.mxu1 %v24276_v18  ;;  %v26063_v47 = vand.u32 4294901760, %v24340_v4  ;;  %v5943_v8 = vsub.f32 %v24324_v29, %v26062_v10  ;;  %v5957_v10 = vsub.f32 %v24350_v20, %v5956_v15 }
 0xabc   :  { %20863 = vmatpush3.bf16.msra.mxu0 %v24039_v3 }
 0xabd   :  { %18549 = vmatmul.mubr.f32.vlgmr.msra.gmra.mrb[12].mxu1 %v24152_v48  ;;  %20865 = vmatprep.subr.bf16.mxu0 %v24048_v56  ;;  %v5902_v48 = vand.u32 4294901760, %v5901_v49  ;;  %v5935_v49 = vand.u32 4294901760, %v24310_v43  ;;  %v5950_v62 = vsub.f32 %v24340_v4, %v26063_v47  ;;  %v5944_v52 = vand.u32 4294901760, %v5943_v8 }
 0xabe   :  { %20987 = vmatpush3.bf16.msra.mxu1 %v24276_v18  ;;  %18583 = vmatprep.mubr.f32.mxu1 %v24122_v1 }
 0xabf   :  { %20989 = vmatprep.subr.bf16.mxu1 %v24299_v55  ;;  %v24353_v50 = vpack.c.bf16 %v5902_v48, %v5895_v25  ;;  %v5936_v31 = vsub.f32 %v24310_v43, %v5935_v49  ;;  %v24367_v25 = vpack.c.bf16 %v5916_v9, %v5909_v46  ;;  %v24379_v46 = vpack.c.bf16 %v5930_v30, %v5923_v32 }
 0xac0   :  { %20867 = vmatpush3.bf16.msra.mxu0 %v24048_v56  ;;  %v5951_v9 = vand.u32 4294901760, %v5950_v62  ;;  %v24409_v30 = vpack.c.bf16 %v24197_v58, %v24191_v34 }
 0xac1   :  { %20869 = vmatprep.subr.bf16.mxu0 %v24051_v5  ;;  %26201 = vst [vmem:[#allocation69_spill] sm:$0xff] %v24353_v50  ;;  %26202 = vst [vmem:[#allocation70_spill] sm:$0xff] %v24367_v25  ;;  %v5937_v48 = vand.u32 4294901760, %v5936_v31  ;;  %v5958_v31 = vand.u32 4294901760, %v5957_v10  ;;  %v24400_v10 = vpack.c.bf16 %v24181_v2, %v24176_v23 }
 0xac2   :  { %20991 = vmatpush3.bf16.msra.mxu1 %v24299_v55  ;;  %26203 = vst [vmem:[#allocation71_spill] sm:$0xff] %v24379_v46  ;;  %26207 = vst [vmem:[#allocation75_spill] sm:$0xff] %v24409_v30 }
 0xac3   :  { %20993 = vmatprep.subr.bf16.mxu1 %v24327_v28  ;;  %v24385_v47 = vpack.c.bf16 %v5944_v52, %v5937_v48  ;;  %v24391_v32 = vpack.c.bf16 %v5958_v31, %v5951_v9  ;;  %26206 = vst [vmem:[#allocation74_spill] sm:$0xff] %v24400_v10 }
 0xac4   :  { %20871 = vmatpush3.bf16.msra.mxu0 %v24051_v5 }
 0xac5   :  { %20873 = vmatprep.subr.bf16.mxu0 %v24061_v27  ;;  %26204 = vst [vmem:[#allocation72_spill] sm:$0xff] %v24385_v47  ;;  %26205 = vst [vmem:[#allocation73_spill] sm:$0xff] %v24391_v32 }
 0xac6   :  { %20995 = vmatpush3.bf16.msra.mxu1 %v24327_v28 }
 0xac7   :  { %20997 = vmatprep.subr.bf16.mxu1 %v24353_v50 }
 0xac8   :  { %20875 = vmatpush3.bf16.msra.mxu0 %v24061_v27 }
 0xac9   :  { %20877 = vmatprep.subr.bf16.mxu0 %v24067_v35 }
 0xaca   :  { %20999 = vmatpush3.bf16.msra.mxu1 %v24353_v50 }
 0xacb   :  { %21001 = vmatprep.subr.bf16.mxu1 %v24367_v25 }
 0xacc   :  { %20879 = vmatpush3.bf16.msra.mxu0 %v24067_v35 }
 0xacd   :  { %20881 = vmatprep.subr.bf16.mxu0 %v24075_v53 }
 0xace   :  { %21003 = vmatpush3.bf16.msra.mxu1 %v24367_v25 }
 0xacf   :  { %21005 = vmatprep.subr.bf16.mxu1 %v24379_v46 }
 0xad0   :  { %20883 = vmatpush3.bf16.msra.mxu0 %v24075_v53 }
 0xad1   :  { %20885 = vmatprep.subr.bf16.mxu0 %v24107_v7 }
 0xad2   :  { %21007 = vmatpush3.bf16.msra.mxu1 %v24379_v46 }
 0xad3   :  { %21009 = vmatprep.subr.bf16.mxu1 %v24385_v47 }
 0xad4   :  { %20887 = vmatpush3.bf16.msra.mxu0 %v24107_v7 }
 0xad5   :  { %20889 = vmatprep.subr.bf16.mxu0 %v24023_v19 }
 0xad6   :  { %21011 = vmatpush3.bf16.msra.mxu1 %v24385_v47 }
 0xad7   :  { %18444 = vmatmul.mubr.f32.vlgmr.msra.gmra.mrb[10].mxu0 %v24133_v21  ;;  %21013 = vmatprep.subr.bf16.mxu1 %v24391_v32 }
 0xad8   :  { %20891 = vmatpush3.bf16.msra.mxu0 %v24023_v19  ;;  %18478 = vmatprep.mubr.f32.mxu0 %v24122_v1  ;;  %v24419_v19 = vpack.c.bf16 %v24223_v54, %v24219_v42 }
 0xad9   :  { %20893 = vmatprep.subr.bf16.mxu0 %v24033_v11 }
 0xada   :  { %21015 = vmatpush3.bf16.msra.mxu1 %v24391_v32  ;;  %26208 = vst [vmem:[#allocation76_spill] sm:$0xff] %v24419_v19 }
 0xadb   :  { %21017 = vmatprep.subr.bf16.mxu1 %v24400_v10 }
 0xadc   :  { %20895 = vmatpush3.bf16.msra.mxu0 %v24033_v11  ;;  %v24427_v11 = vpack.c.bf16 %v24249_v51, %v24241_v13 }
 0xadd   :  { %18584 = vmatmul.mubr.f32.vlgmr.msra.gmra.mrb[12].mxu1 %v24120_v37  ;;  %20897 = vmatprep.subr.bf16.mxu0 %v24046_v39 }
 0xade   :  { %21019 = vmatpush3.bf16.msra.mxu1 %v24400_v10  ;;  %18618 = vmatprep.mubr.f32.mxu1 %v24129_v57  ;;  %26209 = vst [vmem:[#allocation77_spill] sm:$0xff] %v24427_v11 }
 0xadf   :  { %21021 = vmatprep.subr.bf16.mxu1 %v24409_v30 }
 0xae0   :  { %20899 = vmatpush3.bf16.msra.mxu0 %v24046_v39  ;;  %v24435_v39 = vpack.c.bf16 %v24267_v60, %v24264_v6 }
 0xae1   :  { %20901 = vmatprep.subr.bf16.mxu0 %v24058_v45 }
 0xae2   :  { %21023 = vmatpush3.bf16.msra.mxu1 %v24409_v30  ;;  %26210 = vst [vmem:[#allocation78_spill] sm:$0xff] %v24435_v39 }
 0xae3   :  { %21025 = vmatprep.subr.bf16.mxu1 %v24419_v19 }
 0xae4   :  { %20903 = vmatpush3.bf16.msra.mxu0 %v24058_v45  ;;  %v24443_v45 = vpack.c.bf16 %v24296_v41, %v24281_v38 }
 0xae5   :  { %20905 = vmatprep.subr.bf16.mxu0 %v24069_v33 }
 0xae6   :  { %21027 = vmatpush3.bf16.msra.mxu1 %v24419_v19  ;;  %26211 = vst [vmem:[#allocation79_spill] sm:$0xff] %v24443_v45 }
 0xae7   :  { %21029 = vmatprep.subr.bf16.mxu1 %v24427_v11 }
 0xae8   :  { %20907 = vmatpush3.bf16.msra.mxu0 %v24069_v33  ;;  %v24451_v33 = vpack.c.bf16 %v24324_v29, %v24310_v43 }
 0xae9   :  { %20909 = vmatprep.subr.bf16.mxu0 %v24077_v44 }
 0xaea   :  { %21031 = vmatpush3.bf16.msra.mxu1 %v24427_v11  ;;  %26212 = vst [vmem:[#allocation80_spill] sm:$0xff] %v24451_v33 }
 0xaeb   :  { %21033 = vmatprep.subr.bf16.mxu1 %v24435_v39 }
 0xaec   :  { %20911 = vmatpush3.bf16.msra.mxu0 %v24077_v44  ;;  %v24459_v44 = vpack.c.bf16 %v24350_v20, %v24340_v4 }
 0xaed   :  { %20913 = vmatprep.subr.bf16.mxu0 %v24083_v26 }
 0xaee   :  { %21035 = vmatpush3.bf16.msra.mxu1 %v24435_v39  ;;  %26213 = vst [vmem:[#allocation81_spill] sm:$0xff] %v24459_v44 }
 0xaef   :  { %21037 = vmatprep.subr.bf16.mxu1 %v24443_v45 }
 0xaf0   :  { %20915 = vmatpush3.bf16.msra.mxu0 %v24083_v26  ;;  %v26222_v26 = vand.u32 4294901760, %v24223_v54 }
 0xaf1   :  { %20917 = vmatprep.subr.bf16.mxu0 %v24118_v40 }
 0xaf2   :  { %21039 = vmatpush3.bf16.msra.mxu1 %v24443_v45 }
 0xaf3   :  { %21041 = vmatprep.subr.bf16.mxu1 %v24451_v33 }
 0xaf4   :  { %20919 = vmatpush3.bf16.msra.mxu0 %v24118_v40  ;;  %v26224_v40 = vand.u32 4294901760, %v24241_v13  ;;  %v26234_v13 = vand.u32 4294901760, %v24340_v4 }
 0xaf5   :  { %20921 = vmatprep.subr.bf16.mxu0 %v24035_v63 }
 0xaf6   :  { %21043 = vmatpush3.bf16.msra.mxu1 %v24451_v33 }
 0xaf7   :  { %18479 = vmatmul.mubr.f32.vlgmr.msra.gmra.mrb[10].mxu0 %v24120_v37  ;;  %21045 = vmatprep.subr.bf16.mxu1 %v24459_v44 }
 0xaf8   :  { %20923 = vmatpush3.bf16.msra.mxu0 %v24035_v63  ;;  %18513 = vmatprep.mubr.f32.mxu0 %v24122_v1  ;;  %v26214_v63 = vld [vmem:[#allocation68_spill] sm:$0xff] }
 0xaf9   :  { %20925 = vmatprep.subr.bf16.mxu0 %v24039_v3 }
 0xafa   :  { %21047 = vmatpush3.bf16.msra.mxu1 %v24459_v44 }
 0xafb   :  { %21049 = vmatprep.subr.bf16.mxu1 %v24105_v17 }
 0xafc   :  { %20927 = vmatpush3.bf16.msra.mxu0 %v24039_v3  ;;  %v26216_v3 = vand.u32 4294901760, %v24181_v2  ;;  %v26221_v2 = vand.u32 4294901760, %v24219_v42  ;;  %v26232_v42 = vand.u32 4294901760, %v24324_v29 }
 0xafd   :  { %18619 = vmatmul.mubr.f32.vlgmr.msra.gmra.mrb[12].mxu1 %v24125_v12  ;;  %20929 = vmatprep.subr.bf16.mxu0 %v24048_v56  ;;  %v26225_v12 = vand.u32 4294901760, %v24249_v51  ;;  %v77_v51 = vld [vmem:[%s25953_s2 + $0x20] sm:$0xff] }
 0xafe   :  { %21051 = vmatpush3.bf16.msra.mxu1 %v24105_v17  ;;  %18653 = vmatprep.mubr.f32.mxu1 %v24136_v22  ;;  %v26228_v22 = vand.u32 4294901760, %v24267_v60  ;;  %v24555_v54 = vpack.c.bf16 %v26232_v42, %v5935_v49  ;;  %v79_v60 = vld [vmem:[%s25953_s2 + $0x30] sm:$0xff] }
 0xaff   :  { %21053 = vmatprep.subr.bf16.mxu1 %v24148_v14  ;;  %v24531_v57 = vpack.c.bf16 %v26225_v12, %v26224_v40  ;;  %v6454_v43 = vand.u32 4294901760, %v79_v60 }
 0xb00   :  { %20931 = vmatpush3.bf16.msra.mxu0 %v24048_v56  ;;  %26233 = vst [vmem:[#allocation87_spill] sm:$0xff] %v24555_v54 }
 0xb01   :  { %20933 = vmatprep.subr.bf16.mxu0 %v24051_v5  ;;  %26226 = vst [vmem:[#allocation84_spill] sm:$0xff] %v24531_v57  ;;  %v6552_v31 = vsub.f32 %v79_v60, %v6454_v43 }
 0xb02   :  { %21055 = vmatpush3.bf16.msra.mxu1 %v24148_v14 }
 0xb03   :  { %21057 = vmatprep.subr.bf16.mxu1 %v26214_v63 }
 0xb04   :  { %20935 = vmatpush3.bf16.msra.mxu0 %v24051_v5  ;;  %v26218_v5 = vand.u32 4294901760, %v24191_v34  ;;  %v26230_v34 = vand.u32 4294901760, %v24281_v38  ;;  %v6448_v38 = vand.u32 4294901760, %v77_v51 }
 0xb05   :  { %20937 = vmatprep.subr.bf16.mxu0 %v24061_v27 }
 0xb06   :  { %21059 = vmatpush3.bf16.msra.mxu1 %v26214_v63  ;;  %v6538_v8 = vsub.f32 %v77_v51, %v6448_v38 }
 0xb07   :  { %21061 = vmatprep.subr.bf16.mxu1 %v24166_v16 }
 0xb08   :  { %20939 = vmatpush3.bf16.msra.mxu0 %v24061_v27  ;;  %v26215_v27 = vand.u32 4294901760, %v24176_v23  ;;  %v6539_v48 = vand.u32 4294901760, %v6538_v8 }
 0xb09   :  { %20941 = vmatprep.subr.bf16.mxu0 %v24067_v35 }
 0xb0a   :  { %21063 = vmatpush3.bf16.msra.mxu1 %v24166_v16  ;;  %v24505_v56 = vpack.c.bf16 %v26216_v3, %v26215_v27  ;;  %v6540_v52 = vsub.f32 %v6538_v8, %v6539_v48 }
 0xb0b   :  { %21065 = vmatprep.subr.bf16.mxu1 %v24185_v0 }
 0xb0c   :  { %20943 = vmatpush3.bf16.msra.mxu0 %v24067_v35  ;;  %26217 = vst [vmem:[#allocation68_spill] sm:$0xff] %v24505_v56  ;;  %v26219_v35 = vand.u32 4294901760, %v24197_v58  ;;  %v24547_v58 = vpack.c.bf16 %v5928_v59, %v26230_v34  ;;  %v24563_v59 = vpack.c.bf16 %v5956_v15, %v26234_v13  ;;  %v6541_v3 = vand.u32 4294901760, %v6540_v52 }
 0xb0d   :  { %20945 = vmatprep.subr.bf16.mxu0 %v24075_v53 }
 0xb0e   :  { %21067 = vmatpush3.bf16.msra.mxu1 %v24185_v0  ;;  %26231 = vst [vmem:[#allocation86_spill] sm:$0xff] %v24547_v58  ;;  %26235 = vst [vmem:[#allocation88_spill] sm:$0xff] %v24563_v59 }
 0xb0f   :  { %21069 = vmatprep.subr.bf16.mxu1 %v24203_v61 }
 0xb10   :  { %20947 = vmatpush3.bf16.msra.mxu0 %v24075_v53  ;;  %v24513_v53 = vpack.c.bf16 %v26219_v35, %v26218_v5  ;;  %v6553_v35 = vand.u32 4294901760, %v6552_v31 }
 0xb11   :  { %20949 = vmatprep.subr.bf16.mxu0 %v24107_v7 }
 0xb12   :  { %21071 = vmatpush3.bf16.msra.mxu1 %v24203_v61  ;;  %26220 = vst [vmem:[#allocation82_spill] sm:$0xff] %v24513_v53  ;;  %v6554_v40 = vsub.f32 %v6552_v31, %v6553_v35 }
 0xb13   :  { %21073 = vmatprep.subr.bf16.mxu1 %v24229_v24 }
 0xb14   :  { %20951 = vmatpush3.bf16.msra.mxu0 %v24107_v7  ;;  %v24523_v7 = vpack.c.bf16 %v26222_v26, %v26221_v2 }
 0xb16   :  { %21075 = vmatpush3.bf16.msra.mxu1 %v24229_v24  ;;  %26223 = vst [vmem:[#allocation83_spill] sm:$0xff] %v24523_v7 }
 0xb17   :  { %18514 = vmatmul.mubr.f32.vlgmr.msra.gmra.mrb[10].mxu0 %v24120_v37  ;;  %21077 = vmatprep.subr.bf16.mxu1 %v24255_v36 }
 0xb1a   :  { %21079 = vmatpush3.bf16.msra.mxu1 %v24255_v36 }
 0xb1b   :  { %21081 = vmatprep.subr.bf16.mxu1 %v24505_v56 }
 0xb1d   :  { %18654 = vmatmul.mubr.f32.vlgmr.msra.gmra.mrb[12].mxu1 %v24133_v21  ;;  %v26227_v21 = vand.u32 4294901760, %v24264_v6  ;;  %v78_v6 = vld [vmem:[%s25953_s2 + $0x28] sm:$0xff] }
 0xb1e   :  { %21083 = vmatpush3.bf16.msra.mxu1 %v24505_v56  ;;  %18688 = vmatprep.mubr.f32.mxu1 %v24122_v1  ;;  %v6451_v41 = vand.u32 4294901760, %v78_v6 }
 0xb1f   :  { %21085 = vmatprep.subr.bf16.mxu1 %v24513_v53  ;;  %v24539_v23 = vpack.c.bf16 %v26228_v22, %v26227_v21  ;;  %v6555_v21 = vand.u32 4294901760, %v6554_v40 }
 0xb20   :  { %v24599_v49 = vpack.c.bf16 %v6451_v41, %v6448_v38  ;;  %v6545_v15 = vsub.f32 %v78_v6, %v6451_v41 }
 0xb21   :  { %26229 = vst [vmem:[#allocation85_spill] sm:$0xff] %v24539_v23 }
 0xb22   :  { %21087 = vmatpush3.bf16.msra.mxu1 %v24513_v53  ;;  %21145 = vmatprep.subr.bf16.mxu0 %v24599_v49  ;;  %v6546_v62 = vand.u32 4294901760, %v6545_v15  ;;  %v21160_v42 = vpack.c.bf16 %v6545_v15, %v6538_v8 }
 0xb23   :  { %21089 = vmatprep.subr.bf16.mxu1 %v24523_v7  ;;  %21147 = vmatpush3.bf16.msra.mxu0 %v24599_v49 }
 0xb24   :  { %v6547_v9 = vsub.f32 %v6545_v15, %v6546_v62  ;;  %v21176_v51 = vpack.c.bf16 %v6546_v62, %v6539_v48 }
 0xb26   :  { %21091 = vmatpush3.bf16.msra.mxu1 %v24523_v7  ;;  %v6548_v5 = vand.u32 4294901760, %v6547_v9 }
 0xb27   :  { %21093 = vmatprep.subr.bf16.mxu1 %v24531_v57 }
 0xb28   :  { %v21152_v26 = vpack.c.bf16 %v6548_v5, %v6541_v3 }
 0xb2a   :  { %21095 = vmatpush3.bf16.msra.mxu1 %v24531_v57 }
 0xb2b   :  { %21097 = vmatprep.subr.bf16.mxu1 %v24539_v23 }
 0xb2e   :  { %21099 = vmatpush3.bf16.msra.mxu1 %v24539_v23 }
 0xb2f   :  { %21101 = vmatprep.subr.bf16.mxu1 %v24547_v58 }
 0xb32   :  { %21103 = vmatpush3.bf16.msra.mxu1 %v24547_v58 }
 0xb33   :  { %21105 = vmatprep.subr.bf16.mxu1 %v24555_v54 }
 0xb36   :  { %21107 = vmatpush3.bf16.msra.mxu1 %v24555_v54 }
 0xb37   :  { %21109 = vmatprep.subr.bf16.mxu1 %v24563_v59 }
 0xb3a   :  { %21111 = vmatpush3.bf16.msra.mxu1 %v24563_v59 }
 0xb3b   :  { %21113 = vmatprep.subr.bf16.mxu1 %v24105_v17 }
 0xb3d   :  { %18689 = vmatmul.mubr.f32.vlgmr.msra.gmra.mrb[12].mxu1 %v24120_v37 }
 0xb3e   :  { %21115 = vmatpush3.bf16.msra.mxu1 %v24105_v17  ;;  %18723 = vmatprep.mubr.f32.mxu1 %v24122_v1 }
 0xb3f   :  { %21117 = vmatprep.subr.bf16.mxu1 %v24148_v14 }
 0xb42   :  { %21119 = vmatpush3.bf16.msra.mxu1 %v24148_v14 }
 0xb43   :  { %21121 = vmatprep.subr.bf16.mxu1 %v26214_v63 }
 0xb46   :  { %21123 = vmatpush3.bf16.msra.mxu1 %v26214_v63 }
 0xb47   :  { %21125 = vmatprep.subr.bf16.mxu1 %v24166_v16 }
 0xb4a   :  { %21127 = vmatpush3.bf16.msra.mxu1 %v24166_v16 }
 0xb4b   :  { %21129 = vmatprep.subr.bf16.mxu1 %v24185_v0 }
 0xb4e   :  { %21131 = vmatpush3.bf16.msra.mxu1 %v24185_v0 }
 0xb4f   :  { %21133 = vmatprep.subr.bf16.mxu1 %v24203_v61 }
 0xb52   :  { %21135 = vmatpush3.bf16.msra.mxu1 %v24203_v61 }
 0xb53   :  { %21137 = vmatprep.subr.bf16.mxu1 %v24229_v24 }
 0xb56   :  { %21139 = vmatpush3.bf16.msra.mxu1 %v24229_v24 }
 0xb57   :  { %21141 = vmatprep.subr.bf16.mxu1 %v24255_v36 }
 0xb5a   :  { %21143 = vmatpush3.bf16.msra.mxu1 %v24255_v36 }
 0xb5d   :  { %18724 = vmatmul.mubr.f32.vlgmr.msra.gmra.mrb[12].mxu1 %v24120_v37  ;;  %v80_v37 = vld [vmem:[%s25953_s2 + $0x38] sm:$0xff] }
 0xb5e   :  { %v6457_v29 = vand.u32 4294901760, %v80_v37 }
 0xb60   :  { %v24601_v4 = vpack.c.bf16 %v6457_v29, %v6454_v43  ;;  %v6559_v27 = vsub.f32 %v80_v37, %v6457_v29 }
 0xb62   :  { %21149 = vmatprep.subr.bf16.mxu0 %v24601_v4  ;;  %v6560_v2 = vand.u32 4294901760, %v6559_v27  ;;  %v21164_v13 = vpack.c.bf16 %v6559_v27, %v6552_v31 }
 0xb63   :  { %21151 = vmatpush3.bf16.msra.mxu0 %v24601_v4 }
 0xb64   :  { %v6561_v12 = vsub.f32 %v6559_v27, %v6560_v2  ;;  %21153 = vmatprep.subr.bf16.mxu0 %v21152_v26  ;;  %v21180_v6 = vpack.c.bf16 %v6560_v2, %v6553_v35 }
 0xb66   :  { %v6562_v22 = vand.u32 4294901760, %v6561_v12 }
 0xb68   :  { %v21156_v34 = vpack.c.bf16 %v6562_v22, %v6555_v21  ;;  %v24623_v22 = vld [vmem:[%s25954_s3] sm:$0xff] }
 0xb70   :  { %v18340_v1 = vpop.f32.mrb[10].mxu1 }
 0xb71   :  { %v5150_v20 = vpop.f32.mrb[11].mxu1 }
 0xbea   :  { %v18515_v38 = vpop.f32.mrb[10].mxu0 }
 0xbeb   :  { %v22404_v60 = vadd.f32 %v18515_v38, %v18340_v1  ;;  %v5737_v41 = vpop.f32.mrb[11].mxu0 }
 0xbec   :  { %v22405_v37 = vadd.f32 %v5737_v41, %v5150_v20 }
 0xc30   :  { %v18725_v43 = vpop.f32.mrb[12].mxu1 }
 0xc31   :  { %v6432_v29 = vmax.f32 %v18725_v43, 1e-30  ;;  %v6421_v52 = vpop.f32.mrb[13].mxu1  ;;  %v22779_v43 = vld [vmem:[%s25952_s1 + $0x18] sm:$0xff] }
 0xc32   :  { %v6431_v9 = vmax.f32 %v6421_v52, 1e-30  ;;  %v22781_v52 = vld [vmem:[%s25952_s1 + $0x38] sm:$0xff] }
 0xc33   :  { %22729 = vrcp.f32 %v6432_v29  ;;  %v22780_v29 = vld [vmem:[%s25952_s1 + $0x28] sm:$0xff] }
 0xc34   :  { %22731 = vrcp.f32 %v6431_v9 }
 0xc3d   :  { %v22730_v3 = vpop.eup %22729 }
 0xc3e   :  { %v22732_v5 = vpop.eup %22731  ;;  %v6436_v59 = vmul.f32 %v22730_v3, %v22404_v60  ;;  %v26239_v60 = vld [vmem:[#allocation49_spill] sm:$0xff] }
 0xc3f   :  { %v6435_v40 = vmul.f32 %v22732_v5, %v22405_v37 }
 0xc40   :  { %v6445_v12 = vsel %vm93_vm0, %v6436_v59, 0  ;;  %v26236_v59 = vld [vmem:[#allocation5_spill] sm:$0xff] }
 0xc41   :  { %v6442_v8 = vsel %vm93_vm0, %v6435_v40, 0  ;;  %v6526_v15 = vand.u32 4294901760, %v6445_v12 }
 0xc42   :  { %v6516_v48 = vand.u32 4294901760, %v6442_v8 }
 0xc43   :  { %v6527_v62 = vsub.f32 %v6445_v12, %v6526_v15 }
 0xc44   :  { %v6517_v1 = vsub.f32 %v6442_v8, %v6516_v48 }
 0xc45   :  { %v6528_v31 = vand.u32 4294901760, %v6527_v62 }
 0xc46   :  { %v6518_v20 = vand.u32 4294901760, %v6517_v1 }
 0xc47   :  { %v6529_v27 = vsub.f32 %v6527_v62, %v6528_v31 }
 0xc48   :  { %v6519_v35 = vsub.f32 %v6517_v1, %v6518_v20 }
 0xc49   :  { %v6530_v21 = vand.u32 4294901760, %v6529_v27 }
 0xc4a   :  { %v6520_v2 = vand.u32 4294901760, %v6519_v35 }
 0xc4c   :  { %18734 = vmatprep.mubr.f32.mxu0 %v6520_v2 }
 0xc4d   :  { %18735 = vmatmul.mubr.f32.vlgmr.msra.gmra.mrb[12].mxu0 %v6530_v21 }
 0xc4e   :  { %21155 = vmatpush3.bf16.msra.mxu0 %v21152_v26  ;;  %18745 = vmatprep.mubr.f32.mxu0 %v6516_v48  ;;  %v24618_v26 = vsub.s32 4, %v26236_v59 }
 0xc4f   :  { %21157 = vmatprep.subr.bf16.mxu0 %v21156_v34 }
 0xc50   :  { %26237 = vst [vmem:[#allocation89_spill] sm:$0xff] %v24618_v26 }
 0xc52   :  { %21159 = vmatpush3.bf16.msra.mxu0 %v21156_v34  ;;  %v6440_v34 = vrot.slane %v24623_v22, %v24618_v26 }
 0xc53   :  { %21161 = vmatprep.subr.bf16.mxu0 %v21160_v42 }
 0xc55   :  { %18746 = vmatmul.mubr.f32.vlgmr.msra.gmra.mrb[12].mxu0 %v6526_v15 }
 0xc56   :  { %21163 = vmatpush3.bf16.msra.mxu0 %v21160_v42  ;;  %18756 = vmatprep.mubr.f32.mxu0 %v6517_v1 }
 0xc57   :  { %21165 = vmatprep.subr.bf16.mxu0 %v21164_v13 }
 0xc5a   :  { %21167 = vmatpush3.bf16.msra.mxu0 %v21164_v13 }
 0xc5b   :  { %21169 = vmatprep.subr.bf16.mxu0 %v24599_v49 }
 0xc5d   :  { %18757 = vmatmul.mubr.f32.vlgmr.msra.gmra.mrb[12].mxu0 %v6527_v62 }
 0xc5e   :  { %21171 = vmatpush3.bf16.msra.mxu0 %v24599_v49  ;;  %18767 = vmatprep.mubr.f32.mxu0 %v6518_v20 }
 0xc5f   :  { %21173 = vmatprep.subr.bf16.mxu0 %v24601_v4 }
 0xc62   :  { %21175 = vmatpush3.bf16.msra.mxu0 %v24601_v4 }
 0xc63   :  { %21177 = vmatprep.subr.bf16.mxu0 %v21176_v51 }
 0xc65   :  { %18768 = vmatmul.mubr.f32.vlgmr.msra.gmra.mrb[12].mxu0 %v6528_v31  ;;  %v22782_v31 = vld [vmem:[%s25952_s1 + $0x8] sm:$0xff] }
 0xc66   :  { %21179 = vmatpush3.bf16.msra.mxu0 %v21176_v51  ;;  %18778 = vmatprep.mubr.f32.mxu0 %v6516_v48 }
 0xc67   :  { %21181 = vmatprep.subr.bf16.mxu0 %v21180_v6 }
 0xc6a   :  { %21183 = vmatpush3.bf16.msra.mxu0 %v21180_v6  ;;  %v26238_v6 = vld [vmem:[#allocation50_spill] sm:$0xff] }
 0xc6b   :  { %21185 = vmatprep.subr.bf16.mxu0 %v24599_v49 }
 0xc6d   :  { %18779 = vmatmul.mubr.f32.vlgmr.msra.gmra.mrb[12].mxu0 %v6526_v15 }
 0xc6e   :  { %21187 = vmatpush3.bf16.msra.mxu0 %v24599_v49  ;;  %18789 = vmatprep.mubr.f32.mxu0 %v6516_v48 }
 0xc6f   :  { %21189 = vmatprep.subr.bf16.mxu0 %v24601_v4 }
 0xc72   :  { %21191 = vmatpush3.bf16.msra.mxu0 %v24601_v4 }
 0xc75   :  { %18790 = vmatmul.mubr.f32.vlgmr.msra.gmra.mrb[12].mxu0 %v6526_v15 }
 0xd48   :  { %v18791_v42 = vpop.f32.mrb[12].mxu0 }
 0xd49   :  { %v22406_v13 = vadd.f32 %v18791_v42, %v6440_v34  ;;  %v6965_v49 = vpop.f32.mrb[13].mxu0 }
 0xd4a   :  { %v22407_v51 = vadd.f32 %v6965_v49, %v6440_v34 }
 0xd4b   :  { %v6976_v38 = vadd.f32 %v22406_v13, %v26238_v6 }
 0xd4c   :  { %v6975_v4 = vadd.f32 %v22407_v51, %v26239_v60 }
 0xd4d   :  { %v6980_v41 = vsel %vm93_vm0, %v6976_v38, 0.0 }
 0xd4e   :  { %6981 = vadd.xlane.f32.xlu1 %v6980_v41  ;;  %v6977_v37 = vsel %vm93_vm0, %v6975_v4, 0.0 }
 0xd4f   :  { %6978 = vadd.xlane.f32.xlu0 %v6977_v37 }
 0xd5f   :  { %7025 = vrot.lane.b32.xlu1 %v22779_v43, %s22835_s13 }
 0xd63   :  { %7027 = vrot.lane.b32.xlu1 %v22780_v29, %s22835_s13 }
 0xd67   :  { %7029 = vrot.lane.b32.xlu1 %v22781_v52, %s22835_s13 }
 0xddb   :  { %v6982_v9 = vpop.xlane.xlu1 %6981 }
 0xddc   :  { %v6984_v3 = vmul.f32 0.03125, %v6982_v9  ;;  %v6979_v5 = vpop.xlane.xlu0 %6978 }
 0xddd   :  { %v6983_v40 = vmul.f32 0.03125, %v6979_v5  ;;  %v24666_v5 = vld [vmem:[%s25954_s3 + $0x8] sm:$0xff] }
 0xdde   :  { %v6986_v12 = vsub.f32 %v6976_v38, %v6984_v3 }
 0xddf   :  { %v6985_v8 = vsub.f32 %v6975_v4, %v6983_v40  ;;  %v7026_v20 = vpop.permute.xlu1 %7025  ;;  %v26240_v40 = vld [vmem:[#allocation47_spill] sm:$0xff] }
 0xde0   :  { %v6988_v62 = vmul.f32 %v6986_v12, %v6986_v12  ;;  %v7045_v27 = vand.u32 4294901760, %v7026_v20 }
 0xde1   :  { %v6987_v15 = vmul.f32 %v6985_v8, %v6985_v8 }
 0xde2   :  { %v6992_v1 = vsel %vm93_vm0, %v6988_v62, 0.0  ;;  %v24649_v42 = vsub.f32 %v7026_v20, %v7045_v27  ;;  %v26241_v20 = vld [vmem:[#allocation65_spill] sm:$0xff] }
 0xde3   :  { %v6989_v48 = vsel %vm93_vm0, %v6987_v15, 0.0  ;;  %v7028_v2 = vpop.permute.xlu1 %7027  ;;  %v7006_v15 = vrot.slane %v24666_v5, %v26240_v40 }
 0xde4   :  { %6990 = vadd.xlane.f32.xlu0 %v6989_v48  ;;  %v26066_v38 = vand.u32 4294901760, %v24649_v42  ;;  %v7048_v4 = vand.u32 4294901760, %v7028_v2 }
 0xde6   :  { %v7141_v43 = vsub.f32 %v24649_v42, %v26066_v38 }
 0xde7   :  { %v7030_v51 = vpop.permute.xlu1 %7029 }
 0xde8   :  { %6993 = vadd.xlane.f32.xlu0 %v6992_v1  ;;  %v7051_v37 = vand.u32 4294901760, %v7030_v51  ;;  %v7142_v1 = vand.u32 4294901760, %v7141_v43 }
 0xdea   :  { %v24659_v9 = vpack.c.bf16 %v7051_v37, %v7048_v4 }
 0xdfe   :  { %7023 = vrot.lane.b32.xlu0 %v22782_v31, %s22835_s13 }
 0xe71   :  { %v6991_v35 = vpop.xlane.xlu0 %6990 }
 0xe72   :  { %v6995_v21 = vmul.f32 0.03125, %v6991_v35 }
 0xe74   :  { %v6997_v34 = vadd.f32 1e-05, %v6995_v21 }
 0xe75   :  { %v6994_v13 = vpop.xlane.xlu0 %6993 }
 0xe76   :  { %22733 = vrsqrt.f32 %v6997_v34  ;;  %v6996_v49 = vmul.f32 0.03125, %v6994_v13 }
 0xe78   :  { %v6998_v6 = vadd.f32 1e-05, %v6996_v49 }
 0xe79   :  { %v7024_v60 = vpop.permute.xlu0 %7023 }
 0xe7a   :  { %22735 = vrsqrt.f32 %v6998_v6  ;;  %v7042_v41 = vand.u32 4294901760, %v7024_v60 }
 0xe7c   :  { %v24655_v29 = vpack.c.bf16 %v7045_v27, %v7042_v41  ;;  %v24657_v52 = vsub.f32 %v7024_v60, %v7042_v41  ;;  %v7012_v27 = vrot.slane %v24666_v5, %v26241_v20  ;;  %v7146_v60 = vsub.f32 %v7028_v2, %v7048_v4 }
 0xe7d   :  { %v7153_v41 = vsub.f32 %v7030_v51, %v7051_v37 }
 0xe7e   :  { %v7133_v3 = vand.u32 4294901760, %v24657_v52  ;;  %21193 = vmatprep.subr.bf16.mxu1 %v24655_v29  ;;  %v7147_v54 = vand.u32 4294901760, %v7146_v60 }
 0xe7f   :  { %21195 = vmatpush3.bf16.msra.mxu1 %v24655_v29  ;;  %v21212_v23 = vpack.c.bf16 %v7153_v41, %v7146_v60 }
 0xe80   :  { %v22734_v48 = vpop.eup %22733  ;;  %21197 = vmatprep.subr.bf16.mxu1 %v24659_v9  ;;  %v7134_v62 = vsub.f32 %v24657_v52, %v7133_v3 }
 0xe81   :  { %v7001_v31 = vmul.f32 %v22734_v48, %v6985_v8 }
 0xe82   :  { %v7135_v35 = vand.u32 4294901760, %v7134_v62  ;;  %v7154_v62 = vand.u32 4294901760, %v7153_v41 }
 0xe83   :  { %21199 = vmatpush3.bf16.msra.mxu1 %v24659_v9  ;;  %v7007_v21 = vmul.f32 %v7006_v15, %v7001_v31 }
 0xe84   :  { %v22736_v34 = vpop.eup %22735  ;;  %v21200_v13 = vpack.c.bf16 %v7142_v1, %v7135_v35  ;;  %v7148_v35 = vsub.f32 %v7146_v60, %v7147_v54 }
 0xe85   :  { %v7002_v49 = vmul.f32 %v22736_v34, %v6986_v12  ;;  %v24676_v6 = vadd.f32 %v7012_v27, %v7007_v21  ;;  %v7155_v21 = vsub.f32 %v7153_v41, %v7154_v62 }
 0xe86   :  { %21201 = vmatprep.subr.bf16.mxu1 %v21200_v13  ;;  %v7149_v34 = vand.u32 4294901760, %v7148_v35 }
 0xe87   :  { %v7008_v38 = vmul.f32 %v7006_v15, %v7002_v49  ;;  %v7036_v43 = vsel %vm93_vm0, %v24676_v6, 0  ;;  %v7156_v49 = vand.u32 4294901760, %v7155_v21 }
 0xe88   :  { %v7110_v8 = vand.u32 4294901760, %v7036_v43 }
 0xe89   :  { %v24680_v48 = vadd.f32 %v7012_v27, %v7008_v38  ;;  %v21204_v27 = vpack.c.bf16 %v7156_v49, %v7149_v34 }
 0xe8a   :  { %v7111_v58 = vsub.f32 %v7036_v43, %v7110_v8  ;;  %v21208_v43 = vpack.c.bf16 %v24649_v42, %v24657_v52  ;;  %v21228_v52 = vpack.c.bf16 %v7154_v62, %v7147_v54  ;;  %v85_v62 = vld [vmem:[%s25953_s2 + $0x60] sm:$0xff] }
 0xe8b   :  { %v7039_v31 = vsel %vm93_vm0, %v24680_v48, 0 }
 0xe8c   :  { %v7112_v1 = vand.u32 4294901760, %v7111_v58  ;;  %v7120_v12 = vand.u32 4294901760, %v7039_v31 }
 0xe8e   :  { %v7113_v2 = vsub.f32 %v7111_v58, %v7112_v1  ;;  %v7121_v51 = vsub.f32 %v7039_v31, %v7120_v12 }
 0xe90   :  { %v7114_v4 = vand.u32 4294901760, %v7113_v2  ;;  %v7122_v37 = vand.u32 4294901760, %v7121_v51 }
 0xe92   :  { %18800 = vmatprep.mubr.f32.mxu1 %v7114_v4  ;;  %v7123_v15 = vsub.f32 %v7121_v51, %v7122_v37  ;;  %v87_v4 = vld [vmem:[%s25953_s2 + $0x70] sm:$0xff] }
 0xe94   :  { %v7124_v38 = vand.u32 4294901760, %v7123_v15  ;;  %v7600_v15 = vand.u32 4294901760, %v87_v4 }
 0xe96   :  { %18801 = vmatmul.mubr.f32.vlgmr.msra.gmra.mrb[14].mxu1 %v7124_v38 }
 0xe97   :  { %21203 = vmatpush3.bf16.msra.mxu1 %v21200_v13  ;;  %18811 = vmatprep.mubr.f32.mxu1 %v7110_v8  ;;  %v26242_v13 = vand.u32 4294901760, %v24649_v42 }
 0xe98   :  { %21205 = vmatprep.subr.bf16.mxu1 %v21204_v27 }
 0xe99   :  { %v21224_v31 = vpack.c.bf16 %v26242_v13, %v7133_v3 }
 0xe9b   :  { %21207 = vmatpush3.bf16.msra.mxu1 %v21204_v27 }
 0xe9c   :  { %21209 = vmatprep.subr.bf16.mxu1 %v21208_v43 }
 0xe9e   :  { %18812 = vmatmul.mubr.f32.vlgmr.msra.gmra.mrb[14].mxu1 %v7120_v12 }
 0xe9f   :  { %21211 = vmatpush3.bf16.msra.mxu1 %v21208_v43  ;;  %18822 = vmatprep.mubr.f32.mxu1 %v7111_v58  ;;  %v82_v58 = vld [vmem:[%s25953_s2 + $0x48] sm:$0xff] }
 0xea0   :  { %21213 = vmatprep.subr.bf16.mxu1 %v21212_v23  ;;  %v7585_v42 = vand.u32 4294901760, %v82_v58 }
 0xea3   :  { %21215 = vmatpush3.bf16.msra.mxu1 %v21212_v23  ;;  %v81_v23 = vld [vmem:[%s25953_s2 + $0x40] sm:$0xff] }
 0xea4   :  { %21217 = vmatprep.subr.bf16.mxu1 %v24655_v29  ;;  %v7582_v54 = vand.u32 4294901760, %v81_v23 }
 0xea6   :  { %18823 = vmatmul.mubr.f32.vlgmr.msra.gmra.mrb[14].mxu1 %v7121_v51  ;;  %v24702_v3 = vpack.c.bf16 %v7585_v42, %v7582_v54  ;;  %v7676_v2 = vsub.f32 %v81_v23, %v7582_v54  ;;  %v7683_v51 = vsub.f32 %v82_v58, %v7585_v42 }
 0xea7   :  { %21219 = vmatpush3.bf16.msra.mxu1 %v24655_v29  ;;  %18833 = vmatprep.mubr.f32.mxu1 %v7112_v1  ;;  %v86_v1 = vld [vmem:[%s25953_s2 + $0x68] sm:$0xff] }
 0xea8   :  { %21221 = vmatprep.subr.bf16.mxu1 %v24659_v9  ;;  %21241 = vmatprep.subr.bf16.mxu0 %v24702_v3  ;;  %v7597_v35 = vand.u32 4294901760, %v86_v1  ;;  %v7677_v49 = vand.u32 4294901760, %v7676_v2  ;;  %v7684_v38 = vand.u32 4294901760, %v7683_v51 }
 0xea9   :  { %21243 = vmatpush3.bf16.msra.mxu0 %v24702_v3 }
 0xeaa   :  { %v7678_v43 = vsub.f32 %v7676_v2, %v7677_v49  ;;  %v7685_v13 = vsub.f32 %v7683_v51, %v7684_v38  ;;  %v7711_v56 = vsub.f32 %v86_v1, %v7597_v35 }
 0xeab   :  { %21223 = vmatpush3.bf16.msra.mxu1 %v24659_v9 }
 0xeac   :  { %21225 = vmatprep.subr.bf16.mxu1 %v21224_v31  ;;  %v7679_v23 = vand.u32 4294901760, %v7678_v43  ;;  %v7686_v58 = vand.u32 4294901760, %v7685_v13  ;;  %v7712_v39 = vand.u32 4294901760, %v7711_v56 }
 0xeae   :  { %18834 = vmatmul.mubr.f32.vlgmr.msra.gmra.mrb[14].mxu1 %v7122_v37  ;;  %v88_v37 = vld [vmem:[%s25953_s2 + $0x78] sm:$0xff]  ;;  %v21256_v57 = vpack.c.bf16 %v7686_v58, %v7679_v23 }
 0xeaf   :  { %21227 = vmatpush3.bf16.msra.mxu1 %v21224_v31  ;;  %18844 = vmatprep.mubr.f32.mxu1 %v7110_v8  ;;  %v7603_v34 = vand.u32 4294901760, %v88_v37 }
 0xeb0   :  { %21229 = vmatprep.subr.bf16.mxu1 %v21228_v52 }
 0xeb1   :  { %v24732_v27 = vpack.c.bf16 %v7603_v34, %v7600_v15 }
 0xeb3   :  { %21231 = vmatpush3.bf16.msra.mxu1 %v21228_v52 }
 0xeb4   :  { %21233 = vmatprep.subr.bf16.mxu1 %v24655_v29 }
 0xeb6   :  { %18845 = vmatmul.mubr.f32.vlgmr.msra.gmra.mrb[14].mxu1 %v7120_v12 }
 0xeb7   :  { %21235 = vmatpush3.bf16.msra.mxu1 %v24655_v29  ;;  %18855 = vmatprep.mubr.f32.mxu1 %v7110_v8  ;;  %v83_v29 = vld [vmem:[%s25953_s2 + $0x50] sm:$0xff] }
 0xeb8   :  { %21237 = vmatprep.subr.bf16.mxu1 %v24659_v9  ;;  %v7588_v60 = vand.u32 4294901760, %v83_v29 }
 0xeba   :  { %v7690_v31 = vsub.f32 %v83_v29, %v7588_v60 }
 0xebb   :  { %21239 = vmatpush3.bf16.msra.mxu1 %v24659_v9  ;;  %v84_v9 = vld [vmem:[%s25953_s2 + $0x58] sm:$0xff] }
 0xebc   :  { %v7591_v41 = vand.u32 4294901760, %v84_v9  ;;  %v7691_v54 = vand.u32 4294901760, %v7690_v31 }
 0xebe   :  { %18856 = vmatmul.mubr.f32.vlgmr.msra.gmra.mrb[14].mxu1 %v7120_v12  ;;  %v24712_v8 = vpack.c.bf16 %v7591_v41, %v7588_v60  ;;  %v7594_v12 = vand.u32 4294901760, %v85_v62  ;;  %v7697_v52 = vsub.f32 %v84_v9, %v7591_v41  ;;  %v7692_v7 = vsub.f32 %v7690_v31, %v7691_v54 }
 0xebf   :  { %v7713_v9 = vsub.f32 %v7711_v56, %v7712_v39  ;;  %v7718_v60 = vsub.f32 %v87_v4, %v7600_v15  ;;  %v7725_v41 = vsub.f32 %v88_v37, %v7603_v34 }
 0xec0   :  { %21245 = vmatprep.subr.bf16.mxu0 %v24712_v8  ;;  %v24722_v21 = vpack.c.bf16 %v7597_v35, %v7594_v12  ;;  %v7698_v42 = vand.u32 4294901760, %v7697_v52  ;;  %v7704_v53 = vsub.f32 %v85_v62, %v7594_v12  ;;  %v7693_v33 = vand.u32 4294901760, %v7692_v7 }
 0xec1   :  { %21247 = vmatpush3.bf16.msra.mxu0 %v24712_v8  ;;  %v7714_v19 = vand.u32 4294901760, %v7713_v9  ;;  %v7719_v30 = vand.u32 4294901760, %v7718_v60  ;;  %v7726_v10 = vand.u32 4294901760, %v7725_v41  ;;  %v21272_v35 = vpack.c.bf16 %v7683_v51, %v7676_v2 }
 0xec2   :  { %21249 = vmatprep.subr.bf16.mxu0 %v24722_v21  ;;  %v7699_v44 = vsub.f32 %v7697_v52, %v7698_v42  ;;  %v7705_v45 = vand.u32 4294901760, %v7704_v53  ;;  %v21276_v7 = vpack.c.bf16 %v7697_v52, %v7690_v31  ;;  %v21280_v47 = vpack.c.bf16 %v7711_v56, %v7704_v53 }
 0xec3   :  { %v7720_v23 = vsub.f32 %v7718_v60, %v7719_v30  ;;  %v7727_v58 = vsub.f32 %v7725_v41, %v7726_v10  ;;  %v21284_v46 = vpack.c.bf16 %v7725_v41, %v7718_v60  ;;  %v21308_v25 = vpack.c.bf16 %v7698_v42, %v7691_v54 }
 0xec4   :  { %v7700_v11 = vand.u32 4294901760, %v7699_v44  ;;  %v7706_v29 = vsub.f32 %v7704_v53, %v7705_v45  ;;  %v21304_v44 = vpack.c.bf16 %v7684_v38, %v7677_v49  ;;  %v21312_v50 = vpack.c.bf16 %v7712_v39, %v7705_v45 }
 0xec5   :  { %21251 = vmatpush3.bf16.msra.mxu0 %v24722_v21  ;;  %v7721_v62 = vand.u32 4294901760, %v7720_v23  ;;  %v7728_v1 = vand.u32 4294901760, %v7727_v58  ;;  %v21316_v4 = vpack.c.bf16 %v7726_v10, %v7719_v30 }
 0xec6   :  { %21253 = vmatprep.subr.bf16.mxu0 %v24732_v27  ;;  %v21260_v43 = vpack.c.bf16 %v7700_v11, %v7693_v33  ;;  %v7707_v13 = vand.u32 4294901760, %v7706_v29  ;;  %v26108_v11 = vsub.s32 5, %v26236_v59 }
 0xec7   :  { %v21268_v12 = vpack.c.bf16 %v7728_v1, %v7721_v62  ;;  %v16248_v62 = vld [vmem:[%s25952_s1 + $0x50] sm:$0xff]  ;;  %v16250_v1 = vld [vmem:[%s25952_s1 + $0x60] sm:$0xff] }
 0xec8   :  { %v21264_v32 = vpack.c.bf16 %v7714_v19, %v7707_v13  ;;  %v7018_v33 = vrot.slane %v24623_v22, %v26108_v11 }
 0xec9   :  { %21255 = vmatpush3.bf16.msra.mxu0 %v24732_v27 }
 0xeca   :  { %21257 = vmatprep.subr.bf16.mxu0 %v21256_v57 }
 0xf91   :  { %v18857_v19 = vpop.f32.mrb[14].mxu1 }
 0xf92   :  { %v22408_v37 = vadd.f32 %v18857_v19, %v7018_v33  ;;  %v7559_v15 = vpop.f32.mrb[15].mxu1 }
 0xf93   :  { %v22409_v34 = vadd.f32 %v7559_v15, %v7018_v33 }
 0xf94   :  { %v7570_v29 = vmax.f32 %v22408_v37, 0.0 }
 0xf95   :  { %v7569_v9 = vmax.f32 %v22409_v34, 0.0 }
 0xf96   :  { %v7579_v2 = vsel %vm1302_vm3, %v7570_v29, 0 }
 0xf97   :  { %v7664_v56 = vand.u32 4294901760, %v7579_v2  ;;  %v7576_v53 = vsel %vm1302_vm3, %v7569_v9, 0 }
 0xf98   :  { %v7654_v51 = vand.u32 4294901760, %v7576_v53 }
 0xf99   :  { %v7665_v39 = vsub.f32 %v7579_v2, %v7664_v56 }
 0xf9a   :  { %v7655_v10 = vsub.f32 %v7576_v53, %v7654_v51 }
 0xf9b   :  { %v7666_v30 = vand.u32 4294901760, %v7665_v39 }
 0xf9c   :  { %v7656_v45 = vand.u32 4294901760, %v7655_v10 }
 0xf9d   :  { %v7667_v49 = vsub.f32 %v7665_v39, %v7666_v30 }
 0xf9e   :  { %v7657_v38 = vsub.f32 %v7655_v10, %v7656_v45 }
 0xf9f   :  { %v7668_v52 = vand.u32 4294901760, %v7667_v49 }
 0xfa0   :  { %v7658_v31 = vand.u32 4294901760, %v7657_v38 }
 0xfa2   :  { %18874 = vmatprep.mubr.f32.mxu0 %v7658_v31 }
 0xfa3   :  { %18875 = vmatmul.mubr.f32.vlgmr.msra.gmra.mrb[14].mxu0 %v7668_v52 }
 0xfa4   :  { %21259 = vmatpush3.bf16.msra.mxu0 %v21256_v57  ;;  %18893 = vmatprep.mubr.f32.mxu0 %v7654_v51 }
 0xfa5   :  { %21261 = vmatprep.subr.bf16.mxu0 %v21260_v43 }
 0xfa8   :  { %21263 = vmatpush3.bf16.msra.mxu0 %v21260_v43 }
 0xfa9   :  { %21265 = vmatprep.subr.bf16.mxu0 %v21264_v32 }
 0xfac   :  { %21267 = vmatpush3.bf16.msra.mxu0 %v21264_v32 }
 0xfad   :  { %21269 = vmatprep.subr.bf16.mxu0 %v21268_v12 }
 0xfb0   :  { %21271 = vmatpush3.bf16.msra.mxu0 %v21268_v12 }
 0xfb1   :  { %21273 = vmatprep.subr.bf16.mxu0 %v21272_v35 }
 0xfb3   :  { %18894 = vmatmul.mubr.f32.vlgmr.msra.gmra.mrb[14].mxu0 %v7664_v56 }
 0xfb4   :  { %21275 = vmatpush3.bf16.msra.mxu0 %v21272_v35  ;;  %18912 = vmatprep.mubr.f32.mxu0 %v7655_v10  ;;  %v8244_v35 = vand.u32 4294901760, %v16248_v62 }
 0xfb5   :  { %21277 = vmatprep.subr.bf16.mxu0 %v21276_v7 }
 0xfb6   :  { %v8338_v15 = vsub.f32 %v16248_v62, %v8244_v35 }
 0xfb8   :  { %21279 = vmatpush3.bf16.msra.mxu0 %v21276_v7  ;;  %v16252_v7 = vld [vmem:[%s25952_s1 + $0x70] sm:$0xff]  ;;  %v8339_v29 = vand.u32 4294901760, %v8338_v15 }
 0xfb9   :  { %21281 = vmatprep.subr.bf16.mxu0 %v21280_v47 }
 0xfba   :  { %v8340_v2 = vsub.f32 %v8338_v15, %v8339_v29 }
 0xfbc   :  { %21283 = vmatpush3.bf16.msra.mxu0 %v21280_v47 }
 0xfbd   :  { %21285 = vmatprep.subr.bf16.mxu0 %v21284_v46 }
 0xfc0   :  { %21287 = vmatpush3.bf16.msra.mxu0 %v21284_v46 }
 0xfc1   :  { %21289 = vmatprep.subr.bf16.mxu0 %v24702_v3 }
 0xfc3   :  { %18913 = vmatmul.mubr.f32.vlgmr.msra.gmra.mrb[14].mxu0 %v7665_v39  ;;  %v8341_v39 = vand.u32 4294901760, %v8340_v2 }
 0xfc4   :  { %21291 = vmatpush3.bf16.msra.mxu0 %v24702_v3  ;;  %18931 = vmatprep.mubr.f32.mxu0 %v7656_v45 }
 0xfc5   :  { %21293 = vmatprep.subr.bf16.mxu0 %v24712_v8 }
 0xfc8   :  { %21295 = vmatpush3.bf16.msra.mxu0 %v24712_v8 }
 0xfc9   :  { %21297 = vmatprep.subr.bf16.mxu0 %v24722_v21 }
 0xfcc   :  { %21299 = vmatpush3.bf16.msra.mxu0 %v24722_v21 }
 0xfcd   :  { %21301 = vmatprep.subr.bf16.mxu0 %v24732_v27 }
 0xfd0   :  { %21303 = vmatpush3.bf16.msra.mxu0 %v24732_v27 }
 0xfd1   :  { %21305 = vmatprep.subr.bf16.mxu0 %v21304_v44 }
 0xfd3   :  { %18932 = vmatmul.mubr.f32.vlgmr.msra.gmra.mrb[14].mxu0 %v7666_v30 }
 0xfd4   :  { %21307 = vmatpush3.bf16.msra.mxu0 %v21304_v44  ;;  %18950 = vmatprep.mubr.f32.mxu0 %v7654_v51  ;;  %v8247_v44 = vand.u32 4294901760, %v16250_v1 }
 0xfd5   :  { %21309 = vmatprep.subr.bf16.mxu0 %v21308_v25 }
 0xfd8   :  { %21311 = vmatpush3.bf16.msra.mxu0 %v21308_v25 }
 0xfd9   :  { %21313 = vmatprep.subr.bf16.mxu0 %v21312_v50 }
 0xfdc   :  { %21315 = vmatpush3.bf16.msra.mxu0 %v21312_v50  ;;  %v26107_v50 = vsub.s32 6, %v26236_v59 }
 0xfdd   :  { %21317 = vmatprep.subr.bf16.mxu0 %v21316_v4 }
 0xfde   :  { %v7574_v47 = vrot.slane %v24623_v22, %v26107_v50 }
 0xfe0   :  { %21319 = vmatpush3.bf16.msra.mxu0 %v21316_v4  ;;  %v8250_v4 = vand.u32 4294901760, %v16252_v7 }
 0xfe1   :  { %21321 = vmatprep.subr.bf16.mxu0 %v24702_v3 }
 0xfe2   :  { %v24782_v19 = vpack.c.bf16 %v8250_v4, %v8247_v44  ;;  %v8352_v53 = vsub.f32 %v16252_v7, %v8250_v4 }
 0xfe3   :  { %18951 = vmatmul.mubr.f32.vlgmr.msra.gmra.mrb[14].mxu0 %v7664_v56 }
 0xfe4   :  { %21323 = vmatpush3.bf16.msra.mxu0 %v24702_v3  ;;  %18969 = vmatprep.mubr.f32.mxu0 %v7654_v51  ;;  %v8353_v30 = vand.u32 4294901760, %v8352_v53 }
 0xfe5   :  { %21325 = vmatprep.subr.bf16.mxu0 %v24712_v8 }
 0xfe6   :  { %v8354_v38 = vsub.f32 %v8352_v53, %v8353_v30 }
 0xfe8   :  { %21327 = vmatpush3.bf16.msra.mxu0 %v24712_v8  ;;  %v8355_v52 = vand.u32 4294901760, %v8354_v38 }
 0xfe9   :  { %21329 = vmatprep.subr.bf16.mxu0 %v24722_v21 }
 0xfec   :  { %21331 = vmatpush3.bf16.msra.mxu0 %v24722_v21 }
 0xfed   :  { %21333 = vmatprep.subr.bf16.mxu0 %v24732_v27 }
 0xff0   :  { %21335 = vmatpush3.bf16.msra.mxu0 %v24732_v27 }
 0xff3   :  { %18970 = vmatmul.mubr.f32.vlgmr.msra.gmra.mrb[14].mxu0 %v7664_v56  ;;  %v8345_v56 = vsub.f32 %v16250_v1, %v8247_v44 }
 0xff5   :  { %v8346_v10 = vand.u32 4294901760, %v8345_v56 }
 0xff7   :  { %v8347_v49 = vsub.f32 %v8345_v56, %v8346_v10 }
 0xff9   :  { %v8348_v31 = vand.u32 4294901760, %v8347_v49 }
0x10c6   :  { %v18971_v25 = vpop.f32.mrb[14].mxu0 }
0x10c7   :  { %v22410_v46 = vadd.f32 %v18971_v25, %v7574_v47  ;;  %v8151_v32 = vpop.f32.mrb[15].mxu0 }
0x10c8   :  { %v22411_v57 = vadd.f32 %v8151_v32, %v7574_v47  ;;  %v21348_v47 = vpack.c.bf16 %v8355_v52, %v8348_v31 }
0x10c9   :  { %v8162_v3 = vadd.f32 %v22410_v46, %v24680_v48  ;;  %v21356_v46 = vpack.c.bf16 %v8352_v53, %v8345_v56  ;;  %v16270_v56 = vld [vmem:[%s25954_s3 + $0x20] sm:$0xff]  ;;  %v26244_v53 = vld [vmem:[#allocation6_spill] sm:$0xff] }
0x10ca   :  { %v8161_v8 = vadd.f32 %v22411_v57, %v24676_v6  ;;  %v16246_v6 = vld [vmem:[%s25952_s1 + $0x40] sm:$0xff]  ;;  %v21372_v57 = vpack.c.bf16 %v8353_v30, %v8346_v10 }
0x10cb   :  { %v8166_v21 = vsel %vm93_vm0, %v8162_v3, 0.0  ;;  %v8241_v12 = vand.u32 4294901760, %v16246_v6 }
0x10cc   :  { %8167 = vadd.xlane.f32.xlu1 %v8166_v21  ;;  %v8163_v27 = vsel %vm93_vm0, %v8161_v8, 0.0 }
0x10cd   :  { %8164 = vadd.xlane.f32.xlu0 %v8163_v27  ;;  %v24780_v33 = vpack.c.bf16 %v8244_v35, %v8241_v12  ;;  %v8331_v37 = vsub.f32 %v16246_v6, %v8241_v12 }
0x10cf   :  { %21337 = vmatprep.subr.bf16.mxu1 %v24780_v33  ;;  %v8332_v34 = vand.u32 4294901760, %v8331_v37  ;;  %v21352_v25 = vpack.c.bf16 %v8338_v15, %v8331_v37 }
0x10d0   :  { %21339 = vmatpush3.bf16.msra.mxu1 %v24780_v33 }
0x10d1   :  { %21341 = vmatprep.subr.bf16.mxu1 %v24782_v19  ;;  %v8333_v9 = vsub.f32 %v8331_v37, %v8332_v34  ;;  %v21368_v32 = vpack.c.bf16 %v8339_v29, %v8332_v34 }
0x10d3   :  { %v8334_v51 = vand.u32 4294901760, %v8333_v9 }
0x10d4   :  { %21343 = vmatpush3.bf16.msra.mxu1 %v24782_v19 }
0x10d5   :  { %v21344_v45 = vpack.c.bf16 %v8341_v39, %v8334_v51  ;;  %v8233_v51 = vrot.slane %v16270_v56, %v26244_v53 }
0x10d7   :  { %21345 = vmatprep.subr.bf16.mxu1 %v21344_v45 }
0x1159   :  { %v8168_v54 = vpop.xlane.xlu1 %8167 }
0x115a   :  { %v8170_v42 = vmul.f32 0.03125, %v8168_v54  ;;  %v8165_v60 = vpop.xlane.xlu0 %8164 }
0x115b   :  { %v8169_v41 = vmul.f32 0.03125, %v8165_v60  ;;  %v26243_v60 = vld [vmem:[#allocation48_spill] sm:$0xff] }
0x115c   :  { %v8172_v43 = vsub.f32 %v8162_v3, %v8170_v42 }
0x115d   :  { %v8171_v22 = vsub.f32 %v8161_v8, %v8169_v41  ;;  %v8192_v41 = vrot.slane %v24666_v5, %v26243_v60 }
0x115e   :  { %v8174_v58 = vmul.f32 %v8172_v43, %v8172_v43 }
0x115f   :  { %v8173_v13 = vmul.f32 %v8171_v22, %v8171_v22 }
0x1160   :  { %v8178_v48 = vsel %vm93_vm0, %v8174_v58, 0.0  ;;  %v8198_v58 = vrot.slane %v24666_v5, %v24618_v26 }
0x1161   :  { %v8175_v23 = vsel %vm93_vm0, %v8173_v13, 0.0 }
0x1162   :  { %8176 = vadd.xlane.f32.xlu0 %v8175_v23 }
0x1166   :  { %8179 = vadd.xlane.f32.xlu0 %v8178_v48 }
0x11ef   :  { %v8177_v3 = vpop.xlane.xlu0 %8176 }
0x11f0   :  { %v8181_v8 = vmul.f32 0.03125, %v8177_v3 }
0x11f2   :  { %v8183_v21 = vadd.f32 1e-05, %v8181_v8  ;;  %v26245_v8 = vld [vmem:[#allocation9_spill] sm:$0xff] }
0x11f3   :  { %v8180_v27 = vpop.xlane.xlu0 %8179 }
0x11f4   :  { %22737 = vrsqrt.f32 %v8183_v21  ;;  %v8182_v54 = vmul.f32 0.03125, %v8180_v27  ;;  %v26246_v27 = vld [vmem:[#allocation10_spill] sm:$0xff] }
0x11f6   :  { %v8184_v42 = vadd.f32 1e-05, %v8182_v54 }
0x11f8   :  { %22739 = vrsqrt.f32 %v8184_v42  ;;  %v26247_v42 = vld [vmem:[#allocation8_spill] sm:$0xff] }
0x11fe   :  { %v22738_v13 = vpop.eup %22737 }
0x11ff   :  { %v8187_v23 = vmul.f32 %v22738_v13, %v8171_v22  ;;  %v26248_v13 = vld [vmem:[#allocation13_spill] sm:$0xff] }
0x1201   :  { %v8193_v48 = vmul.f32 %v8192_v41, %v8187_v23 }
0x1202   :  { %v22740_v6 = vpop.eup %22739 }
0x1203   :  { %v8188_v62 = vmul.f32 %v22740_v6, %v8172_v43  ;;  %v24792_v1 = vadd.f32 %v8198_v58, %v8193_v48  ;;  %v26250_v6 = vld [vmem:[#allocation14_spill] sm:$0xff] }
0x1205   :  { %v8194_v12 = vmul.f32 %v8192_v41, %v8188_v62  ;;  %v8235_v35 = vsel %vm93_vm0, %v24792_v1, 0 }
0x1206   :  { %v8309_v7 = vand.u32 4294901760, %v8235_v35 }
0x1207   :  { %v24796_v44 = vadd.f32 %v8198_v58, %v8194_v12  ;;  %v26249_v58 = vld [vmem:[#allocation11_spill] sm:$0xff] }
0x1208   :  { %v8310_v4 = vsub.f32 %v8235_v35, %v8309_v7 }
0x1209   :  { %v8238_v37 = vsel %vm93_vm0, %v24796_v44, 0 }
0x120a   :  { %v8311_v22 = vand.u32 4294901760, %v8310_v4  ;;  %v8319_v15 = vand.u32 4294901760, %v8238_v37 }
0x120c   :  { %v8312_v34 = vsub.f32 %v8310_v4, %v8311_v22  ;;  %v8320_v5 = vsub.f32 %v8238_v37, %v8319_v15 }
0x120e   :  { %v8313_v29 = vand.u32 4294901760, %v8312_v34  ;;  %v8321_v9 = vand.u32 4294901760, %v8320_v5 }
0x1210   :  { %18980 = vmatprep.mubr.f32.mxu1 %v8313_v29  ;;  %v8322_v43 = vsub.f32 %v8320_v5, %v8321_v9  ;;  %v22784_v29 = vld [vmem:[%s25955_s4 + $0x20] sm:$0xff] }
0x1212   :  { %v8323_v2 = vand.u32 4294901760, %v8322_v43 }
0x1214   :  { %18981 = vmatmul.mubr.f32.vlgmr.msra.gmra.mrb[16].mxu1 %v8323_v2 }
0x1215   :  { %21347 = vmatpush3.bf16.msra.mxu1 %v21344_v45  ;;  %18991 = vmatprep.mubr.f32.mxu1 %v8309_v7 }
0x1216   :  { %21349 = vmatprep.subr.bf16.mxu1 %v21348_v47 }
0x1219   :  { %21351 = vmatpush3.bf16.msra.mxu1 %v21348_v47 }
0x121a   :  { %21353 = vmatprep.subr.bf16.mxu1 %v21352_v25 }
0x121c   :  { %18992 = vmatmul.mubr.f32.vlgmr.msra.gmra.mrb[16].mxu1 %v8319_v15 }
0x121d   :  { %21355 = vmatpush3.bf16.msra.mxu1 %v21352_v25  ;;  %19002 = vmatprep.mubr.f32.mxu1 %v8310_v4 }
0x121e   :  { %21357 = vmatprep.subr.bf16.mxu1 %v21356_v46 }
0x1221   :  { %21359 = vmatpush3.bf16.msra.mxu1 %v21356_v46 }
0x1222   :  { %21361 = vmatprep.subr.bf16.mxu1 %v24780_v33 }
0x1224   :  { %19003 = vmatmul.mubr.f32.vlgmr.msra.gmra.mrb[16].mxu1 %v8320_v5 }
0x1225   :  { %21363 = vmatpush3.bf16.msra.mxu1 %v24780_v33  ;;  %19013 = vmatprep.mubr.f32.mxu1 %v8311_v22 }
0x1226   :  { %21365 = vmatprep.subr.bf16.mxu1 %v24782_v19 }
0x1229   :  { %21367 = vmatpush3.bf16.msra.mxu1 %v24782_v19 }
0x122a   :  { %21369 = vmatprep.subr.bf16.mxu1 %v21368_v32 }
0x122c   :  { %19014 = vmatmul.mubr.f32.vlgmr.msra.gmra.mrb[16].mxu1 %v8321_v9 }
0x122d   :  { %21371 = vmatpush3.bf16.msra.mxu1 %v21368_v32  ;;  %19024 = vmatprep.mubr.f32.mxu1 %v8309_v7 }
0x122e   :  { %21373 = vmatprep.subr.bf16.mxu1 %v21372_v57 }
0x1231   :  { %21375 = vmatpush3.bf16.msra.mxu1 %v21372_v57 }
0x1232   :  { %21377 = vmatprep.subr.bf16.mxu1 %v24780_v33 }
0x1234   :  { %19025 = vmatmul.mubr.f32.vlgmr.msra.gmra.mrb[16].mxu1 %v8319_v15 }
0x1235   :  { %21379 = vmatpush3.bf16.msra.mxu1 %v24780_v33  ;;  %19035 = vmatprep.mubr.f32.mxu1 %v8309_v7 }
0x1236   :  { %21381 = vmatprep.subr.bf16.mxu1 %v24782_v19 }
0x1239   :  { %21383 = vmatpush3.bf16.msra.mxu1 %v24782_v19 }
0x123c   :  { %19036 = vmatmul.mubr.f32.vlgmr.msra.gmra.mrb[16].mxu1 %v8319_v15 }
0x130f   :  { %v19037_v39 = vpop.f32.mrb[16].mxu1 }
0x1310   :  { %v24812_v10 = vadd.f32 %v19037_v39, %v8233_v51  ;;  %v8758_v30 = vpop.f32.mrb[17].mxu1 }
0x1311   :  { %v22413_v45 = vadd.f32 %v8758_v30, %v8233_v51  ;;  %v22785_v51 = vld [vmem:[%s25955_s4 + $0x28] sm:$0xff] }
0x1312   :  { %8772 = vrot.lane.b32.xlu1 %v24812_v10, %s22831_s7  ;;  %v8867_v41 = vmul.f32 %v24812_v10, %v26247_v42  ;;  %v8869_v48 = vmul.f32 %v24812_v10, %v26249_v58 }
0x1313   :  { %8770 = vrot.lane.b32.xlu0 %v22413_v45, %s22831_s7  ;;  %v8872_v33 = vsel %vm93_vm0, %v22413_v45, 0  ;;  %v8864_v21 = vmul.f32 %v22413_v45, %v26245_v8  ;;  %v8866_v54 = vmul.f32 %v22413_v45, %v26246_v27  ;;  %v8868_v23 = vmul.f32 %v22413_v45, %v26248_v13 }
0x1314   :  { %v24818_v19 = vand.u32 4294901760, %v8872_v33  ;;  %v8870_v62 = vmul.f32 %v22413_v45, %v26250_v6  ;;  %v22786_v6 = vld [vmem:[%s25955_s4 + $0x38] sm:$0xff] }
0x1316   :  { %v24821_v49 = vsub.f32 %v8872_v33, %v24818_v19 }
0x1318   :  { %v8947_v38 = vand.u32 4294901760, %v24821_v49 }
0x131a   :  { %v8948_v31 = vsub.f32 %v24821_v49, %v8947_v38 }
0x131c   :  { %v8949_v52 = vand.u32 4294901760, %v8948_v31 }
0x131e   :  { %19046 = vmatprep.mubr.f32.mxu1 %v8949_v52 }
0x1384   :  { %v8773_v25 = vpop.permute.xlu1 %8772 }
0x1385   :  { %v8771_v47 = vpop.permute.xlu0 %8770 }
0x1386   :  { %8776 = vxpose.xlu1.b32.start [1/2] (short) (narrow) %v8771_v47, 32  ;;  %v8874_v47 = vsel %vm93_vm0, %v24812_v10, 0 }
0x1387   :  { %v24871_v8 = vand.u32 4294901760, %v8874_v47 }
0x1389   :  { %v8956_v58 = vsub.f32 %v8874_v47, %v24871_v8 }
0x138a   :  { %8777 = vxpose.xlu1.b32.end [2/2] (short) (narrow) %v8773_v25, 32 }
0x1406   :  { %v8792_v46 = vpop.trf.xlu1 }
0x1407   :  { %8812 = vrot.lane.b32.xlu0 %v8792_v46, %s22832_s8 }
0x140a   :  { %v8793_v32 = vpop.trf.xlu1 }
0x140b   :  { %8824 = vrot.lane.b32.xlu0 %v8792_v46, %s22833_s9 }
0x140e   :  { %v8794_v57 = vpop.trf.xlu1 }
0x140f   :  { %8836 = vrot.lane.b32.xlu0 %v8792_v46, %s22834_s10 }
0x1412   :  { %v8795_v3 = vpop.trf.xlu1 }
0x1413   :  { %8814 = vrot.lane.b32.xlu0 %v8793_v32, %s22832_s8  ;;  %8842 = vrot.lane.b32.xlu1 %v8795_v3, %s22834_s10 }
0x1417   :  { %8826 = vrot.lane.b32.xlu0 %v8793_v32, %s22833_s9  ;;  %9428 = vrot.lane.b32.xlu1 %v8864_v21, %s22835_s13 }
0x141b   :  { %8838 = vrot.lane.b32.xlu0 %v8793_v32, %s22834_s10  ;;  %9432 = vrot.lane.b32.xlu1 %v8866_v54, %s22835_s13 }
0x141f   :  { %8816 = vrot.lane.b32.xlu0 %v8794_v57, %s22832_s8  ;;  %9434 = vrot.lane.b32.xlu1 %v8867_v41, %s22835_s13 }
0x1423   :  { %8828 = vrot.lane.b32.xlu0 %v8794_v57, %s22833_s9  ;;  %9436 = vrot.lane.b32.xlu1 %v8868_v23, %s22835_s13 }
0x1427   :  { %8818 = vrot.lane.b32.xlu0 %v8795_v3, %s22832_s8  ;;  %9438 = vrot.lane.b32.xlu1 %v8869_v48, %s22835_s13 }
0x142b   :  { %8830 = vrot.lane.b32.xlu0 %v8795_v3, %s22833_s9  ;;  %9440 = vrot.lane.b32.xlu1 %v8870_v62, %s22835_s13 }
0x142f   :  { %8840 = vrot.lane.b32.xlu0 %v8794_v57, %s22834_s10 }
0x1479   :  { %v8813_v12 = vpop.permute.xlu0 %8812 }
0x147a   :  { %v8848_v37 = vsel %vm708_vm1, %v8792_v46, %v8813_v12 }
0x147d   :  { %v8825_v35 = vpop.permute.xlu0 %8824 }
0x147e   :  { %v8852_v22 = vsel %vm93_vm0, %v8848_v37, %v8825_v35  ;;  %v22787_v37 = vld [vmem:[%s25955_s4 + $0x30] sm:$0xff] }
0x1481   :  { %v8837_v7 = vpop.permute.xlu0 %8836 }
0x1482   :  { %v8856_v34 = vsel %vm717_vm2, %v8852_v22, %v8837_v7 }
0x1483   :  { %v8860_v9 = vmul.f32 %v22784_v29, %v8856_v34  ;;  %v8957_v34 = vand.u32 4294901760, %v8956_v58 }
0x1485   :  { %v8815_v4 = vpop.permute.xlu0 %8814  ;;  %v8877_v30 = vand.u32 4294901760, %v8860_v9  ;;  %v8843_v42 = vpop.permute.xlu1 %8842 }
0x1486   :  { %v8849_v5 = vsel %vm708_vm1, %v8793_v32, %v8815_v4 }
0x1487   :  { %v8967_v32 = vsub.f32 %v8860_v9, %v8877_v30 }
0x1489   :  { %v8827_v15 = vpop.permute.xlu0 %8826  ;;  %v8968_v23 = vand.u32 4294901760, %v8967_v32 }
0x148a   :  { %v8853_v43 = vsel %vm93_vm0, %v8849_v5, %v8827_v15 }
0x148b   :  { %v8969_v15 = vsub.f32 %v8967_v32, %v8968_v23 }
0x148d   :  { %v8839_v2 = vpop.permute.xlu0 %8838 }
0x148e   :  { %v8857_v56 = vsel %vm717_vm2, %v8853_v43, %v8839_v2 }
0x148f   :  { %v8861_v39 = vmul.f32 %v22785_v51, %v8857_v56  ;;  %v8970_v56 = vand.u32 4294901760, %v8969_v15  ;;  %v8958_v51 = vsub.f32 %v8956_v58, %v8957_v34 }
0x1491   :  { %v8880_v45 = vand.u32 4294901760, %v8861_v39  ;;  %v8817_v33 = vpop.permute.xlu0 %8816 }
0x1492   :  { %v8850_v48 = vsel %vm708_vm1, %v8794_v57, %v8817_v33  ;;  %v8959_v33 = vand.u32 4294901760, %v8958_v51 }
0x1493   :  { %v24865_v31 = vpack.c.bf16 %v8880_v45, %v8877_v30  ;;  %v8974_v25 = vsub.f32 %v8861_v39, %v8880_v45 }
0x1495   :  { %21385 = vmatprep.subr.bf16.mxu1 %v24865_v31  ;;  %v8829_v52 = vpop.permute.xlu0 %8828  ;;  %v8975_v54 = vand.u32 4294901760, %v8974_v25 }
0x1496   :  { %21387 = vmatpush3.bf16.msra.mxu1 %v24865_v31  ;;  %v8854_v12 = vsel %vm93_vm0, %v8850_v48, %v8829_v52 }
0x1497   :  { %v8976_v35 = vsub.f32 %v8974_v25, %v8975_v54 }
0x1499   :  { %v8819_v46 = vpop.permute.xlu0 %8818  ;;  %v8977_v29 = vand.u32 4294901760, %v8976_v35  ;;  %v26256_v35 = vld [vmem:[#allocation7_spill] sm:$0xff] }
0x149a   :  { %v8851_v21 = vsel %vm708_vm1, %v8795_v3, %v8819_v46 }
0x149b   :  { %v21392_v39 = vpack.c.bf16 %v8977_v29, %v8970_v56 }
0x149d   :  { %v8831_v27 = vpop.permute.xlu0 %8830 }
0x149e   :  { %v8855_v41 = vsel %vm93_vm0, %v8851_v21, %v8831_v27  ;;  %v21400_v27 = vpack.c.bf16 %v8974_v25, %v8967_v32  ;;  %v21416_v25 = vpack.c.bf16 %v8975_v54, %v8968_v23  ;;  %v26253_v54 = vld [vmem:[#allocation17_spill] sm:$0xff] }
0x149f   :  { %v8859_v13 = vsel %vm717_vm2, %v8855_v41, %v8843_v42  ;;  %v26254_v41 = vld [vmem:[#allocation18_spill] sm:$0xff] }
0x14a0   :  { %v8863_v62 = vmul.f32 %v22786_v6, %v8859_v13  ;;  %v22789_v6 = vld [vmem:[%s25955_s4 + $0x48] sm:$0xff] }
0x14a1   :  { %v8841_v3 = vpop.permute.xlu0 %8840 }
0x14a2   :  { %v8886_v7 = vand.u32 4294901760, %v8863_v62  ;;  %v8858_v4 = vsel %vm717_vm2, %v8854_v12, %v8841_v3 }
0x14a3   :  { %v8862_v22 = vmul.f32 %v22787_v37, %v8858_v4  ;;  %v26257_v4 = vld [vmem:[#allocation12_spill] sm:$0xff] }
0x14a4   :  { %v8988_v57 = vsub.f32 %v8863_v62, %v8886_v7  ;;  %v8871_v37 = vmul.f32 %v24812_v10, %v26257_v4 }
0x14a5   :  { %v8883_v5 = vand.u32 4294901760, %v8862_v22 }
0x14a6   :  { %v8989_v9 = vand.u32 4294901760, %v8988_v57 }
0x14a7   :  { %v21388_v43 = vpack.c.bf16 %v8886_v7, %v8883_v5  ;;  %v8981_v2 = vsub.f32 %v8862_v22, %v8883_v5  ;;  %v8865_v7 = vmul.f32 %v24812_v10, %v26256_v35  ;;  %v9429_v22 = vpop.permute.xlu1 %9428 }
0x14a8   :  { %v8990_v45 = vsub.f32 %v8988_v57, %v8989_v9  ;;  %v9459_v56 = vand.u32 4294901760, %v9429_v22 }
0x14a9   :  { %21389 = vmatprep.subr.bf16.mxu1 %v21388_v43  ;;  %v8982_v30 = vand.u32 4294901760, %v8981_v2  ;;  %v21404_v42 = vpack.c.bf16 %v8988_v57, %v8981_v2 }
0x14aa   :  { %21391 = vmatpush3.bf16.msra.mxu1 %v21388_v43  ;;  %v8991_v46 = vand.u32 4294901760, %v8990_v45 }
0x14ab   :  { %21393 = vmatprep.subr.bf16.mxu1 %v21392_v39  ;;  %v8983_v52 = vsub.f32 %v8981_v2, %v8982_v30  ;;  %v21420_v32 = vpack.c.bf16 %v8989_v9, %v8982_v30  ;;  %v9433_v15 = vpop.permute.xlu1 %9432 }
0x14ad   :  { %19047 = vmatmul.mubr.f32.vlgmr.msra.gmra.mrb[18].mxu1 %v8959_v33  ;;  %v8984_v47 = vand.u32 4294901760, %v8983_v52  ;;  %v24922_v33 = vsub.f32 %v9429_v22, %v9459_v56  ;;  %v9465_v52 = vand.u32 4294901760, %v9433_v15 }
0x14ae   :  { %21395 = vmatpush3.bf16.msra.mxu1 %v21392_v39  ;;  %19057 = vmatprep.mubr.f32.mxu1 %v24818_v19 }
0x14af   :  { %v21396_v21 = vpack.c.bf16 %v8991_v46, %v8984_v47 }
0x14b1   :  { %21397 = vmatprep.subr.bf16.mxu1 %v21396_v21 }
0x14b2   :  { %21399 = vmatpush3.bf16.msra.mxu1 %v21396_v21 }
0x14b3   :  { %21401 = vmatprep.subr.bf16.mxu1 %v21400_v27 }
0x14b5   :  { %19058 = vmatmul.mubr.f32.vlgmr.msra.gmra.mrb[18].mxu1 %v24871_v8 }
0x14b6   :  { %21403 = vmatpush3.bf16.msra.mxu1 %v21400_v27  ;;  %19068 = vmatprep.mubr.f32.mxu1 %v24821_v49  ;;  %v26251_v49 = vld [vmem:[#allocation15_spill] sm:$0xff] }
0x14b7   :  { %21405 = vmatprep.subr.bf16.mxu1 %v21404_v42 }
0x14ba   :  { %21407 = vmatpush3.bf16.msra.mxu1 %v21404_v42 }
0x14bb   :  { %21409 = vmatprep.subr.bf16.mxu1 %v24865_v31 }
0x14bd   :  { %19069 = vmatmul.mubr.f32.vlgmr.msra.gmra.mrb[18].mxu1 %v8956_v58  ;;  %v22788_v58 = vld [vmem:[%s25955_s4 + $0x40] sm:$0xff] }
0x14be   :  { %21411 = vmatpush3.bf16.msra.mxu1 %v24865_v31  ;;  %19079 = vmatprep.mubr.f32.mxu1 %v8947_v38  ;;  %v26252_v38 = vld [vmem:[#allocation16_spill] sm:$0xff] }
0x14bf   :  { %21413 = vmatprep.subr.bf16.mxu1 %v21388_v43 }
0x14c2   :  { %21415 = vmatpush3.bf16.msra.mxu1 %v21388_v43 }
0x14c3   :  { %21417 = vmatprep.subr.bf16.mxu1 %v21416_v25 }
0x14c5   :  { %19080 = vmatmul.mubr.f32.vlgmr.msra.gmra.mrb[18].mxu1 %v8957_v34  ;;  %v9435_v34 = vpop.permute.xlu1 %9434 }
0x14c6   :  { %21419 = vmatpush3.bf16.msra.mxu1 %v21416_v25  ;;  %19090 = vmatprep.mubr.f32.mxu1 %v24818_v19  ;;  %v9468_v30 = vand.u32 4294901760, %v9435_v34  ;;  %v9554_v25 = vand.u32 4294901760, %v24922_v33 }
0x14c7   :  { %21421 = vmatprep.subr.bf16.mxu1 %v21420_v32 }
0x14c8   :  { %v24928_v21 = vpack.c.bf16 %v9468_v30, %v9465_v52  ;;  %v9555_v35 = vsub.f32 %v24922_v33, %v9554_v25 }
0x14c9   :  { %v9437_v9 = vpop.permute.xlu1 %9436 }
0x14ca   :  { %21423 = vmatpush3.bf16.msra.mxu1 %v21420_v32  ;;  %v24933_v32 = vsub.f32 %v9435_v34, %v9468_v30 }
0x14cb   :  { %21425 = vmatprep.subr.bf16.mxu1 %v24865_v31 }
0x14cd   :  { %19091 = vmatmul.mubr.f32.vlgmr.msra.gmra.mrb[18].mxu1 %v24871_v8  ;;  %v9439_v10 = vpop.permute.xlu1 %9438 }
0x14ce   :  { %21427 = vmatpush3.bf16.msra.mxu1 %v24865_v31  ;;  %19101 = vmatprep.mubr.f32.mxu1 %v24818_v19  ;;  %v26255_v19 = vld [vmem:[#allocation19_spill] sm:$0xff]  ;;  %v9474_v27 = vand.u32 4294901760, %v9439_v10 }
0x14cf   :  { %21429 = vmatprep.subr.bf16.mxu1 %v21388_v43 }
0x14d2   :  { %21431 = vmatpush3.bf16.msra.mxu1 %v21388_v43 }
0x14d3   :  { %21529 = vmatprep.subr.bf16.mxu1 %v26251_v49 }
0x14d5   :  { %19102 = vmatmul.mubr.f32.vlgmr.msra.gmra.mrb[18].mxu1 %v24871_v8 }
0x14d6   :  { %21531 = vmatpush3.bf16.msra.mxu1 %v26251_v49 }
0x14d7   :  { %21533 = vmatprep.subr.bf16.mxu1 %v26252_v38 }
0x14da   :  { %21535 = vmatpush3.bf16.msra.mxu1 %v26252_v38 }
0x14db   :  { %21537 = vmatprep.subr.bf16.mxu1 %v26253_v54 }
0x14de   :  { %21539 = vmatpush3.bf16.msra.mxu1 %v26253_v54 }
0x14df   :  { %21541 = vmatprep.subr.bf16.mxu1 %v26254_v41 }
0x14e2   :  { %21543 = vmatpush3.bf16.msra.mxu1 %v26254_v41 }
0x14e3   :  { %21545 = vmatprep.subr.bf16.mxu1 %v26255_v19 }
0x15a8   :  { %v19103_v31 = vpop.f32.mrb[18].mxu1 }
0x15a9   :  { %v9394_v13 = vpop.f32.mrb[19].mxu1  ;;  %v9405_v23 = vmul.f32 0.35355338, %v19103_v31 }
0x15aa   :  { %v9404_v8 = vmul.f32 0.35355338, %v9394_v13 }
0x15ab   :  { %v9407_v62 = vadd.f32 %v22789_v6, %v9405_v23  ;;  %v9471_v23 = vand.u32 4294901760, %v9437_v9 }
0x15ac   :  { %v9406_v48 = vadd.f32 %v22788_v58, %v9404_v8  ;;  %v24937_v8 = vsub.f32 %v9433_v15, %v9465_v52  ;;  %v9441_v58 = vpop.permute.xlu1 %9440 }
0x15ad   :  { %v9411_v3 = vsel %vm1302_vm3, %v9407_v62, -inf  ;;  %v24940_v6 = vpack.c.bf16 %v9474_v27, %v9471_v23  ;;  %v9477_v22 = vand.u32 4294901760, %v9441_v58 }
0x15ae   :  { %v9408_v12 = vsel %vm1302_vm3, %v9406_v48, -inf  ;;  %v9568_v34 = vand.u32 4294901760, %v24937_v8 }
0x15af   :  { %9409 = vmax.xlane.f32.xlu0 %v9408_v12 }
0x15b0   :  { %v9569_v52 = vsub.f32 %v24937_v8, %v9568_v34 }
0x15b3   :  { %9412 = vmax.xlane.f32.xlu0 %v9411_v3 }
0x15c9   :  { %9430 = vrot.lane.b32.xlu0 %v8865_v7, %s22835_s13  ;;  %v9575_v7 = vand.u32 4294901760, %v24933_v32 }
0x15cd   :  { %9442 = vrot.lane.b32.xlu0 %v8871_v37, %s22835_s13  ;;  %v24952_v37 = vsub.f32 %v9439_v10, %v9474_v27 }
0x163c   :  { %v9410_v57 = vpop.xlane.xlu0 %9409 }
0x163d   :  { %v9414_v5 = vsub.f32 %v9406_v48, %v9410_v57  ;;  %v24959_v57 = vsub.f32 %v9437_v9, %v9471_v23  ;;  %v9589_v9 = vand.u32 4294901760, %v24952_v37 }
0x163f   :  { %v9416_v29 = vmul.f32 1.442695, %v9414_v5  ;;  %v9582_v27 = vand.u32 4294901760, %v24959_v57 }
0x1640   :  { %v9413_v43 = vpop.xlane.xlu0 %9412 }
0x1641   :  { %22741 = vpow2.f32 %v9416_v29  ;;  %v9415_v2 = vsub.f32 %v9407_v62, %v9413_v43 }
0x1643   :  { %v9418_v51 = vmul.f32 1.442695, %v9415_v2 }
0x1644   :  { %v9431_v39 = vpop.permute.xlu0 %9430 }
0x1645   :  { %22743 = vpow2.f32 %v9418_v51  ;;  %v9462_v45 = vand.u32 4294901760, %v9431_v39  ;;  %v9576_v51 = vsub.f32 %v24933_v32, %v9575_v7 }
0x1647   :  { %v24924_v47 = vpack.c.bf16 %v9462_v45, %v9459_v56  ;;  %v24926_v46 = vsub.f32 %v9431_v39, %v9462_v45  ;;  %v9556_v39 = vand.u32 4294901760, %v9555_v35 }
0x1648   :  { %v9443_v31 = vpop.permute.xlu0 %9442 }
0x1649   :  { %v9561_v42 = vand.u32 4294901760, %v24926_v46  ;;  %21433 = vmatprep.subr.bf16.mxu0 %v24924_v47  ;;  %v9480_v3 = vand.u32 4294901760, %v9443_v31 }
0x164a   :  { %21435 = vmatpush3.bf16.msra.mxu0 %v24924_v47 }
0x164b   :  { %v22742_v13 = vpop.eup %22741  ;;  %21437 = vmatprep.subr.bf16.mxu0 %v24928_v21  ;;  %v9562_v12 = vsub.f32 %v24926_v46, %v9561_v42  ;;  %v24964_v43 = vpack.c.bf16 %v9480_v3, %v9477_v22  ;;  %v24977_v45 = vsub.f32 %v9443_v31, %v9480_v3  ;;  %v9590_v31 = vsub.f32 %v24952_v37, %v9589_v9 }
0x164c   :  { %v9453_v48 = vsel %vm1302_vm3, %v22742_v13, 0  ;;  %v24986_v13 = vsub.f32 %v9441_v58, %v9477_v22  ;;  %v9577_v58 = vand.u32 4294901760, %v9576_v51 }
0x164d   :  { %v24942_v62 = vand.u32 4294901760, %v9453_v48  ;;  %v9563_v56 = vand.u32 4294901760, %v9562_v12  ;;  %v9603_v3 = vand.u32 4294901760, %v24977_v45  ;;  %v9591_v50 = vand.u32 4294901760, %v9590_v31 }
0x164e   :  { %21439 = vmatpush3.bf16.msra.mxu0 %v24928_v21  ;;  %v9596_v22 = vand.u32 4294901760, %v24986_v13 }
0x164f   :  { %v22744_v4 = vpop.eup %22743  ;;  %21441 = vmatprep.subr.bf16.mxu0 %v24940_v6  ;;  %v24956_v15 = vsub.f32 %v9453_v48, %v24942_v62  ;;  %v21448_v48 = vpack.c.bf16 %v9563_v56, %v9556_v39  ;;  %v9570_v56 = vand.u32 4294901760, %v9569_v52  ;;  %v9604_v39 = vsub.f32 %v24977_v45, %v9603_v3  ;;  %v26258_v52 = vld [vmem:[#allocation20_spill] sm:$0xff] }
0x1650   :  { %v9456_v5 = vsel %vm1302_vm3, %v22744_v4, 0  ;;  %v9583_v4 = vsub.f32 %v24959_v57, %v9582_v27  ;;  %v9597_v51 = vsub.f32 %v24986_v13, %v9596_v22 }
0x1651   :  { %v24962_v29 = vand.u32 4294901760, %v9456_v5  ;;  %v24967_v2 = vand.u32 4294901760, %v24956_v15  ;;  %v9605_v11 = vand.u32 4294901760, %v9604_v39  ;;  %v26263_v39 = vld [vmem:[#allocation25_spill] sm:$0xff] }
0x1652   :  { %21443 = vmatpush3.bf16.msra.mxu0 %v24940_v6 }
0x1653   :  { %v24975_v30 = vsub.f32 %v9456_v5, %v24962_v29  ;;  %21445 = vmatprep.subr.bf16.mxu0 %v24964_v43  ;;  %v9534_v10 = vsub.f32 %v24956_v15, %v24967_v2 }
0x1655   :  { %v9535_v23 = vand.u32 4294901760, %v9534_v10  ;;  %v24989_v12 = vand.u32 4294901760, %v24975_v30  ;;  %v21452_v10 = vpack.c.bf16 %v9577_v58, %v9570_v56  ;;  %v26260_v58 = vld [vmem:[#allocation22_spill] sm:$0xff]  ;;  %v21472_v56 = vpack.c.bf16 %v24952_v37, %v24959_v57 }
0x1656   :  { %21447 = vmatpush3.bf16.msra.mxu0 %v24964_v43 }
0x1657   :  { %19120 = vmatprep.mubr.f32.mxu0 %v9535_v23  ;;  %21449 = vmatprep.subr.bf16.mxu0 %v21448_v48  ;;  %v9544_v35 = vsub.f32 %v24975_v30, %v24989_v12 }
0x1658   :  { %19234 = vmatprep.mubr.f32.mxu1 %v9535_v23  ;;  %v9584_v23 = vand.u32 4294901760, %v9583_v4  ;;  %v21464_v4 = vpack.c.bf16 %v24926_v46, %v24922_v33  ;;  %v21500_v33 = vpack.c.bf16 %v9575_v7, %v9568_v34  ;;  %v26266_v46 = vld [vmem:[#allocation28_spill] sm:$0xff] }
0x1659   :  { %v9545_v5 = vand.u32 4294901760, %v9544_v35 }
0x165a   :  { %v21456_v35 = vpack.c.bf16 %v9591_v50, %v9584_v23  ;;  %v26261_v50 = vld [vmem:[#allocation23_spill] sm:$0xff] }
0x165b   :  { %19121 = vmatmul.mubr.f32.vlgmr.msra.gmra.mrb[16].mxu0 %v9545_v5  ;;  %19235 = vmatmul.mubr.f32.vlgmr.msra.gmra.mrb[20].mxu1 %v9545_v5  ;;  %v26262_v5 = vld [vmem:[#allocation24_spill] sm:$0xff] }
0x165c   :  { %21451 = vmatpush3.bf16.msra.mxu0 %v21448_v48  ;;  %21547 = vmatpush3.bf16.msra.mxu1 %v26255_v19  ;;  %v26259_v48 = vld [vmem:[#allocation21_spill] sm:$0xff]  ;;  %v9598_v19 = vand.u32 4294901760, %v9597_v51 }
0x165d   :  { %21453 = vmatprep.subr.bf16.mxu0 %v21452_v10  ;;  %19139 = vmatprep.mubr.f32.mxu0 %v24942_v62 }
0x165e   :  { %19253 = vmatprep.mubr.f32.mxu1 %v24942_v62  ;;  %21549 = vmatprep.subr.bf16.mxu1 %v26258_v52  ;;  %v21460_v31 = vpack.c.bf16 %v9605_v11, %v9598_v19  ;;  %v21468_v11 = vpack.c.bf16 %v24933_v32, %v24937_v8  ;;  %v21508_v32 = vpack.c.bf16 %v9603_v3, %v9596_v22  ;;  %v26268_v8 = vld [vmem:[#allocation30_spill] sm:$0xff] }
0x1660   :  { %21455 = vmatpush3.bf16.msra.mxu0 %v21452_v10  ;;  %21551 = vmatpush3.bf16.msra.mxu1 %v26258_v52  ;;  %v21476_v10 = vpack.c.bf16 %v24977_v45, %v24986_v13 }
0x1661   :  { %21457 = vmatprep.subr.bf16.mxu0 %v21456_v35  ;;  %21553 = vmatprep.subr.bf16.mxu1 %v26259_v48 }
0x1664   :  { %21459 = vmatpush3.bf16.msra.mxu0 %v21456_v35  ;;  %21555 = vmatpush3.bf16.msra.mxu1 %v26259_v48 }
0x1665   :  { %21461 = vmatprep.subr.bf16.mxu0 %v21460_v31  ;;  %21557 = vmatprep.subr.bf16.mxu1 %v26260_v58 }
0x1668   :  { %21463 = vmatpush3.bf16.msra.mxu0 %v21460_v31  ;;  %21559 = vmatpush3.bf16.msra.mxu1 %v26260_v58 }
0x1669   :  { %21465 = vmatprep.subr.bf16.mxu0 %v21464_v4  ;;  %21561 = vmatprep.subr.bf16.mxu1 %v26261_v50 }
0x166b   :  { %19140 = vmatmul.mubr.f32.vlgmr.msra.gmra.mrb[16].mxu0 %v24962_v29  ;;  %19254 = vmatmul.mubr.f32.vlgmr.msra.gmra.mrb[20].mxu1 %v24962_v29 }
0x166c   :  { %21467 = vmatpush3.bf16.msra.mxu0 %v21464_v4  ;;  %19158 = vmatprep.mubr.f32.mxu0 %v24956_v15 }
0x166d   :  { %21563 = vmatpush3.bf16.msra.mxu1 %v26261_v50  ;;  %19272 = vmatprep.mubr.f32.mxu1 %v24956_v15  ;;  %v26264_v15 = vld [vmem:[#allocation26_spill] sm:$0xff] }
0x166e   :  { %21469 = vmatprep.subr.bf16.mxu0 %v21468_v11  ;;  %21565 = vmatprep.subr.bf16.mxu1 %v26262_v5 }
0x1670   :  { %21471 = vmatpush3.bf16.msra.mxu0 %v21468_v11 }
0x1671   :  { %21567 = vmatpush3.bf16.msra.mxu1 %v26262_v5  ;;  %21473 = vmatprep.subr.bf16.mxu0 %v21472_v56 }
0x1672   :  { %21569 = vmatprep.subr.bf16.mxu1 %v26263_v39 }
0x1674   :  { %21475 = vmatpush3.bf16.msra.mxu0 %v21472_v56 }
0x1675   :  { %21571 = vmatpush3.bf16.msra.mxu1 %v26263_v39  ;;  %21477 = vmatprep.subr.bf16.mxu0 %v21476_v10 }
0x1676   :  { %21573 = vmatprep.subr.bf16.mxu1 %v26264_v15 }
0x1678   :  { %21479 = vmatpush3.bf16.msra.mxu0 %v21476_v10 }
0x1679   :  { %21575 = vmatpush3.bf16.msra.mxu1 %v26264_v15  ;;  %21481 = vmatprep.subr.bf16.mxu0 %v24924_v47 }
0x167a   :  { %21577 = vmatprep.subr.bf16.mxu1 %v26251_v49 }
0x167b   :  { %19159 = vmatmul.mubr.f32.vlgmr.msra.gmra.mrb[16].mxu0 %v24975_v30 }
0x167c   :  { %19273 = vmatmul.mubr.f32.vlgmr.msra.gmra.mrb[20].mxu1 %v24975_v30  ;;  %21483 = vmatpush3.bf16.msra.mxu0 %v24924_v47  ;;  %v26265_v30 = vld [vmem:[#allocation27_spill] sm:$0xff] }
0x167d   :  { %19177 = vmatprep.mubr.f32.mxu0 %v24967_v2  ;;  %21579 = vmatpush3.bf16.msra.mxu1 %v26251_v49 }
0x167e   :  { %19291 = vmatprep.mubr.f32.mxu1 %v24967_v2  ;;  %21485 = vmatprep.subr.bf16.mxu0 %v24928_v21  ;;  %v21496_v2 = vpack.c.bf16 %v9561_v42, %v9554_v25  ;;  %v21504_v42 = vpack.c.bf16 %v9589_v9, %v9582_v27  ;;  %v26267_v25 = vld [vmem:[#allocation29_spill] sm:$0xff] }
0x167f   :  { %21581 = vmatprep.subr.bf16.mxu1 %v26252_v38 }
0x1680   :  { %21487 = vmatpush3.bf16.msra.mxu0 %v24928_v21 }
0x1681   :  { %21583 = vmatpush3.bf16.msra.mxu1 %v26252_v38  ;;  %21489 = vmatprep.subr.bf16.mxu0 %v24940_v6 }
0x1682   :  { %21585 = vmatprep.subr.bf16.mxu1 %v26253_v54 }
0x1684   :  { %21491 = vmatpush3.bf16.msra.mxu0 %v24940_v6 }
0x1685   :  { %21587 = vmatpush3.bf16.msra.mxu1 %v26253_v54  ;;  %21493 = vmatprep.subr.bf16.mxu0 %v24964_v43 }
0x1686   :  { %21589 = vmatprep.subr.bf16.mxu1 %v26254_v41 }
0x1688   :  { %21495 = vmatpush3.bf16.msra.mxu0 %v24964_v43 }
0x1689   :  { %21591 = vmatpush3.bf16.msra.mxu1 %v26254_v41  ;;  %21497 = vmatprep.subr.bf16.mxu0 %v21496_v2 }
0x168a   :  { %21593 = vmatprep.subr.bf16.mxu1 %v26265_v30 }
0x168b   :  { %19178 = vmatmul.mubr.f32.vlgmr.msra.gmra.mrb[16].mxu0 %v24989_v12 }
0x168c   :  { %19292 = vmatmul.mubr.f32.vlgmr.msra.gmra.mrb[20].mxu1 %v24989_v12  ;;  %21499 = vmatpush3.bf16.msra.mxu0 %v21496_v2 }
0x168d   :  { %19196 = vmatprep.mubr.f32.mxu0 %v24942_v62  ;;  %21595 = vmatpush3.bf16.msra.mxu1 %v26265_v30 }
0x168e   :  { %19310 = vmatprep.mubr.f32.mxu1 %v24942_v62  ;;  %21501 = vmatprep.subr.bf16.mxu0 %v21500_v33 }
0x168f   :  { %21597 = vmatprep.subr.bf16.mxu1 %v26266_v46 }
0x1690   :  { %21503 = vmatpush3.bf16.msra.mxu0 %v21500_v33 }
0x1691   :  { %21599 = vmatpush3.bf16.msra.mxu1 %v26266_v46  ;;  %21505 = vmatprep.subr.bf16.mxu0 %v21504_v42 }
0x1692   :  { %21601 = vmatprep.subr.bf16.mxu1 %v26267_v25 }
0x1694   :  { %21507 = vmatpush3.bf16.msra.mxu0 %v21504_v42 }
0x1695   :  { %21603 = vmatpush3.bf16.msra.mxu1 %v26267_v25  ;;  %21509 = vmatprep.subr.bf16.mxu0 %v21508_v32 }
0x1696   :  { %21605 = vmatprep.subr.bf16.mxu1 %v26268_v8 }
0x1698   :  { %21511 = vmatpush3.bf16.msra.mxu0 %v21508_v32 }
0x1699   :  { %21607 = vmatpush3.bf16.msra.mxu1 %v26268_v8  ;;  %21513 = vmatprep.subr.bf16.mxu0 %v24924_v47 }
0x169a   :  { %21609 = vmatprep.subr.bf16.mxu1 %v26251_v49 }
0x169b   :  { %19197 = vmatmul.mubr.f32.vlgmr.msra.gmra.mrb[16].mxu0 %v24962_v29 }
0x169c   :  { %19311 = vmatmul.mubr.f32.vlgmr.msra.gmra.mrb[20].mxu1 %v24962_v29  ;;  %21515 = vmatpush3.bf16.msra.mxu0 %v24924_v47 }
0x169d   :  { %19215 = vmatprep.mubr.f32.mxu0 %v24942_v62  ;;  %21611 = vmatpush3.bf16.msra.mxu1 %v26251_v49  ;;  %v16254_v49 = vld [vmem:[%s25953_s2 + $0x80] sm:$0xff] }
0x169e   :  { %19329 = vmatprep.mubr.f32.mxu1 %v24942_v62  ;;  %21517 = vmatprep.subr.bf16.mxu0 %v24928_v21  ;;  %v10635_v47 = vand.u32 4294901760, %v16254_v49 }
0x169f   :  { %21613 = vmatprep.subr.bf16.mxu1 %v26252_v38 }
0x16a0   :  { %21519 = vmatpush3.bf16.msra.mxu0 %v24928_v21  ;;  %v10725_v34 = vsub.f32 %v16254_v49, %v10635_v47 }
0x16a1   :  { %21615 = vmatpush3.bf16.msra.mxu1 %v26252_v38  ;;  %21521 = vmatprep.subr.bf16.mxu0 %v24940_v6  ;;  %v16255_v38 = vld [vmem:[%s25953_s2 + $0x88] sm:$0xff] }
0x16a2   :  { %21617 = vmatprep.subr.bf16.mxu1 %v26253_v54  ;;  %v10638_v21 = vand.u32 4294901760, %v16255_v38 }
0x16a4   :  { %21523 = vmatpush3.bf16.msra.mxu0 %v24940_v6  ;;  %v25119_v7 = vpack.c.bf16 %v10638_v21, %v10635_v47  ;;  %v10732_v57 = vsub.f32 %v16255_v38, %v10638_v21 }
0x16a5   :  { %21619 = vmatpush3.bf16.msra.mxu1 %v26253_v54  ;;  %21525 = vmatprep.subr.bf16.mxu0 %v24964_v43  ;;  %v16256_v54 = vld [vmem:[%s25953_s2 + $0x90] sm:$0xff] }
0x16a6   :  { %21621 = vmatprep.subr.bf16.mxu1 %v26254_v41  ;;  %v10641_v6 = vand.u32 4294901760, %v16256_v54  ;;  %v21640_v58 = vpack.c.bf16 %v10732_v57, %v10725_v34 }
0x16a8   :  { %21527 = vmatpush3.bf16.msra.mxu0 %v24964_v43  ;;  %v10733_v43 = vand.u32 4294901760, %v10732_v57  ;;  %v10739_v27 = vsub.f32 %v16256_v54, %v10641_v6 }
0x16a9   :  { %21623 = vmatpush3.bf16.msra.mxu1 %v26254_v41  ;;  %v16257_v41 = vld [vmem:[%s25953_s2 + $0x98] sm:$0xff]  ;;  %21625 = vmatprep.subr.bf16.mxu0 %v25119_v7 }
0x16aa   :  { %v10644_v62 = vand.u32 4294901760, %v16257_v41  ;;  %v10734_v45 = vsub.f32 %v10732_v57, %v10733_v43  ;;  %v10740_v22 = vand.u32 4294901760, %v10739_v27  ;;  %v16247_v57 = vld [vmem:[%s25952_s1 + $0x48] sm:$0xff] }
0x16ab   :  { %19216 = vmatmul.mubr.f32.vlgmr.msra.gmra.mrb[16].mxu0 %v24962_v29 }
0x16ac   :  { %19330 = vmatmul.mubr.f32.vlgmr.msra.gmra.mrb[20].mxu1 %v24962_v29  ;;  %v25121_v37 = vpack.c.bf16 %v10644_v62, %v10641_v6  ;;  %21627 = vmatpush3.bf16.msra.mxu0 %v25119_v7  ;;  %v10726_v29 = vand.u32 4294901760, %v10725_v34  ;;  %v10746_v13 = vsub.f32 %v16257_v41, %v10644_v62  ;;  %v10735_v3 = vand.u32 4294901760, %v10734_v45  ;;  %v16251_v45 = vld [vmem:[%s25952_s1 + $0x68] sm:$0xff] }
0x16ad   :  { %v10741_v52 = vsub.f32 %v10739_v27, %v10740_v22 }
0x16ae   :  { %21629 = vmatprep.subr.bf16.mxu0 %v25121_v37  ;;  %v10727_v9 = vsub.f32 %v10725_v34, %v10726_v29  ;;  %v10747_v51 = vand.u32 4294901760, %v10746_v13  ;;  %v21644_v4 = vpack.c.bf16 %v10746_v13, %v10739_v27  ;;  %v21656_v50 = vpack.c.bf16 %v10733_v43, %v10726_v29  ;;  %v16249_v29 = vld [vmem:[%s25952_s1 + $0x58] sm:$0xff] }
0x16af   :  { %v10742_v48 = vand.u32 4294901760, %v10741_v52  ;;  %v11761_v43 = vand.u32 4294901760, %v16247_v57  ;;  %v16253_v27 = vld [vmem:[%s25952_s1 + $0x78] sm:$0xff] }
0x16b0   :  { %21631 = vmatpush3.bf16.msra.mxu0 %v25121_v37  ;;  %v10728_v12 = vand.u32 4294901760, %v10727_v9  ;;  %v10748_v35 = vsub.f32 %v10746_v13, %v10747_v51  ;;  %v21660_v11 = vpack.c.bf16 %v10747_v51, %v10740_v22  ;;  %v11764_v9 = vand.u32 4294901760, %v16249_v29 }
0x16b1   :  { %v11767_v13 = vand.u32 4294901760, %v16251_v45 }
0x16b2   :  { %v21632_v23 = vpack.c.bf16 %v10735_v3, %v10728_v12  ;;  %v10749_v19 = vand.u32 4294901760, %v10748_v35  ;;  %v11770_v12 = vand.u32 4294901760, %v16253_v27  ;;  %v11871_v3 = vsub.f32 %v16247_v57, %v11761_v43  ;;  %v26282_v57 = vld [vmem:[#allocation39_spill] sm:$0xff] }
0x16b3   :  { %v11878_v22 = vsub.f32 %v16249_v29, %v11764_v9  ;;  %v11885_v52 = vsub.f32 %v16251_v45, %v11767_v13  ;;  %v26283_v29 = vld [vmem:[#allocation42_spill] sm:$0xff] }
0x16b4   :  { %21633 = vmatprep.subr.bf16.mxu0 %v21632_v23  ;;  %v21636_v31 = vpack.c.bf16 %v10749_v19, %v10742_v48  ;;  %v11872_v51 = vand.u32 4294901760, %v11871_v3  ;;  %v11892_v35 = vsub.f32 %v16253_v27, %v11770_v12  ;;  %v21720_v48 = vpack.c.bf16 %v11764_v9, %v11761_v43  ;;  %v26284_v43 = vld [vmem:[#allocation43_spill] sm:$0xff] }
0x16b5   :  { %v25182_v9 = vld [vmem:[%s25954_s3 + $0x20] sm:$0xff] }
0x16b6   :  { %v11873_v19 = vsub.f32 %v11871_v3, %v11872_v51  ;;  %v10627_v45 = vrot.slane %v25182_v9, %v26240_v40 }
0x177e   :  { %v19217_v5 = vpop.f32.mrb[16].mxu0 }
0x177f   :  { %v19331_v56 = vpop.f32.mrb[20].mxu1  ;;  %v10028_v39 = vpop.f32.mrb[17].mxu0 }
0x1780   :  { %v10619_v10 = vmax.f32 %v19331_v56, 1e-30  ;;  %v10608_v15 = vpop.f32.mrb[21].mxu1 }
0x1781   :  { %v10618_v2 = vmax.f32 %v10608_v15, 1e-30 }
0x1782   :  { %22745 = vrcp.f32 %v10619_v10 }
0x1783   :  { %22747 = vrcp.f32 %v10618_v2 }
0x178c   :  { %v22746_v30 = vpop.eup %22745 }
0x178d   :  { %v22748_v33 = vpop.eup %22747  ;;  %v10623_v46 = vmul.f32 %v22746_v30, %v19217_v5 }
0x178e   :  { %v10622_v42 = vmul.f32 %v22748_v33, %v10028_v39  ;;  %v26270_v33 = vld [vmem:[#allocation44_spill] sm:$0xff] }
0x178f   :  { %v10632_v25 = vsel %vm93_vm0, %v10623_v46, 0  ;;  %v21736_v46 = vpack.c.bf16 %v11878_v22, %v11871_v3 }
0x1790   :  { %v10629_v32 = vsel %vm93_vm0, %v10622_v42, 0  ;;  %v25129_v8 = vand.u32 4294901760, %v10632_v25  ;;  %v26272_v42 = vld [vmem:[#allocation46_spill] sm:$0xff] }
0x1791   :  { %v10703_v49 = vand.u32 4294901760, %v10629_v32 }
0x1792   :  { %v10714_v38 = vsub.f32 %v10632_v25, %v25129_v8  ;;  %v26273_v25 = vld [vmem:[#allocation31_spill] sm:$0xff] }
0x1793   :  { %v10704_v54 = vsub.f32 %v10629_v32, %v10703_v49  ;;  %v21740_v32 = vpack.c.bf16 %v11892_v35, %v11885_v52 }
0x1794   :  { %v10715_v47 = vand.u32 4294901760, %v10714_v38 }
0x1795   :  { %v10705_v21 = vand.u32 4294901760, %v10704_v54 }
0x1796   :  { %v10716_v41 = vsub.f32 %v10714_v38, %v10715_v47 }
0x1797   :  { %v10706_v6 = vsub.f32 %v10704_v54, %v10705_v21 }
0x1798   :  { %v10717_v34 = vand.u32 4294901760, %v10716_v41 }
0x1799   :  { %v10707_v62 = vand.u32 4294901760, %v10706_v6  ;;  %v26280_v6 = vld [vmem:[#allocation40_spill] sm:$0xff] }
0x179b   :  { %19340 = vmatprep.mubr.f32.mxu0 %v10707_v62  ;;  %v26281_v62 = vld [vmem:[#allocation34_spill] sm:$0xff] }
0x179c   :  { %19341 = vmatmul.mubr.f32.vlgmr.msra.gmra.mrb[18].mxu0 %v10717_v34 }
0x179d   :  { %21635 = vmatpush3.bf16.msra.mxu0 %v21632_v23  ;;  %19351 = vmatprep.mubr.f32.mxu0 %v10703_v49  ;;  %v11879_v23 = vand.u32 4294901760, %v11878_v22 }
0x179e   :  { %21637 = vmatprep.subr.bf16.mxu0 %v21636_v31 }
0x179f   :  { %v21752_v41 = vpack.c.bf16 %v11879_v23, %v11872_v51 }
0x17a1   :  { %21639 = vmatpush3.bf16.msra.mxu0 %v21636_v31  ;;  %v11880_v31 = vsub.f32 %v11878_v22, %v11879_v23 }
0x17a2   :  { %21641 = vmatprep.subr.bf16.mxu0 %v21640_v58 }
0x17a3   :  { %v11881_v5 = vand.u32 4294901760, %v11880_v31 }
0x17a4   :  { %19352 = vmatmul.mubr.f32.vlgmr.msra.gmra.mrb[18].mxu0 %v25129_v8 }
0x17a5   :  { %21643 = vmatpush3.bf16.msra.mxu0 %v21640_v58  ;;  %19362 = vmatprep.mubr.f32.mxu0 %v10704_v54  ;;  %v11886_v58 = vand.u32 4294901760, %v11885_v52  ;;  %v26277_v54 = vld [vmem:[#allocation32_spill] sm:$0xff] }
0x17a6   :  { %21645 = vmatprep.subr.bf16.mxu0 %v21644_v4 }
0x17a7   :  { %v11887_v56 = vsub.f32 %v11885_v52, %v11886_v58 }
0x17a9   :  { %21647 = vmatpush3.bf16.msra.mxu0 %v21644_v4  ;;  %v11893_v4 = vand.u32 4294901760, %v11892_v35  ;;  %v11888_v15 = vand.u32 4294901760, %v11887_v56 }
0x17aa   :  { %21649 = vmatprep.subr.bf16.mxu0 %v25119_v7 }
0x17ab   :  { %v11894_v39 = vsub.f32 %v11892_v35, %v11893_v4  ;;  %v21756_v34 = vpack.c.bf16 %v11893_v4, %v11886_v58 }
0x17ac   :  { %19363 = vmatmul.mubr.f32.vlgmr.msra.gmra.mrb[18].mxu0 %v10714_v38  ;;  %v26276_v38 = vld [vmem:[#allocation37_spill] sm:$0xff] }
0x17ad   :  { %21651 = vmatpush3.bf16.msra.mxu0 %v25119_v7  ;;  %19373 = vmatprep.mubr.f32.mxu0 %v10705_v21  ;;  %v11895_v2 = vand.u32 4294901760, %v11894_v39  ;;  %v26279_v21 = vld [vmem:[#allocation38_spill] sm:$0xff] }
0x17ae   :  { %21653 = vmatprep.subr.bf16.mxu0 %v25121_v37 }
0x17af   :  { %v21732_v30 = vpack.c.bf16 %v11895_v2, %v11888_v15  ;;  %v22792_v15 = vld [vmem:[%s25952_s1 + $0x60] sm:$0xff] }
0x17b0   :  { %v22793_v2 = vld [vmem:[%s25952_s1 + $0x40] sm:$0xff] }
0x17b1   :  { %21655 = vmatpush3.bf16.msra.mxu0 %v25121_v37 }
0x17b2   :  { %21657 = vmatprep.subr.bf16.mxu0 %v21656_v50 }
0x17b4   :  { %19374 = vmatmul.mubr.f32.vlgmr.msra.gmra.mrb[18].mxu0 %v10715_v47  ;;  %v26278_v47 = vld [vmem:[#allocation36_spill] sm:$0xff] }
0x17b5   :  { %21659 = vmatpush3.bf16.msra.mxu0 %v21656_v50  ;;  %19384 = vmatprep.mubr.f32.mxu0 %v10703_v49  ;;  %v21724_v50 = vpack.c.bf16 %v11770_v12, %v11767_v13 }
0x17b6   :  { %21661 = vmatprep.subr.bf16.mxu0 %v21660_v11 }
0x17b9   :  { %21663 = vmatpush3.bf16.msra.mxu0 %v21660_v11  ;;  %v11874_v11 = vand.u32 4294901760, %v11873_v19 }
0x17ba   :  { %21665 = vmatprep.subr.bf16.mxu0 %v25119_v7 }
0x17bb   :  { %v21728_v10 = vpack.c.bf16 %v11881_v5, %v11874_v11 }
0x17bc   :  { %19385 = vmatmul.mubr.f32.vlgmr.msra.gmra.mrb[18].mxu0 %v25129_v8 }
0x17bd   :  { %21667 = vmatpush3.bf16.msra.mxu0 %v25119_v7  ;;  %19395 = vmatprep.mubr.f32.mxu0 %v10703_v49  ;;  %v26269_v7 = vld [vmem:[#allocation41_spill] sm:$0xff]  ;;  %v26275_v49 = vld [vmem:[#allocation35_spill] sm:$0xff] }
0x17be   :  { %21669 = vmatprep.subr.bf16.mxu0 %v25121_v37 }
0x17c1   :  { %21671 = vmatpush3.bf16.msra.mxu0 %v25121_v37  ;;  %v26271_v37 = vld [vmem:[#allocation45_spill] sm:$0xff] }
0x17c2   :  { %21721 = vmatprep.subr.bf16.mxu0 %v21720_v48 }
0x17c4   :  { %19396 = vmatmul.mubr.f32.vlgmr.msra.gmra.mrb[18].mxu0 %v25129_v8  ;;  %v26274_v8 = vld [vmem:[#allocation33_spill] sm:$0xff] }
0x17c5   :  { %21723 = vmatpush3.bf16.msra.mxu0 %v21720_v48  ;;  %19472 = vmatprep.mubr.f32.mxu0 %v26269_v7 }
0x17c6   :  { %21725 = vmatprep.subr.bf16.mxu0 %v21724_v50 }
0x17c9   :  { %21727 = vmatpush3.bf16.msra.mxu0 %v21724_v50 }
0x17ca   :  { %21729 = vmatprep.subr.bf16.mxu0 %v21728_v10 }
0x17cc   :  { %19473 = vmatmul.mubr.f32.vlgmr.msra.gmra.mrb[20].mxu0 %v26270_v33  ;;  %v11759_v33 = vrot.slane %v25182_v9, %v26243_v60 }
0x17cd   :  { %21731 = vmatpush3.bf16.msra.mxu0 %v21728_v10  ;;  %19475 = vmatprep.mubr.f32.mxu0 %v26271_v37  ;;  %v22791_v10 = vld [vmem:[%s25952_s1 + $0x50] sm:$0xff] }
0x17ce   :  { %21733 = vmatprep.subr.bf16.mxu0 %v21732_v30 }
0x17d0   :  { %19476 = vmatmul.mubr.f32.gmra.mrb[22].mxu0 %v26272_v42 }
0x17d1   :  { %21735 = vmatpush3.bf16.msra.mxu0 %v21732_v30  ;;  %19486 = vmatprep.mubr.f32.mxu0 %v26273_v25  ;;  %v22794_v30 = vld [vmem:[%s25952_s1 + $0x70] sm:$0xff] }
0x17d2   :  { %21737 = vmatprep.subr.bf16.mxu0 %v21736_v46 }
0x17d4   :  { %19487 = vmatmul.mubr.f32.vlgmr.msra.gmra.mrb[20].mxu0 %v26274_v8 }
0x17d5   :  { %21739 = vmatpush3.bf16.msra.mxu0 %v21736_v46  ;;  %19489 = vmatprep.mubr.f32.mxu0 %v26275_v49 }
0x17d6   :  { %21741 = vmatprep.subr.bf16.mxu0 %v21740_v32 }
0x17d8   :  { %19490 = vmatmul.mubr.f32.gmra.mrb[22].mxu0 %v26276_v38 }
0x17d9   :  { %21743 = vmatpush3.bf16.msra.mxu0 %v21740_v32  ;;  %19500 = vmatprep.mubr.f32.mxu0 %v26277_v54  ;;  %v26285_v32 = vld [vmem:[#allocation52_spill] sm:$0xff]  ;;  %v26287_v54 = vld [vmem:[#allocation57_spill] sm:$0xff] }
0x17da   :  { %21745 = vmatprep.subr.bf16.mxu0 %v21720_v48 }
0x17dc   :  { %19501 = vmatmul.mubr.f32.vlgmr.msra.gmra.mrb[20].mxu0 %v26278_v47 }
0x17dd   :  { %21747 = vmatpush3.bf16.msra.mxu0 %v21720_v48  ;;  %19503 = vmatprep.mubr.f32.mxu0 %v26279_v21 }
0x17de   :  { %21749 = vmatprep.subr.bf16.mxu0 %v21724_v50 }
0x17e0   :  { %19504 = vmatmul.mubr.f32.gmra.mrb[22].mxu0 %v26280_v6 }
0x17e1   :  { %21751 = vmatpush3.bf16.msra.mxu0 %v21724_v50  ;;  %19514 = vmatprep.mubr.f32.mxu0 %v26281_v62 }
0x17e2   :  { %21753 = vmatprep.subr.bf16.mxu0 %v21752_v41 }
0x17e4   :  { %19515 = vmatmul.mubr.f32.vlgmr.msra.gmra.mrb[20].mxu0 %v26282_v57 }
0x17e5   :  { %21755 = vmatpush3.bf16.msra.mxu0 %v21752_v41  ;;  %19517 = vmatprep.mubr.f32.mxu0 %v26283_v29 }
0x17e6   :  { %21757 = vmatprep.subr.bf16.mxu0 %v21756_v34 }
0x17e8   :  { %19518 = vmatmul.mubr.f32.gmra.mrb[22].mxu0 %v26284_v43 }
0x17e9   :  { %21759 = vmatpush3.bf16.msra.mxu0 %v21756_v34  ;;  %19528 = vmatprep.mubr.f32.mxu0 %v26273_v25 }
0x17ea   :  { %21761 = vmatprep.subr.bf16.mxu0 %v21720_v48 }
0x17ec   :  { %19529 = vmatmul.mubr.f32.vlgmr.msra.gmra.mrb[20].mxu0 %v26274_v8 }
0x17ed   :  { %21763 = vmatpush3.bf16.msra.mxu0 %v21720_v48  ;;  %19531 = vmatprep.mubr.f32.mxu0 %v26275_v49 }
0x17ee   :  { %21765 = vmatprep.subr.bf16.mxu0 %v21724_v50 }
0x17f0   :  { %19532 = vmatmul.mubr.f32.gmra.mrb[22].mxu0 %v26276_v38 }
0x17f1   :  { %21767 = vmatpush3.bf16.msra.mxu0 %v21724_v50  ;;  %19542 = vmatprep.mubr.f32.mxu0 %v26273_v25 }
0x17f4   :  { %19543 = vmatmul.mubr.f32.vlgmr.msra.gmra.mrb[20].mxu0 %v26274_v8 }
0x17f5   :  { %19545 = vmatprep.mubr.f32.mxu0 %v26275_v49  ;;  %v26286_v49 = vld [vmem:[#allocation55_spill] sm:$0xff] }
0x17f8   :  { %19546 = vmatmul.mubr.f32.gmra.mrb[22].mxu0 %v26276_v38 }
0x1897   :  { %v19397_v27 = vpop.f32.mrb[18].mxu0 }
0x1898   :  { %v22414_v13 = vadd.f32 %v19397_v27, %v10627_v45  ;;  %v11152_v12 = vpop.f32.mrb[19].mxu0 }
0x1899   :  { %v22415_v3 = vadd.f32 %v11152_v12, %v10627_v45 }
0x189a   :  { %v11163_v22 = vadd.f32 %v22414_v13, %v24796_v44 }
0x189b   :  { %v11162_v51 = vadd.f32 %v22415_v3, %v24792_v1 }
0x189c   :  { %v11167_v23 = vsel %vm93_vm0, %v11163_v22, 0.0 }
0x189d   :  { %11168 = vadd.xlane.f32.xlu0 %v11167_v23  ;;  %v11164_v52 = vsel %vm93_vm0, %v11162_v51, 0.0 }
0x189e   :  { %11165 = vadd.xlane.f32.xlu1 %v11164_v52 }
0x18c7   :  { %v19544_v35 = vpop.f32.mrb[20].mxu0 }
0x18c8   :  { %v12352_v48 = vpop.f32.mrb[21].mxu0  ;;  %v25221_v46 = vadd.f32 %v19544_v35, %v11759_v33 }
0x18c9   :  { %v25218_v37 = vadd.f32 %v12352_v48, %v11759_v33 }
0x18ca   :  { %v12463_v8 = vmul.f32 %v25221_v46, %v26285_v32 }
0x18cb   :  { %v19547_v19 = vpop.f32.mrb[22].mxu0  ;;  %v12466_v38 = vmul.f32 %v25218_v37, %v26286_v49 }
0x18cc   :  { %v12364_v31 = vpop.f32.mrb[23].mxu0  ;;  %v25227_v25 = vadd.f32 %v19547_v19, %v11759_v33 }
0x18cd   :  { %v25224_v42 = vadd.f32 %v12364_v31, %v11759_v33 }
0x18cf   :  { %v12468_v47 = vmul.f32 %v25224_v42, %v26287_v54 }
0x192a   :  { %v11169_v58 = vpop.xlane.xlu0 %11168 }
0x192b   :  { %v11171_v4 = vmul.f32 0.03125, %v11169_v58  ;;  %v11166_v50 = vpop.xlane.xlu1 %11165 }
0x192c   :  { %v11170_v11 = vmul.f32 0.03125, %v11166_v50  ;;  %v16271_v50 = vld [vmem:[%s25954_s3 + $0x28] sm:$0xff] }
0x192d   :  { %v25190_v5 = vsub.f32 %v11163_v22, %v11171_v4 }
0x192e   :  { %v25192_v56 = vsub.f32 %v11162_v51, %v11170_v11  ;;  %v26288_v11 = vsub.s32 7, %v26236_v59 }
0x192f   :  { %v11175_v1 = vmul.f32 %v25190_v5, %v25190_v5 }
0x1930   :  { %v11174_v44 = vmul.f32 %v25192_v56, %v25192_v56 }
0x1931   :  { %v11179_v39 = vsel %vm93_vm0, %v11175_v1, 0.0  ;;  %v11193_v1 = vrot.slane %v25182_v9, %v26288_v11 }
0x1932   :  { %11180 = vadd.xlane.f32.xlu1 %v11179_v39  ;;  %v11176_v7 = vsel %vm93_vm0, %v11174_v44, 0.0 }
0x1933   :  { %11177 = vadd.xlane.f32.xlu0 %v11176_v7 }
0x1943   :  { %11212 = vrot.lane.b32.xlu1 %v22791_v10, %s22833_s9 }
0x1947   :  { %11214 = vrot.lane.b32.xlu1 %v22792_v15, %s22833_s9 }
0x1949   :  { %11210 = vrot.lane.b32.xlu0 %v22793_v2, %s22833_s9  ;;  %v11199_v2 = vrot.slane %v16271_v50, %v26244_v53 }
0x194d   :  { %11216 = vrot.lane.b32.xlu0 %v22794_v30, %s22833_s9 }
0x1970   :  { %12374 = vxpose.xlu1.b32.start [1/4] (short) (narrow) %v25218_v37, 32 }
0x1974   :  { %12375 = vxpose.xlu1.b32.cont [2/4] (short) (narrow) %v25221_v46, 32 }
0x1978   :  { %12376 = vxpose.xlu1.b32.cont [3/4] (short) (narrow) %v25224_v42, 32 }
0x197c   :  { %12377 = vxpose.xlu1.b32.end [4/4] (short) (narrow) %v25227_v25, 32 }
0x199a   :  { %13044 = vrot.lane.b32.xlu1 %v12463_v8, %s22831_s7 }
0x199e   :  { %13050 = vrot.lane.b32.xlu1 %v12466_v38, %s22831_s7 }
0x19a2   :  { %13054 = vrot.lane.b32.xlu1 %v12468_v47, %s22831_s7 }
0x19bf   :  { %v11181_v21 = vpop.xlane.xlu1 %11180 }
0x19c0   :  { %v11183_v41 = vmul.f32 0.03125, %v11181_v21  ;;  %v11178_v6 = vpop.xlane.xlu0 %11177 }
0x19c1   :  { %v11182_v62 = vmul.f32 0.03125, %v11178_v6 }
0x19c2   :  { %v11185_v34 = vadd.f32 1e-05, %v11183_v41 }
0x19c3   :  { %v11184_v57 = vadd.f32 1e-05, %v11182_v62  ;;  %v11213_v29 = vpop.permute.xlu1 %11212 }
0x19c4   :  { %22749 = vrsqrt.f32 %v11185_v34  ;;  %v11211_v43 = vpop.permute.xlu0 %11210  ;;  %v11232_v45 = vand.u32 4294901760, %v11213_v29 }
0x19c5   :  { %22751 = vrsqrt.f32 %v11184_v57  ;;  %v11229_v27 = vand.u32 4294901760, %v11211_v43 }
0x19c6   :  { %v25239_v13 = vsub.f32 %v11213_v29, %v11232_v45 }
0x19c7   :  { %v25241_v12 = vsub.f32 %v11211_v43, %v11229_v27  ;;  %v25243_v3 = vpack.c.bf16 %v11232_v45, %v11229_v27  ;;  %v11215_v22 = vpop.permute.xlu1 %11214 }
0x19c8   :  { %v11327_v51 = vand.u32 4294901760, %v25239_v13  ;;  %v11217_v23 = vpop.permute.xlu0 %11216  ;;  %v11235_v48 = vand.u32 4294901760, %v11215_v22 }
0x19c9   :  { %v11320_v52 = vand.u32 4294901760, %v25241_v12  ;;  %v11238_v35 = vand.u32 4294901760, %v11217_v23  ;;  %21673 = vmatprep.subr.bf16.mxu1 %v25243_v3 }
0x19ca   :  { %v11328_v19 = vsub.f32 %v25239_v13, %v11327_v51  ;;  %21675 = vmatpush3.bf16.msra.mxu1 %v25243_v3  ;;  %v11333_v32 = vsub.f32 %v11215_v22, %v11235_v48 }
0x19cb   :  { %v11321_v31 = vsub.f32 %v25241_v12, %v11320_v52  ;;  %v25255_v58 = vpack.c.bf16 %v11238_v35, %v11235_v48  ;;  %v11340_v33 = vsub.f32 %v11217_v23, %v11238_v35 }
0x19cc   :  { %v11329_v4 = vand.u32 4294901760, %v11328_v19  ;;  %v11334_v47 = vand.u32 4294901760, %v11333_v32 }
0x19cd   :  { %21677 = vmatprep.subr.bf16.mxu1 %v25255_v58  ;;  %v11322_v44 = vand.u32 4294901760, %v11321_v31  ;;  %v11341_v54 = vand.u32 4294901760, %v11340_v33  ;;  %v21688_v31 = vpack.c.bf16 %v25239_v13, %v25241_v12 }
0x19ce   :  { %v22750_v39 = vpop.eup %22749  ;;  %21679 = vmatpush3.bf16.msra.mxu1 %v25255_v58  ;;  %v11335_v62 = vsub.f32 %v11333_v32, %v11334_v47 }
0x19cf   :  { %v22752_v7 = vpop.eup %22751  ;;  %v11189_v10 = vmul.f32 %v22750_v39, %v25190_v5  ;;  %v21680_v15 = vpack.c.bf16 %v11329_v4, %v11322_v44  ;;  %v21692_v4 = vpack.c.bf16 %v11340_v33, %v11333_v32  ;;  %v21708_v44 = vpack.c.bf16 %v11341_v54, %v11334_v47  ;;  %v26293_v39 = vld [vmem:[#allocation54_spill] sm:$0xff] }
0x19d0   :  { %v11188_v30 = vmul.f32 %v22752_v7, %v25192_v56  ;;  %v11342_v56 = vsub.f32 %v11340_v33, %v11341_v54  ;;  %v11336_v27 = vand.u32 4294901760, %v11335_v62  ;;  %v12465_v7 = vmul.f32 %v25227_v25, %v26293_v39  ;;  %v22797_v39 = vld [vmem:[%s25955_s4 + $0x10] sm:$0xff] }
0x19d1   :  { %v11195_v8 = vmul.f32 %v11193_v1, %v11189_v10  ;;  %21681 = vmatprep.subr.bf16.mxu1 %v21680_v15  ;;  %v26294_v10 = vld [vmem:[#allocation56_spill] sm:$0xff] }
0x19d2   :  { %v11194_v49 = vmul.f32 %v11193_v1, %v11188_v30  ;;  %v11343_v22 = vand.u32 4294901760, %v11342_v56  ;;  %v21704_v1 = vpack.c.bf16 %v11327_v51, %v11320_v52  ;;  %v26292_v52 = vld [vmem:[#allocation53_spill] sm:$0xff] }
0x19d3   :  { %v25268_v38 = vadd.f32 %v11199_v2, %v11195_v8 }
0x19d4   :  { %v25270_v21 = vadd.f32 %v11199_v2, %v11194_v49  ;;  %v21684_v19 = vpack.c.bf16 %v11343_v22, %v11336_v27 }
0x19d5   :  { %26289 = vst [vmem:[#allocation50_spill] sm:$0xff] %v25268_v38  ;;  %v11226_v41 = vsel %vm93_vm0, %v25268_v38, 0 }
0x19d6   :  { %26290 = vst [vmem:[#allocation49_spill] sm:$0xff] %v25270_v21  ;;  %v11223_v5 = vsel %vm93_vm0, %v25270_v21, 0  ;;  %v11307_v53 = vand.u32 4294901760, %v11226_v41 }
0x19d7   :  { %v11297_v6 = vand.u32 4294901760, %v11223_v5 }
0x19d8   :  { %v11308_v34 = vsub.f32 %v11226_v41, %v11307_v53  ;;  %v22795_v41 = vld [vmem:[%s25955_s4] sm:$0xff] }
0x19d9   :  { %v11298_v57 = vsub.f32 %v11223_v5, %v11297_v6 }
0x19da   :  { %v11309_v29 = vand.u32 4294901760, %v11308_v34 }
0x19db   :  { %v11299_v43 = vand.u32 4294901760, %v11298_v57 }
0x19dc   :  { %v11310_v45 = vsub.f32 %v11308_v34, %v11309_v29 }
0x19dd   :  { %v11300_v23 = vsub.f32 %v11298_v57, %v11299_v43 }
0x19de   :  { %v11311_v48 = vand.u32 4294901760, %v11310_v45 }
0x19df   :  { %v11301_v35 = vand.u32 4294901760, %v11300_v23 }
0x19e1   :  { %19406 = vmatprep.mubr.f32.mxu1 %v11301_v35 }
0x19e2   :  { %19407 = vmatmul.mubr.f32.vlgmr.msra.gmra.mrb[22].mxu1 %v11311_v48 }
0x19e3   :  { %21683 = vmatpush3.bf16.msra.mxu1 %v21680_v15  ;;  %19417 = vmatprep.mubr.f32.mxu1 %v11297_v6  ;;  %v12467_v15 = vmul.f32 %v25221_v46, %v26294_v10 }
0x19e4   :  { %21685 = vmatprep.subr.bf16.mxu1 %v21684_v19 }
0x19e7   :  { %21687 = vmatpush3.bf16.msra.mxu1 %v21684_v19 }
0x19e8   :  { %21689 = vmatprep.subr.bf16.mxu1 %v21688_v31 }
0x19ea   :  { %19418 = vmatmul.mubr.f32.vlgmr.msra.gmra.mrb[22].mxu1 %v11307_v53 }
0x19eb   :  { %21691 = vmatpush3.bf16.msra.mxu1 %v21688_v31  ;;  %19428 = vmatprep.mubr.f32.mxu1 %v11298_v57  ;;  %v22796_v57 = vld [vmem:[%s25955_s4 + $0x8] sm:$0xff] }
0x19ec   :  { %21693 = vmatprep.subr.bf16.mxu1 %v21692_v4 }
0x19ef   :  { %21695 = vmatpush3.bf16.msra.mxu1 %v21692_v4 }
0x19f0   :  { %21697 = vmatprep.subr.bf16.mxu1 %v25243_v3  ;;  %v12390_v50 = vpop.trf.xlu1 }
0x19f1   :  { %12410 = vrot.lane.b32.xlu0 %v12390_v50, %s22833_s9 }
0x19f2   :  { %19429 = vmatmul.mubr.f32.vlgmr.msra.gmra.mrb[22].mxu1 %v11308_v34 }
0x19f3   :  { %21699 = vmatpush3.bf16.msra.mxu1 %v25243_v3  ;;  %19439 = vmatprep.mubr.f32.mxu1 %v11299_v43 }
0x19f4   :  { %21701 = vmatprep.subr.bf16.mxu1 %v25255_v58  ;;  %v12391_v11 = vpop.trf.xlu1 }
0x19f5   :  { %12412 = vrot.lane.b32.xlu0 %v12391_v11, %s22833_s9 }
0x19f7   :  { %21703 = vmatpush3.bf16.msra.mxu1 %v25255_v58 }
0x19f8   :  { %21705 = vmatprep.subr.bf16.mxu1 %v21704_v1  ;;  %v12392_v13 = vpop.trf.xlu1 }
0x19f9   :  { %12422 = vrot.lane.b32.xlu0 %v12390_v50, %s22835_s13 }
0x19fa   :  { %19440 = vmatmul.mubr.f32.vlgmr.msra.gmra.mrb[22].mxu1 %v11309_v29 }
0x19fb   :  { %21707 = vmatpush3.bf16.msra.mxu1 %v21704_v1  ;;  %19450 = vmatprep.mubr.f32.mxu1 %v11297_v6 }
0x19fc   :  { %21709 = vmatprep.subr.bf16.mxu1 %v21708_v44  ;;  %v12393_v12 = vpop.trf.xlu1 }
0x19fd   :  { %12424 = vrot.lane.b32.xlu0 %v12391_v11, %s22835_s13 }
0x19ff   :  { %21711 = vmatpush3.bf16.msra.mxu1 %v21708_v44 }
0x1a00   :  { %21713 = vmatprep.subr.bf16.mxu1 %v25243_v3 }
0x1a01   :  { %12434 = vrot.lane.b32.xlu0 %v12390_v50, %s22831_s7 }
0x1a02   :  { %19451 = vmatmul.mubr.f32.vlgmr.msra.gmra.mrb[22].mxu1 %v11307_v53 }
0x1a03   :  { %21715 = vmatpush3.bf16.msra.mxu1 %v25243_v3  ;;  %19461 = vmatprep.mubr.f32.mxu1 %v11297_v6  ;;  %v26291_v3 = vld [vmem:[#allocation51_spill] sm:$0xff] }
0x1a04   :  { %21717 = vmatprep.subr.bf16.mxu1 %v25255_v58  ;;  %v12462_v51 = vmul.f32 %v25218_v37, %v26291_v3 }
0x1a05   :  { %12436 = vrot.lane.b32.xlu0 %v12391_v11, %s22831_s7 }
0x1a07   :  { %21719 = vmatpush3.bf16.msra.mxu1 %v25255_v58  ;;  %v12464_v58 = vmul.f32 %v25224_v42, %v26292_v52 }
0x1a09   :  { %12414 = vrot.lane.b32.xlu0 %v12392_v13, %s22833_s9 }
0x1a0a   :  { %19462 = vmatmul.mubr.f32.vlgmr.msra.gmra.mrb[22].mxu1 %v11307_v53 }
0x1a0c   :  { %v13045_v1 = vpop.permute.xlu1 %13044 }
0x1a0d   :  { %12416 = vrot.lane.b32.xlu0 %v12393_v12, %s22833_s9  ;;  %v13094_v52 = vand.u32 4294901760, %v13045_v1 }
0x1a11   :  { %12426 = vrot.lane.b32.xlu0 %v12392_v13, %s22835_s13 }
0x1a15   :  { %12428 = vrot.lane.b32.xlu0 %v12393_v12, %s22835_s13 }
0x1a19   :  { %12438 = vrot.lane.b32.xlu0 %v12392_v13, %s22831_s7 }
0x1a1d   :  { %12440 = vrot.lane.b32.xlu0 %v12393_v12, %s22831_s7 }
0x1a21   :  { %13042 = vrot.lane.b32.xlu0 %v12462_v51, %s22831_s7 }
0x1a25   :  { %13046 = vrot.lane.b32.xlu0 %v12464_v58, %s22831_s7 }
0x1a29   :  { %13048 = vrot.lane.b32.xlu0 %v12465_v7, %s22831_s7 }
0x1a2d   :  { %13052 = vrot.lane.b32.xlu0 %v12467_v15, %s22831_s7 }
0x1a63   :  { %v12411_v2 = vpop.permute.xlu0 %12410 }
0x1a64   :  { %v12446_v8 = vsel %vm93_vm0, %v12390_v50, %v12411_v2 }
0x1a67   :  { %v12413_v30 = vpop.permute.xlu0 %12412 }
0x1a68   :  { %v12447_v53 = vsel %vm93_vm0, %v12391_v11, %v12413_v30 }
0x1a6b   :  { %v12423_v33 = vpop.permute.xlu0 %12422 }
0x1a6c   :  { %v12450_v49 = vsel %vm1302_vm3, %v12446_v8, %v12423_v33 }
0x1a6f   :  { %v12425_v32 = vpop.permute.xlu0 %12424 }
0x1a70   :  { %v12451_v6 = vsel %vm1302_vm3, %v12447_v53, %v12425_v32  ;;  %v25342_v32 = vsub.f32 %v13045_v1, %v13094_v52 }
0x1a73   :  { %v12435_v54 = vpop.permute.xlu0 %12434 }
0x1a74   :  { %v12454_v47 = vsel %vm4362_vm4, %v12450_v49, %v12435_v54  ;;  %v22798_v49 = vld [vmem:[%s25955_s4 + $0x18] sm:$0xff] }
0x1a75   :  { %v12458_v5 = vmul.f32 %v22795_v41, %v12454_v47  ;;  %v13051_v41 = vpop.permute.xlu1 %13050 }
0x1a77   :  { %v12485_v56 = vand.u32 4294901760, %v12458_v5  ;;  %v12437_v62 = vpop.permute.xlu0 %12436 }
0x1a78   :  { %v12455_v34 = vsel %vm4362_vm4, %v12451_v6, %v12437_v62 }
0x1a79   :  { %v12459_v29 = vmul.f32 %v22796_v57, %v12455_v34  ;;  %v12575_v43 = vsub.f32 %v12458_v5, %v12485_v56 }
0x1a7b   :  { %v12488_v45 = vand.u32 4294901760, %v12459_v29  ;;  %v12415_v27 = vpop.permute.xlu0 %12414  ;;  %v12576_v48 = vand.u32 4294901760, %v12575_v43 }
0x1a7c   :  { %v12448_v44 = vsel %vm93_vm0, %v12392_v13, %v12415_v27 }
0x1a7d   :  { %v25326_v22 = vpack.c.bf16 %v12488_v45, %v12485_v56  ;;  %v12582_v23 = vsub.f32 %v12459_v29, %v12488_v45  ;;  %v12577_v47 = vsub.f32 %v12575_v43, %v12576_v48  ;;  %v26111_v56 = vand.u32 4294901760, %v25342_v32 }
0x1a7e   :  { %v13103_v45 = vand.u32 4294901760, %v13051_v41 }
0x1a7f   :  { %21769 = vmatprep.subr.bf16.mxu1 %v25326_v22  ;;  %v12417_v35 = vpop.permute.xlu0 %12416  ;;  %v12583_v19 = vand.u32 4294901760, %v12582_v23  ;;  %v25329_v31 = vpack.c.bf16 %v12582_v23, %v12575_v43  ;;  %v12578_v29 = vand.u32 4294901760, %v12577_v47 }
0x1a80   :  { %21771 = vmatpush3.bf16.msra.mxu1 %v25326_v22  ;;  %v12449_v10 = vsel %vm93_vm0, %v12393_v12, %v12417_v35 }
0x1a81   :  { %v25332_v4 = vpack.c.bf16 %v12583_v19, %v12576_v48  ;;  %v12584_v33 = vsub.f32 %v12582_v23, %v12583_v19 }
0x1a83   :  { %v12427_v50 = vpop.permute.xlu0 %12426  ;;  %v12585_v12 = vand.u32 4294901760, %v12584_v33 }
0x1a84   :  { %v12452_v3 = vsel %vm1302_vm3, %v12448_v44, %v12427_v50 }
0x1a85   :  { %v25356_v35 = vpack.c.bf16 %v12585_v12, %v12578_v29 }
0x1a87   :  { %v12429_v11 = vpop.permute.xlu0 %12428 }
0x1a88   :  { %v12453_v15 = vsel %vm1302_vm3, %v12449_v10, %v12429_v11  ;;  %v13202_v11 = vsub.f32 %v25342_v32, %v26111_v56 }
0x1a8b   :  { %v12439_v51 = vpop.permute.xlu0 %12438 }
0x1a8c   :  { %v12456_v58 = vsel %vm4362_vm4, %v12452_v3, %v12439_v51 }
0x1a8d   :  { %v12460_v7 = vmul.f32 %v22797_v39, %v12456_v58 }
0x1a8f   :  { %v12491_v2 = vand.u32 4294901760, %v12460_v7  ;;  %v12441_v30 = vpop.permute.xlu0 %12440 }
0x1a90   :  { %v12457_v13 = vsel %vm4362_vm4, %v12453_v15, %v12441_v30 }
0x1a91   :  { %v12589_v8 = vsub.f32 %v12460_v7, %v12491_v2  ;;  %v12461_v54 = vmul.f32 %v22798_v49, %v12457_v13  ;;  %v25377_v7 = vsub.f32 %v13051_v41, %v13103_v45 }
0x1a93   :  { %v12494_v5 = vand.u32 4294901760, %v12461_v54  ;;  %v13043_v53 = vpop.permute.xlu0 %13042  ;;  %v12590_v6 = vand.u32 4294901760, %v12589_v8 }
0x1a94   :  { %v13091_v62 = vand.u32 4294901760, %v13043_v53 }
0x1a95   :  { %v25349_v34 = vpack.c.bf16 %v12494_v5, %v12491_v2  ;;  %v12596_v57 = vsub.f32 %v12461_v54, %v12494_v5  ;;  %v12591_v48 = vsub.f32 %v12589_v8, %v12590_v6 }
0x1a96   :  { %v25351_v27 = vpack.c.bf16 %v13094_v52, %v13091_v62  ;;  %v25353_v23 = vsub.f32 %v13043_v53, %v13091_v62  ;;  %v26110_v53 = vand.u32 4294901760, %v25377_v7 }
0x1a97   :  { %21773 = vmatprep.subr.bf16.mxu1 %v25349_v34  ;;  %v13047_v43 = vpop.permute.xlu0 %13046  ;;  %v12597_v19 = vand.u32 4294901760, %v12596_v57  ;;  %v25358_v50 = vpack.c.bf16 %v12596_v57, %v12589_v8  ;;  %v12592_v15 = vand.u32 4294901760, %v12591_v48  ;;  %v13203_v8 = vand.u32 4294901760, %v13202_v11 }
0x1a98   :  { %v26112_v1 = vand.u32 4294901760, %v25353_v23  ;;  %v13097_v44 = vand.u32 4294901760, %v13047_v43  ;;  %21775 = vmatpush3.bf16.msra.mxu1 %v25349_v34  ;;  %21817 = vmatprep.subr.bf16.mxu0 %v25351_v27  ;;  %v25368_v3 = vpack.c.bf16 %v25342_v32, %v25353_v23  ;;  %v13223_v11 = vsub.f32 %v25377_v7, %v26110_v53 }
0x1a99   :  { %21777 = vmatprep.subr.bf16.mxu1 %v25356_v35  ;;  %21819 = vmatpush3.bf16.msra.mxu0 %v25351_v27  ;;  %v12598_v51 = vsub.f32 %v12596_v57, %v12597_v19  ;;  %v25372_v52 = vpack.c.bf16 %v12597_v19, %v12590_v6 }
0x1a9a   :  { %v13195_v58 = vsub.f32 %v25353_v23, %v26112_v1  ;;  %v13207_v39 = vsub.f32 %v13047_v43, %v13097_v44 }
0x1a9b   :  { %v13049_v10 = vpop.permute.xlu0 %13048  ;;  %v12599_v2 = vand.u32 4294901760, %v12598_v51 }
0x1a9c   :  { %v13208_v30 = vand.u32 4294901760, %v13207_v39  ;;  %v13100_v33 = vand.u32 4294901760, %v13049_v10  ;;  %v13196_v13 = vand.u32 4294901760, %v13195_v58 }
0x1a9d   :  { %v21780_v49 = vpack.c.bf16 %v12599_v2, %v12592_v15  ;;  %v13224_v15 = vand.u32 4294901760, %v13223_v11 }
0x1a9e   :  { %v25379_v54 = vpack.c.bf16 %v13100_v33, %v13097_v44  ;;  %v13214_v47 = vsub.f32 %v13049_v10, %v13100_v33  ;;  %v25381_v5 = vpack.c.bf16 %v13203_v8, %v13196_v13  ;;  %v13209_v6 = vsub.f32 %v13207_v39, %v13208_v30 }
0x1a9f   :  { %v13053_v12 = vpop.permute.xlu0 %13052  ;;  %v11205_v33 = vrot.slane %v25182_v9, %v26241_v20 }
0x1aa0   :  { %v13215_v62 = vand.u32 4294901760, %v13214_v47  ;;  %v13106_v41 = vand.u32 4294901760, %v13053_v12  ;;  %21821 = vmatprep.subr.bf16.mxu0 %v25379_v54  ;;  %v25385_v57 = vpack.c.bf16 %v13214_v47, %v13207_v39  ;;  %v13210_v51 = vand.u32 4294901760, %v13209_v6 }
0x1aa1   :  { %21823 = vmatpush3.bf16.msra.mxu0 %v25379_v54 }
0x1aa2   :  { %v13216_v29 = vsub.f32 %v13214_v47, %v13215_v62  ;;  %v25388_v43 = vpack.c.bf16 %v13106_v41, %v13103_v45  ;;  %v25390_v48 = vsub.f32 %v13053_v12, %v13106_v41  ;;  %v25392_v19 = vpack.c.bf16 %v13215_v62, %v13208_v30 }
0x1aa4   :  { %v26109_v44 = vand.u32 4294901760, %v25390_v48  ;;  %21825 = vmatprep.subr.bf16.mxu0 %v25388_v43  ;;  %v13217_v58 = vand.u32 4294901760, %v13216_v29  ;;  %v25401_v39 = vpack.c.bf16 %v25390_v48, %v25377_v7 }
0x1aa5   :  { %21827 = vmatpush3.bf16.msra.mxu0 %v25388_v43 }
0x1aa6   :  { %v13230_v45 = vsub.f32 %v25390_v48, %v26109_v44  ;;  %v25407_v10 = vpack.c.bf16 %v13217_v58, %v13210_v51 }
0x1aa8   :  { %v13231_v2 = vand.u32 4294901760, %v13230_v45 }
0x1aaa   :  { %v25409_v30 = vpack.c.bf16 %v13231_v2, %v13224_v15 }
0x1add   :  { %v19463_v13 = vpop.f32.mrb[22].mxu1 }
0x1ade   :  { %v22416_v8 = vadd.f32 %v19463_v13, %v11205_v33  ;;  %v11746_v47 = vpop.f32.mrb[23].mxu1  ;;  %v26297_v13 = vld [vmem:[#allocation58_spill] sm:$0xff] }
0x1adf   :  { %v22417_v12 = vadd.f32 %v11746_v47, %v11205_v33  ;;  %v26298_v47 = vld [vmem:[#allocation62_spill] sm:$0xff] }
0x1ae0   :  { %v12482_v6 = vsel %vm93_vm0, %v22416_v8, 0  ;;  %v12469_v8 = vmul.f32 %v25227_v25, %v26297_v13 }
0x1ae1   :  { %v12563_v62 = vand.u32 4294901760, %v12482_v6  ;;  %v12479_v41 = vsel %vm93_vm0, %v22417_v12, 0  ;;  %v12474_v12 = vmul.f32 %v25218_v37, %v26298_v47 }
0x1ae2   :  { %v12553_v29 = vand.u32 4294901760, %v12479_v41 }
0x1ae3   :  { %v12564_v44 = vsub.f32 %v12482_v6, %v12563_v62  ;;  %v26299_v6 = vld [vmem:[#allocation61_spill] sm:$0xff] }
0x1ae4   :  { %v12554_v51 = vsub.f32 %v12479_v41, %v12553_v29  ;;  %v26300_v41 = vld [vmem:[#allocation66_spill] sm:$0xff] }
0x1ae5   :  { %v12565_v58 = vand.u32 4294901760, %v12564_v44 }
0x1ae6   :  { %v12555_v11 = vand.u32 4294901760, %v12554_v51 }
0x1ae7   :  { %v12566_v45 = vsub.f32 %v12564_v44, %v12565_v58 }
0x1ae8   :  { %v12556_v15 = vsub.f32 %v12554_v51, %v12555_v11 }
0x1ae9   :  { %v12567_v53 = vand.u32 4294901760, %v12566_v45  ;;  %v26303_v45 = vld [vmem:[#allocation67_spill] sm:$0xff] }
0x1aea   :  { %v12557_v2 = vand.u32 4294901760, %v12556_v15  ;;  %v12477_v15 = vmul.f32 %v25227_v25, %v26303_v45 }
0x1aec   :  { %19556 = vmatprep.mubr.f32.mxu1 %v12557_v2  ;;  %v25482_v2 = vpop.permute.xlu1 %13054 }
0x1aed   :  { %19557 = vmatmul.mubr.f32.vlgmr.msra.gmra.mrb[24].mxu1 %v12567_v53 }
0x1aee   :  { %21779 = vmatpush3.bf16.msra.mxu1 %v25356_v35  ;;  %19567 = vmatprep.mubr.f32.mxu1 %v12553_v29 }
0x1aef   :  { %21781 = vmatprep.subr.bf16.mxu1 %v21780_v49 }
0x1af2   :  { %21783 = vmatpush3.bf16.msra.mxu1 %v21780_v49  ;;  %v26295_v49 = vld [vmem:[#allocation60_spill] sm:$0xff] }
0x1af3   :  { %21785 = vmatprep.subr.bf16.mxu1 %v25329_v31  ;;  %v12470_v53 = vmul.f32 %v25218_v37, %v26295_v49 }
0x1af5   :  { %19568 = vmatmul.mubr.f32.vlgmr.msra.gmra.mrb[24].mxu1 %v12563_v62 }
0x1af6   :  { %21787 = vmatpush3.bf16.msra.mxu1 %v25329_v31  ;;  %19578 = vmatprep.mubr.f32.mxu1 %v12554_v51  ;;  %v26301_v51 = vld [vmem:[#allocation63_spill] sm:$0xff] }
0x1af7   :  { %21789 = vmatprep.subr.bf16.mxu1 %v25358_v50 }
0x1afa   :  { %21791 = vmatpush3.bf16.msra.mxu1 %v25358_v50  ;;  %v22800_v50 = vld [vmem:[%s25954_s3 + $0x10] sm:$0xff] }
0x1afb   :  { %21793 = vmatprep.subr.bf16.mxu1 %v25326_v22 }
0x1afd   :  { %19579 = vmatmul.mubr.f32.vlgmr.msra.gmra.mrb[24].mxu1 %v12564_v44  ;;  %v26296_v44 = vld [vmem:[#allocation59_spill] sm:$0xff] }
0x1afe   :  { %21795 = vmatpush3.bf16.msra.mxu1 %v25326_v22  ;;  %19589 = vmatprep.mubr.f32.mxu1 %v12555_v11  ;;  %v12472_v33 = vmul.f32 %v25224_v42, %v26296_v44  ;;  %v26302_v11 = vld [vmem:[#allocation64_spill] sm:$0xff] }
0x1aff   :  { %21797 = vmatprep.subr.bf16.mxu1 %v25349_v34  ;;  %v12475_v37 = vmul.f32 %v25221_v46, %v26302_v11 }
0x1b02   :  { %21799 = vmatpush3.bf16.msra.mxu1 %v25349_v34 }
0x1b03   :  { %21801 = vmatprep.subr.bf16.mxu1 %v25332_v4 }
0x1b05   :  { %19590 = vmatmul.mubr.f32.vlgmr.msra.gmra.mrb[24].mxu1 %v12565_v58  ;;  %v12473_v58 = vmul.f32 %v25227_v25, %v26301_v51 }
0x1b06   :  { %21803 = vmatpush3.bf16.msra.mxu1 %v25332_v4  ;;  %19600 = vmatprep.mubr.f32.mxu1 %v12553_v29 }
0x1b07   :  { %21805 = vmatprep.subr.bf16.mxu1 %v25372_v52 }
0x1b0a   :  { %21807 = vmatpush3.bf16.msra.mxu1 %v25372_v52 }
0x1b0b   :  { %21809 = vmatprep.subr.bf16.mxu1 %v25326_v22 }
0x1b0d   :  { %19601 = vmatmul.mubr.f32.vlgmr.msra.gmra.mrb[24].mxu1 %v12563_v62 }
0x1b0e   :  { %21811 = vmatpush3.bf16.msra.mxu1 %v25326_v22  ;;  %19611 = vmatprep.mubr.f32.mxu1 %v12553_v29  ;;  %v12476_v29 = vmul.f32 %v25224_v42, %v26300_v41 }
0x1b0f   :  { %21813 = vmatprep.subr.bf16.mxu1 %v25349_v34 }
0x1b12   :  { %21815 = vmatpush3.bf16.msra.mxu1 %v25349_v34  ;;  %v22799_v34 = vld [vmem:[%s25954_s3 + $0x18] sm:$0xff] }
0x1b13   :  { %22009 = vmatprep.subr.bf16.mxu1 %v24105_v17 }
0x1b15   :  { %19612 = vmatmul.mubr.f32.vlgmr.msra.gmra.mrb[24].mxu1 %v12563_v62  ;;  %v12471_v62 = vmul.f32 %v25221_v46, %v26299_v6  ;;  %v13109_v46 = vand.u32 4294901760, %v25482_v2 }
0x1b16   :  { %22011 = vmatpush3.bf16.msra.mxu1 %v24105_v17 }
0x1b17   :  { %22013 = vmatprep.subr.bf16.mxu1 %v24148_v14  ;;  %v25547_v60 = vsub.f32 %v25482_v2, %v13109_v46 }
0x1b1a   :  { %22015 = vmatpush3.bf16.msra.mxu1 %v24148_v14 }
0x1b1b   :  { %22017 = vmatprep.subr.bf16.mxu1 %v26214_v63 }
0x1b1e   :  { %22019 = vmatpush3.bf16.msra.mxu1 %v26214_v63 }
0x1b1f   :  { %22021 = vmatprep.subr.bf16.mxu1 %v24166_v16 }
0x1b22   :  { %22023 = vmatpush3.bf16.msra.mxu1 %v24166_v16 }
0x1b23   :  { %22025 = vmatprep.subr.bf16.mxu1 %v24185_v0 }
0x1b26   :  { %22027 = vmatpush3.bf16.msra.mxu1 %v24185_v0 }
0x1b27   :  { %22029 = vmatprep.subr.bf16.mxu1 %v24203_v61 }
0x1b2a   :  { %22031 = vmatpush3.bf16.msra.mxu1 %v24203_v61 }
0x1b2b   :  { %22033 = vmatprep.subr.bf16.mxu1 %v24229_v24 }
0x1b2e   :  { %22035 = vmatpush3.bf16.msra.mxu1 %v24229_v24 }
0x1b2f   :  { %22037 = vmatprep.subr.bf16.mxu1 %v24255_v36 }
0x1b32   :  { %22039 = vmatpush3.bf16.msra.mxu1 %v24255_v36 }
0x1b33   :  { %22041 = vmatprep.subr.bf16.mxu1 %v24276_v18 }
0x1be8   :  { %v19613_v9 = vpop.f32.mrb[24].mxu1 }
0x1be9   :  { %v13013_v22 = vmul.f32 0.35355338, %v19613_v9  ;;  %v13002_v31 = vpop.f32.mrb[25].mxu1 }
0x1bea   :  { %v13012_v4 = vmul.f32 0.35355338, %v13002_v31 }
0x1beb   :  { %v13015_v35 = vadd.f32 %v22799_v34, %v13013_v22 }
0x1bec   :  { %v13014_v52 = vadd.f32 %v22800_v50, %v13012_v4 }
0x1bed   :  { %13018 = vmax.xlane.f32.xlu1 %v13015_v35 }
0x1bee   :  { %13016 = vmax.xlane.f32.xlu0 %v13014_v52 }
0x1bfe   :  { %13058 = vrot.lane.b32.xlu1 %v12470_v53, %s22831_s7 }
0x1c02   :  { %13062 = vrot.lane.b32.xlu1 %v12472_v33, %s22831_s7 }
0x1c04   :  { %13056 = vrot.lane.b32.xlu0 %v12469_v8, %s22831_s7 }
0x1c06   :  { %13066 = vrot.lane.b32.xlu1 %v12474_v12, %s22831_s7 }
0x1c08   :  { %13060 = vrot.lane.b32.xlu0 %v12471_v62, %s22831_s7 }
0x1c0a   :  { %13070 = vrot.lane.b32.xlu1 %v12476_v29, %s22831_s7 }
0x1c0c   :  { %13064 = vrot.lane.b32.xlu0 %v12473_v58, %s22831_s7 }
0x1c10   :  { %13068 = vrot.lane.b32.xlu0 %v12475_v37, %s22831_s7 }
0x1c14   :  { %13072 = vrot.lane.b32.xlu0 %v12477_v15, %s22831_s7 }
0x1c7a   :  { %v13019_v42 = vpop.xlane.xlu1 %13018 }
0x1c7b   :  { %v13021_v9 = vsub.f32 %v13015_v35, %v13019_v42  ;;  %v13017_v22 = vpop.xlane.xlu0 %13016 }
0x1c7c   :  { %v13020_v31 = vsub.f32 %v13014_v52, %v13017_v22 }
0x1c7d   :  { %v13024_v4 = vmul.f32 1.442695, %v13021_v9 }
0x1c7e   :  { %v13022_v34 = vmul.f32 1.442695, %v13020_v31  ;;  %v13059_v50 = vpop.permute.xlu1 %13058 }
0x1c7f   :  { %22753 = vpow2.f32 %v13024_v4  ;;  %v13057_v49 = vpop.permute.xlu0 %13056  ;;  %v13115_v13 = vand.u32 4294901760, %v13059_v50 }
0x1c80   :  { %22755 = vpow2.f32 %v13022_v34  ;;  %v13112_v53 = vand.u32 4294901760, %v13057_v49 }
0x1c81   :  { %v25507_v4 = vsub.f32 %v13059_v50, %v13115_v13 }
0x1c82   :  { %v25485_v44 = vpack.c.bf16 %v13112_v53, %v13109_v46  ;;  %v13063_v25 = vpop.permute.xlu1 %13062  ;;  %v25528_v1 = vsub.f32 %v13057_v49, %v13112_v53 }
0x1c83   :  { %v13061_v33 = vpop.permute.xlu0 %13060  ;;  %v13121_v12 = vand.u32 4294901760, %v13063_v25 }
0x1c84   :  { %v13118_v8 = vand.u32 4294901760, %v13061_v33  ;;  %21829 = vmatprep.subr.bf16.mxu0 %v25485_v44 }
0x1c85   :  { %21831 = vmatpush3.bf16.msra.mxu0 %v25485_v44 }
0x1c86   :  { %v25489_v35 = vpack.c.bf16 %v13118_v8, %v13115_v13  ;;  %v13067_v52 = vpop.permute.xlu1 %13066  ;;  %v25499_v37 = vsub.f32 %v13061_v33, %v13118_v8  ;;  %v25513_v33 = vsub.f32 %v13063_v25, %v13121_v12 }
0x1c87   :  { %v13065_v47 = vpop.permute.xlu0 %13064  ;;  %v13127_v45 = vand.u32 4294901760, %v13067_v52 }
0x1c88   :  { %v13124_v6 = vand.u32 4294901760, %v13065_v47  ;;  %21833 = vmatprep.subr.bf16.mxu0 %v25489_v35  ;;  %v13264_v53 = vand.u32 4294901760, %v25513_v33 }
0x1c89   :  { %v22754_v62 = vpop.eup %22753  ;;  %21835 = vmatpush3.bf16.msra.mxu0 %v25489_v35 }
0x1c8a   :  { %v22756_v41 = vpop.eup %22755  ;;  %v25493_v29 = vand.u32 4294901760, %v22754_v62  ;;  %v25495_v51 = vpack.c.bf16 %v13124_v6, %v13121_v12  ;;  %v13071_v58 = vpop.permute.xlu1 %13070  ;;  %v25504_v9 = vsub.f32 %v13065_v47, %v13124_v6  ;;  %v13257_v6 = vand.u32 4294901760, %v25499_v37 }
0x1c8b   :  { %v25497_v11 = vand.u32 4294901760, %v22756_v41  ;;  %v13069_v15 = vpop.permute.xlu0 %13068  ;;  %v13133_v22 = vand.u32 4294901760, %v13071_v58 }
0x1c8c   :  { %v25502_v42 = vsub.f32 %v22754_v62, %v25493_v29  ;;  %v13130_v31 = vand.u32 4294901760, %v13069_v15  ;;  %21837 = vmatprep.subr.bf16.mxu0 %v25495_v51  ;;  %v25523_v62 = vsub.f32 %v13067_v52, %v13127_v45  ;;  %v13271_v25 = vand.u32 4294901760, %v25504_v9 }
0x1c8d   :  { %21839 = vmatpush3.bf16.msra.mxu0 %v25495_v51  ;;  %v25511_v34 = vsub.f32 %v22756_v41, %v25497_v11  ;;  %v25531_v12 = vsub.f32 %v13071_v58, %v13133_v22 }
0x1c8e   :  { %v25515_v8 = vpack.c.bf16 %v13130_v31, %v13127_v45  ;;  %v25517_v56 = vsub.f32 %v13069_v15, %v13130_v31  ;;  %v25520_v47 = vand.u32 4294901760, %v25502_v42  ;;  %v13250_v15 = vand.u32 4294901760, %v25507_v4 }
0x1c8f   :  { %v13073_v50 = vpop.permute.xlu0 %13072  ;;  %v25526_v13 = vand.u32 4294901760, %v25511_v34  ;;  %v13278_v59 = vand.u32 4294901760, %v25523_v62  ;;  %v13292_v21 = vand.u32 4294901760, %v25531_v12  ;;  %v25555_v26 = vpack.c.bf16 %v13271_v25, %v13264_v53 }
0x1c90   :  { %v13136_v41 = vand.u32 4294901760, %v13073_v50  ;;  %21841 = vmatprep.subr.bf16.mxu0 %v25515_v8  ;;  %v13285_v31 = vand.u32 4294901760, %v25517_v56  ;;  %v13184_v49 = vsub.f32 %v25502_v42, %v25520_v47  ;;  %v25550_v40 = vpack.c.bf16 %v13257_v6, %v13250_v15 }
0x1c91   :  { %21843 = vmatpush3.bf16.msra.mxu0 %v25515_v8  ;;  %v13174_v52 = vsub.f32 %v25511_v34, %v25526_v13 }
0x1c92   :  { %v25542_v45 = vpack.c.bf16 %v13136_v41, %v13133_v22  ;;  %v25544_v58 = vsub.f32 %v13073_v50, %v13136_v41  ;;  %v26121_v22 = vand.u32 4294901760, %v25528_v1  ;;  %v13185_v2 = vand.u32 4294901760, %v13184_v49 }
0x1c93   :  { %v13175_v20 = vand.u32 4294901760, %v13174_v52  ;;  %v25559_v46 = vpack.c.bf16 %v13285_v31, %v13278_v59  ;;  %v26122_v41 = vand.u32 4294901760, %v25547_v60 }
0x1c94   :  { %v13299_v38 = vand.u32 4294901760, %v25544_v58  ;;  %21845 = vmatprep.subr.bf16.mxu0 %v25542_v45  ;;  %v13244_v52 = vsub.f32 %v25528_v1, %v26121_v22  ;;  %v13272_v22 = vsub.f32 %v25504_v9, %v13271_v25  ;;  %v13279_v25 = vsub.f32 %v25523_v62, %v13278_v59 }
0x1c95   :  { %21847 = vmatpush3.bf16.msra.mxu0 %v25542_v45  ;;  %19646 = vmatprep.mubr.f32.mxu0 %v13175_v20 }
0x1c96   :  { %19856 = vmatprep.mubr.f32.mxu1 %v13175_v20  ;;  %21849 = vmatprep.subr.bf16.mxu0 %v25381_v5  ;;  %v25562_v50 = vpack.c.bf16 %v13299_v38, %v13292_v21  ;;  %v13237_v20 = vsub.f32 %v25547_v60, %v26122_v41  ;;  %v13245_v49 = vand.u32 4294901760, %v13244_v52  ;;  %v26305_v41 = vld [vmem:[#allocation69_spill] sm:$0xff] }
0x1c97   :  { %19857 = vmatmul.mubr.f32.vlgmr.msra.gmra.mrb[26].mxu1 %v13185_v2 }
0x1c98   :  { %26304 = vst [vmem:[#allocation6_spill] sm:$0xff] %v25562_v50  ;;  %22043 = vmatpush3.bf16.msra.mxu1 %v24276_v18  ;;  %19891 = vmatprep.mubr.f32.mxu1 %v25497_v11  ;;  %v13258_v18 = vsub.f32 %v25499_v37, %v13257_v6  ;;  %v13265_v6 = vsub.f32 %v25513_v33, %v13264_v53  ;;  %v26307_v53 = vld [vmem:[#allocation71_spill] sm:$0xff] }
0x1c99   :  { %19647 = vmatmul.mubr.f32.vlgmr.msra.gmra.mrb[24].mxu0 %v13185_v2  ;;  %22045 = vmatprep.subr.bf16.mxu1 %v24299_v55  ;;  %v13251_v2 = vsub.f32 %v25507_v4, %v13250_v15  ;;  %v26306_v15 = vld [vmem:[#allocation70_spill] sm:$0xff] }
0x1c9a   :  { %21851 = vmatpush3.bf16.msra.mxu0 %v25381_v5  ;;  %19681 = vmatprep.mubr.f32.mxu0 %v25497_v11  ;;  %v13238_v5 = vand.u32 4294901760, %v13237_v20 }
0x1c9b   :  { %21853 = vmatprep.subr.bf16.mxu0 %v25407_v10  ;;  %v13252_v52 = vand.u32 4294901760, %v13251_v2 }
0x1c9c   :  { %22047 = vmatpush3.bf16.msra.mxu1 %v24299_v55  ;;  %v21860_v50 = vpack.c.bf16 %v13245_v49, %v13238_v5  ;;  %v13259_v55 = vand.u32 4294901760, %v13258_v18  ;;  %v13266_v49 = vand.u32 4294901760, %v13265_v6  ;;  %v26311_v6 = vld [vmem:[#allocation75_spill] sm:$0xff] }
0x1c9d   :  { %22049 = vmatprep.subr.bf16.mxu1 %v24327_v28 }
0x1c9e   :  { %21855 = vmatpush3.bf16.msra.mxu0 %v25407_v10  ;;  %v13286_v10 = vsub.f32 %v25517_v56, %v13285_v31  ;;  %v21864_v20 = vpack.c.bf16 %v13259_v55, %v13252_v52  ;;  %v13293_v31 = vsub.f32 %v25531_v12, %v13292_v21  ;;  %v26310_v21 = vld [vmem:[#allocation74_spill] sm:$0xff]  ;;  %v26312_v52 = vld [vmem:[#allocation76_spill] sm:$0xff] }
0x1c9f   :  { %21857 = vmatprep.subr.bf16.mxu0 %v25409_v30 }
0x1ca0   :  { %22051 = vmatpush3.bf16.msra.mxu1 %v24327_v28  ;;  %v13273_v28 = vand.u32 4294901760, %v13272_v22  ;;  %v13287_v2 = vand.u32 4294901760, %v13286_v10  ;;  %v26308_v22 = vld [vmem:[#allocation72_spill] sm:$0xff]  ;;  %v13294_v5 = vand.u32 4294901760, %v13293_v31  ;;  %v26313_v10 = vld [vmem:[#allocation77_spill] sm:$0xff] }
0x1ca1   :  { %22053 = vmatprep.subr.bf16.mxu1 %v26305_v41 }
0x1ca2   :  { %21859 = vmatpush3.bf16.msra.mxu0 %v25409_v30  ;;  %v13300_v30 = vsub.f32 %v25544_v58, %v13299_v38  ;;  %v21868_v18 = vpack.c.bf16 %v13273_v28, %v13266_v49  ;;  %v26309_v38 = vld [vmem:[#allocation73_spill] sm:$0xff]  ;;  %v21904_v28 = vpack.c.bf16 %v25517_v56, %v25523_v62  ;;  %v26318_v56 = vld [vmem:[#allocation68_spill] sm:$0xff]  ;;  %v26321_v62 = vld [vmem:[#allocation82_spill] sm:$0xff] }
0x1ca3   :  { %21861 = vmatprep.subr.bf16.mxu0 %v21860_v50 }
0x1ca4   :  { %22055 = vmatpush3.bf16.msra.mxu1 %v26305_v41  ;;  %v13280_v41 = vand.u32 4294901760, %v13279_v25  ;;  %v26327_v25 = vand.u32 4294901760, %v25528_v1 }
0x1ca5   :  { %22057 = vmatprep.subr.bf16.mxu1 %v26306_v15 }
0x1ca6   :  { %21863 = vmatpush3.bf16.msra.mxu0 %v21860_v50  ;;  %v21872_v59 = vpack.c.bf16 %v13287_v2, %v13280_v41  ;;  %v13301_v50 = vand.u32 4294901760, %v13300_v30 }
0x1ca7   :  { %21865 = vmatprep.subr.bf16.mxu0 %v21864_v20 }
0x1ca8   :  { %22059 = vmatpush3.bf16.msra.mxu1 %v26306_v15  ;;  %v21876_v55 = vpack.c.bf16 %v13301_v50, %v13294_v5  ;;  %v21892_v15 = vpack.c.bf16 %v25528_v1, %v25547_v60  ;;  %v26331_v1 = vld [vmem:[#allocation88_spill] sm:$0xff] }
0x1ca9   :  { %22061 = vmatprep.subr.bf16.mxu1 %v26307_v53 }
0x1caa   :  { %21867 = vmatpush3.bf16.msra.mxu0 %v21864_v20  ;;  %v21900_v20 = vpack.c.bf16 %v25504_v9, %v25513_v33  ;;  %v26320_v9 = vand.u32 4294901760, %v25342_v32  ;;  %v26322_v32 = vld [vmem:[#allocation83_spill] sm:$0xff] }
0x1cab   :  { %21869 = vmatprep.subr.bf16.mxu0 %v21868_v18 }
0x1cac   :  { %22063 = vmatpush3.bf16.msra.mxu1 %v26307_v53 }
0x1cad   :  { %22065 = vmatprep.subr.bf16.mxu1 %v26308_v22 }
0x1cae   :  { %21871 = vmatpush3.bf16.msra.mxu0 %v21868_v18 }
0x1caf   :  { %21873 = vmatprep.subr.bf16.mxu0 %v21872_v59 }
0x1cb0   :  { %22067 = vmatpush3.bf16.msra.mxu1 %v26308_v22 }
0x1cb1   :  { %22069 = vmatprep.subr.bf16.mxu1 %v26309_v38 }
0x1cb2   :  { %21875 = vmatpush3.bf16.msra.mxu0 %v21872_v59 }
0x1cb3   :  { %21877 = vmatprep.subr.bf16.mxu0 %v21876_v55 }
0x1cb4   :  { %22071 = vmatpush3.bf16.msra.mxu1 %v26309_v38 }
0x1cb5   :  { %22073 = vmatprep.subr.bf16.mxu1 %v26310_v21 }
0x1cb6   :  { %21879 = vmatpush3.bf16.msra.mxu0 %v21876_v55 }
0x1cb7   :  { %19892 = vmatmul.mubr.f32.vlgmr.msra.gmra.mrb[26].mxu1 %v25493_v29  ;;  %21881 = vmatprep.subr.bf16.mxu0 %v25368_v3 }
0x1cb8   :  { %22075 = vmatpush3.bf16.msra.mxu1 %v26310_v21  ;;  %19926 = vmatprep.mubr.f32.mxu1 %v25511_v34 }
0x1cb9   :  { %19682 = vmatmul.mubr.f32.vlgmr.msra.gmra.mrb[24].mxu0 %v25493_v29  ;;  %22077 = vmatprep.subr.bf16.mxu1 %v26311_v6 }
0x1cba   :  { %21883 = vmatpush3.bf16.msra.mxu0 %v25368_v3  ;;  %19716 = vmatprep.mubr.f32.mxu0 %v25511_v34  ;;  %v26314_v3 = vld [vmem:[#allocation78_spill] sm:$0xff]  ;;  %v21896_v34 = vpack.c.bf16 %v25499_v37, %v25507_v4  ;;  %v26317_v37 = vld [vmem:[#allocation81_spill] sm:$0xff]  ;;  %v21908_v4 = vpack.c.bf16 %v25544_v58, %v25531_v12  ;;  %v26326_v58 = vand.u32 4294901760, %v25547_v60  ;;  %v26330_v60 = vld [vmem:[#allocation87_spill] sm:$0xff] }
0x1cbb   :  { %21885 = vmatprep.subr.bf16.mxu0 %v25385_v57 }
0x1cbc   :  { %22079 = vmatpush3.bf16.msra.mxu1 %v26311_v6  ;;  %v21956_v49 = vpack.c.bf16 %v26327_v25, %v26326_v58 }
0x1cbd   :  { %22081 = vmatprep.subr.bf16.mxu1 %v26312_v52 }
0x1cbe   :  { %21887 = vmatpush3.bf16.msra.mxu0 %v25385_v57  ;;  %v26315_v57 = vld [vmem:[#allocation79_spill] sm:$0xff] }
0x1cbf   :  { %21889 = vmatprep.subr.bf16.mxu0 %v25401_v39 }
0x1cc0   :  { %22083 = vmatpush3.bf16.msra.mxu1 %v26312_v52 }
0x1cc1   :  { %22085 = vmatprep.subr.bf16.mxu1 %v26313_v10 }
0x1cc2   :  { %21891 = vmatpush3.bf16.msra.mxu0 %v25401_v39  ;;  %v26316_v39 = vld [vmem:[#allocation80_spill] sm:$0xff] }
0x1cc3   :  { %21893 = vmatprep.subr.bf16.mxu0 %v21892_v15 }
0x1cc4   :  { %22087 = vmatpush3.bf16.msra.mxu1 %v26313_v10 }
0x1cc5   :  { %22089 = vmatprep.subr.bf16.mxu1 %v26314_v3 }
0x1cc6   :  { %21895 = vmatpush3.bf16.msra.mxu0 %v21892_v15 }
0x1cc7   :  { %21897 = vmatprep.subr.bf16.mxu0 %v21896_v34 }
0x1cc8   :  { %22091 = vmatpush3.bf16.msra.mxu1 %v26314_v3 }
0x1cc9   :  { %22093 = vmatprep.subr.bf16.mxu1 %v26315_v57 }
0x1cca   :  { %21899 = vmatpush3.bf16.msra.mxu0 %v21896_v34 }
0x1ccb   :  { %21901 = vmatprep.subr.bf16.mxu0 %v21900_v20 }
0x1ccc   :  { %22095 = vmatpush3.bf16.msra.mxu1 %v26315_v57 }
0x1ccd   :  { %22097 = vmatprep.subr.bf16.mxu1 %v26316_v39 }
0x1cce   :  { %21903 = vmatpush3.bf16.msra.mxu0 %v21900_v20 }
0x1ccf   :  { %21905 = vmatprep.subr.bf16.mxu0 %v21904_v28 }
0x1cd0   :  { %22099 = vmatpush3.bf16.msra.mxu1 %v26316_v39 }
0x1cd1   :  { %22101 = vmatprep.subr.bf16.mxu1 %v26317_v37 }
0x1cd2   :  { %21907 = vmatpush3.bf16.msra.mxu0 %v21904_v28 }
0x1cd3   :  { %21909 = vmatprep.subr.bf16.mxu0 %v21908_v4 }
0x1cd4   :  { %22103 = vmatpush3.bf16.msra.mxu1 %v26317_v37 }
0x1cd5   :  { %22105 = vmatprep.subr.bf16.mxu1 %v24105_v17 }
0x1cd6   :  { %21911 = vmatpush3.bf16.msra.mxu0 %v21908_v4 }
0x1cd7   :  { %19927 = vmatmul.mubr.f32.vlgmr.msra.gmra.mrb[26].mxu1 %v25502_v42  ;;  %21913 = vmatprep.subr.bf16.mxu0 %v25351_v27 }
0x1cd8   :  { %22107 = vmatpush3.bf16.msra.mxu1 %v24105_v17  ;;  %19961 = vmatprep.mubr.f32.mxu1 %v25526_v13 }
0x1cd9   :  { %19717 = vmatmul.mubr.f32.vlgmr.msra.gmra.mrb[24].mxu0 %v25502_v42  ;;  %22109 = vmatprep.subr.bf16.mxu1 %v24148_v14  ;;  %v26319_v42 = vand.u32 4294901760, %v25353_v23  ;;  %v26323_v23 = vand.u32 4294901760, %v25377_v7  ;;  %v26328_v7 = vld [vmem:[#allocation85_spill] sm:$0xff] }
0x1cda   :  { %21915 = vmatpush3.bf16.msra.mxu0 %v25351_v27  ;;  %19751 = vmatprep.mubr.f32.mxu0 %v25526_v13  ;;  %v26324_v13 = vand.u32 4294901760, %v25390_v48  ;;  %v26329_v48 = vld [vmem:[#allocation86_spill] sm:$0xff] }
0x1cdb   :  { %21917 = vmatprep.subr.bf16.mxu0 %v25379_v54  ;;  %v21944_v33 = vpack.c.bf16 %v26320_v9, %v26319_v42 }
0x1cdc   :  { %22111 = vmatpush3.bf16.msra.mxu1 %v24148_v14  ;;  %v21952_v12 = vpack.c.bf16 %v26324_v13, %v26323_v23 }
0x1cdd   :  { %22113 = vmatprep.subr.bf16.mxu1 %v26214_v63 }
0x1cde   :  { %21919 = vmatpush3.bf16.msra.mxu0 %v25379_v54 }
0x1cdf   :  { %21921 = vmatprep.subr.bf16.mxu0 %v25388_v43 }
0x1ce0   :  { %22115 = vmatpush3.bf16.msra.mxu1 %v26214_v63 }
0x1ce1   :  { %22117 = vmatprep.subr.bf16.mxu1 %v24166_v16 }
0x1ce2   :  { %21923 = vmatpush3.bf16.msra.mxu0 %v25388_v43 }
0x1ce3   :  { %21925 = vmatprep.subr.bf16.mxu0 %v25485_v44 }
0x1ce4   :  { %22119 = vmatpush3.bf16.msra.mxu1 %v24166_v16 }
0x1ce5   :  { %22121 = vmatprep.subr.bf16.mxu1 %v24185_v0 }
0x1ce6   :  { %21927 = vmatpush3.bf16.msra.mxu0 %v25485_v44 }
0x1ce7   :  { %21929 = vmatprep.subr.bf16.mxu0 %v25489_v35 }
0x1ce8   :  { %22123 = vmatpush3.bf16.msra.mxu1 %v24185_v0 }
0x1ce9   :  { %22125 = vmatprep.subr.bf16.mxu1 %v24203_v61 }
0x1cea   :  { %21931 = vmatpush3.bf16.msra.mxu0 %v25489_v35 }
0x1ceb   :  { %21933 = vmatprep.subr.bf16.mxu0 %v25495_v51 }
0x1cec   :  { %22127 = vmatpush3.bf16.msra.mxu1 %v24203_v61 }
0x1ced   :  { %22129 = vmatprep.subr.bf16.mxu1 %v24229_v24 }
0x1cee   :  { %21935 = vmatpush3.bf16.msra.mxu0 %v25495_v51 }
0x1cef   :  { %21937 = vmatprep.subr.bf16.mxu0 %v25515_v8 }
0x1cf0   :  { %22131 = vmatpush3.bf16.msra.mxu1 %v24229_v24 }
0x1cf1   :  { %22133 = vmatprep.subr.bf16.mxu1 %v24255_v36 }
0x1cf2   :  { %21939 = vmatpush3.bf16.msra.mxu0 %v25515_v8 }
0x1cf3   :  { %21941 = vmatprep.subr.bf16.mxu0 %v25542_v45 }
0x1cf4   :  { %22135 = vmatpush3.bf16.msra.mxu1 %v24255_v36 }
0x1cf5   :  { %22137 = vmatprep.subr.bf16.mxu1 %v26318_v56 }
0x1cf6   :  { %21943 = vmatpush3.bf16.msra.mxu0 %v25542_v45 }
0x1cf7   :  { %19962 = vmatmul.mubr.f32.vlgmr.msra.gmra.mrb[26].mxu1 %v25520_v47  ;;  %21945 = vmatprep.subr.bf16.mxu0 %v21944_v33 }
0x1cf8   :  { %22139 = vmatpush3.bf16.msra.mxu1 %v26318_v56  ;;  %19996 = vmatprep.mubr.f32.mxu1 %v25497_v11 }
0x1cf9   :  { %19752 = vmatmul.mubr.f32.vlgmr.msra.gmra.mrb[24].mxu0 %v25520_v47  ;;  %22141 = vmatprep.subr.bf16.mxu1 %v26321_v62  ;;  %v26325_v47 = vld [vmem:[#allocation84_spill] sm:$0xff] }
0x1cfa   :  { %21947 = vmatpush3.bf16.msra.mxu0 %v21944_v33  ;;  %19786 = vmatprep.mubr.f32.mxu0 %v25497_v11 }
0x1cfb   :  { %21949 = vmatprep.subr.bf16.mxu0 %v25392_v19 }
0x1cfc   :  { %22143 = vmatpush3.bf16.msra.mxu1 %v26321_v62 }
0x1cfd   :  { %22145 = vmatprep.subr.bf16.mxu1 %v26322_v32 }
0x1cfe   :  { %21951 = vmatpush3.bf16.msra.mxu0 %v25392_v19  ;;  %v26332_v19 = vld [vmem:[#allocation6_spill] sm:$0xff] }
0x1cff   :  { %21953 = vmatprep.subr.bf16.mxu0 %v21952_v12 }
0x1d00   :  { %22147 = vmatpush3.bf16.msra.mxu1 %v26322_v32 }
0x1d01   :  { %22149 = vmatprep.subr.bf16.mxu1 %v26325_v47 }
0x1d02   :  { %21955 = vmatpush3.bf16.msra.mxu0 %v21952_v12  ;;  %v25786_v12 = vld [vmem:[%s25954_s3 + $0x20] sm:$0xff] }
0x1d03   :  { %21957 = vmatprep.subr.bf16.mxu0 %v21956_v49 }
0x1d04   :  { %22151 = vmatpush3.bf16.msra.mxu1 %v26325_v47  ;;  %v26333_v47 = vld [vmem:[#allocation89_spill] sm:$0xff] }
0x1d05   :  { %22153 = vmatprep.subr.bf16.mxu1 %v26328_v7  ;;  %v14467_v58 = vrot.slane %v25786_v12, %v26333_v47 }
0x1d06   :  { %21959 = vmatpush3.bf16.msra.mxu0 %v21956_v49 }
0x1d07   :  { %21961 = vmatprep.subr.bf16.mxu0 %v25550_v40 }
0x1d08   :  { %22155 = vmatpush3.bf16.msra.mxu1 %v26328_v7 }
0x1d09   :  { %22157 = vmatprep.subr.bf16.mxu1 %v26329_v48 }
0x1d0a   :  { %21963 = vmatpush3.bf16.msra.mxu0 %v25550_v40 }
0x1d0b   :  { %21965 = vmatprep.subr.bf16.mxu0 %v25555_v26 }
0x1d0c   :  { %22159 = vmatpush3.bf16.msra.mxu1 %v26329_v48 }
0x1d0d   :  { %22161 = vmatprep.subr.bf16.mxu1 %v26330_v60 }
0x1d0e   :  { %21967 = vmatpush3.bf16.msra.mxu0 %v25555_v26 }
0x1d0f   :  { %21969 = vmatprep.subr.bf16.mxu0 %v25559_v46 }
0x1d10   :  { %22163 = vmatpush3.bf16.msra.mxu1 %v26330_v60  ;;  %v26334_v60 = vld [vmem:[#allocation50_spill] sm:$0xff] }
0x1d11   :  { %22165 = vmatprep.subr.bf16.mxu1 %v26331_v1 }
0x1d12   :  { %21971 = vmatpush3.bf16.msra.mxu0 %v25559_v46 }
0x1d13   :  { %21973 = vmatprep.subr.bf16.mxu0 %v26332_v19 }
0x1d14   :  { %22167 = vmatpush3.bf16.msra.mxu1 %v26331_v1 }
0x1d15   :  { %22169 = vmatprep.subr.bf16.mxu1 %v24105_v17 }
0x1d16   :  { %21975 = vmatpush3.bf16.msra.mxu0 %v26332_v19  ;;  %v26335_v19 = vld [vmem:[#allocation49_spill] sm:$0xff] }
0x1d17   :  { %19997 = vmatmul.mubr.f32.vlgmr.msra.gmra.mrb[26].mxu1 %v25493_v29  ;;  %21977 = vmatprep.subr.bf16.mxu0 %v25351_v27 }
0x1d18   :  { %22171 = vmatpush3.bf16.msra.mxu1 %v24105_v17  ;;  %20031 = vmatprep.mubr.f32.mxu1 %v25497_v11  ;;  %v16259_v17 = vld [vmem:[%s25953_s2 + $0xa8] sm:$0xff] }
0x1d19   :  { %19787 = vmatmul.mubr.f32.vlgmr.msra.gmra.mrb[24].mxu0 %v25493_v29  ;;  %22173 = vmatprep.subr.bf16.mxu1 %v24148_v14 }
0x1d1a   :  { %21979 = vmatpush3.bf16.msra.mxu0 %v25351_v27  ;;  %19821 = vmatprep.mubr.f32.mxu0 %v25497_v11 }
0x1d1b   :  { %21981 = vmatprep.subr.bf16.mxu0 %v25379_v54 }
0x1d1c   :  { %22175 = vmatpush3.bf16.msra.mxu1 %v24148_v14  ;;  %v16260_v14 = vld [vmem:[%s25953_s2 + $0xb0] sm:$0xff] }
0x1d1d   :  { %22177 = vmatprep.subr.bf16.mxu1 %v26214_v63 }
0x1d1e   :  { %21983 = vmatpush3.bf16.msra.mxu0 %v25379_v54 }
0x1d1f   :  { %21985 = vmatprep.subr.bf16.mxu0 %v25388_v43 }
0x1d20   :  { %22179 = vmatpush3.bf16.msra.mxu1 %v26214_v63 }
0x1d21   :  { %22181 = vmatprep.subr.bf16.mxu1 %v24166_v16 }
0x1d22   :  { %21987 = vmatpush3.bf16.msra.mxu0 %v25388_v43 }
0x1d23   :  { %21989 = vmatprep.subr.bf16.mxu0 %v25485_v44 }
0x1d24   :  { %22183 = vmatpush3.bf16.msra.mxu1 %v24166_v16  ;;  %v14478_v16 = vand.u32 4294901760, %v16259_v17 }
0x1d25   :  { %22185 = vmatprep.subr.bf16.mxu1 %v24185_v0 }
0x1d26   :  { %21991 = vmatpush3.bf16.msra.mxu0 %v25485_v44  ;;  %v14572_v54 = vsub.f32 %v16259_v17, %v14478_v16 }
0x1d27   :  { %21993 = vmatprep.subr.bf16.mxu0 %v25489_v35 }
0x1d28   :  { %22187 = vmatpush3.bf16.msra.mxu1 %v24185_v0  ;;  %v16258_v0 = vld [vmem:[%s25953_s2 + $0xa0] sm:$0xff]  ;;  %v14573_v44 = vand.u32 4294901760, %v14572_v54 }
0x1d29   :  { %22189 = vmatprep.subr.bf16.mxu1 %v24203_v61 }
0x1d2a   :  { %21995 = vmatpush3.bf16.msra.mxu0 %v25489_v35 }
0x1d2b   :  { %21997 = vmatprep.subr.bf16.mxu0 %v25495_v51 }
0x1d2c   :  { %22191 = vmatpush3.bf16.msra.mxu1 %v24203_v61  ;;  %v14475_v61 = vand.u32 4294901760, %v16258_v0 }
0x1d2d   :  { %22193 = vmatprep.subr.bf16.mxu1 %v24229_v24 }
0x1d2e   :  { %21999 = vmatpush3.bf16.msra.mxu0 %v25495_v51  ;;  %v25765_v26 = vpack.c.bf16 %v14478_v16, %v14475_v61  ;;  %v14565_v27 = vsub.f32 %v16258_v0, %v14475_v61 }
0x1d2f   :  { %22001 = vmatprep.subr.bf16.mxu0 %v25515_v8 }
0x1d30   :  { %22195 = vmatpush3.bf16.msra.mxu1 %v24229_v24  ;;  %v16261_v24 = vld [vmem:[%s25953_s2 + $0xb8] sm:$0xff]  ;;  %v14566_v43 = vand.u32 4294901760, %v14565_v27  ;;  %v22216_v22 = vpack.c.bf16 %v14572_v54, %v14565_v27 }
0x1d31   :  { %22197 = vmatprep.subr.bf16.mxu1 %v24255_v36  ;;  %v14484_v63 = vand.u32 4294901760, %v16261_v24 }
0x1d32   :  { %22003 = vmatpush3.bf16.msra.mxu0 %v25515_v8  ;;  %v14567_v35 = vsub.f32 %v14565_v27, %v14566_v43  ;;  %v22232_v5 = vpack.c.bf16 %v14573_v44, %v14566_v43 }
0x1d33   :  { %22005 = vmatprep.subr.bf16.mxu0 %v25542_v45  ;;  %v14586_v11 = vsub.f32 %v16261_v24, %v14484_v63 }
0x1d34   :  { %22199 = vmatpush3.bf16.msra.mxu1 %v24255_v36  ;;  %v14481_v36 = vand.u32 4294901760, %v16260_v14  ;;  %v14568_v8 = vand.u32 4294901760, %v14567_v35  ;;  %v22803_v35 = vld [vmem:[%s25952_s1 + $0x68] sm:$0xff] }
0x1d35   :  { %v14587_v30 = vand.u32 4294901760, %v14586_v11 }
0x1d36   :  { %22007 = vmatpush3.bf16.msra.mxu0 %v25542_v45  ;;  %v25767_v40 = vpack.c.bf16 %v14484_v63, %v14481_v36  ;;  %v14579_v51 = vsub.f32 %v16260_v14, %v14481_v36 }
0x1d37   :  { %20032 = vmatmul.mubr.f32.vlgmr.msra.gmra.mrb[26].mxu1 %v25493_v29  ;;  %22201 = vmatprep.subr.bf16.mxu0 %v25765_v26  ;;  %v14588_v2 = vsub.f32 %v14586_v11, %v14587_v30 }
0x1d38   :  { %v14580_v46 = vand.u32 4294901760, %v14579_v51  ;;  %v22220_v50 = vpack.c.bf16 %v14586_v11, %v14579_v51 }
0x1d39   :  { %19822 = vmatmul.mubr.f32.vlgmr.msra.gmra.mrb[24].mxu0 %v25493_v29  ;;  %v14574_v29 = vsub.f32 %v14572_v54, %v14573_v44  ;;  %v14589_v41 = vand.u32 4294901760, %v14588_v2  ;;  %v22802_v44 = vld [vmem:[%s25952_s1 + $0x58] sm:$0xff] }
0x1d3a   :  { %22203 = vmatpush3.bf16.msra.mxu0 %v25765_v26  ;;  %v14581_v18 = vsub.f32 %v14579_v51, %v14580_v46  ;;  %v22236_v38 = vpack.c.bf16 %v14587_v30, %v14580_v46  ;;  %v22805_v51 = vld [vmem:[%s25952_s1 + $0x78] sm:$0xff] }
0x1d3b   :  { %22205 = vmatprep.subr.bf16.mxu0 %v25767_v40  ;;  %v14575_v45 = vand.u32 4294901760, %v14574_v29  ;;  %v22804_v29 = vld [vmem:[%s25952_s1 + $0x48] sm:$0xff] }
0x1d3c   :  { %v14582_v31 = vand.u32 4294901760, %v14581_v18 }
0x1d3d   :  { %v22208_v53 = vpack.c.bf16 %v14575_v45, %v14568_v8 }
0x1d3e   :  { %22207 = vmatpush3.bf16.msra.mxu0 %v25767_v40  ;;  %v22212_v59 = vpack.c.bf16 %v14589_v41, %v14582_v31 }
0x1d3f   :  { %22209 = vmatprep.subr.bf16.mxu0 %v22208_v53 }
0x1e0a   :  { %v20033_v55 = vpop.f32.mrb[26].mxu1 }
0x1e0b   :  { %v14459_v21 = vmax.f32 %v20033_v55, 1e-30  ;;  %v14448_v6 = vpop.f32.mrb[27].mxu1 }
0x1e0c   :  { %v14458_v52 = vmax.f32 %v14448_v6, 1e-30  ;;  %v19823_v10 = vpop.f32.mrb[24].mxu0 }
0x1e0d   :  { %22757 = vrcp.f32 %v14459_v21  ;;  %v13764_v15 = vpop.f32.mrb[25].mxu0 }
0x1e0e   :  { %22759 = vrcp.f32 %v14458_v52 }
0x1e17   :  { %v22758_v3 = vpop.eup %22757 }
0x1e18   :  { %v22760_v34 = vpop.eup %22759  ;;  %v14463_v57 = vmul.f32 %v22758_v3, %v19823_v10 }
0x1e19   :  { %v14462_v20 = vmul.f32 %v22760_v34, %v13764_v15 }
0x1e1a   :  { %v14472_v39 = vsel %vm93_vm0, %v14463_v57, 0  ;;  %v25833_v57 = vld [vmem:[%s25954_s3 + $0x28] sm:$0xff] }
0x1e1b   :  { %v14553_v28 = vand.u32 4294901760, %v14472_v39  ;;  %v14469_v37 = vsel %vm93_vm0, %v14462_v20, 0  ;;  %v26336_v20 = vld [vmem:[#allocation47_spill] sm:$0xff] }
0x1e1c   :  { %v14543_v4 = vand.u32 4294901760, %v14469_v37 }
0x1e1d   :  { %v14554_v56 = vsub.f32 %v14472_v39, %v14553_v28  ;;  %v15033_v39 = vrot.slane %v25833_v57, %v26336_v20 }
0x1e1e   :  { %v14544_v42 = vsub.f32 %v14469_v37, %v14543_v4 }
0x1e1f   :  { %v14555_v9 = vand.u32 4294901760, %v14554_v56 }
0x1e20   :  { %v14545_v33 = vand.u32 4294901760, %v14544_v42 }
0x1e21   :  { %v14556_v62 = vsub.f32 %v14554_v56, %v14555_v9 }
0x1e22   :  { %v14546_v32 = vsub.f32 %v14544_v42, %v14545_v33 }
0x1e23   :  { %v14557_v13 = vand.u32 4294901760, %v14556_v62 }
0x1e24   :  { %v14547_v23 = vand.u32 4294901760, %v14546_v32 }
0x1e26   :  { %20042 = vmatprep.mubr.f32.mxu0 %v14547_v23 }
0x1e27   :  { %20043 = vmatmul.mubr.f32.vlgmr.msra.gmra.mrb[26].mxu0 %v14557_v13 }
0x1e28   :  { %22211 = vmatpush3.bf16.msra.mxu0 %v22208_v53  ;;  %20053 = vmatprep.mubr.f32.mxu0 %v14543_v4 }
0x1e29   :  { %22213 = vmatprep.subr.bf16.mxu0 %v22212_v59 }
0x1e2c   :  { %22215 = vmatpush3.bf16.msra.mxu0 %v22212_v59 }
0x1e2d   :  { %22217 = vmatprep.subr.bf16.mxu0 %v22216_v22 }
0x1e2f   :  { %20054 = vmatmul.mubr.f32.vlgmr.msra.gmra.mrb[26].mxu0 %v14553_v28 }
0x1e30   :  { %22219 = vmatpush3.bf16.msra.mxu0 %v22216_v22  ;;  %20064 = vmatprep.mubr.f32.mxu0 %v14544_v42 }
0x1e31   :  { %22221 = vmatprep.subr.bf16.mxu0 %v22220_v50 }
0x1e34   :  { %22223 = vmatpush3.bf16.msra.mxu0 %v22220_v50 }
0x1e35   :  { %22225 = vmatprep.subr.bf16.mxu0 %v25765_v26 }
0x1e37   :  { %20065 = vmatmul.mubr.f32.vlgmr.msra.gmra.mrb[26].mxu0 %v14554_v56 }
0x1e38   :  { %22227 = vmatpush3.bf16.msra.mxu0 %v25765_v26  ;;  %20075 = vmatprep.mubr.f32.mxu0 %v14545_v33 }
0x1e39   :  { %22229 = vmatprep.subr.bf16.mxu0 %v25767_v40 }
0x1e3c   :  { %22231 = vmatpush3.bf16.msra.mxu0 %v25767_v40 }
0x1e3d   :  { %22233 = vmatprep.subr.bf16.mxu0 %v22232_v5 }
0x1e3f   :  { %20076 = vmatmul.mubr.f32.vlgmr.msra.gmra.mrb[26].mxu0 %v14555_v9  ;;  %v26337_v9 = vld [vmem:[#allocation65_spill] sm:$0xff] }
0x1e40   :  { %22235 = vmatpush3.bf16.msra.mxu0 %v22232_v5  ;;  %20086 = vmatprep.mubr.f32.mxu0 %v14543_v4  ;;  %v15039_v33 = vrot.slane %v25833_v57, %v26337_v9 }
0x1e41   :  { %22237 = vmatprep.subr.bf16.mxu0 %v22236_v38 }
0x1e44   :  { %22239 = vmatpush3.bf16.msra.mxu0 %v22236_v38 }
0x1e45   :  { %22241 = vmatprep.subr.bf16.mxu0 %v25765_v26 }
0x1e47   :  { %20087 = vmatmul.mubr.f32.vlgmr.msra.gmra.mrb[26].mxu0 %v14553_v28 }
0x1e48   :  { %22243 = vmatpush3.bf16.msra.mxu0 %v25765_v26  ;;  %20097 = vmatprep.mubr.f32.mxu0 %v14543_v4 }
0x1e49   :  { %22245 = vmatprep.subr.bf16.mxu0 %v25767_v40 }
0x1e4c   :  { %22247 = vmatpush3.bf16.msra.mxu0 %v25767_v40 }
0x1e4f   :  { %20098 = vmatmul.mubr.f32.vlgmr.msra.gmra.mrb[26].mxu0 %v14553_v28 }
0x1f22   :  { %v20099_v25 = vpop.f32.mrb[26].mxu0 }
0x1f23   :  { %v22422_v49 = vadd.f32 %v20099_v25, %v14467_v58  ;;  %v14992_v7 = vpop.f32.mrb[27].mxu0 }
0x1f24   :  { %v22423_v48 = vadd.f32 %v14992_v7, %v14467_v58 }
0x1f25   :  { %v15003_v1 = vadd.f32 %v22422_v49, %v26334_v60 }
0x1f26   :  { %v15002_v0 = vadd.f32 %v22423_v48, %v26335_v19 }
0x1f27   :  { %v15007_v17 = vsel %vm93_vm0, %v15003_v1, 0.0 }
0x1f28   :  { %15008 = vadd.xlane.f32.xlu0 %v15007_v17  ;;  %v15004_v14 = vsel %vm93_vm0, %v15002_v0, 0.0 }
0x1f29   :  { %15005 = vadd.xlane.f32.xlu1 %v15004_v14 }
0x1fb5   :  { %v15009_v61 = vpop.xlane.xlu0 %15008 }
0x1fb6   :  { %v15011_v16 = vmul.f32 0.03125, %v15009_v61  ;;  %v15006_v24 = vpop.xlane.xlu1 %15005 }
0x1fb7   :  { %v15010_v36 = vmul.f32 0.03125, %v15006_v24 }
0x1fb8   :  { %v15013_v63 = vsub.f32 %v15003_v1, %v15011_v16 }
0x1fb9   :  { %v15012_v26 = vsub.f32 %v15002_v0, %v15010_v36 }
0x1fba   :  { %v15015_v40 = vmul.f32 %v15013_v63, %v15013_v63 }
0x1fbb   :  { %v15014_v27 = vmul.f32 %v15012_v26, %v15012_v26 }
0x1fbc   :  { %v15019_v54 = vsel %vm93_vm0, %v15015_v40, 0.0 }
0x1fbd   :  { %15020 = vadd.xlane.f32.xlu1 %v15019_v54  ;;  %v15016_v43 = vsel %vm93_vm0, %v15014_v27, 0.0 }
0x1fbe   :  { %15017 = vadd.xlane.f32.xlu0 %v15016_v43 }
0x1fce   :  { %15052 = vrot.lane.b32.xlu1 %v22802_v44, %s22835_s13 }
0x1fd2   :  { %15054 = vrot.lane.b32.xlu1 %v22803_v35, %s22835_s13 }
0x1fd4   :  { %15050 = vrot.lane.b32.xlu0 %v22804_v29, %s22835_s13 }
0x1fd8   :  { %15056 = vrot.lane.b32.xlu0 %v22805_v51, %s22835_s13 }
0x204a   :  { %v15021_v11 = vpop.xlane.xlu1 %15020 }
0x204b   :  { %v15023_v8 = vmul.f32 0.03125, %v15021_v11  ;;  %v15018_v45 = vpop.xlane.xlu0 %15017 }
0x204c   :  { %v15022_v46 = vmul.f32 0.03125, %v15018_v45  ;;  %v16263_v45 = vld [vmem:[%s25953_s2 + $0xc8] sm:$0xff] }
0x204d   :  { %v15025_v30 = vadd.f32 1e-05, %v15023_v8  ;;  %v16262_v8 = vld [vmem:[%s25953_s2 + $0xc0] sm:$0xff] }
0x204e   :  { %v15024_v53 = vadd.f32 1e-05, %v15022_v46  ;;  %v15053_v18 = vpop.permute.xlu1 %15052  ;;  %v15609_v46 = vand.u32 4294901760, %v16262_v8 }
0x204f   :  { %22761 = vrsqrt.f32 %v15025_v30  ;;  %v15051_v2 = vpop.permute.xlu0 %15050  ;;  %v15072_v31 = vand.u32 4294901760, %v15053_v18  ;;  %v15612_v30 = vand.u32 4294901760, %v16263_v45 }
0x2050   :  { %22763 = vrsqrt.f32 %v15024_v53  ;;  %v15069_v41 = vand.u32 4294901760, %v15051_v2 }
0x2051   :  { %v25812_v22 = vsub.f32 %v15053_v18, %v15072_v31  ;;  %v25869_v53 = vpack.c.bf16 %v15612_v30, %v15609_v46  ;;  %v16264_v18 = vld [vmem:[%s25953_s2 + $0xd0] sm:$0xff] }
0x2052   :  { %v25814_v59 = vsub.f32 %v15051_v2, %v15069_v41  ;;  %v25816_v50 = vpack.c.bf16 %v15072_v31, %v15069_v41  ;;  %v15055_v5 = vpop.permute.xlu1 %15054  ;;  %v16265_v2 = vld [vmem:[%s25953_s2 + $0xd8] sm:$0xff]  ;;  %v15615_v31 = vand.u32 4294901760, %v16264_v18 }
0x2053   :  { %v15167_v38 = vand.u32 4294901760, %v25812_v22  ;;  %v15057_v55 = vpop.permute.xlu0 %15056  ;;  %v15075_v52 = vand.u32 4294901760, %v15055_v5  ;;  %22297 = vmatprep.subr.bf16.mxu0 %v25869_v53  ;;  %v15618_v41 = vand.u32 4294901760, %v16265_v2 }
0x2054   :  { %v15160_v21 = vand.u32 4294901760, %v25814_v59  ;;  %v15078_v6 = vand.u32 4294901760, %v15057_v55  ;;  %22249 = vmatprep.subr.bf16.mxu1 %v25816_v50  ;;  %v22264_v35 = vpack.c.bf16 %v25812_v22, %v25814_v59  ;;  %22299 = vmatpush3.bf16.msra.mxu0 %v25869_v53 }
0x2055   :  { %v15168_v10 = vsub.f32 %v25812_v22, %v15167_v38  ;;  %22251 = vmatpush3.bf16.msra.mxu1 %v25816_v50  ;;  %v15173_v23 = vsub.f32 %v15055_v5, %v15075_v52  ;;  %v25879_v22 = vpack.c.bf16 %v15618_v41, %v15615_v31  ;;  %v16268_v5 = vld [vmem:[%s25953_s2 + $0xf0] sm:$0xff] }
0x2056   :  { %v15161_v15 = vsub.f32 %v25814_v59, %v15160_v21  ;;  %v25828_v3 = vpack.c.bf16 %v15078_v6, %v15075_v52  ;;  %v15180_v32 = vsub.f32 %v15057_v55, %v15078_v6  ;;  %v22280_v51 = vpack.c.bf16 %v15167_v38, %v15160_v21  ;;  %v16266_v59 = vld [vmem:[%s25953_s2 + $0xe0] sm:$0xff]  ;;  %v16269_v21 = vld [vmem:[%s25953_s2 + $0xf8] sm:$0xff] }
0x2057   :  { %v15169_v34 = vand.u32 4294901760, %v15168_v10  ;;  %v15174_v7 = vand.u32 4294901760, %v15173_v23  ;;  %v15621_v38 = vand.u32 4294901760, %v16266_v59  ;;  %v15627_v6 = vand.u32 4294901760, %v16268_v5  ;;  %22301 = vmatprep.subr.bf16.mxu0 %v25879_v22 }
0x2058   :  { %22253 = vmatprep.subr.bf16.mxu1 %v25828_v3  ;;  %v15162_v28 = vand.u32 4294901760, %v15161_v15  ;;  %v15181_v49 = vand.u32 4294901760, %v15180_v32  ;;  %v22268_v29 = vpack.c.bf16 %v15180_v32, %v15173_v23  ;;  %v15630_v52 = vand.u32 4294901760, %v16269_v21  ;;  %22303 = vmatpush3.bf16.msra.mxu0 %v25879_v22 }
0x2059   :  { %v22762_v37 = vpop.eup %22761  ;;  %22255 = vmatpush3.bf16.msra.mxu1 %v25828_v3  ;;  %v15175_v14 = vsub.f32 %v15173_v23, %v15174_v7 }
0x205a   :  { %v22764_v4 = vpop.eup %22763  ;;  %v15029_v56 = vmul.f32 %v22762_v37, %v15013_v63  ;;  %v22256_v42 = vpack.c.bf16 %v15169_v34, %v15162_v28  ;;  %v15182_v17 = vsub.f32 %v15180_v32, %v15181_v49  ;;  %v22284_v11 = vpack.c.bf16 %v15181_v49, %v15174_v7 }
0x205b   :  { %v15028_v62 = vmul.f32 %v22764_v4, %v15012_v26  ;;  %v15176_v26 = vand.u32 4294901760, %v15175_v14  ;;  %v25897_v15 = vpack.c.bf16 %v15630_v52, %v15627_v6  ;;  %v15710_v34 = vsub.f32 %v16263_v45, %v15612_v30 }
0x205c   :  { %v15035_v13 = vmul.f32 %v15033_v39, %v15029_v56  ;;  %22257 = vmatprep.subr.bf16.mxu1 %v22256_v42  ;;  %v15183_v40 = vand.u32 4294901760, %v15182_v17  ;;  %v15717_v4 = vsub.f32 %v16264_v18, %v15615_v31  ;;  %v15724_v56 = vsub.f32 %v16265_v2, %v15618_v41  ;;  %v26338_v2 = vld [vmem:[#allocation5_spill] sm:$0xff] }
0x205d   :  { %v15034_v58 = vmul.f32 %v15033_v39, %v15028_v62  ;;  %v15711_v39 = vand.u32 4294901760, %v15710_v34  ;;  %v15745_v14 = vsub.f32 %v16268_v5, %v15627_v6  ;;  %v26339_v31 = vsub.s32 5, %v26338_v2 }
0x205e   :  { %v25841_v25 = vadd.f32 %v15039_v33, %v15035_v13  ;;  %v22260_v44 = vpack.c.bf16 %v15183_v40, %v15176_v26  ;;  %v15725_v62 = vand.u32 4294901760, %v15724_v56 }
0x205f   :  { %v25843_v48 = vadd.f32 %v15039_v33, %v15034_v58  ;;  %v15712_v37 = vsub.f32 %v15710_v34, %v15711_v39  ;;  %v15718_v33 = vand.u32 4294901760, %v15717_v4  ;;  %v15731_v58 = vsub.f32 %v16266_v59, %v15621_v38 }
0x2060   :  { %v15066_v60 = vsel %vm93_vm0, %v25841_v25, 0  ;;  %v15726_v13 = vsub.f32 %v15724_v56, %v15725_v62  ;;  %v15045_v41 = vrot.slane %v25786_v12, %v26339_v31 }
0x2061   :  { %v15063_v1 = vsel %vm93_vm0, %v25843_v48, 0  ;;  %v15147_v19 = vand.u32 4294901760, %v15066_v60  ;;  %v15713_v9 = vand.u32 4294901760, %v15712_v37  ;;  %v15719_v23 = vsub.f32 %v15717_v4, %v15718_v33 }
0x2062   :  { %v15137_v0 = vand.u32 4294901760, %v15063_v1 }
0x2063   :  { %v15148_v61 = vsub.f32 %v15066_v60, %v15147_v19  ;;  %v15720_v7 = vand.u32 4294901760, %v15719_v23  ;;  %v15727_v60 = vand.u32 4294901760, %v15726_v13 }
0x2064   :  { %v15138_v16 = vsub.f32 %v15063_v1, %v15137_v0  ;;  %v15732_v1 = vand.u32 4294901760, %v15731_v58 }
0x2065   :  { %v15149_v24 = vand.u32 4294901760, %v15148_v61 }
0x2066   :  { %v15139_v36 = vand.u32 4294901760, %v15138_v16  ;;  %v15733_v17 = vsub.f32 %v15731_v58, %v15732_v1 }
0x2067   :  { %v15150_v63 = vsub.f32 %v15148_v61, %v15149_v24 }
0x2068   :  { %v15140_v27 = vsub.f32 %v15138_v16, %v15139_v36 }
0x2069   :  { %v15151_v43 = vand.u32 4294901760, %v15150_v63 }
0x206a   :  { %v15141_v54 = vand.u32 4294901760, %v15140_v27 }
0x206c   :  { %20108 = vmatprep.mubr.f32.mxu1 %v15141_v54 }
0x206d   :  { %20109 = vmatmul.mubr.f32.vlgmr.msra.gmra.mrb[28].mxu1 %v15151_v43 }
0x206e   :  { %22259 = vmatpush3.bf16.msra.mxu1 %v22256_v42  ;;  %20119 = vmatprep.mubr.f32.mxu1 %v15137_v0 }
0x206f   :  { %22261 = vmatprep.subr.bf16.mxu1 %v22260_v44 }
0x2072   :  { %22263 = vmatpush3.bf16.msra.mxu1 %v22260_v44 }
0x2073   :  { %22265 = vmatprep.subr.bf16.mxu1 %v22264_v35 }
0x2075   :  { %20120 = vmatmul.mubr.f32.vlgmr.msra.gmra.mrb[28].mxu1 %v15147_v19 }
0x2076   :  { %22267 = vmatpush3.bf16.msra.mxu1 %v22264_v35  ;;  %20130 = vmatprep.mubr.f32.mxu1 %v15138_v16 }
0x2077   :  { %22269 = vmatprep.subr.bf16.mxu1 %v22268_v29 }
0x207a   :  { %22271 = vmatpush3.bf16.msra.mxu1 %v22268_v29 }
0x207b   :  { %22273 = vmatprep.subr.bf16.mxu1 %v25816_v50 }
0x207d   :  { %20131 = vmatmul.mubr.f32.vlgmr.msra.gmra.mrb[28].mxu1 %v15148_v61  ;;  %v15752_v61 = vsub.f32 %v16269_v21, %v15630_v52 }
0x207e   :  { %22275 = vmatpush3.bf16.msra.mxu1 %v25816_v50  ;;  %20141 = vmatprep.mubr.f32.mxu1 %v15139_v36  ;;  %v15746_v36 = vand.u32 4294901760, %v15745_v14 }
0x207f   :  { %22277 = vmatprep.subr.bf16.mxu1 %v25828_v3  ;;  %v15753_v63 = vand.u32 4294901760, %v15752_v61 }
0x2080   :  { %v15747_v40 = vsub.f32 %v15745_v14, %v15746_v36 }
0x2081   :  { %v15754_v27 = vsub.f32 %v15752_v61, %v15753_v63  ;;  %v22372_v18 = vpack.c.bf16 %v15753_v63, %v15746_v36 }
0x2082   :  { %22279 = vmatpush3.bf16.msra.mxu1 %v25828_v3  ;;  %v15748_v43 = vand.u32 4294901760, %v15747_v40 }
0x2083   :  { %22281 = vmatprep.subr.bf16.mxu1 %v22280_v51  ;;  %v15755_v44 = vand.u32 4294901760, %v15754_v27 }
0x2085   :  { %20142 = vmatmul.mubr.f32.vlgmr.msra.gmra.mrb[28].mxu1 %v15149_v24  ;;  %v15734_v24 = vand.u32 4294901760, %v15733_v17  ;;  %v22324_v35 = vpack.c.bf16 %v15755_v44, %v15748_v43  ;;  %v16225_v44 = vrot.slane %v25833_v57, %v26333_v47 }
0x2086   :  { %22283 = vmatpush3.bf16.msra.mxu1 %v22280_v51  ;;  %20152 = vmatprep.mubr.f32.mxu1 %v15137_v0  ;;  %v22332_v51 = vpack.c.bf16 %v15724_v56, %v15717_v4 }
0x2087   :  { %22285 = vmatprep.subr.bf16.mxu1 %v22284_v11 }
0x208a   :  { %22287 = vmatpush3.bf16.msra.mxu1 %v22284_v11 }
0x208b   :  { %22289 = vmatprep.subr.bf16.mxu1 %v25816_v50 }
0x208d   :  { %20153 = vmatmul.mubr.f32.vlgmr.msra.gmra.mrb[28].mxu1 %v15147_v19 }
0x208e   :  { %22291 = vmatpush3.bf16.msra.mxu1 %v25816_v50  ;;  %20163 = vmatprep.mubr.f32.mxu1 %v15137_v0  ;;  %v16267_v50 = vld [vmem:[%s25953_s2 + $0xe8] sm:$0xff]  ;;  %v22316_v0 = vpack.c.bf16 %v15727_v60, %v15720_v7  ;;  %s22836_s2 = smov [#allocation2]  }
0x208f   :  { %22293 = vmatprep.subr.bf16.mxu1 %v25828_v3  ;;  %v15624_v55 = vand.u32 4294901760, %v16267_v50  ;;  %s16235_s16 = sshll.u32 %s22836_s2, 4  ;;  %s16236_s16 = int_to_ptr.vmem [resolvable:$true] %s16235_s16 }
0x2090   :  { %s22807_s17 = scalar_lea.vmem %s16236_s16, 256  ;;  %p22812_p1 = scmp.lt.s32.totalorder %s16236_s16, %s16236_s16 }
0x2091   :  { %v25895_v10 = vpack.c.bf16 %v15624_v55, %v15621_v38  ;;  %v15738_v49 = vsub.f32 %v16267_v50, %v15624_v55  ;;  %p22808_p0 = scmp.ne.s32.totalorder %s16236_s16, %s22807_s17  ;;  %p22813_p2 = scmp.lt.s32.totalorder %s22807_s17, %s22807_s17 }
0x2092   :  { %22295 = vmatpush3.bf16.msra.mxu1 %v25828_v3  ;;  %v15703_v3 = vsub.f32 %v16262_v8, %v15609_v46  ;;  %v22340_v8 = vpack.c.bf16 %v15752_v61, %v15745_v14  ;;  %v22364_v46 = vpack.c.bf16 %v15725_v62, %v15718_v33  ;;  %v26340_v33 = vsub.s32 6, %v26338_v2 }
0x2093   :  { %22305 = vmatprep.subr.bf16.mxu0 %v25895_v10  ;;  %v22336_v11 = vpack.c.bf16 %v15738_v49, %v15731_v58  ;;  %p22814_p3 = por %p22813_p2, %p22812_p1 }
0x2094   :  { %v15704_v20 = vand.u32 4294901760, %v15703_v3  ;;  %22307 = vmatpush3.bf16.msra.mxu0 %v25895_v10  ;;  %v22328_v29 = vpack.c.bf16 %v15710_v34, %v15703_v3  ;;  %v15601_v62 = vrot.slane %v25786_v12, %v26340_v33 }
0x2095   :  { %20164 = vmatmul.mubr.f32.vlgmr.msra.gmra.mrb[28].mxu1 %v15147_v19  ;;  %22309 = vmatprep.subr.bf16.mxu0 %v25897_v15  ;;  %v15739_v19 = vand.u32 4294901760, %v15738_v49  ;;  %p22815_p4 = pnand %p22814_p3, %p22808_p0 }
0x2096   :  { %v15705_v28 = vsub.f32 %v15703_v3, %v15704_v20  ;;  %v22360_v45 = vpack.c.bf16 %v15711_v39, %v15704_v20 }
0x2097   :  { %v15740_v16 = vsub.f32 %v15738_v49, %v15739_v19  ;;  %v22368_v30 = vpack.c.bf16 %v15739_v19, %v15732_v1 }
0x2098   :  { %v15706_v42 = vand.u32 4294901760, %v15705_v28  ;;  %22311 = vmatpush3.bf16.msra.mxu0 %v25897_v15 }
0x2099   :  { %v15741_v26 = vand.u32 4294901760, %v15740_v16 }
0x209a   :  { %v22312_v32 = vpack.c.bf16 %v15713_v9, %v15706_v42 }
0x209b   :  { %v22320_v54 = vpack.c.bf16 %v15741_v26, %v15734_v24  ;;  %v26341_v26 = vld [vmem:[#allocation48_spill] sm:$0xff] }
0x209c   :  { %22313 = vmatprep.subr.bf16.mxu0 %v22312_v32  ;;  %v16219_v40 = vrot.slane %v25833_v57, %v26341_v26 }
0x2168   :  { %v20165_v59 = vpop.f32.mrb[28].mxu1 }
0x2169   :  { %v22424_v50 = vadd.f32 %v20165_v59, %v15045_v41  ;;  %v15586_v5 = vpop.f32.mrb[29].mxu1 }
0x216a   :  { %v22425_v38 = vadd.f32 %v15586_v5, %v15045_v41 }
0x216b   :  { %v15597_v55 = vmax.f32 %v22424_v50, 0.0 }
0x216c   :  { %v15596_v21 = vmax.f32 %v22425_v38, 0.0 }
0x216d   :  { %v15606_v6 = vsel %vm1302_vm3, %v15597_v55, 0 }
0x216e   :  { %v15691_v52 = vand.u32 4294901760, %v15606_v6  ;;  %v15603_v3 = vsel %vm1302_vm3, %v15596_v21, 0 }
0x216f   :  { %v15681_v34 = vand.u32 4294901760, %v15603_v3 }
0x2170   :  { %v15692_v20 = vsub.f32 %v15606_v6, %v15691_v52 }
0x2171   :  { %v15682_v39 = vsub.f32 %v15603_v3, %v15681_v34 }
0x2172   :  { %v15693_v28 = vand.u32 4294901760, %v15692_v20 }
0x2173   :  { %v15683_v37 = vand.u32 4294901760, %v15682_v39 }
0x2174   :  { %v15694_v4 = vsub.f32 %v15692_v20, %v15693_v28 }
0x2175   :  { %v15684_v56 = vsub.f32 %v15682_v39, %v15683_v37 }
0x2176   :  { %v15695_v9 = vand.u32 4294901760, %v15694_v4 }
0x2177   :  { %v15685_v42 = vand.u32 4294901760, %v15684_v56 }
0x2179   :  { %20182 = vmatprep.mubr.f32.mxu0 %v15685_v42 }
0x217a   :  { %20183 = vmatmul.mubr.f32.vlgmr.msra.gmra.mrb[28].mxu0 %v15695_v9 }
0x217b   :  { %22315 = vmatpush3.bf16.msra.mxu0 %v22312_v32  ;;  %20201 = vmatprep.mubr.f32.mxu0 %v15681_v34 }
0x217c   :  { %22317 = vmatprep.subr.bf16.mxu0 %v22316_v0 }
0x217f   :  { %22319 = vmatpush3.bf16.msra.mxu0 %v22316_v0 }
0x2180   :  { %22321 = vmatprep.subr.bf16.mxu0 %v22320_v54 }
0x2183   :  { %22323 = vmatpush3.bf16.msra.mxu0 %v22320_v54 }
0x2184   :  { %22325 = vmatprep.subr.bf16.mxu0 %v22324_v35 }
0x2187   :  { %22327 = vmatpush3.bf16.msra.mxu0 %v22324_v35 }
0x2188   :  { %22329 = vmatprep.subr.bf16.mxu0 %v22328_v29 }
0x218a   :  { %20202 = vmatmul.mubr.f32.vlgmr.msra.gmra.mrb[28].mxu0 %v15691_v52 }
0x218b   :  { %22331 = vmatpush3.bf16.msra.mxu0 %v22328_v29  ;;  %20220 = vmatprep.mubr.f32.mxu0 %v15682_v39 }
0x218c   :  { %22333 = vmatprep.subr.bf16.mxu0 %v22332_v51 }
0x218f   :  { %22335 = vmatpush3.bf16.msra.mxu0 %v22332_v51 }
0x2190   :  { %22337 = vmatprep.subr.bf16.mxu0 %v22336_v11 }
0x2193   :  { %22339 = vmatpush3.bf16.msra.mxu0 %v22336_v11 }
0x2194   :  { %22341 = vmatprep.subr.bf16.mxu0 %v22340_v8 }
0x2197   :  { %22343 = vmatpush3.bf16.msra.mxu0 %v22340_v8 }
0x2198   :  { %22345 = vmatprep.subr.bf16.mxu0 %v25869_v53 }
0x219a   :  { %20221 = vmatmul.mubr.f32.vlgmr.msra.gmra.mrb[28].mxu0 %v15692_v20 }
0x219b   :  { %22347 = vmatpush3.bf16.msra.mxu0 %v25869_v53  ;;  %20239 = vmatprep.mubr.f32.mxu0 %v15683_v37 }
0x219c   :  { %22349 = vmatprep.subr.bf16.mxu0 %v25879_v22 }
0x219f   :  { %22351 = vmatpush3.bf16.msra.mxu0 %v25879_v22 }
0x21a0   :  { %22353 = vmatprep.subr.bf16.mxu0 %v25895_v10 }
0x21a3   :  { %22355 = vmatpush3.bf16.msra.mxu0 %v25895_v10 }
0x21a4   :  { %22357 = vmatprep.subr.bf16.mxu0 %v25897_v15 }
0x21a7   :  { %22359 = vmatpush3.bf16.msra.mxu0 %v25897_v15 }
0x21a8   :  { %22361 = vmatprep.subr.bf16.mxu0 %v22360_v45 }
0x21aa   :  { %20240 = vmatmul.mubr.f32.vlgmr.msra.gmra.mrb[28].mxu0 %v15693_v28 }
0x21ab   :  { %22363 = vmatpush3.bf16.msra.mxu0 %v22360_v45  ;;  %20258 = vmatprep.mubr.f32.mxu0 %v15681_v34 }
0x21ac   :  { %22365 = vmatprep.subr.bf16.mxu0 %v22364_v46 }
0x21af   :  { %22367 = vmatpush3.bf16.msra.mxu0 %v22364_v46 }
0x21b0   :  { %22369 = vmatprep.subr.bf16.mxu0 %v22368_v30 }
0x21b3   :  { %22371 = vmatpush3.bf16.msra.mxu0 %v22368_v30 }
0x21b4   :  { %22373 = vmatprep.subr.bf16.mxu0 %v22372_v18 }
0x21b7   :  { %22375 = vmatpush3.bf16.msra.mxu0 %v22372_v18 }
0x21b8   :  { %22377 = vmatprep.subr.bf16.mxu0 %v25869_v53 }
0x21ba   :  { %20259 = vmatmul.mubr.f32.vlgmr.msra.gmra.mrb[28].mxu0 %v15691_v52 }
0x21bb   :  { %22379 = vmatpush3.bf16.msra.mxu0 %v25869_v53  ;;  %20277 = vmatprep.mubr.f32.mxu0 %v15681_v34 }
0x21bc   :  { %22381 = vmatprep.subr.bf16.mxu0 %v25879_v22 }
0x21bf   :  { %22383 = vmatpush3.bf16.msra.mxu0 %v25879_v22 }
0x21c0   :  { %22385 = vmatprep.subr.bf16.mxu0 %v25895_v10 }
0x21c3   :  { %22387 = vmatpush3.bf16.msra.mxu0 %v25895_v10 }
0x21c4   :  { %22389 = vmatprep.subr.bf16.mxu0 %v25897_v15 }
0x21c7   :  { %22391 = vmatpush3.bf16.msra.mxu0 %v25897_v15 }
0x21ca   :  { %20278 = vmatmul.mubr.f32.vlgmr.msra.gmra.mrb[28].mxu0 %v15691_v52 }
0x229d   :  { %v20279_v32 = vpop.f32.mrb[28].mxu0 }
0x229e   :  { %v22426_v53 = vadd.f32 %v20279_v32, %v15601_v62  ;;  %v16178_v23 = vpop.f32.mrb[29].mxu0 }
0x229f   :  { %v22427_v13 = vadd.f32 %v16178_v23, %v15601_v62 }
0x22a0   :  { %v16189_v58 = vadd.f32 %v22426_v53, %v25841_v25 }
0x22a1   :  { %v16188_v22 = vadd.f32 %v22427_v13, %v25843_v48 }
0x22a2   :  { %v16193_v49 = vsel %vm93_vm0, %v16189_v58, 0.0 }
0x22a3   :  { %16194 = vadd.xlane.f32.xlu0 %v16193_v49  ;;  %v16190_v10 = vsel %vm93_vm0, %v16188_v22, 0.0 }
0x22a4   :  { %16191 = vadd.xlane.f32.xlu1 %v16190_v10 }
0x2330   :  { %v16195_v15 = vpop.xlane.xlu0 %16194 }
0x2331   :  { %v16197_v7 = vmul.f32 0.03125, %v16195_v15  ;;  %v16192_v60 = vpop.xlane.xlu1 %16191 }
0x2332   :  { %v16196_v1 = vmul.f32 0.03125, %v16192_v60 }
0x2333   :  { %v16199_v19 = vsub.f32 %v16189_v58, %v16197_v7 }
0x2334   :  { %v16198_v12 = vsub.f32 %v16188_v22, %v16196_v1 }
0x2335   :  { %v16201_v0 = vmul.f32 %v16199_v19, %v16199_v19 }
0x2336   :  { %v16200_v17 = vmul.f32 %v16198_v12, %v16198_v12 }
0x2337   :  { %v16205_v14 = vsel %vm93_vm0, %v16201_v0, 0.0 }
0x2338   :  { %16206 = vadd.xlane.f32.xlu1 %v16205_v14  ;;  %v16202_v25 = vsel %vm93_vm0, %v16200_v17, 0.0 }
0x2339   :  { %16203 = vadd.xlane.f32.xlu0 %v16202_v25 }
0x23c5   :  { %v16207_v48 = vpop.xlane.xlu1 %16206 }
0x23c6   :  { %v16209_v61 = vmul.f32 0.03125, %v16207_v48  ;;  %v16204_v16 = vpop.xlane.xlu0 %16203 }
0x23c7   :  { %v16208_v24 = vmul.f32 0.03125, %v16204_v16 }
0x23c8   :  { %v16211_v36 = vadd.f32 1e-05, %v16209_v61 }
0x23c9   :  { %v16210_v63 = vadd.f32 1e-05, %v16208_v24 }
0x23ca   :  { %22765 = vrsqrt.f32 %v16211_v36 }
0x23cb   :  { %22767 = vrsqrt.f32 %v16210_v63 }
0x23d4   :  { %v22766_v27 = vpop.eup %22765 }
0x23d5   :  { %v22768_v54 = vpop.eup %22767  ;;  %v16215_v43 = vmul.f32 %v22766_v27, %v16199_v19 }
0x23d6   :  { %v16214_v35 = vmul.f32 %v22768_v54, %v16198_v12 }
0x23d7   :  { %v16221_v29 = vmul.f32 %v16219_v40, %v16215_v43 }
0x23d8   :  { %v16220_v51 = vmul.f32 %v16219_v40, %v16214_v35 }
0x23d9   :  { %v16227_v11 = vadd.f32 %v16225_v44, %v16221_v29 }
0x23da   :  { %v16226_v8 = vadd.f32 %v16225_v44, %v16220_v51 }
0x23db   :  { %16229 = vst.msk [vmem:[#allocation2 + $0x8] sm:$0xff] %vm93_vm0, %v16227_v11 }
0x23dc   :  { %16228 = vst.msk [vmem:[#allocation2] sm:$0xff] %vm93_vm0, %v16226_v8 }
0x23dd   :  { %22818 = shalt.err (!%p22815_p4)
}
0x23de   :  { %s22819_s20 = scalar_lea.hbm %s25956_s5, 256 }
0x23df   :  { %p22820_p5 = scmp.ne.s32.totalorder %s25956_s5, %s22819_s20  ;;  %p22823_p6 = scmp.lt.u32.totalorder %s22819_s20, %s25956_s5 }
0x23e1   :  { %p22825_p7 = pnand %p22823_p6, %p22820_p5 }
0x23e3   :  { %22828 = shalt.err (!%p22825_p7)
}
0x23e4   :  { %s22837_s24 = smov 128   ;;  %s22838_s25 = smov 8  }
0x23e5   :  { %16241 = dma.vmem_to_hbm [thread:$0]  %s16236_s16, 256, %s25956_s5, [#allocation3], %s22837_s24, %s22837_s24, %s22838_s25  }
0x23e6   :  { %22829 = dma.done.wait [#allocation3], 256  }
0x23e7   :  { %22830 = vsyncadd [#allocation3], 4294967040 }
0x23e8   :  { %16245 = vsyncpa [#allocation3], 1 }

</bundles_post_ra>
